<compile_context>
chip_gen: v5e
topology: v5e:2x2
jax: 0.10.0
libtpu: 0.0.40
codegen_flags: <defaults>
</compile_context>

<pallas_src>
import jax
import jax.numpy as jnp
from jax import lax
from jax.experimental import pallas as pl
from jax.experimental.pallas import tpu as pltpu


# ----------------------- in-kernel building blocks -----------------------------------

def _fill_pad(pad_ref, x, value):
    """Write x into the interior of a (B, h+2, w+2, C) VMEM scratch, border = value."""
    b, h, w, c = x.shape
    pad_ref[...] = jnp.full(pad_ref.shape, value, pad_ref.dtype)
    pad_ref[:, 1:h + 1, 1:w + 1, :] = x.astype(pad_ref.dtype)


def _sepconv_bn(x, pad_ref, w_flat, bias):
    """SeparableConv2d(3x3, pad 1, no bias) + folded BN as ONE K-fused MXU matmul.

    x:      (B, H, W, Cin) f32, already ReLU'd
    pad_ref:(B, H+2, W+2, Cin) f32 VMEM scratch (zero border)
    w_flat: (9*Cin, Cout) bf16   (dy, dx, ci ordering, ci fastest)
    bias:   (1, Cout) f32 folded BN bias
    """
    b, h, w, c = x.shape
    cout = w_flat.shape[-1]
    _fill_pad(pad_ref, x, 0.0)
    # im2col: 9 shifted views concatenated along the lane (channel) axis.
    taps = [pad_ref[:, dy:dy + h, dx:dx + w, :].astype(jnp.bfloat16)
            for dy in range(3) for dx in range(3)]
    im = jnp.concatenate(taps, axis=-1)                       # (B, H, W, 9*Cin) bf16
    acc = jnp.dot(im.reshape(b * h * w, 9 * c), w_flat,
                  preferred_element_type=jnp.float32)         # single MXU matmul
    return (acc + bias).reshape(b, h, w, cout)


def _maxpool_3x3_s2_p1(y, pad_ref):
    """MaxPool2d(kernel=3, stride=2, padding=1); H is subsampled before the W pass."""
    b, h, w, c = y.shape
    h2, w2 = h // 2, w // 2
    _fill_pad(pad_ref, y, -jnp.inf)
    yp = pad_ref[...]                                         # (B, H+2, W+2, C)
    # rows {2i, 2i+1, 2i+2} for each output row i  (leading-dim reshapes only)
    e0 = yp[:, 0:h].reshape(b, h2, 2, w + 2, c)
    e2 = yp[:, 2:h + 2].reshape(b, h2, 2, w + 2, c)
    mh = jnp.maximum(jnp.maximum(e0[:, :, 0], e0[:, :, 1]), e2[:, :, 0])   # (B,H/2,W+2,C)
    # cols {2j, 2j+1, 2j+2} for each output col j
    f0 = mh[:, :, 0:w].reshape(b, h2, w2, 2, c)
    f2 = mh[:, :, 2:w + 2].reshape(b, h2, w2, 2, c)
    return jnp.maximum(jnp.maximum(f0[:, :, :, 0], f0[:, :, :, 1]), f2[:, :, :, 0])


def _subsample2(v):
    """Keep even-H / even-W positions of an (B, H, W, C) value via reshape+index."""
    b, h, w, c = v.shape
    v = v.reshape(b, h // 2, 2, w, c)[:, :, 0]                # even rows
    return v.reshape(b, h // 2, w // 2, 2, c)[:, :, :, 0]     # even cols


def _xblock(x, cpad_a_ref, cpad_b_ref, ppad_ref, w_a, b_a, w_b, b_b, w_s, b_s):
    """Xception Block(in, out, reps=2, strides=2)."""
    b, h, w, cin = x.shape
    h2, w2 = h // 2, w // 2
    cout = w_s.shape[-1]
    y = _sepconv_bn(jnp.maximum(x, 0.0), cpad_a_ref, w_a, b_a)
    y = _sepconv_bn(jnp.maximum(y, 0.0), cpad_b_ref, w_b, b_b)
    rep = _maxpool_3x3_s2_p1(y, ppad_ref)                     # (B, H/2, W/2, Cout)
    # skip = BN(Conv1x1 stride 2): subsample FIRST (1x1 conv commutes with stride-2),
    # then one small MXU matmul.  Uses the un-ReLU'd input, as in the module.
    xs = _subsample2(x)
    skip = jnp.dot(xs.reshape(b * h2 * w2, cin).astype(jnp.bfloat16), w_s,
                   preferred_element_type=jnp.float32) + b_s
    return rep + skip.reshape(b, h2, w2, cout)


def _to_lane_dense(v):
    """(B, H, W, C) -> (B, H, W*C): flatten W into the lane axis for unmasked stores."""
    b, h, w, c = v.shape
    return jnp.concatenate([v[:, :, j, :] for j in range(w)], axis=-1)


def _lfs_kernel(x_ref,
                w1a, b1a, w1b, b1b, ws1, bs1,
                w2a, b2a, w2b, b2b, ws2, bs2,
                o_ref,
                pad1_in, pad1, pad2):
    """Whole LFS_conv feature path (XBlock1 + XBlock2) for one batch block."""
    f = _xblock(x_ref[...], pad1_in, pad1, pad1,
                w1a[...], b1a[...], w1b[...], b1b[...], ws1[...], bs1[...])
    f = _xblock(f, pad2, pad2, pad2,
                w2a[...], b2a[...], w2b[...], b2b[...], ws2[...], bs2[...])
    o_ref[...] = _to_lane_dense(f)                            # (B, H/4, (W/4)*Cout)


# ----------------------------------- wrapper -----------------------------------------

def lfs_conv_forward(x_nchw, fp1, fp2, samples_per_block=None):
    """Matches LFS_conv.forward: returns (seg_LFS, feas), both NCHW."""
    seg_LFS = x_nchw
    n, cin, h, w = x_nchw.shape
    assert h % 4 == 0 and w % 4 == 0, "kernel assumes H % 4 == 0 and W % 4 == 0"
    x = jnp.transpose(x_nchw, (0, 2, 3, 1)).astype(jnp.float32)      # NCHW -> NHWC once
    cin_p = fp1["w_skip"].shape[0]                                   # padded Cin (6 -> 8)
    if cin_p != cin:
        x = jnp.pad(x, ((0, 0), (0, 0), (0, 0), (0, cin_p - cin)))
    c1 = fp1["w_skip"].shape[1]
    c2 = fp2["w_skip"].shape[1]
    ho, wo = h // 4, w // 4                                          # two stride-2 blocks

    # ceil(N/2) samples per grid step -> one step per v7x TensorCore; on single-TC
    # v5e/v6e pass samples_per_block=n to fold the whole batch into one step.
    if samples_per_block is None:
        samples_per_block = n // 2 if (n % 2 == 0 and n >= 2) else n
    spb = samples_per_block
    assert n % spb == 0

    params = [fp1[k] for k in ("w_a", "b_a", "w_b", "b_b", "w_skip", "b_skip")]
    params += [fp2[k] for k in ("w_a", "b_a", "w_b", "b_b", "w_skip", "b_skip")]

    def _const_spec(a):
        nd = a.ndim
        return pl.BlockSpec(a.shape, lambda i, _nd=nd: (0,) * _nd)

    feas_flat = pl.pallas_call(
        _lfs_kernel,
        out_shape=jax.ShapeDtypeStruct((n, ho, wo * c2), jnp.float32),   # lane-dense
        grid=(n // spb,),
        in_specs=[pl.BlockSpec((spb, h, w, cin_p), lambda i: (i, 0, 0, 0))]
                + [_const_spec(p) for p in params],
        out_specs=pl.BlockSpec((spb, ho, wo * c2), lambda i: (i, 0, 0)),
        scratch_shapes=[
            pltpu.VMEM((spb, h + 2, w + 2, cin_p), jnp.float32),           # blk1 conv1 pad
            pltpu.VMEM((spb, h + 2, w + 2, c1), jnp.float32),              # blk1 conv2/pool pad
            pltpu.VMEM((spb, h // 2 + 2, w // 2 + 2, c1), jnp.float32),    # blk2 conv/pool pad
        ],
        compiler_params=pltpu.CompilerParams(dimension_semantics=("parallel",)),
    )(x, *params)

    feas = jnp.transpose(feas_flat.reshape(n, ho, wo, c2), (0, 3, 1, 2))   # -> NCHW once
    return seg_LFS, feas


# --------------------------- parameters (init + folding) -----------------------------

def _folded_bn(key, c, eps=1e-5):
    """Random inference-mode BatchNorm folded to (scale, bias), shapes (1, c)."""
    k1, k2, k3, k4 = jax.random.split(key, 4)
    gamma = 1.0 + 0.1 * jax.random.normal(k1, (1, c))
    beta = 0.1 * jax.random.normal(k2, (1, c))
    mean = 0.1 * jax.random.normal(k3, (1, c))
    var = 1.0 + 0.1 * jax.random.uniform(k4, (1, c))
    scale = gamma / jnp.sqrt(var + eps)
    bias = beta - mean * scale
    return scale.astype(jnp.float32), bias.astype(jnp.float32)


def init_block_params(key, cin, cout):
    """Raw Block parameters (depthwise / pointwise / skip weights + BN stats)."""
    ks = jax.random.split(key, 8)
    p = {}
    p["dw1"] = (0.2 * jax.random.normal(ks[0], (3, 3, cin))).astype(jnp.float32)
    p["pw1"] = (0.2 * jax.random.normal(ks[1], (cin, cout))).astype(jnp.float32)
    p["bn1_scale"], p["bn1_bias"] = _folded_bn(ks[2], cout)
    p["dw2"] = (0.2 * jax.random.normal(ks[3], (3, 3, cout))).astype(jnp.float32)
    p["pw2"] = (0.2 * jax.random.normal(ks[4], (cout, cout))).astype(jnp.float32)
    p["bn2_scale"], p["bn2_bias"] = _folded_bn(ks[5], cout)
    p["wskip"] = (0.2 * jax.random.normal(ks[6], (cin, cout))).astype(jnp.float32)
    p["skipbn_scale"], p["skipbn_bias"] = _folded_bn(ks[7], cout)
    return p


def fold_block_params(p, cin_pad_to=None):
    """Fold depthwise*pointwise*BN-scale into ONE (9*Cin_p, Cout) bf16 matmul weight."""
    cin = p["dw1"].shape[-1]
    cin_p = cin if cin_pad_to is None else max(cin, cin_pad_to)
    cout = p["pw1"].shape[-1]

    def sep(dw, pw, scale, pad_to):
        w = dw[:, :, :, None] * pw[None, None, :, :] * scale.reshape(1, 1, 1, -1)
        ci = w.shape[2]
        pad_to = max(pad_to, ci)
        if pad_to > ci:
            w = jnp.pad(w, ((0, 0), (0, 0), (0, pad_to - ci), (0, 0)))
        # (3, 3, ci_p, co) -> (9*ci_p, co); (dy, dx, ci) row order, ci fastest,
        # matching the in-kernel im2col lane-concat order.
        return w.reshape(9 * pad_to, cout).astype(jnp.bfloat16)

    wskip = p["wskip"] * p["skipbn_scale"]
    if cin_p > cin:
        wskip = jnp.pad(wskip, ((0, cin_p - cin), (0, 0)))
    return {
        "w_a": sep(p["dw1"], p["pw1"], p["bn1_scale"], cin_p),
        "b_a": p["bn1_bias"],
        "w_b": sep(p["dw2"], p["pw2"], p["bn2_scale"], cout),
        "b_b": p["bn2_bias"],
        "w_skip": wskip.astype(jnp.bfloat16),
        "b_skip": p["skipbn_bias"],
    }


# ------------------------- pure-XLA reference (validation only) ----------------------

def _ref_block(x, p):
    def sepconv(v, dw, pw):
        cin = v.shape[-1]
        y = lax.conv_general_dilated(
            v, dw[:, :, None, :], (1, 1), ((1, 1), (1, 1)),
            dimension_numbers=("NHWC", "HWIO", "NHWC"),
            feature_group_count=cin, precision=lax.Precision.HIGHEST)
        return lax.conv_general_dilated(
            y, pw[None, None, :, :], (1, 1), "VALID",
            dimension_numbers=("NHWC", "HWIO", "NHWC"),
            precision=lax.Precision.HIGHEST)

    def bn(v, scale, bias):
        return v * scale.reshape(1, 1, 1, -1) + bias.reshape(1, 1, 1, -1)

    y = bn(sepconv(jax.nn.relu(x), p["dw1"], p["pw1"]), p["bn1_scale"], p["bn1_bias"])
    y = bn(sepconv(jax.nn.relu(y), p["dw2"], p["pw2"]), p["bn2_scale"], p["bn2_bias"])
    rep = lax.reduce_window(y, -jnp.inf, lax.max, (1, 3, 3, 1), (1, 2, 2, 1),
                            ((0, 0), (1, 1), (1, 1), (0, 0)))
    skip = lax.conv_general_dilated(
        x, p["wskip"][None, None, :, :], (2, 2), "VALID",
        dimension_numbers=("NHWC", "HWIO", "NHWC"), precision=lax.Precision.HIGHEST)
    skip = bn(skip, p["skipbn_scale"], p["skipbn_bias"])
    return rep + skip


def lfs_conv_reference(x_nchw, raw1, raw2):
    x = jnp.transpose(x_nchw, (0, 2, 3, 1)).astype(jnp.float32)
    f = _ref_block(_ref_block(x, raw1), raw2)
    return jnp.transpose(f, (0, 3, 1, 2))


# ------------------------------------- main -------------------------------------------

if __name__ == "__main__":
    key = jax.random.PRNGKey(0)
    k_x, k_b1, k_b2 = jax.random.split(key, 3)

    in_channel = 6
    x = jax.random.normal(k_x, (2, in_channel, 16, 16), dtype=jnp.float32)   # NCHW

    raw1 = init_block_params(k_b1, in_channel, 32)    # XBlock1
    raw2 = init_block_params(k_b2, 32, 32)            # XBlock2
    fp1 = fold_block_params(raw1, cin_pad_to=8)       # fold + pad Cin 6->8, bf16 weights
    fp2 = fold_block_params(raw2)

    seg_LFS, feas = jax.jit(lfs_conv_forward)(x, fp1, fp2)
    jax.block_until_ready((seg_LFS, feas))

    assert seg_LFS.shape == (2, in_channel, 16, 16)
    assert feas.shape == (2, 32, 4, 4)

    # Validate against a pure-XLA f32 reference of the same module.  Loose tolerance:
    # the kernel feeds bf16 operands to the MXU (per perf review), f32 accumulation.
    feas_ref = jax.jit(lfs_conv_reference)(x, raw1, raw2)
    err = float(jnp.max(jnp.abs(feas - feas_ref)))
    scale = float(jnp.max(jnp.abs(feas_ref)))
    assert err <= 5e-2 * max(1.0, scale), \
        f"mismatch vs reference: max abs err = {err} (ref scale {scale})"

    print("KERNEL_OK")
</pallas_src>

<mosaic_0001>
module attributes {stable_mosaic.version = 11 : i64} {
  func.func @_lfs_kernel(%arg0: i32, %arg1: memref<1x16x16x8xf32, #tpu.memory_space<vmem>>, %arg2: memref<72x32xbf16, #tpu.memory_space<vmem>>, %arg3: memref<1x32xf32, #tpu.memory_space<vmem>>, %arg4: memref<288x32xbf16, #tpu.memory_space<vmem>>, %arg5: memref<1x32xf32, #tpu.memory_space<vmem>>, %arg6: memref<8x32xbf16, #tpu.memory_space<vmem>>, %arg7: memref<1x32xf32, #tpu.memory_space<vmem>>, %arg8: memref<288x32xbf16, #tpu.memory_space<vmem>>, %arg9: memref<1x32xf32, #tpu.memory_space<vmem>>, %arg10: memref<288x32xbf16, #tpu.memory_space<vmem>>, %arg11: memref<1x32xf32, #tpu.memory_space<vmem>>, %arg12: memref<32x32xbf16, #tpu.memory_space<vmem>>, %arg13: memref<1x32xf32, #tpu.memory_space<vmem>>, %arg14: memref<1x4x128xf32, #tpu.memory_space<vmem>>, %arg15: memref<1x18x18x8xf32, #tpu.memory_space<vmem>>, %arg16: memref<1x18x18x32xf32, #tpu.memory_space<vmem>>, %arg17: memref<1x10x10x32xf32, #tpu.memory_space<vmem>>) attributes {dimension_semantics = [#tpu.dimension_semantics<parallel>], iteration_bounds = array<i64: 2>, scalar_prefetch = 0 : i64, scratch_operands = 3 : i64, tpu.core_type = #tpu.core_type<tc>, window_params = [{transform_indices = @transform_0, window_bounds = array<i64: 1, 16, 16, 8>}, {pipeline_mode = #tpu.pipeline_mode<synchronous>, transform_indices = @transform_1, window_bounds = array<i64: 72, 32>}, {pipeline_mode = #tpu.pipeline_mode<synchronous>, transform_indices = @transform_2, window_bounds = array<i64: 1, 32>}, {pipeline_mode = #tpu.pipeline_mode<synchronous>, transform_indices = @transform_3, window_bounds = array<i64: 288, 32>}, {pipeline_mode = #tpu.pipeline_mode<synchronous>, transform_indices = @transform_4, window_bounds = array<i64: 1, 32>}, {pipeline_mode = #tpu.pipeline_mode<synchronous>, transform_indices = @transform_5, window_bounds = array<i64: 8, 32>}, {pipeline_mode = #tpu.pipeline_mode<synchronous>, transform_indices = @transform_6, window_bounds = array<i64: 1, 32>}, {pipeline_mode = #tpu.pipeline_mode<synchronous>, transform_indices = @transform_7, window_bounds = array<i64: 288, 32>}, {pipeline_mode = #tpu.pipeline_mode<synchronous>, transform_indices = @transform_8, window_bounds = array<i64: 1, 32>}, {pipeline_mode = #tpu.pipeline_mode<synchronous>, transform_indices = @transform_9, window_bounds = array<i64: 288, 32>}, {pipeline_mode = #tpu.pipeline_mode<synchronous>, transform_indices = @transform_10, window_bounds = array<i64: 1, 32>}, {pipeline_mode = #tpu.pipeline_mode<synchronous>, transform_indices = @transform_11, window_bounds = array<i64: 32, 32>}, {pipeline_mode = #tpu.pipeline_mode<synchronous>, transform_indices = @transform_12, window_bounds = array<i64: 1, 32>}, {transform_indices = @transform_13, window_bounds = array<i64: 1, 4, 128>}]} {
    %c0 = arith.constant 0 : index
    %c0_0 = arith.constant 0 : index
    %c0_1 = arith.constant 0 : index
    %c0_2 = arith.constant 0 : index
    %0 = vector.load %arg1[%c0, %c0_0, %c0_1, %c0_2] : memref<1x16x16x8xf32, #tpu.memory_space<vmem>>, vector<1x16x16x8xf32>
    %c0_3 = arith.constant 0 : index
    %c0_4 = arith.constant 0 : index
    %1 = vector.load %arg2[%c0_3, %c0_4] : memref<72x32xbf16, #tpu.memory_space<vmem>>, vector<72x32xbf16>
    %c0_5 = arith.constant 0 : index
    %c0_6 = arith.constant 0 : index
    %2 = vector.load %arg3[%c0_5, %c0_6] : memref<1x32xf32, #tpu.memory_space<vmem>>, vector<1x32xf32>
    %c0_7 = arith.constant 0 : index
    %c0_8 = arith.constant 0 : index
    %3 = vector.load %arg4[%c0_7, %c0_8] : memref<288x32xbf16, #tpu.memory_space<vmem>>, vector<288x32xbf16>
    %c0_9 = arith.constant 0 : index
    %c0_10 = arith.constant 0 : index
    %4 = vector.load %arg5[%c0_9, %c0_10] : memref<1x32xf32, #tpu.memory_space<vmem>>, vector<1x32xf32>
    %c0_11 = arith.constant 0 : index
    %c0_12 = arith.constant 0 : index
    %5 = vector.load %arg6[%c0_11, %c0_12] : memref<8x32xbf16, #tpu.memory_space<vmem>>, vector<8x32xbf16>
    %c0_13 = arith.constant 0 : index
    %c0_14 = arith.constant 0 : index
    %6 = vector.load %arg7[%c0_13, %c0_14] : memref<1x32xf32, #tpu.memory_space<vmem>>, vector<1x32xf32>
    %cst = arith.constant 0.000000e+00 : f32
    %7 = vector.broadcast %cst : f32 to vector<1x16x16x8xf32>
    %8 = arith.maximumf %0, %7 : vector<1x16x16x8xf32>
    %cst_15 = arith.constant 0.000000e+00 : f32
    %9 = vector.broadcast %cst_15 : f32 to vector<1x18x18x8xf32>
    %c0_16 = arith.constant 0 : index
    %c0_17 = arith.constant 0 : index
    %c0_18 = arith.constant 0 : index
    %c0_19 = arith.constant 0 : index
    %10 = vector.load %arg15[%c0_16, %c0_17, %c0_18, %c0_19] : memref<1x18x18x8xf32, #tpu.memory_space<vmem>>, vector<1x18x18x8xf32>
    tpu.vector_store %arg15[%c0_16, %c0_17, %c0_18, %c0_19], %9 {strides = array<i32>} : memref<1x18x18x8xf32, #tpu.memory_space<vmem>>, vector<1x18x18x8xf32>,
    %c0_20 = arith.constant 0 : index
    %c1 = arith.constant 1 : index
    %c1_21 = arith.constant 1 : index
    %c0_22 = arith.constant 0 : index
    %11 = vector.load %arg15[%c0_20, %c1, %c1_21, %c0_22] : memref<1x18x18x8xf32, #tpu.memory_space<vmem>>, vector<1x16x16x8xf32>
    tpu.vector_store %arg15[%c0_20, %c1, %c1_21, %c0_22], %8 {strides = array<i32>} : memref<1x18x18x8xf32, #tpu.memory_space<vmem>>, vector<1x16x16x8xf32>,
    %c0_23 = arith.constant 0 : index
    %c0_24 = arith.constant 0 : index
    %c0_25 = arith.constant 0 : index
    %c0_26 = arith.constant 0 : index
    %12 = vector.load %arg15[%c0_23, %c0_24, %c0_25, %c0_26] : memref<1x18x18x8xf32, #tpu.memory_space<vmem>>, vector<1x16x16x8xf32>
    %13 = arith.truncf %12 : vector<1x16x16x8xf32> to vector<1x16x16x8xbf16>
    %c0_27 = arith.constant 0 : index
    %c0_28 = arith.constant 0 : index
    %c1_29 = arith.constant 1 : index
    %c0_30 = arith.constant 0 : index
    %14 = vector.load %arg15[%c0_27, %c0_28, %c1_29, %c0_30] : memref<1x18x18x8xf32, #tpu.memory_space<vmem>>, vector<1x16x16x8xf32>
    %15 = arith.truncf %14 : vector<1x16x16x8xf32> to vector<1x16x16x8xbf16>
    %c0_31 = arith.constant 0 : index
    %c0_32 = arith.constant 0 : index
    %c2 = arith.constant 2 : index
    %c0_33 = arith.constant 0 : index
    %16 = vector.load %arg15[%c0_31, %c0_32, %c2, %c0_33] : memref<1x18x18x8xf32, #tpu.memory_space<vmem>>, vector<1x16x16x8xf32>
    %17 = arith.truncf %16 : vector<1x16x16x8xf32> to vector<1x16x16x8xbf16>
    %c0_34 = arith.constant 0 : index
    %c1_35 = arith.constant 1 : index
    %c0_36 = arith.constant 0 : index
    %c0_37 = arith.constant 0 : index
    %18 = vector.load %arg15[%c0_34, %c1_35, %c0_36, %c0_37] : memref<1x18x18x8xf32, #tpu.memory_space<vmem>>, vector<1x16x16x8xf32>
    %19 = arith.truncf %18 : vector<1x16x16x8xf32> to vector<1x16x16x8xbf16>
    %c0_38 = arith.constant 0 : index
    %c1_39 = arith.constant 1 : index
    %c1_40 = arith.constant 1 : index
    %c0_41 = arith.constant 0 : index
    %20 = vector.load %arg15[%c0_38, %c1_39, %c1_40, %c0_41] : memref<1x18x18x8xf32, #tpu.memory_space<vmem>>, vector<1x16x16x8xf32>
    %21 = arith.truncf %20 : vector<1x16x16x8xf32> to vector<1x16x16x8xbf16>
    %c0_42 = arith.constant 0 : index
    %c1_43 = arith.constant 1 : index
    %c2_44 = arith.constant 2 : index
    %c0_45 = arith.constant 0 : index
    %22 = vector.load %arg15[%c0_42, %c1_43, %c2_44, %c0_45] : memref<1x18x18x8xf32, #tpu.memory_space<vmem>>, vector<1x16x16x8xf32>
    %23 = arith.truncf %22 : vector<1x16x16x8xf32> to vector<1x16x16x8xbf16>
    %c0_46 = arith.constant 0 : index
    %c2_47 = arith.constant 2 : index
    %c0_48 = arith.constant 0 : index
    %c0_49 = arith.constant 0 : index
    %24 = vector.load %arg15[%c0_46, %c2_47, %c0_48, %c0_49] : memref<1x18x18x8xf32, #tpu.memory_space<vmem>>, vector<1x16x16x8xf32>
    %25 = arith.truncf %24 : vector<1x16x16x8xf32> to vector<1x16x16x8xbf16>
    %c0_50 = arith.constant 0 : index
    %c2_51 = arith.constant 2 : index
    %c1_52 = arith.constant 1 : index
    %c0_53 = arith.constant 0 : index
    %26 = vector.load %arg15[%c0_50, %c2_51, %c1_52, %c0_53] : memref<1x18x18x8xf32, #tpu.memory_space<vmem>>, vector<1x16x16x8xf32>
    %27 = arith.truncf %26 : vector<1x16x16x8xf32> to vector<1x16x16x8xbf16>
    %c0_54 = arith.constant 0 : index
    %c2_55 = arith.constant 2 : index
    %c2_56 = arith.constant 2 : index
    %c0_57 = arith.constant 0 : index
    %28 = vector.load %arg15[%c0_54, %c2_55, %c2_56, %c0_57] : memref<1x18x18x8xf32, #tpu.memory_space<vmem>>, vector<1x16x16x8xf32>
    %29 = arith.truncf %28 : vector<1x16x16x8xf32> to vector<1x16x16x8xbf16>
    %30 = tpu.concatenate %13, %15, %17, %19, %21, %23, %25, %27, %29 in 3 : vector<1x16x16x8xbf16>, vector<1x16x16x8xbf16>, vector<1x16x16x8xbf16>, vector<1x16x16x8xbf16>, vector<1x16x16x8xbf16>, vector<1x16x16x8xbf16>, vector<1x16x16x8xbf16>, vector<1x16x16x8xbf16>, vector<1x16x16x8xbf16> -> vector<1x16x16x72xbf16>
    %31 = vector.shape_cast %30 : vector<1x16x16x72xbf16> to vector<256x72xbf16>
    %cst_58 = arith.constant dense<0.000000e+00> : vector<256x32xf32>
    %32 = tpu.matmul %31, %1, %cst_58 {dimension_numbers = #tpu.dot_dimension_numbers<[1], [0], [0], [1], [0, 0, 1, 1], [], []>} : vector<256x72xbf16>, vector<72x32xbf16>, vector<256x32xf32> -> vector<256x32xf32>
    %33 = vector.broadcast %2 : vector<1x32xf32> to vector<256x32xf32>
    %34 = arith.addf %32, %33 : vector<256x32xf32>
    %35 = vector.shape_cast %34 : vector<256x32xf32> to vector<1x16x16x32xf32>
    %cst_59 = arith.constant 0.000000e+00 : f32
    %36 = vector.broadcast %cst_59 : f32 to vector<1x16x16x32xf32>
    %37 = arith.maximumf %35, %36 : vector<1x16x16x32xf32>
    %cst_60 = arith.constant 0.000000e+00 : f32
    %38 = vector.broadcast %cst_60 : f32 to vector<1x18x18x32xf32>
    %c0_61 = arith.constant 0 : index
    %c0_62 = arith.constant 0 : index
    %c0_63 = arith.constant 0 : index
    %c0_64 = arith.constant 0 : index
    %39 = vector.load %arg16[%c0_61, %c0_62, %c0_63, %c0_64] : memref<1x18x18x32xf32, #tpu.memory_space<vmem>>, vector<1x18x18x32xf32>
    tpu.vector_store %arg16[%c0_61, %c0_62, %c0_63, %c0_64], %38 {strides = array<i32>} : memref<1x18x18x32xf32, #tpu.memory_space<vmem>>, vector<1x18x18x32xf32>,
    %c0_65 = arith.constant 0 : index
    %c1_66 = arith.constant 1 : index
    %c1_67 = arith.constant 1 : index
    %c0_68 = arith.constant 0 : index
    %40 = vector.load %arg16[%c0_65, %c1_66, %c1_67, %c0_68] : memref<1x18x18x32xf32, #tpu.memory_space<vmem>>, vector<1x16x16x32xf32>
    tpu.vector_store %arg16[%c0_65, %c1_66, %c1_67, %c0_68], %37 {strides = array<i32>} : memref<1x18x18x32xf32, #tpu.memory_space<vmem>>, vector<1x16x16x32xf32>,
    %c0_69 = arith.constant 0 : index
    %c0_70 = arith.constant 0 : index
    %c0_71 = arith.constant 0 : index
    %c0_72 = arith.constant 0 : index
    %41 = vector.load %arg16[%c0_69, %c0_70, %c0_71, %c0_72] : memref<1x18x18x32xf32, #tpu.memory_space<vmem>>, vector<1x16x16x32xf32>
    %42 = arith.truncf %41 : vector<1x16x16x32xf32> to vector<1x16x16x32xbf16>
    %c0_73 = arith.constant 0 : index
    %c0_74 = arith.constant 0 : index
    %c1_75 = arith.constant 1 : index
    %c0_76 = arith.constant 0 : index
    %43 = vector.load %arg16[%c0_73, %c0_74, %c1_75, %c0_76] : memref<1x18x18x32xf32, #tpu.memory_space<vmem>>, vector<1x16x16x32xf32>
    %44 = arith.truncf %43 : vector<1x16x16x32xf32> to vector<1x16x16x32xbf16>
    %c0_77 = arith.constant 0 : index
    %c0_78 = arith.constant 0 : index
    %c2_79 = arith.constant 2 : index
    %c0_80 = arith.constant 0 : index
    %45 = vector.load %arg16[%c0_77, %c0_78, %c2_79, %c0_80] : memref<1x18x18x32xf32, #tpu.memory_space<vmem>>, vector<1x16x16x32xf32>
    %46 = arith.truncf %45 : vector<1x16x16x32xf32> to vector<1x16x16x32xbf16>
    %c0_81 = arith.constant 0 : index
    %c1_82 = arith.constant 1 : index
    %c0_83 = arith.constant 0 : index
    %c0_84 = arith.constant 0 : index
    %47 = vector.load %arg16[%c0_81, %c1_82, %c0_83, %c0_84] : memref<1x18x18x32xf32, #tpu.memory_space<vmem>>, vector<1x16x16x32xf32>
    %48 = arith.truncf %47 : vector<1x16x16x32xf32> to vector<1x16x16x32xbf16>
    %c0_85 = arith.constant 0 : index
    %c1_86 = arith.constant 1 : index
    %c1_87 = arith.constant 1 : index
    %c0_88 = arith.constant 0 : index
    %49 = vector.load %arg16[%c0_85, %c1_86, %c1_87, %c0_88] : memref<1x18x18x32xf32, #tpu.memory_space<vmem>>, vector<1x16x16x32xf32>
    %50 = arith.truncf %49 : vector<1x16x16x32xf32> to vector<1x16x16x32xbf16>
    %c0_89 = arith.constant 0 : index
    %c1_90 = arith.constant 1 : index
    %c2_91 = arith.constant 2 : index
    %c0_92 = arith.constant 0 : index
    %51 = vector.load %arg16[%c0_89, %c1_90, %c2_91, %c0_92] : memref<1x18x18x32xf32, #tpu.memory_space<vmem>>, vector<1x16x16x32xf32>
    %52 = arith.truncf %51 : vector<1x16x16x32xf32> to vector<1x16x16x32xbf16>
    %c0_93 = arith.constant 0 : index
    %c2_94 = arith.constant 2 : index
    %c0_95 = arith.constant 0 : index
    %c0_96 = arith.constant 0 : index
    %53 = vector.load %arg16[%c0_93, %c2_94, %c0_95, %c0_96] : memref<1x18x18x32xf32, #tpu.memory_space<vmem>>, vector<1x16x16x32xf32>
    %54 = arith.truncf %53 : vector<1x16x16x32xf32> to vector<1x16x16x32xbf16>
    %c0_97 = arith.constant 0 : index
    %c2_98 = arith.constant 2 : index
    %c1_99 = arith.constant 1 : index
    %c0_100 = arith.constant 0 : index
    %55 = vector.load %arg16[%c0_97, %c2_98, %c1_99, %c0_100] : memref<1x18x18x32xf32, #tpu.memory_space<vmem>>, vector<1x16x16x32xf32>
    %56 = arith.truncf %55 : vector<1x16x16x32xf32> to vector<1x16x16x32xbf16>
    %c0_101 = arith.constant 0 : index
    %c2_102 = arith.constant 2 : index
    %c2_103 = arith.constant 2 : index
    %c0_104 = arith.constant 0 : index
    %57 = vector.load %arg16[%c0_101, %c2_102, %c2_103, %c0_104] : memref<1x18x18x32xf32, #tpu.memory_space<vmem>>, vector<1x16x16x32xf32>
    %58 = arith.truncf %57 : vector<1x16x16x32xf32> to vector<1x16x16x32xbf16>
    %59 = tpu.concatenate %42, %44, %46, %48, %50, %52, %54, %56, %58 in 3 : vector<1x16x16x32xbf16>, vector<1x16x16x32xbf16>, vector<1x16x16x32xbf16>, vector<1x16x16x32xbf16>, vector<1x16x16x32xbf16>, vector<1x16x16x32xbf16>, vector<1x16x16x32xbf16>, vector<1x16x16x32xbf16>, vector<1x16x16x32xbf16> -> vector<1x16x16x288xbf16>
    %60 = vector.shape_cast %59 : vector<1x16x16x288xbf16> to vector<256x288xbf16>
    %cst_105 = arith.constant dense<0.000000e+00> : vector<256x32xf32>
    %61 = tpu.matmul %60, %3, %cst_105 {dimension_numbers = #tpu.dot_dimension_numbers<[1], [0], [0], [1], [0, 0, 1, 1], [], []>} : vector<256x288xbf16>, vector<288x32xbf16>, vector<256x32xf32> -> vector<256x32xf32>
    %62 = vector.broadcast %4 : vector<1x32xf32> to vector<256x32xf32>
    %63 = arith.addf %61, %62 : vector<256x32xf32>
    %64 = vector.shape_cast %63 : vector<256x32xf32> to vector<1x16x16x32xf32>
    %cst_106 = arith.constant 0xFF800000 : f32
    %65 = vector.broadcast %cst_106 : f32 to vector<1x18x18x32xf32>
    %c0_107 = arith.constant 0 : index
    %c0_108 = arith.constant 0 : index
    %c0_109 = arith.constant 0 : index
    %c0_110 = arith.constant 0 : index
    %66 = vector.load %arg16[%c0_107, %c0_108, %c0_109, %c0_110] : memref<1x18x18x32xf32, #tpu.memory_space<vmem>>, vector<1x18x18x32xf32>
    tpu.vector_store %arg16[%c0_107, %c0_108, %c0_109, %c0_110], %65 {strides = array<i32>} : memref<1x18x18x32xf32, #tpu.memory_space<vmem>>, vector<1x18x18x32xf32>,
    %c0_111 = arith.constant 0 : index
    %c1_112 = arith.constant 1 : index
    %c1_113 = arith.constant 1 : index
    %c0_114 = arith.constant 0 : index
    %67 = vector.load %arg16[%c0_111, %c1_112, %c1_113, %c0_114] : memref<1x18x18x32xf32, #tpu.memory_space<vmem>>, vector<1x16x16x32xf32>
    tpu.vector_store %arg16[%c0_111, %c1_112, %c1_113, %c0_114], %64 {strides = array<i32>} : memref<1x18x18x32xf32, #tpu.memory_space<vmem>>, vector<1x16x16x32xf32>,
    %c0_115 = arith.constant 0 : index
    %c0_116 = arith.constant 0 : index
    %c0_117 = arith.constant 0 : index
    %c0_118 = arith.constant 0 : index
    %68 = vector.load %arg16[%c0_115, %c0_116, %c0_117, %c0_118] : memref<1x18x18x32xf32, #tpu.memory_space<vmem>>, vector<1x18x18x32xf32>
    %69 = vector.extract_strided_slice %68 {offsets = [0, 0, 0, 0], sizes = [1, 16, 18, 32], strides = [1, 1, 1, 1]} : vector<1x18x18x32xf32> to vector<1x16x18x32xf32>
    %70 = vector.shape_cast %69 : vector<1x16x18x32xf32> to vector<1x8x2x18x32xf32>
    %71 = vector.extract_strided_slice %68 {offsets = [0, 2, 0, 0], sizes = [1, 16, 18, 32], strides = [1, 1, 1, 1]} : vector<1x18x18x32xf32> to vector<1x16x18x32xf32>
    %72 = vector.shape_cast %71 : vector<1x16x18x32xf32> to vector<1x8x2x18x32xf32>
    %73 = vector.extract_strided_slice %70 {offsets = [0, 0, 0, 0, 0], sizes = [1, 8, 1, 18, 32], strides = [1, 1, 1, 1, 1]} : vector<1x8x2x18x32xf32> to vector<1x8x1x18x32xf32>
    %74 = vector.shape_cast %73 : vector<1x8x1x18x32xf32> to vector<1x8x18x32xf32>
    %75 = vector.extract_strided_slice %70 {offsets = [0, 0, 1, 0, 0], sizes = [1, 8, 1, 18, 32], strides = [1, 1, 1, 1, 1]} : vector<1x8x2x18x32xf32> to vector<1x8x1x18x32xf32>
    %76 = vector.shape_cast %75 : vector<1x8x1x18x32xf32> to vector<1x8x18x32xf32>
    %77 = arith.maximumf %74, %76 : vector<1x8x18x32xf32>
    %78 = vector.extract_strided_slice %72 {offsets = [0, 0, 0, 0, 0], sizes = [1, 8, 1, 18, 32], strides = [1, 1, 1, 1, 1]} : vector<1x8x2x18x32xf32> to vector<1x8x1x18x32xf32>
    %79 = vector.shape_cast %78 : vector<1x8x1x18x32xf32> to vector<1x8x18x32xf32>
    %80 = arith.maximumf %77, %79 : vector<1x8x18x32xf32>
    %81 = vector.extract_strided_slice %80 {offsets = [0, 0, 0, 0], sizes = [1, 8, 16, 32], strides = [1, 1, 1, 1]} : vector<1x8x18x32xf32> to vector<1x8x16x32xf32>
    %82 = vector.shape_cast %81 : vector<1x8x16x32xf32> to vector<1x8x8x2x32xf32>
    %83 = vector.extract_strided_slice %80 {offsets = [0, 0, 2, 0], sizes = [1, 8, 16, 32], strides = [1, 1, 1, 1]} : vector<1x8x18x32xf32> to vector<1x8x16x32xf32>
    %84 = vector.shape_cast %83 : vector<1x8x16x32xf32> to vector<1x8x8x2x32xf32>
    %85 = vector.extract_strided_slice %82 {offsets = [0, 0, 0, 0, 0], sizes = [1, 8, 8, 1, 32], strides = [1, 1, 1, 1, 1]} : vector<1x8x8x2x32xf32> to vector<1x8x8x1x32xf32>
    %86 = vector.shape_cast %85 : vector<1x8x8x1x32xf32> to vector<1x8x8x32xf32>
    %87 = vector.extract_strided_slice %82 {offsets = [0, 0, 0, 1, 0], sizes = [1, 8, 8, 1, 32], strides = [1, 1, 1, 1, 1]} : vector<1x8x8x2x32xf32> to vector<1x8x8x1x32xf32>
    %88 = vector.shape_cast %87 : vector<1x8x8x1x32xf32> to vector<1x8x8x32xf32>
    %89 = arith.maximumf %86, %88 : vector<1x8x8x32xf32>
    %90 = vector.extract_strided_slice %84 {offsets = [0, 0, 0, 0, 0], sizes = [1, 8, 8, 1, 32], strides = [1, 1, 1, 1, 1]} : vector<1x8x8x2x32xf32> to vector<1x8x8x1x32xf32>
    %91 = vector.shape_cast %90 : vector<1x8x8x1x32xf32> to vector<1x8x8x32xf32>
    %92 = arith.maximumf %89, %91 : vector<1x8x8x32xf32>
    %93 = vector.shape_cast %0 : vector<1x16x16x8xf32> to vector<1x8x2x16x8xf32>
    %94 = vector.extract_strided_slice %93 {offsets = [0, 0, 0, 0, 0], sizes = [1, 8, 1, 16, 8], strides = [1, 1, 1, 1, 1]} : vector<1x8x2x16x8xf32> to vector<1x8x1x16x8xf32>
    %95 = vector.shape_cast %94 : vector<1x8x1x16x8xf32> to vector<1x8x16x8xf32>
    %96 = vector.shape_cast %95 : vector<1x8x16x8xf32> to vector<1x8x8x2x8xf32>
    %97 = vector.extract_strided_slice %96 {offsets = [0, 0, 0, 0, 0], sizes = [1, 8, 8, 1, 8], strides = [1, 1, 1, 1, 1]} : vector<1x8x8x2x8xf32> to vector<1x8x8x1x8xf32>
    %98 = vector.shape_cast %97 : vector<1x8x8x1x8xf32> to vector<1x8x8x8xf32>
    %99 = vector.shape_cast %98 : vector<1x8x8x8xf32> to vector<64x8xf32>
    %100 = arith.truncf %99 : vector<64x8xf32> to vector<64x8xbf16>
    %cst_119 = arith.constant dense<0.000000e+00> : vector<64x32xf32>
    %101 = tpu.matmul %100, %5, %cst_119 {dimension_numbers = #tpu.dot_dimension_numbers<[1], [0], [0], [1], [0, 0, 1, 1], [], []>} : vector<64x8xbf16>, vector<8x32xbf16>, vector<64x32xf32> -> vector<64x32xf32>
    %102 = vector.broadcast %6 : vector<1x32xf32> to vector<64x32xf32>
    %103 = arith.addf %101, %102 : vector<64x32xf32>
    %104 = vector.shape_cast %103 : vector<64x32xf32> to vector<1x8x8x32xf32>
    %105 = arith.addf %92, %104 : vector<1x8x8x32xf32>
    %c0_120 = arith.constant 0 : index
    %c0_121 = arith.constant 0 : index
    %106 = vector.load %arg8[%c0_120, %c0_121] : memref<288x32xbf16, #tpu.memory_space<vmem>>, vector<288x32xbf16>
    %c0_122 = arith.constant 0 : index
    %c0_123 = arith.constant 0 : index
    %107 = vector.load %arg9[%c0_122, %c0_123] : memref<1x32xf32, #tpu.memory_space<vmem>>, vector<1x32xf32>
    %c0_124 = arith.constant 0 : index
    %c0_125 = arith.constant 0 : index
    %108 = vector.load %arg10[%c0_124, %c0_125] : memref<288x32xbf16, #tpu.memory_space<vmem>>, vector<288x32xbf16>
    %c0_126 = arith.constant 0 : index
    %c0_127 = arith.constant 0 : index
    %109 = vector.load %arg11[%c0_126, %c0_127] : memref<1x32xf32, #tpu.memory_space<vmem>>, vector<1x32xf32>
    %c0_128 = arith.constant 0 : index
    %c0_129 = arith.constant 0 : index
    %110 = vector.load %arg12[%c0_128, %c0_129] : memref<32x32xbf16, #tpu.memory_space<vmem>>, vector<32x32xbf16>
    %c0_130 = arith.constant 0 : index
    %c0_131 = arith.constant 0 : index
    %111 = vector.load %arg13[%c0_130, %c0_131] : memref<1x32xf32, #tpu.memory_space<vmem>>, vector<1x32xf32>
    %cst_132 = arith.constant 0.000000e+00 : f32
    %112 = vector.broadcast %cst_132 : f32 to vector<1x8x8x32xf32>
    %113 = arith.maximumf %105, %112 : vector<1x8x8x32xf32>
    %cst_133 = arith.constant 0.000000e+00 : f32
    %114 = vector.broadcast %cst_133 : f32 to vector<1x10x10x32xf32>
    %c0_134 = arith.constant 0 : index
    %c0_135 = arith.constant 0 : index
    %c0_136 = arith.constant 0 : index
    %c0_137 = arith.constant 0 : index
    %115 = vector.load %arg17[%c0_134, %c0_135, %c0_136, %c0_137] : memref<1x10x10x32xf32, #tpu.memory_space<vmem>>, vector<1x10x10x32xf32>
    tpu.vector_store %arg17[%c0_134, %c0_135, %c0_136, %c0_137], %114 {strides = array<i32>} : memref<1x10x10x32xf32, #tpu.memory_space<vmem>>, vector<1x10x10x32xf32>,
    %c0_138 = arith.constant 0 : index
    %c1_139 = arith.constant 1 : index
    %c1_140 = arith.constant 1 : index
    %c0_141 = arith.constant 0 : index
    %116 = vector.load %arg17[%c0_138, %c1_139, %c1_140, %c0_141] : memref<1x10x10x32xf32, #tpu.memory_space<vmem>>, vector<1x8x8x32xf32>
    tpu.vector_store %arg17[%c0_138, %c1_139, %c1_140, %c0_141], %113 {strides = array<i32>} : memref<1x10x10x32xf32, #tpu.memory_space<vmem>>, vector<1x8x8x32xf32>,
    %c0_142 = arith.constant 0 : index
    %c0_143 = arith.constant 0 : index
    %c0_144 = arith.constant 0 : index
    %c0_145 = arith.constant 0 : index
    %117 = vector.load %arg17[%c0_142, %c0_143, %c0_144, %c0_145] : memref<1x10x10x32xf32, #tpu.memory_space<vmem>>, vector<1x8x8x32xf32>
    %118 = arith.truncf %117 : vector<1x8x8x32xf32> to vector<1x8x8x32xbf16>
    %c0_146 = arith.constant 0 : index
    %c0_147 = arith.constant 0 : index
    %c1_148 = arith.constant 1 : index
    %c0_149 = arith.constant 0 : index
    %119 = vector.load %arg17[%c0_146, %c0_147, %c1_148, %c0_149] : memref<1x10x10x32xf32, #tpu.memory_space<vmem>>, vector<1x8x8x32xf32>
    %120 = arith.truncf %119 : vector<1x8x8x32xf32> to vector<1x8x8x32xbf16>
    %c0_150 = arith.constant 0 : index
    %c0_151 = arith.constant 0 : index
    %c2_152 = arith.constant 2 : index
    %c0_153 = arith.constant 0 : index
    %121 = vector.load %arg17[%c0_150, %c0_151, %c2_152, %c0_153] : memref<1x10x10x32xf32, #tpu.memory_space<vmem>>, vector<1x8x8x32xf32>
    %122 = arith.truncf %121 : vector<1x8x8x32xf32> to vector<1x8x8x32xbf16>
    %c0_154 = arith.constant 0 : index
    %c1_155 = arith.constant 1 : index
    %c0_156 = arith.constant 0 : index
    %c0_157 = arith.constant 0 : index
    %123 = vector.load %arg17[%c0_154, %c1_155, %c0_156, %c0_157] : memref<1x10x10x32xf32, #tpu.memory_space<vmem>>, vector<1x8x8x32xf32>
    %124 = arith.truncf %123 : vector<1x8x8x32xf32> to vector<1x8x8x32xbf16>
    %c0_158 = arith.constant 0 : index
    %c1_159 = arith.constant 1 : index
    %c1_160 = arith.constant 1 : index
    %c0_161 = arith.constant 0 : index
    %125 = vector.load %arg17[%c0_158, %c1_159, %c1_160, %c0_161] : memref<1x10x10x32xf32, #tpu.memory_space<vmem>>, vector<1x8x8x32xf32>
    %126 = arith.truncf %125 : vector<1x8x8x32xf32> to vector<1x8x8x32xbf16>
    %c0_162 = arith.constant 0 : index
    %c1_163 = arith.constant 1 : index
    %c2_164 = arith.constant 2 : index
    %c0_165 = arith.constant 0 : index
    %127 = vector.load %arg17[%c0_162, %c1_163, %c2_164, %c0_165] : memref<1x10x10x32xf32, #tpu.memory_space<vmem>>, vector<1x8x8x32xf32>
    %128 = arith.truncf %127 : vector<1x8x8x32xf32> to vector<1x8x8x32xbf16>
    %c0_166 = arith.constant 0 : index
    %c2_167 = arith.constant 2 : index
    %c0_168 = arith.constant 0 : index
    %c0_169 = arith.constant 0 : index
    %129 = vector.load %arg17[%c0_166, %c2_167, %c0_168, %c0_169] : memref<1x10x10x32xf32, #tpu.memory_space<vmem>>, vector<1x8x8x32xf32>
    %130 = arith.truncf %129 : vector<1x8x8x32xf32> to vector<1x8x8x32xbf16>
    %c0_170 = arith.constant 0 : index
    %c2_171 = arith.constant 2 : index
    %c1_172 = arith.constant 1 : index
    %c0_173 = arith.constant 0 : index
    %131 = vector.load %arg17[%c0_170, %c2_171, %c1_172, %c0_173] : memref<1x10x10x32xf32, #tpu.memory_space<vmem>>, vector<1x8x8x32xf32>
    %132 = arith.truncf %131 : vector<1x8x8x32xf32> to vector<1x8x8x32xbf16>
    %c0_174 = arith.constant 0 : index
    %c2_175 = arith.constant 2 : index
    %c2_176 = arith.constant 2 : index
    %c0_177 = arith.constant 0 : index
    %133 = vector.load %arg17[%c0_174, %c2_175, %c2_176, %c0_177] : memref<1x10x10x32xf32, #tpu.memory_space<vmem>>, vector<1x8x8x32xf32>
    %134 = arith.truncf %133 : vector<1x8x8x32xf32> to vector<1x8x8x32xbf16>
    %135 = tpu.concatenate %118, %120, %122, %124, %126, %128, %130, %132, %134 in 3 : vector<1x8x8x32xbf16>, vector<1x8x8x32xbf16>, vector<1x8x8x32xbf16>, vector<1x8x8x32xbf16>, vector<1x8x8x32xbf16>, vector<1x8x8x32xbf16>, vector<1x8x8x32xbf16>, vector<1x8x8x32xbf16>, vector<1x8x8x32xbf16> -> vector<1x8x8x288xbf16>
    %136 = vector.shape_cast %135 : vector<1x8x8x288xbf16> to vector<64x288xbf16>
    %cst_178 = arith.constant dense<0.000000e+00> : vector<64x32xf32>
    %137 = tpu.matmul %136, %106, %cst_178 {dimension_numbers = #tpu.dot_dimension_numbers<[1], [0], [0], [1], [0, 0, 1, 1], [], []>} : vector<64x288xbf16>, vector<288x32xbf16>, vector<64x32xf32> -> vector<64x32xf32>
    %138 = vector.broadcast %107 : vector<1x32xf32> to vector<64x32xf32>
    %139 = arith.addf %137, %138 : vector<64x32xf32>
    %140 = vector.shape_cast %139 : vector<64x32xf32> to vector<1x8x8x32xf32>
    %cst_179 = arith.constant 0.000000e+00 : f32
    %141 = vector.broadcast %cst_179 : f32 to vector<1x8x8x32xf32>
    %142 = arith.maximumf %140, %141 : vector<1x8x8x32xf32>
    %cst_180 = arith.constant 0.000000e+00 : f32
    %143 = vector.broadcast %cst_180 : f32 to vector<1x10x10x32xf32>
    %c0_181 = arith.constant 0 : index
    %c0_182 = arith.constant 0 : index
    %c0_183 = arith.constant 0 : index
    %c0_184 = arith.constant 0 : index
    %144 = vector.load %arg17[%c0_181, %c0_182, %c0_183, %c0_184] : memref<1x10x10x32xf32, #tpu.memory_space<vmem>>, vector<1x10x10x32xf32>
    tpu.vector_store %arg17[%c0_181, %c0_182, %c0_183, %c0_184], %143 {strides = array<i32>} : memref<1x10x10x32xf32, #tpu.memory_space<vmem>>, vector<1x10x10x32xf32>,
    %c0_185 = arith.constant 0 : index
    %c1_186 = arith.constant 1 : index
    %c1_187 = arith.constant 1 : index
    %c0_188 = arith.constant 0 : index
    %145 = vector.load %arg17[%c0_185, %c1_186, %c1_187, %c0_188] : memref<1x10x10x32xf32, #tpu.memory_space<vmem>>, vector<1x8x8x32xf32>
    tpu.vector_store %arg17[%c0_185, %c1_186, %c1_187, %c0_188], %142 {strides = array<i32>} : memref<1x10x10x32xf32, #tpu.memory_space<vmem>>, vector<1x8x8x32xf32>,
    %c0_189 = arith.constant 0 : index
    %c0_190 = arith.constant 0 : index
    %c0_191 = arith.constant 0 : index
    %c0_192 = arith.constant 0 : index
    %146 = vector.load %arg17[%c0_189, %c0_190, %c0_191, %c0_192] : memref<1x10x10x32xf32, #tpu.memory_space<vmem>>, vector<1x8x8x32xf32>
    %147 = arith.truncf %146 : vector<1x8x8x32xf32> to vector<1x8x8x32xbf16>
    %c0_193 = arith.constant 0 : index
    %c0_194 = arith.constant 0 : index
    %c1_195 = arith.constant 1 : index
    %c0_196 = arith.constant 0 : index
    %148 = vector.load %arg17[%c0_193, %c0_194, %c1_195, %c0_196] : memref<1x10x10x32xf32, #tpu.memory_space<vmem>>, vector<1x8x8x32xf32>
    %149 = arith.truncf %148 : vector<1x8x8x32xf32> to vector<1x8x8x32xbf16>
    %c0_197 = arith.constant 0 : index
    %c0_198 = arith.constant 0 : index
    %c2_199 = arith.constant 2 : index
    %c0_200 = arith.constant 0 : index
    %150 = vector.load %arg17[%c0_197, %c0_198, %c2_199, %c0_200] : memref<1x10x10x32xf32, #tpu.memory_space<vmem>>, vector<1x8x8x32xf32>
    %151 = arith.truncf %150 : vector<1x8x8x32xf32> to vector<1x8x8x32xbf16>
    %c0_201 = arith.constant 0 : index
    %c1_202 = arith.constant 1 : index
    %c0_203 = arith.constant 0 : index
    %c0_204 = arith.constant 0 : index
    %152 = vector.load %arg17[%c0_201, %c1_202, %c0_203, %c0_204] : memref<1x10x10x32xf32, #tpu.memory_space<vmem>>, vector<1x8x8x32xf32>
    %153 = arith.truncf %152 : vector<1x8x8x32xf32> to vector<1x8x8x32xbf16>
    %c0_205 = arith.constant 0 : index
    %c1_206 = arith.constant 1 : index
    %c1_207 = arith.constant 1 : index
    %c0_208 = arith.constant 0 : index
    %154 = vector.load %arg17[%c0_205, %c1_206, %c1_207, %c0_208] : memref<1x10x10x32xf32, #tpu.memory_space<vmem>>, vector<1x8x8x32xf32>
    %155 = arith.truncf %154 : vector<1x8x8x32xf32> to vector<1x8x8x32xbf16>
    %c0_209 = arith.constant 0 : index
    %c1_210 = arith.constant 1 : index
    %c2_211 = arith.constant 2 : index
    %c0_212 = arith.constant 0 : index
    %156 = vector.load %arg17[%c0_209, %c1_210, %c2_211, %c0_212] : memref<1x10x10x32xf32, #tpu.memory_space<vmem>>, vector<1x8x8x32xf32>
    %157 = arith.truncf %156 : vector<1x8x8x32xf32> to vector<1x8x8x32xbf16>
    %c0_213 = arith.constant 0 : index
    %c2_214 = arith.constant 2 : index
    %c0_215 = arith.constant 0 : index
    %c0_216 = arith.constant 0 : index
    %158 = vector.load %arg17[%c0_213, %c2_214, %c0_215, %c0_216] : memref<1x10x10x32xf32, #tpu.memory_space<vmem>>, vector<1x8x8x32xf32>
    %159 = arith.truncf %158 : vector<1x8x8x32xf32> to vector<1x8x8x32xbf16>
    %c0_217 = arith.constant 0 : index
    %c2_218 = arith.constant 2 : index
    %c1_219 = arith.constant 1 : index
    %c0_220 = arith.constant 0 : index
    %160 = vector.load %arg17[%c0_217, %c2_218, %c1_219, %c0_220] : memref<1x10x10x32xf32, #tpu.memory_space<vmem>>, vector<1x8x8x32xf32>
    %161 = arith.truncf %160 : vector<1x8x8x32xf32> to vector<1x8x8x32xbf16>
    %c0_221 = arith.constant 0 : index
    %c2_222 = arith.constant 2 : index
    %c2_223 = arith.constant 2 : index
    %c0_224 = arith.constant 0 : index
    %162 = vector.load %arg17[%c0_221, %c2_222, %c2_223, %c0_224] : memref<1x10x10x32xf32, #tpu.memory_space<vmem>>, vector<1x8x8x32xf32>
    %163 = arith.truncf %162 : vector<1x8x8x32xf32> to vector<1x8x8x32xbf16>
    %164 = tpu.concatenate %147, %149, %151, %153, %155, %157, %159, %161, %163 in 3 : vector<1x8x8x32xbf16>, vector<1x8x8x32xbf16>, vector<1x8x8x32xbf16>, vector<1x8x8x32xbf16>, vector<1x8x8x32xbf16>, vector<1x8x8x32xbf16>, vector<1x8x8x32xbf16>, vector<1x8x8x32xbf16>, vector<1x8x8x32xbf16> -> vector<1x8x8x288xbf16>
    %165 = vector.shape_cast %164 : vector<1x8x8x288xbf16> to vector<64x288xbf16>
    %cst_225 = arith.constant dense<0.000000e+00> : vector<64x32xf32>
    %166 = tpu.matmul %165, %108, %cst_225 {dimension_numbers = #tpu.dot_dimension_numbers<[1], [0], [0], [1], [0, 0, 1, 1], [], []>} : vector<64x288xbf16>, vector<288x32xbf16>, vector<64x32xf32> -> vector<64x32xf32>
    %167 = vector.broadcast %109 : vector<1x32xf32> to vector<64x32xf32>
    %168 = arith.addf %166, %167 : vector<64x32xf32>
    %169 = vector.shape_cast %168 : vector<64x32xf32> to vector<1x8x8x32xf32>
    %cst_226 = arith.constant 0xFF800000 : f32
    %170 = vector.broadcast %cst_226 : f32 to vector<1x10x10x32xf32>
    %c0_227 = arith.constant 0 : index
    %c0_228 = arith.constant 0 : index
    %c0_229 = arith.constant 0 : index
    %c0_230 = arith.constant 0 : index
    %171 = vector.load %arg17[%c0_227, %c0_228, %c0_229, %c0_230] : memref<1x10x10x32xf32, #tpu.memory_space<vmem>>, vector<1x10x10x32xf32>
    tpu.vector_store %arg17[%c0_227, %c0_228, %c0_229, %c0_230], %170 {strides = array<i32>} : memref<1x10x10x32xf32, #tpu.memory_space<vmem>>, vector<1x10x10x32xf32>,
    %c0_231 = arith.constant 0 : index
    %c1_232 = arith.constant 1 : index
    %c1_233 = arith.constant 1 : index
    %c0_234 = arith.constant 0 : index
    %172 = vector.load %arg17[%c0_231, %c1_232, %c1_233, %c0_234] : memref<1x10x10x32xf32, #tpu.memory_space<vmem>>, vector<1x8x8x32xf32>
    tpu.vector_store %arg17[%c0_231, %c1_232, %c1_233, %c0_234], %169 {strides = array<i32>} : memref<1x10x10x32xf32, #tpu.memory_space<vmem>>, vector<1x8x8x32xf32>,
    %c0_235 = arith.constant 0 : index
    %c0_236 = arith.constant 0 : index
    %c0_237 = arith.constant 0 : index
    %c0_238 = arith.constant 0 : index
    %173 = vector.load %arg17[%c0_235, %c0_236, %c0_237, %c0_238] : memref<1x10x10x32xf32, #tpu.memory_space<vmem>>, vector<1x10x10x32xf32>
    %174 = vector.extract_strided_slice %173 {offsets = [0, 0, 0, 0], sizes = [1, 8, 10, 32], strides = [1, 1, 1, 1]} : vector<1x10x10x32xf32> to vector<1x8x10x32xf32>
    %175 = vector.shape_cast %174 : vector<1x8x10x32xf32> to vector<1x4x2x10x32xf32>
    %176 = vector.extract_strided_slice %173 {offsets = [0, 2, 0, 0], sizes = [1, 8, 10, 32], strides = [1, 1, 1, 1]} : vector<1x10x10x32xf32> to vector<1x8x10x32xf32>
    %177 = vector.shape_cast %176 : vector<1x8x10x32xf32> to vector<1x4x2x10x32xf32>
    %178 = vector.extract_strided_slice %175 {offsets = [0, 0, 0, 0, 0], sizes = [1, 4, 1, 10, 32], strides = [1, 1, 1, 1, 1]} : vector<1x4x2x10x32xf32> to vector<1x4x1x10x32xf32>
    %179 = vector.shape_cast %178 : vector<1x4x1x10x32xf32> to vector<1x4x10x32xf32>
    %180 = vector.extract_strided_slice %175 {offsets = [0, 0, 1, 0, 0], sizes = [1, 4, 1, 10, 32], strides = [1, 1, 1, 1, 1]} : vector<1x4x2x10x32xf32> to vector<1x4x1x10x32xf32>
    %181 = vector.shape_cast %180 : vector<1x4x1x10x32xf32> to vector<1x4x10x32xf32>
    %182 = arith.maximumf %179, %181 : vector<1x4x10x32xf32>
    %183 = vector.extract_strided_slice %177 {offsets = [0, 0, 0, 0, 0], sizes = [1, 4, 1, 10, 32], strides = [1, 1, 1, 1, 1]} : vector<1x4x2x10x32xf32> to vector<1x4x1x10x32xf32>
    %184 = vector.shape_cast %183 : vector<1x4x1x10x32xf32> to vector<1x4x10x32xf32>
    %185 = arith.maximumf %182, %184 : vector<1x4x10x32xf32>
    %186 = vector.extract_strided_slice %185 {offsets = [0, 0, 0, 0], sizes = [1, 4, 8, 32], strides = [1, 1, 1, 1]} : vector<1x4x10x32xf32> to vector<1x4x8x32xf32>
    %187 = vector.shape_cast %186 : vector<1x4x8x32xf32> to vector<1x4x4x2x32xf32>
    %188 = vector.extract_strided_slice %185 {offsets = [0, 0, 2, 0], sizes = [1, 4, 8, 32], strides = [1, 1, 1, 1]} : vector<1x4x10x32xf32> to vector<1x4x8x32xf32>
    %189 = vector.shape_cast %188 : vector<1x4x8x32xf32> to vector<1x4x4x2x32xf32>
    %190 = vector.extract_strided_slice %187 {offsets = [0, 0, 0, 0, 0], sizes = [1, 4, 4, 1, 32], strides = [1, 1, 1, 1, 1]} : vector<1x4x4x2x32xf32> to vector<1x4x4x1x32xf32>
    %191 = vector.shape_cast %190 : vector<1x4x4x1x32xf32> to vector<1x4x4x32xf32>
    %192 = vector.extract_strided_slice %187 {offsets = [0, 0, 0, 1, 0], sizes = [1, 4, 4, 1, 32], strides = [1, 1, 1, 1, 1]} : vector<1x4x4x2x32xf32> to vector<1x4x4x1x32xf32>
    %193 = vector.shape_cast %192 : vector<1x4x4x1x32xf32> to vector<1x4x4x32xf32>
    %194 = arith.maximumf %191, %193 : vector<1x4x4x32xf32>
    %195 = vector.extract_strided_slice %189 {offsets = [0, 0, 0, 0, 0], sizes = [1, 4, 4, 1, 32], strides = [1, 1, 1, 1, 1]} : vector<1x4x4x2x32xf32> to vector<1x4x4x1x32xf32>
    %196 = vector.shape_cast %195 : vector<1x4x4x1x32xf32> to vector<1x4x4x32xf32>
    %197 = arith.maximumf %194, %196 : vector<1x4x4x32xf32>
    %198 = vector.shape_cast %105 : vector<1x8x8x32xf32> to vector<1x4x2x8x32xf32>
    %199 = vector.extract_strided_slice %198 {offsets = [0, 0, 0, 0, 0], sizes = [1, 4, 1, 8, 32], strides = [1, 1, 1, 1, 1]} : vector<1x4x2x8x32xf32> to vector<1x4x1x8x32xf32>
    %200 = vector.shape_cast %199 : vector<1x4x1x8x32xf32> to vector<1x4x8x32xf32>
    %201 = vector.shape_cast %200 : vector<1x4x8x32xf32> to vector<1x4x4x2x32xf32>
    %202 = vector.extract_strided_slice %201 {offsets = [0, 0, 0, 0, 0], sizes = [1, 4, 4, 1, 32], strides = [1, 1, 1, 1, 1]} : vector<1x4x4x2x32xf32> to vector<1x4x4x1x32xf32>
    %203 = vector.shape_cast %202 : vector<1x4x4x1x32xf32> to vector<1x4x4x32xf32>
    %204 = vector.shape_cast %203 : vector<1x4x4x32xf32> to vector<16x32xf32>
    %205 = arith.truncf %204 : vector<16x32xf32> to vector<16x32xbf16>
    %cst_239 = arith.constant dense<0.000000e+00> : vector<16x32xf32>
    %206 = tpu.matmul %205, %110, %cst_239 {dimension_numbers = #tpu.dot_dimension_numbers<[1], [0], [0], [1], [0, 0, 1, 1], [], []>} : vector<16x32xbf16>, vector<32x32xbf16>, vector<16x32xf32> -> vector<16x32xf32>
    %207 = vector.broadcast %111 : vector<1x32xf32> to vector<16x32xf32>
    %208 = arith.addf %206, %207 : vector<16x32xf32>
    %209 = vector.shape_cast %208 : vector<16x32xf32> to vector<1x4x4x32xf32>
    %210 = arith.addf %197, %209 : vector<1x4x4x32xf32>
    %211 = vector.extract_strided_slice %210 {offsets = [0, 0, 0, 0], sizes = [1, 4, 1, 32], strides = [1, 1, 1, 1]} : vector<1x4x4x32xf32> to vector<1x4x1x32xf32>
    %212 = vector.shape_cast %211 : vector<1x4x1x32xf32> to vector<1x4x32xf32>
    %213 = vector.extract_strided_slice %210 {offsets = [0, 0, 1, 0], sizes = [1, 4, 1, 32], strides = [1, 1, 1, 1]} : vector<1x4x4x32xf32> to vector<1x4x1x32xf32>
    %214 = vector.shape_cast %213 : vector<1x4x1x32xf32> to vector<1x4x32xf32>
    %215 = vector.extract_strided_slice %210 {offsets = [0, 0, 2, 0], sizes = [1, 4, 1, 32], strides = [1, 1, 1, 1]} : vector<1x4x4x32xf32> to vector<1x4x1x32xf32>
    %216 = vector.shape_cast %215 : vector<1x4x1x32xf32> to vector<1x4x32xf32>
    %217 = vector.extract_strided_slice %210 {offsets = [0, 0, 3, 0], sizes = [1, 4, 1, 32], strides = [1, 1, 1, 1]} : vector<1x4x4x32xf32> to vector<1x4x1x32xf32>
    %218 = vector.shape_cast %217 : vector<1x4x1x32xf32> to vector<1x4x32xf32>
    %219 = tpu.concatenate %212, %214, %216, %218 in 2 : vector<1x4x32xf32>, vector<1x4x32xf32>, vector<1x4x32xf32>, vector<1x4x32xf32> -> vector<1x4x128xf32>
    %c0_240 = arith.constant 0 : index
    %c0_241 = arith.constant 0 : index
    %c0_242 = arith.constant 0 : index
    %220 = vector.load %arg14[%c0_240, %c0_241, %c0_242] : memref<1x4x128xf32, #tpu.memory_space<vmem>>, vector<1x4x128xf32>
    tpu.vector_store %arg14[%c0_240, %c0_241, %c0_242], %219 {strides = array<i32>} : memref<1x4x128xf32, #tpu.memory_space<vmem>>, vector<1x4x128xf32>,
    return
  }
  func.func @transform_0(%arg0: i32) -> (i32, i32, i32, i32) {
    %c0_i32 = arith.constant 0 : i32
    %c0_i32_0 = arith.constant 0 : i32
    %c0_i32_1 = arith.constant 0 : i32
    %c0_i32_2 = arith.constant 0 : i32
    return %arg0, %c0_i32, %c0_i32_0, %c0_i32_1 : i32, i32, i32, i32
  }
  func.func @transform_1(%arg0: i32) -> (i32, i32) {
    %c0_i32 = arith.constant 0 : i32
    %c0_i32_0 = arith.constant 0 : i32
    %c0_i32_1 = arith.constant 0 : i32
    return %c0_i32, %c0_i32_0 : i32, i32
  }
  func.func @transform_2(%arg0: i32) -> (i32, i32) {
    %c0_i32 = arith.constant 0 : i32
    %c0_i32_0 = arith.constant 0 : i32
    %c0_i32_1 = arith.constant 0 : i32
    return %c0_i32, %c0_i32_0 : i32, i32
  }
  func.func @transform_3(%arg0: i32) -> (i32, i32) {
    %c0_i32 = arith.constant 0 : i32
    %c0_i32_0 = arith.constant 0 : i32
    %c0_i32_1 = arith.constant 0 : i32
    return %c0_i32, %c0_i32_0 : i32, i32
  }
  func.func @transform_4(%arg0: i32) -> (i32, i32) {
    %c0_i32 = arith.constant 0 : i32
    %c0_i32_0 = arith.constant 0 : i32
    %c0_i32_1 = arith.constant 0 : i32
    return %c0_i32, %c0_i32_0 : i32, i32
  }
  func.func @transform_5(%arg0: i32) -> (i32, i32) {
    %c0_i32 = arith.constant 0 : i32
    %c0_i32_0 = arith.constant 0 : i32
    %c0_i32_1 = arith.constant 0 : i32
    return %c0_i32, %c0_i32_0 : i32, i32
  }
  func.func @transform_6(%arg0: i32) -> (i32, i32) {
    %c0_i32 = arith.constant 0 : i32
    %c0_i32_0 = arith.constant 0 : i32
    %c0_i32_1 = arith.constant 0 : i32
    return %c0_i32, %c0_i32_0 : i32, i32
  }
  func.func @transform_7(%arg0: i32) -> (i32, i32) {
    %c0_i32 = arith.constant 0 : i32
    %c0_i32_0 = arith.constant 0 : i32
    %c0_i32_1 = arith.constant 0 : i32
    return %c0_i32, %c0_i32_0 : i32, i32
  }
  func.func @transform_8(%arg0: i32) -> (i32, i32) {
    %c0_i32 = arith.constant 0 : i32
    %c0_i32_0 = arith.constant 0 : i32
    %c0_i32_1 = arith.constant 0 : i32
    return %c0_i32, %c0_i32_0 : i32, i32
  }
  func.func @transform_9(%arg0: i32) -> (i32, i32) {
    %c0_i32 = arith.constant 0 : i32
    %c0_i32_0 = arith.constant 0 : i32
    %c0_i32_1 = arith.constant 0 : i32
    return %c0_i32, %c0_i32_0 : i32, i32
  }
  func.func @transform_10(%arg0: i32) -> (i32, i32) {
    %c0_i32 = arith.constant 0 : i32
    %c0_i32_0 = arith.constant 0 : i32
    %c0_i32_1 = arith.constant 0 : i32
    return %c0_i32, %c0_i32_0 : i32, i32
  }
  func.func @transform_11(%arg0: i32) -> (i32, i32) {
    %c0_i32 = arith.constant 0 : i32
    %c0_i32_0 = arith.constant 0 : i32
    %c0_i32_1 = arith.constant 0 : i32
    return %c0_i32, %c0_i32_0 : i32, i32
  }
  func.func @transform_12(%arg0: i32) -> (i32, i32) {
    %c0_i32 = arith.constant 0 : i32
    %c0_i32_0 = arith.constant 0 : i32
    %c0_i32_1 = arith.constant 0 : i32
    return %c0_i32, %c0_i32_0 : i32, i32
  }
  func.func @transform_13(%arg0: i32) -> (i32, i32, i32) {
    %c0_i32 = arith.constant 0 : i32
    %c0_i32_0 = arith.constant 0 : i32
    %c0_i32_1 = arith.constant 0 : i32
    return %arg0, %c0_i32, %c0_i32_0 : i32, i32, i32
  }
}

</mosaic_0001>

<bundles_post_ra>
// kernel: lfs_conv_forward.1
= control target key start
LH: loop header
LB: loop body
LE: loop exit
PB: predicated region body
PF: predicated region fallthrough
CT: control target
= control target key end

     0   :  { %s9400_s25 = smov 0   ;;  %s13097_s0 = inlined_call_operand.vmem [shape: f32[2,16,16,8], index: 0, kind: input, shape index: {}]   ;;  %s13098_s1 = inlined_call_operand.vmem [shape: bf16[72,32], index: 1, kind: input, shape index: {}]   ;;  %s13099_s2 = inlined_call_operand.vmem [shape: f32[1,32], index: 2, kind: input, shape index: {}]   ;;  %s13100_s3 = inlined_call_operand.vmem [shape: bf16[288,32], index: 3, kind: input, shape index: {}]   ;;  %s13101_s4 = inlined_call_operand.vmem [shape: f32[1,32], index: 4, kind: input, shape index: {}]   ;;  %s13102_s5 = inlined_call_operand.vmem [shape: bf16[8,32], index: 5, kind: input, shape index: {}]   ;;  %s13103_s6 = inlined_call_operand.vmem [shape: f32[1,32], index: 6, kind: input, shape index: {}]   ;;  %s13104_s7 = inlined_call_operand.vmem [shape: bf16[288,32], index: 7, kind: input, shape index: {}]   ;;  %s13105_s8 = inlined_call_operand.vmem [shape: f32[1,32], index: 8, kind: input, shape index: {}]   ;;  %s13106_s9 = inlined_call_operand.vmem [shape: bf16[288,32], index: 9, kind: input, shape index: {}]   ;;  %s13107_s10 = inlined_call_operand.vmem [shape: f32[1,32], index: 10, kind: input, shape index: {}]   ;;  %s13108_s11 = inlined_call_operand.vmem [shape: bf16[32,32], index: 11, kind: input, shape index: {}]   ;;  %s13109_s12 = inlined_call_operand.vmem [shape: f32[1,32], index: 12, kind: input, shape index: {}]   ;;  %s13110_s13 = inlined_call_operand.vmem [shape: f32[2,4,128], index: 13, kind: output, shape index: {}]  }
   0x1 LB: > { %s8821_s26 = sadd.s32 4294967295, %s9317_s25   ;;  %p8825_p0 = scmp.ge.s32.totalorder %s9317_s25, 1  ;;  %s9317_s25 = sphi %s9400_s25, %s23_s25  }
   0x2   : > { %p387_p1 = scmp.lt.s32.totalorder %s9317_s25, 3 }
   0x4   : > { %p388_p2 = pnand %p8825_p0, %p387_p1 }
   0x6   : > { %391 = sbr.rel (%p388_p2) target bundleno = 1891 (0x763), region = 72 }
   0xb   : > { %vm553_vm0 = vcmask 64512   ;;  %vm556_vm1 = vcmask 58368   ;;  %v13111_v0 = vmov 0.0   ;;  %s9320_s27 = smov 8   ;;  %s9321_s28 = smov 16   ;;  %vm2537_vm2 = vcmask 1043456  }
   0xc   : > { %554 = vst.msk [vmem:[#allocation2] sm:$0xff] %vm553_vm0, %v13111_v0  ;;  %p430_p3 = scmp.lt.s32.totalorder %s8821_s26, 1  ;;  %s9322_s16 = smov 40   ;;  %vm2309_vm3 = vcmask 261120   ;;  %vm2243_vm4 = vcmask 130048   ;;  %vm2276_vm5 = vcmask 195584  }
   0xd   : > { %555 = vst.msk [vmem:[#allocation2 + $0x8] sm:$0xff] %vm553_vm0, %v13111_v0  ;;  %s9323_s17 = smov 24   ;;  %s9324_s18 = smov 56   ;;  %vm2342_vm6 = vcmask 326656   ;;  %vm2375_vm7 = vcmask 392192   ;;  %vm2408_vm8 = vcmask 457728  }
   0xe   : > { %557 = vst.msk [vmem:[#allocation2 + $0x10] sm:$0x3] %vm556_vm1, %v13111_v0  ;;  %s13237_s26 = smov (!%p430_p3, %s8821_s26), 1  ;;  %s9325_s19 = smov 48   ;;  %vm2441_vm9 = vcmask 523264   ;;  %vm2504_vm10 = vcmask 588800  }
   0xf   : > { %558 = vst.msk [vmem:[#allocation2 + $0x18] sm:$0xff] %vm553_vm0, %v13111_v0  ;;  %s9196_s29 = sshll.u32 %s13237_s26, 8  ;;  %s9326_s20 = smov 32   ;;  %vm2664_vm11 = vcmask 254976   ;;  %vm4319_vm12 = vcmask 785408   ;;  %vm6014_vm13 = vcmask 1041409  }
  0x10   : > { %559 = vst.msk [vmem:[#allocation2 + $0x20] sm:$0xff] %vm553_vm0, %v13111_v0  ;;  %s9510_s15 = scalar_lea.vmem %s13097_s0, %s9196_s29  ;;  %s9327_s21 = smov 64   ;;  %vm6017_vm14 = vcmask 1042434   ;;  %vm6020_vm15 = vcmask 1043459  }
  0x11   : > { %560 = vst.msk [vmem:[#allocation2 + $0x28] sm:$0x3] %vm556_vm1, %v13111_v0  ;;  %v440_v15 = vld [vmem:[%s9510_s15] sm:$0xff]  ;;  %v441_v16 = vld [vmem:[%s9510_s15 + $0x8] sm:$0xff]  ;;  %v442_v17 = vld [vmem:[%s9510_s15 + $0x10] sm:$0xff]  ;;  %s9329_s30 = smov 96  }
  0x12   : > { %561 = vst.msk [vmem:[#allocation2 + $0x30] sm:$0xff] %vm553_vm0, %v13111_v0  ;;  %v521_v18 = vmax.f32 %v440_v15, 0.0  ;;  %v443_v19 = vld [vmem:[%s9510_s15 + $0x18] sm:$0xff]  ;;  %v522_v20 = vmax.f32 %v441_v16, 0.0  ;;  %v523_v21 = vmax.f32 %v442_v17, 0.0  ;;  %v444_v22 = vld [vmem:[%s9510_s15 + $0x20] sm:$0xff] }
  0x13   : > { %562 = vst.msk [vmem:[#allocation2 + $0x38] sm:$0xff] %vm553_vm0, %v13111_v0  ;;  %v445_v23 = vld [vmem:[%s9510_s15 + $0x28] sm:$0xff]  ;;  %v524_v24 = vmax.f32 %v443_v19, 0.0  ;;  %v525_v25 = vmax.f32 %v444_v22, 0.0  ;;  %v446_v57 = vld [vmem:[%s9510_s15 + $0x30] sm:$0xff]  ;;  %v447_v61 = vld [vmem:[%s9510_s15 + $0x38] sm:$0xff] }
  0x14   : > { %v706_v1 = vld [vmem:[#allocation2 + $0x1] sm:$0xff]  ;;  %563 = vst.msk [vmem:[#allocation2 + $0x40] sm:$0x3] %vm556_vm1, %v13111_v0  ;;  %v526_v26 = vmax.f32 %v445_v23, 0.0  ;;  %v527_v62 = vmax.f32 %v446_v57, 0.0 }
  0x15   : > { %v707_v2 = vld [vmem:[#allocation2 + $0x9] sm:$0xff]  ;;  %v738_v3 = vpack.c.bf16 %v706_v1, %v706_v1  ;;  %564 = vst.msk [vmem:[#allocation2 + $0x48] sm:$0xff] %vm553_vm0, %v13111_v0 }
  0x16   : > { %v770_v4 = vld [vmem:[#allocation2 + $0x2] sm:$0xff]  ;;  %v771_v5 = vld [vmem:[#allocation2 + $0xa] sm:$0xff]  ;;  %v739_v6 = vpack.c.bf16 %v707_v2, %v707_v2  ;;  %565 = vst.msk [vmem:[#allocation2 + $0x50] sm:$0xff] %vm553_vm0, %v13111_v0  ;;  %v528_v2 = vmax.f32 %v447_v61, 0.0 }
  0x17   : > { %v1331_v7 = vunpack.c.l.b16 %v738_v3  ;;  %566 = vst.msk [vmem:[#allocation2 + $0x58] sm:$0x3] %vm556_vm1, %v13111_v0  ;;  %v802_v9 = vpack.c.bf16 %v770_v4, %v770_v4  ;;  %v803_v10 = vpack.c.bf16 %v771_v5, %v771_v5 }
  0x18   : > { %v1332_v8 = vunpack.c.l.b16 %v739_v6  ;;  %567 = vst.msk [vmem:[#allocation2 + $0x60] sm:$0xff] %vm553_vm0, %v13111_v0 }
  0x19   : > { %568 = vst.msk [vmem:[#allocation2 + $0x68] sm:$0xff] %vm553_vm0, %v13111_v0  ;;  %v1443_v12 = vunpack.c.l.b16 %v802_v9  ;;  %v1444_v13 = vunpack.c.l.b16 %v803_v10 }
  0x1a   : > { %v1363_v11 = vpack.c.b16 %v1332_v8, %v1331_v7  ;;  %569 = vst.msk [vmem:[#allocation2 + $0x70] sm:$0x3] %vm556_vm1, %v13111_v0 }
  0x1b   : > { %570 = vst.msk [vmem:[#allocation2 + $0x78] sm:$0xff] %vm553_vm0, %v13111_v0  ;;  %v1475_v14 = vpack.c.b16 %v1444_v13, %v1443_v12 }
  0x1c   : > { %1379 = vrot.lane.b32.xlu0 %v1363_v11, %s9320_s27  ;;  %571 = vst.msk [vmem:[#allocation2 + $0x80] sm:$0xff] %vm553_vm0, %v13111_v0 }
  0x1d   : > { %572 = vst.msk [vmem:[#allocation2 + $0x88] sm:$0x3] %vm556_vm1, %v13111_v0 }
  0x1e   : > { %573 = vst.msk [vmem:[#allocation2 + $0x90] sm:$0xff] %vm553_vm0, %v13111_v0 }
  0x1f   : > { %574 = vst.msk [vmem:[#allocation2 + $0x98] sm:$0xff] %vm553_vm0, %v13111_v0 }
  0x20   : > { %575 = vst.msk [vmem:[#allocation2 + $0xa0] sm:$0x3] %vm556_vm1, %v13111_v0 }
  0x21   : > { %576 = vst.msk [vmem:[#allocation2 + $0xa8] sm:$0xff] %vm553_vm0, %v13111_v0 }
  0x22   : > { %577 = vst.msk [vmem:[#allocation2 + $0xb0] sm:$0xff] %vm553_vm0, %v13111_v0 }
  0x23   : > { %578 = vst.msk [vmem:[#allocation2 + $0xb8] sm:$0x3] %vm556_vm1, %v13111_v0 }
  0x24   : > { %579 = vst.msk [vmem:[#allocation2 + $0xc0] sm:$0xff] %vm553_vm0, %v13111_v0  ;;  %1491 = vrot.lane.b32.xlu0 %v1475_v14, %s9321_s28 }
  0x25   : > { %580 = vst.msk [vmem:[#allocation2 + $0xc8] sm:$0xff] %vm553_vm0, %v13111_v0 }
  0x26   : > { %581 = vst.msk [vmem:[#allocation2 + $0xd0] sm:$0x3] %vm556_vm1, %v13111_v0 }
  0x27   : > { %582 = vst.msk [vmem:[#allocation2 + $0xd8] sm:$0xff] %vm553_vm0, %v13111_v0 }
  0x28   : > { %583 = vst.msk [vmem:[#allocation2 + $0xe0] sm:$0xff] %vm553_vm0, %v13111_v0 }
  0x29   : > { %584 = vst.msk [vmem:[#allocation2 + $0xe8] sm:$0x3] %vm556_vm1, %v13111_v0 }
  0x2a   : > { %585 = vst.msk [vmem:[#allocation2 + $0xf0] sm:$0xff] %vm553_vm0, %v13111_v0 }
  0x2b   : > { %586 = vst.msk [vmem:[#allocation2 + $0xf8] sm:$0xff] %vm553_vm0, %v13111_v0 }
  0x2c   : > { %587 = vst.msk [vmem:[#allocation2 + $0x100] sm:$0x3] %vm556_vm1, %v13111_v0 }
  0x2d   : > { %588 = vst.msk [vmem:[#allocation2 + $0x108] sm:$0xff] %vm553_vm0, %v13111_v0 }
  0x2e   : > { %589 = vst.msk [vmem:[#allocation2 + $0x110] sm:$0xff] %vm553_vm0, %v13111_v0 }
  0x2f   : > { %590 = vst.msk [vmem:[#allocation2 + $0x118] sm:$0x3] %vm556_vm1, %v13111_v0 }
  0x30   : > { %591 = vst.msk [vmem:[#allocation2 + $0x120] sm:$0xff] %vm553_vm0, %v13111_v0 }
  0x31   : > { %592 = vst.msk [vmem:[#allocation2 + $0x128] sm:$0xff] %vm553_vm0, %v13111_v0 }
  0x32   : > { %593 = vst.msk [vmem:[#allocation2 + $0x130] sm:$0x3] %vm556_vm1, %v13111_v0 }
  0x33   : > { %594 = vst.msk [vmem:[#allocation2 + $0x138] sm:$0xff] %vm553_vm0, %v13111_v0 }
  0x34   : > { %595 = vst.msk [vmem:[#allocation2 + $0x140] sm:$0xff] %vm553_vm0, %v13111_v0 }
  0x35   : > { %596 = vst.msk [vmem:[#allocation2 + $0x148] sm:$0x3] %vm556_vm1, %v13111_v0 }
  0x36   : > { %597 = vst.msk [vmem:[#allocation2 + $0x150] sm:$0xff] %vm553_vm0, %v13111_v0 }
  0x37   : > { %598 = vst.msk [vmem:[#allocation2 + $0x158] sm:$0xff] %vm553_vm0, %v13111_v0 }
  0x38   : > { %599 = vst.msk [vmem:[#allocation2 + $0x160] sm:$0x3] %vm556_vm1, %v13111_v0 }
  0x39   : > { %600 = vst.msk [vmem:[#allocation2 + $0x168] sm:$0xff] %vm553_vm0, %v13111_v0 }
  0x3a   : > { %601 = vst.msk [vmem:[#allocation2 + $0x170] sm:$0xff] %vm553_vm0, %v13111_v0 }
  0x3b   : > { %602 = vst.msk [vmem:[#allocation2 + $0x178] sm:$0x3] %vm556_vm1, %v13111_v0 }
  0x3c   : > { %603 = vst.msk [vmem:[#allocation2 + $0x180] sm:$0xff] %vm553_vm0, %v13111_v0 }
  0x3d   : > { %604 = vst.msk [vmem:[#allocation2 + $0x188] sm:$0xff] %vm553_vm0, %v13111_v0 }
  0x3e   : > { %605 = vst.msk [vmem:[#allocation2 + $0x190] sm:$0x3] %vm556_vm1, %v13111_v0 }
  0x3f   : > { %606 = vst.msk [vmem:[#allocation2 + $0x198] sm:$0xff] %vm553_vm0, %v13111_v0 }
  0x40   : > { %607 = vst.msk [vmem:[#allocation2 + $0x1a0] sm:$0xff] %vm553_vm0, %v13111_v0 }
  0x41   : > { %608 = vst.msk [vmem:[#allocation2 + $0x1a8] sm:$0x3] %vm556_vm1, %v13111_v0  ;;  %vm6023_vm1 = vcmask 1044484  }
  0x42   : > { %610 = vst.msk [vmem:[#allocation2 + $0x19] sm:$0xff] %vm553_vm0, %v521_v18 }
  0x43   : > { %611 = vst.msk [vmem:[#allocation2 + $0x21] sm:$0xff] %vm553_vm0, %v522_v20 }
  0x44   : > { %612 = vst.msk [vmem:[#allocation2 + $0x31] sm:$0xff] %vm553_vm0, %v523_v21 }
  0x45   : > { %613 = vst.msk [vmem:[#allocation2 + $0x39] sm:$0xff] %vm553_vm0, %v524_v24 }
  0x46   : > { %614 = vst.msk [vmem:[#allocation2 + $0x49] sm:$0xff] %vm553_vm0, %v525_v25 }
  0x47   : > { %615 = vst.msk [vmem:[#allocation2 + $0x51] sm:$0xff] %vm553_vm0, %v526_v26 }
  0x48   : > { %616 = vst.msk [vmem:[#allocation2 + $0x61] sm:$0xff] %vm553_vm0, %v527_v62 }
  0x49   : > { %v834_v27 = vld [vmem:[#allocation2 + $0x18] sm:$0xff]  ;;  %617 = vst.msk [vmem:[#allocation2 + $0x69] sm:$0xff] %vm553_vm0, %v528_v2 }
  0x4a   : > { %v898_v28 = vld [vmem:[#allocation2 + $0x19] sm:$0xff]  ;;  %v963_v30 = vld [vmem:[#allocation2 + $0x22] sm:$0xff]  ;;  %v866_v32 = vpack.c.bf16 %v834_v27, %v834_v27  ;;  %2662 = vst.msk [vmem:[#allocation3] sm:$0xff] %vm2309_vm3, %v13111_v0 }
  0x4b   : > { %v962_v29 = vld [vmem:[#allocation2 + $0x1a] sm:$0xff]  ;;  %v995_v34 = vpack.c.bf16 %v963_v30, %v963_v30  ;;  %v1091_v36 = vld [vmem:[#allocation2 + $0x31] sm:$0xff]  ;;  %v930_v39 = vpack.c.bf16 %v898_v28, %v898_v28  ;;  %2663 = vst.msk [vmem:[#allocation3 + $0x8] sm:$0xff] %vm2309_vm3, %v13111_v0 }
  0x4c   : > { %v835_v31 = vld [vmem:[#allocation2 + $0x20] sm:$0xff]  ;;  %v994_v33 = vpack.c.bf16 %v962_v29, %v962_v29  ;;  %v1027_v37 = vld [vmem:[#allocation2 + $0x30] sm:$0xff]  ;;  %v1555_v40 = vunpack.c.l.b16 %v866_v32  ;;  %v1123_v42 = vpack.c.bf16 %v1091_v36, %v1091_v36  ;;  %v1028_v43 = vld [vmem:[#allocation2 + $0x38] sm:$0xff]  ;;  %2666 = vst.msk [vmem:[#allocation3 + $0x18] sm:$0xff] %vm2309_vm3, %v13111_v0 }
  0x4d   : > { %v867_v35 = vpack.c.bf16 %v835_v31, %v835_v31  ;;  %v899_v38 = vld [vmem:[#allocation2 + $0x21] sm:$0xff]  ;;  %v1092_v41 = vld [vmem:[#allocation2 + $0x39] sm:$0xff]  ;;  %v1059_v44 = vpack.c.bf16 %v1027_v37, %v1027_v37  ;;  %v1780_v47 = vunpack.c.l.b16 %v995_v34  ;;  %v1060_v51 = vpack.c.bf16 %v1028_v43, %v1028_v43  ;;  %v1093_v16 = vld [vmem:[#allocation2 + $0x49] sm:$0xff]  ;;  %2667 = vst.msk [vmem:[#allocation3 + $0x20] sm:$0xff] %vm2309_vm3, %v13111_v0 }
  0x4e   : > { %v931_v45 = vpack.c.bf16 %v899_v38, %v899_v38  ;;  %v1779_v46 = vunpack.c.l.b16 %v994_v33  ;;  %v1124_v49 = vpack.c.bf16 %v1092_v41, %v1092_v41  ;;  %v2003_v50 = vunpack.c.l.b16 %v1123_v42  ;;  %v1155_v63 = vld [vmem:[#allocation2 + $0x32] sm:$0xff]  ;;  %v1156_v1 = vld [vmem:[#allocation2 + $0x3a] sm:$0xff]  ;;  %v1157_v9 = vld [vmem:[#allocation2 + $0x4a] sm:$0xff]  ;;  %2669 = vst.msk [vmem:[#allocation3 + $0x30] sm:$0xff] %vm2309_vm3, %v13111_v0 }
  0x4f   : > { %v1556_v48 = vunpack.c.l.b16 %v867_v35  ;;  %v1891_v55 = vunpack.c.l.b16 %v1059_v44  ;;  %v1667_v56 = vunpack.c.l.b16 %v930_v39  ;;  %v1892_v59 = vunpack.c.l.b16 %v1060_v51  ;;  %v1158_v10 = vld [vmem:[#allocation2 + $0x52] sm:$0xff]  ;;  %v1029_v14 = vld [vmem:[#allocation2 + $0x48] sm:$0xff]  ;;  %v449_v28 = vld [vmem:[%s9510_s15 + $0x48] sm:$0xff]  ;;  %2670 = vst.msk [vmem:[#allocation3 + $0x38] sm:$0xff] %vm2309_vm3, %v13111_v0 }
  0x50   : > { %v1811_v52 = vpack.c.b16 %v1780_v47, %v1779_v46  ;;  %v2004_v54 = vunpack.c.l.b16 %v1124_v49  ;;  %v1668_v60 = vunpack.c.l.b16 %v931_v45  ;;  %v1187_v5 = vpack.c.bf16 %v1155_v63, %v1155_v63  ;;  %v1030_v15 = vld [vmem:[#allocation2 + $0x50] sm:$0xff]  ;;  %v448_v27 = vld [vmem:[%s9510_s15 + $0x40] sm:$0xff]  ;;  %v1031_v33 = vld [vmem:[#allocation2 + $0x60] sm:$0xff]  ;;  %2672 = vst.msk [vmem:[#allocation3 + $0x48] sm:$0xff] %vm2309_vm3, %v13111_v0 }
  0x51   : > { %v9542_v53 = vpack.c.b16 %v1556_v48, %v1555_v40  ;;  %v1923_v3 = vpack.c.b16 %v1892_v59, %v1891_v55  ;;  %v1188_v6 = vpack.c.bf16 %v1156_v1, %v1156_v1  ;;  %v1189_v12 = vpack.c.bf16 %v1157_v9, %v1157_v9  ;;  %v1094_v17 = vld [vmem:[#allocation2 + $0x51] sm:$0xff]  ;;  %v1032_v34 = vld [vmem:[#allocation2 + $0x68] sm:$0xff]  ;;  %2673 = vst.msk [vmem:[#allocation3 + $0x50] sm:$0xff] %vm2309_vm3, %v13111_v0 }
  0x52   : > { %1827 = vrot.lane.b32.xlu2 %v1811_v52, %s9322_s16  ;;  %v9548_v58 = vpack.c.b16 %v2004_v54, %v2003_v50  ;;  %v1699_v4 = vpack.c.b16 %v1668_v60, %v1667_v56  ;;  %v2115_v7 = vunpack.c.l.b16 %v1187_v5  ;;  %v1190_v13 = vpack.c.bf16 %v1158_v10, %v1158_v10  ;;  %v1095_v42 = vld [vmem:[#allocation2 + $0x61] sm:$0xff]  ;;  %v1096_v43 = vld [vmem:[#allocation2 + $0x69] sm:$0xff]  ;;  %v452_v9 = vld [vmem:[%s9510_s15 + $0x60] sm:$0xff]  ;;  %2675 = vst.msk [vmem:[#allocation3 + $0x60] sm:$0xff] %vm2309_vm3, %v13111_v0 }
  0x53   : > { %1603 = vrot.lane.b32.xlu1 %v9542_v53, %s9323_s17  ;;  %v2116_v8 = vunpack.c.l.b16 %v1188_v6  ;;  %v2117_v18 = vunpack.c.l.b16 %v1189_v12  ;;  %v1061_v20 = vpack.c.bf16 %v1029_v14, %v1029_v14  ;;  %v1062_v21 = vpack.c.bf16 %v1030_v15, %v1030_v15  ;;  %v1159_v44 = vld [vmem:[#allocation2 + $0x62] sm:$0xff]  ;;  %v1160_v45 = vld [vmem:[#allocation2 + $0x6a] sm:$0xff]  ;;  %2676 = vst.msk [vmem:[#allocation3 + $0x68] sm:$0xff] %vm2309_vm3, %v13111_v0 }
  0x54   : > { %2051 = vrot.lane.b32.xlu0 %v9548_v58, %s9324_s18  ;;  %v2118_v19 = vunpack.c.l.b16 %v1190_v13  ;;  %v1125_v22 = vpack.c.bf16 %v1093_v16, %v1093_v16  ;;  %v1126_v23 = vpack.c.bf16 %v1094_v17, %v1094_v17  ;;  %v529_v31 = vmax.f32 %v448_v27, 0.0  ;;  %v451_v54 = vld [vmem:[%s9510_s15 + $0x58] sm:$0xff]  ;;  %v453_v10 = vld [vmem:[%s9510_s15 + $0x68] sm:$0xff]  ;;  %2678 = vst.msk [vmem:[#allocation3 + $0x78] sm:$0xff] %vm2309_vm3, %v13111_v0 }
  0x55   : > { %v2147_v11 = vpack.c.b16 %v2116_v8, %v2115_v7  ;;  %v1893_v25 = vunpack.c.l.b16 %v1061_v20  ;;  %v1894_v26 = vunpack.c.l.b16 %v1062_v21  ;;  %v530_v32 = vmax.f32 %v449_v28, 0.0  ;;  %2679 = vst.msk [vmem:[#allocation3 + $0x80] sm:$0xff] %vm2309_vm3, %v13111_v0 }
  0x56   : > { %v9561_v24 = vpack.c.b16 %v2118_v19, %v2117_v18  ;;  %v2005_v29 = vunpack.c.l.b16 %v1125_v22  ;;  %v2006_v30 = vunpack.c.l.b16 %v1126_v23  ;;  %618 = vst.msk [vmem:[#allocation2 + $0x79] sm:$0xff] %vm553_vm0, %v529_v31  ;;  %v1063_v37 = vpack.c.bf16 %v1031_v33, %v1031_v33 }
  0x57   : > { %619 = vst.msk [vmem:[#allocation2 + $0x81] sm:$0xff] %vm553_vm0, %v530_v32  ;;  %v1924_v35 = vpack.c.b16 %v1894_v26, %v1893_v25  ;;  %v1064_v38 = vpack.c.bf16 %v1032_v34, %v1032_v34  ;;  %v1127_v46 = vpack.c.bf16 %v1095_v42, %v1095_v42  ;;  %v1128_v47 = vpack.c.bf16 %v1096_v43, %v1096_v43 }
  0x58   : > { %v2036_v36 = vpack.c.b16 %v2006_v30, %v2005_v29  ;;  %v1895_v39 = vunpack.c.l.b16 %v1063_v37  ;;  %v1191_v48 = vpack.c.bf16 %v1159_v44, %v1159_v44  ;;  %v1192_v49 = vpack.c.bf16 %v1160_v45, %v1160_v45  ;;  %v9199_v44 = vld [vmem:[%s13098_s1 + $0x10] sm:$0xff]  ;;  %2681 = vst.msk [vmem:[#allocation3 + $0x90] sm:$0xff] %vm2309_vm3, %v13111_v0 }
  0x59   : > { %v1896_v40 = vunpack.c.l.b16 %v1064_v38  ;;  %v2007_v50 = vunpack.c.l.b16 %v1127_v46  ;;  %v2008_v51 = vunpack.c.l.b16 %v1128_v47  ;;  %v533_v13 = vmax.f32 %v452_v9, 0.0  ;;  %v9200_v38 = vld [vmem:[%s13098_s1 + $0x18] sm:$0xff]  ;;  %2682 = vst.msk [vmem:[#allocation3 + $0x98] sm:$0xff] %vm2309_vm3, %v13111_v0 }
  0x5a   : > { %1939 = vrot.lane.b32.xlu2 %v1923_v3, %s9325_s19  ;;  %v2119_v55 = vunpack.c.l.b16 %v1191_v48  ;;  %v2120_v56 = vunpack.c.l.b16 %v1192_v49  ;;  %v534_v14 = vmax.f32 %v453_v10, 0.0  ;;  %2684 = vst.msk [vmem:[#allocation3 + $0xa8] sm:$0xff] %vm2309_vm3, %v13111_v0 }
  0x5b   : > { %1715 = vrot.lane.b32.xlu1 %v1699_v4, %s9326_s20  ;;  %v1925_v41 = vpack.c.b16 %v1896_v40, %v1895_v39  ;;  %v2037_v61 = vpack.c.b16 %v2008_v51, %v2007_v50  ;;  %622 = vst.msk [vmem:[#allocation2 + $0xa9] sm:$0xff] %vm553_vm0, %v533_v13  ;;  %v9198_v51 = vld [vmem:[%s13098_s1 + $0x8] sm:$0xff] }
  0x5c   : > { %1493 = vrot.lane.b32.xlu0 %v1811_v52, %s9321_s28  ;;  %v450_v52 = vld [vmem:[%s9510_s15 + $0x50] sm:$0xff]  ;;  %v2149_v62 = vpack.c.b16 %v2120_v56, %v2119_v55  ;;  %623 = vst.msk [vmem:[#allocation2 + $0xb1] sm:$0xff] %vm553_vm0, %v534_v14 }
  0x5d   : > { %v531_v57 = vmax.f32 %v450_v52, 0.0  ;;  %v1097_v59 = vld [vmem:[#allocation2 + $0x79] sm:$0xff]  ;;  %2685 = vst.msk [vmem:[#allocation3 + $0xb0] sm:$0xff] %vm2309_vm3, %v13111_v0 }
  0x5e   : > { %v1098_v60 = vld [vmem:[#allocation2 + $0x81] sm:$0xff]  ;;  %v1129_v63 = vpack.c.bf16 %v1097_v59, %v1097_v59  ;;  %v1033_v2 = vld [vmem:[#allocation2 + $0x78] sm:$0xff]  ;;  %2687 = vst.msk [vmem:[#allocation3 + $0xc0] sm:$0xff] %vm2309_vm3, %v13111_v0 }
  0x5f   : > { %620 = vst.msk [vmem:[#allocation2 + $0x91] sm:$0xff] %vm553_vm0, %v531_v57  ;;  %v1130_v1 = vpack.c.bf16 %v1098_v60, %v1098_v60  ;;  %v1065_v6 = vpack.c.bf16 %v1033_v2, %v1033_v2  ;;  %v1161_v15 = vld [vmem:[#allocation2 + $0x7a] sm:$0xff]  ;;  %v1162_v16 = vld [vmem:[#allocation2 + $0x82] sm:$0xff] }
  0x60   : > { %v1193_v18 = vpack.c.bf16 %v1161_v15, %v1161_v15  ;;  %v1194_v19 = vpack.c.bf16 %v1162_v16, %v1162_v16  ;;  %v9197_v57 = vld [vmem:[%s13098_s1] sm:$0xff]  ;;  %2688 = vst.msk [vmem:[#allocation3 + $0xc8] sm:$0xff] %vm2309_vm3, %v13111_v0 }
  0x61   : > { %v2010_v5 = vunpack.c.l.b16 %v1130_v1  ;;  %2690 = vst.msk [vmem:[#allocation3 + $0xd8] sm:$0xff] %vm2309_vm3, %v13111_v0 }
  0x62   : > { %1381 = vrot.lane.b32.xlu2 %v1699_v4, %s9320_s27  ;;  %v2009_v4 = vunpack.c.l.b16 %v1129_v63  ;;  %v2121_v20 = vunpack.c.l.b16 %v1193_v18  ;;  %v2122_v21 = vunpack.c.l.b16 %v1194_v19  ;;  %v1037_v49 = vld [vmem:[#allocation2 + $0xa8] sm:$0xff]  ;;  %v642_v63 = vld [vmem:[#allocation2] sm:$0xff]  ;;  %2691 = vst.msk [vmem:[#allocation3 + $0xe0] sm:$0xff] %vm2309_vm3, %v13111_v0 }
  0x63   : > { %2163 = vrot.lane.b32.xlu1 %v2147_v11, %s9327_s21  ;;  %v1038_v50 = vld [vmem:[#allocation2 + $0xb0] sm:$0xff]  ;;  %v1069_v55 = vpack.c.bf16 %v1037_v49, %v1037_v49  ;;  %2693 = vst.msk [vmem:[#allocation3 + $0xf0] sm:$0xff] %vm2309_vm3, %v13111_v0 }
  0x64   : > { %1829 = vrot.lane.b32.xlu0 %v2147_v11, %s9322_s16  ;;  %v9590_v8 = vpack.c.b16 %v2010_v5, %v2009_v4  ;;  %v9607_v25 = vpack.c.b16 %v2122_v21, %v2121_v20  ;;  %v1070_v56 = vpack.c.bf16 %v1038_v50, %v1038_v50  ;;  %v1101_v4 = vld [vmem:[#allocation2 + $0xa9] sm:$0xff]  ;;  %v1102_v5 = vld [vmem:[#allocation2 + $0xb1] sm:$0xff]  ;;  %2694 = vst.msk [vmem:[#allocation3 + $0xf8] sm:$0xff] %vm2309_vm3, %v13111_v0 }
  0x65   : > { %v1901_v60 = vunpack.c.l.b16 %v1069_v55  ;;  %v1134_v13 = vpack.c.bf16 %v1102_v5, %v1102_v5  ;;  %2696 = vst.msk [vmem:[#allocation3 + $0x108] sm:$0xff] %vm2309_vm3, %v13111_v0  ;;  %v458_v55 = vld [vmem:[%s9510_s15 + $0x90] sm:$0xff] }
  0x66   : > { %v1035_v30 = vld [vmem:[#allocation2 + $0x90] sm:$0xff]  ;;  %2697 = vst.msk [vmem:[#allocation3 + $0x110] sm:$0xff] %vm2309_vm3, %v13111_v0 }
  0x67   : > { %v1099_v33 = vld [vmem:[#allocation2 + $0x91] sm:$0xff]  ;;  %v1067_v37 = vpack.c.bf16 %v1035_v30, %v1035_v30  ;;  %v2014_v18 = vunpack.c.l.b16 %v1134_v13  ;;  %2699 = vst.msk [vmem:[#allocation3 + $0x120] sm:$0xff] %vm2309_vm3, %v13111_v0 }
  0x68   : > { %v1131_v40 = vpack.c.bf16 %v1099_v33, %v1099_v33  ;;  %2700 = vst.msk [vmem:[#allocation3 + $0x128] sm:$0xff] %vm2309_vm3, %v13111_v0 }
  0x69   : > { %v1899_v43 = vunpack.c.l.b16 %v1067_v37  ;;  %2702 = vst.msk [vmem:[#allocation3 + $0x138] sm:$0xff] %vm2309_vm3, %v13111_v0 }
  0x6a   : > { %1717 = vrot.lane.b32.xlu2 %v9548_v58, %s9326_s20  ;;  %v2011_v46 = vunpack.c.l.b16 %v1131_v40  ;;  %2703 = vst.msk [vmem:[#allocation3 + $0x140] sm:$0xff] %vm2309_vm3, %v13111_v0  ;;  %v456_v40 = vld [vmem:[%s9510_s15 + $0x80] sm:$0xff] }
  0x6b   : > { %1605 = vrot.lane.b32.xlu1 %v1923_v3, %s9323_s17  ;;  %v1034_v3 = vld [vmem:[#allocation2 + $0x80] sm:$0xff]  ;;  %2705 = vst.msk [vmem:[#allocation3 + $0x150] sm:$0xff] %vm2309_vm3, %v13111_v0 }
  0x6c   : > { %2165 = vrot.lane.b32.xlu0 %v9561_v24, %s9327_s21  ;;  %v1066_v7 = vpack.c.bf16 %v1034_v3, %v1034_v3  ;;  %v674_v3 = vpack.c.bf16 %v642_v63, %v642_v63  ;;  %2706 = vst.msk [vmem:[#allocation3 + $0x158] sm:$0xff] %vm2309_vm3, %v13111_v0 }
  0x6d   : > { %2708 = vst.msk [vmem:[#allocation3 + $0x168] sm:$0xff] %vm2309_vm3, %v13111_v0 }
  0x6e   : > { %v1898_v12 = vunpack.c.l.b16 %v1066_v7  ;;  %v1166_v7 = vld [vmem:[#allocation2 + $0xb2] sm:$0xff]  ;;  %2709 = vst.msk [vmem:[#allocation3 + $0x170] sm:$0xff] %vm2309_vm3, %v13111_v0 }
  0x6f   : > { %v1198_v15 = vpack.c.bf16 %v1166_v7, %v1166_v7  ;;  %2711 = vst.msk [vmem:[#allocation3 + $0x180] sm:$0xff] %vm2309_vm3, %v13111_v0 }
  0x70   : > { %2712 = vst.msk [vmem:[#allocation3 + $0x188] sm:$0xff] %vm2309_vm3, %v13111_v0 }
  0x71   : > { %v2126_v20 = vunpack.c.l.b16 %v1198_v15  ;;  %2714 = vst.msk [vmem:[#allocation3 + $0x198] sm:$0xff] %vm2309_vm3, %v13111_v0 }
  0x72   : > { %2053 = vrot.lane.b32.xlu2 %v2036_v36, %s9324_s18  ;;  %2715 = vst.msk [vmem:[#allocation3 + $0x1a0] sm:$0xff] %vm2309_vm3, %v13111_v0 }
  0x73   : > { %1941 = vrot.lane.b32.xlu1 %v1924_v35, %s9325_s19  ;;  %6515 = vst.msk [vmem:[#allocation4] sm:$0xff] %vm2309_vm3, %v13111_v0 }
  0x74   : > { %1607 = vrot.lane.b32.xlu0 %v1924_v35, %s9323_s17  ;;  %6517 = vst.msk [vmem:[#allocation4 + $0x10] sm:$0xff] %vm2309_vm3, %v13111_v0 }
  0x75   : > { %6519 = vst.msk [vmem:[#allocation4 + $0x20] sm:$0xff] %vm2309_vm3, %v13111_v0 }
  0x76   : > { %6521 = vst.msk [vmem:[#allocation4 + $0x30] sm:$0xff] %vm2309_vm3, %v13111_v0 }
  0x77   : > { %6523 = vst.msk [vmem:[#allocation4 + $0x40] sm:$0xff] %vm2309_vm3, %v13111_v0 }
  0x78   : > { %6525 = vst.msk [vmem:[#allocation4 + $0x50] sm:$0xff] %vm2309_vm3, %v13111_v0 }
  0x79   : > { %6527 = vst.msk [vmem:[#allocation4 + $0x60] sm:$0xff] %vm2309_vm3, %v13111_v0 }
  0x7a   : > { %1495 = vrot.lane.b32.xlu2 %v2147_v11, %s9321_s28  ;;  %v1897_v11 = vunpack.c.l.b16 %v1065_v6  ;;  %v1165_v6 = vld [vmem:[#allocation2 + $0xaa] sm:$0xff]  ;;  %6529 = vst.msk [vmem:[#allocation4 + $0x70] sm:$0xff] %vm2309_vm3, %v13111_v0 }
  0x7b   : > { %1383 = vrot.lane.b32.xlu1 %v9548_v58, %s9320_s27  ;;  %v532_v58 = vmax.f32 %v451_v54, 0.0  ;;  %v1197_v14 = vpack.c.bf16 %v1165_v6, %v1165_v6  ;;  %6531 = vst.msk [vmem:[#allocation4 + $0x80] sm:$0xff] %vm2309_vm3, %v13111_v0 }
  0x7c   : > { %1943 = vrot.lane.b32.xlu0 %v1925_v41, %s9325_s19  ;;  %v1926_v17 = vpack.c.b16 %v1898_v12, %v1897_v11  ;;  %v1251_v11 = vunpack.c.l.b16 %v674_v3  ;;  %v1133_v12 = vpack.c.bf16 %v1101_v4, %v1101_v4  ;;  %6533 = vst.msk [vmem:[#allocation4 + $0x90] sm:$0xff] %vm2309_vm3, %v13111_v0 }
  0x7d   : > { %621 = vst.msk [vmem:[#allocation2 + $0x99] sm:$0xff] %vm553_vm0, %v532_v58  ;;  %v2125_v19 = vunpack.c.l.b16 %v1197_v14 }
  0x7e   : > { %2668 = vst.msk [vmem:[#allocation3 + $0x28] sm:$0x3] %vm2664_vm11, %v13111_v0 }
  0x7f   : > { %2665 = vst.msk [vmem:[#allocation3 + $0x10] sm:$0x3] %vm2664_vm11, %v13111_v0 }
  0x80   : > { %2671 = vst.msk [vmem:[#allocation3 + $0x40] sm:$0x3] %vm2664_vm11, %v13111_v0 }
  0x81   : > { %2674 = vst.msk [vmem:[#allocation3 + $0x58] sm:$0x3] %vm2664_vm11, %v13111_v0 }
  0x82   : > { %1831 = vrot.lane.b32.xlu2 %v9561_v24, %s9322_s16  ;;  %2677 = vst.msk [vmem:[#allocation3 + $0x70] sm:$0x3] %vm2664_vm11, %v13111_v0 }
  0x83   : > { %1719 = vrot.lane.b32.xlu1 %v2036_v36, %s9326_s20  ;;  %2680 = vst.msk [vmem:[#allocation3 + $0x88] sm:$0x3] %vm2664_vm11, %v13111_v0 }
  0x84   : > { %1385 = vrot.lane.b32.xlu0 %v2036_v36, %s9320_s27  ;;  %v1163_v22 = vld [vmem:[#allocation2 + $0x92] sm:$0xff]  ;;  %v1164_v23 = vld [vmem:[#allocation2 + $0x9a] sm:$0xff]  ;;  %2683 = vst.msk [vmem:[#allocation3 + $0xa0] sm:$0x3] %vm2664_vm11, %v13111_v0 }
  0x85   : > { %v1195_v27 = vpack.c.bf16 %v1163_v22, %v1163_v22  ;;  %v1196_v28 = vpack.c.bf16 %v1164_v23, %v1164_v23  ;;  %v1036_v32 = vld [vmem:[#allocation2 + $0x98] sm:$0xff]  ;;  %2686 = vst.msk [vmem:[#allocation3 + $0xb8] sm:$0x3] %vm2664_vm11, %v13111_v0 }
  0x86   : > { %v1100_v34 = vld [vmem:[#allocation2 + $0x99] sm:$0xff]  ;;  %v1068_v39 = vpack.c.bf16 %v1036_v32, %v1036_v32  ;;  %2689 = vst.msk [vmem:[#allocation3 + $0xd0] sm:$0x3] %vm2664_vm11, %v13111_v0 }
  0x87   : > { %v2123_v35 = vunpack.c.l.b16 %v1195_v27  ;;  %v2124_v36 = vunpack.c.l.b16 %v1196_v28  ;;  %2692 = vst.msk [vmem:[#allocation3 + $0xe8] sm:$0x3] %vm2664_vm11, %v13111_v0 }
  0x88   : > { %v1900_v45 = vunpack.c.l.b16 %v1068_v39  ;;  %2695 = vst.msk [vmem:[#allocation3 + $0x100] sm:$0x3] %vm2664_vm11, %v13111_v0 }
  0x89   : > { %v9618_v42 = vpack.c.b16 %v2124_v36, %v2123_v35  ;;  %v454_v35 = vld [vmem:[%s9510_s15 + $0x70] sm:$0xff]  ;;  %v455_v36 = vld [vmem:[%s9510_s15 + $0x78] sm:$0xff]  ;;  %2698 = vst.msk [vmem:[#allocation3 + $0x118] sm:$0x3] %vm2664_vm11, %v13111_v0 }
  0x8a   : > { %2167 = vrot.lane.b32.xlu2 %v2149_v62, %s9327_s21  ;;  %v1927_v52 = vpack.c.b16 %v1900_v45, %v1899_v43  ;;  %v457_v43 = vld [vmem:[%s9510_s15 + $0x88] sm:$0xff]  ;;  %2701 = vst.msk [vmem:[#allocation3 + $0x130] sm:$0x3] %vm2664_vm11, %v13111_v0 }
  0x8b   : > { %2055 = vrot.lane.b32.xlu1 %v2037_v61, %s9324_s18  ;;  %2704 = vst.msk [vmem:[#allocation3 + $0x148] sm:$0x3] %vm2664_vm11, %v13111_v0 }
  0x8c   : > { %1721 = vrot.lane.b32.xlu0 %v2037_v61, %s9326_s20  ;;  %2707 = vst.msk [vmem:[#allocation3 + $0x160] sm:$0x3] %vm2664_vm11, %v13111_v0 }
  0x8d   : > { %2710 = vst.msk [vmem:[#allocation3 + $0x178] sm:$0x3] %vm2664_vm11, %v13111_v0 }
  0x8e   : > { %v1380_v58 = vpop.permute.xlu0 %1379  ;;  %2713 = vst.msk [vmem:[#allocation3 + $0x190] sm:$0x3] %vm2664_vm11, %v13111_v0 }
  0x8f   : > { %2716 = vst.msk [vmem:[#allocation3 + $0x1a8] sm:$0x3] %vm2664_vm11, %v13111_v0 }
  0x90   : > { %6516 = vst.msk [vmem:[#allocation4 + $0x8] sm:$0x3] %vm2664_vm11, %v13111_v0 }
  0x91   : > { %6518 = vst.msk [vmem:[#allocation4 + $0x18] sm:$0x3] %vm2664_vm11, %v13111_v0 }
  0x92   : > { %1609 = vrot.lane.b32.xlu2 %v1925_v41, %s9323_s17  ;;  %v1132_v41 = vpack.c.bf16 %v1100_v34, %v1100_v34  ;;  %6520 = vst.msk [vmem:[#allocation4 + $0x28] sm:$0x3] %vm2664_vm11, %v13111_v0 }
  0x93   : > { %1497 = vrot.lane.b32.xlu1 %v9561_v24, %s9321_s28  ;;  %v480_v24 = vld [vmem:[%s13098_s1 + $0x20] sm:$0xf]  ;;  %6522 = vst.msk [vmem:[#allocation4 + $0x38] sm:$0x3] %vm2664_vm11, %v13111_v0 }
  0x94   : > { %2057 = vrot.lane.b32.xlu0 %v9590_v8, %s9324_s18  ;;  %v2494_v26 = vunpack.c.l.b16 %v480_v24  ;;  %v2012_v47 = vunpack.c.l.b16 %v1132_v41  ;;  %6524 = vst.msk [vmem:[#allocation4 + $0x48] sm:$0x3] %vm2664_vm11, %v13111_v0 }
  0x95   : > { %6526 = vst.msk [vmem:[#allocation4 + $0x58] sm:$0x3] %vm2664_vm11, %v13111_v0 }
  0x96   : > { %v2499_v29 = vpack.c.b16 %v2494_v26, %v2494_v26  ;;  %v9639_v54 = vpack.c.b16 %v2012_v47, %v2011_v46  ;;  %v1492_v10 = vpop.permute.xlu0 %1491  ;;  %v537_v46 = vmax.f32 %v456_v40, 0.0  ;;  %6528 = vst.msk [vmem:[#allocation4 + $0x68] sm:$0x3] %vm2664_vm11, %v13111_v0 }
  0x97   : > { %6530 = vst.msk [vmem:[#allocation4 + $0x78] sm:$0x3] %vm2664_vm11, %v13111_v0 }
  0x98   : > { %v2539_v31 = vsel %vm2537_vm2, %v2499_v29, 0  ;;  %626 = vst.msk [vmem:[#allocation2 + $0xd9] sm:$0xff] %vm553_vm0, %v537_v46 }
  0x99   : > { %2544 = vmatpush.bf16.msra.mxu0 %v2539_v31  ;;  %6532 = vst.msk [vmem:[#allocation4 + $0x88] sm:$0x3] %vm2664_vm11, %v13111_v0 }
  0x9a   : > { %1945 = vrot.lane.b32.xlu2 %v1926_v17, %s9325_s19  ;;  %6534 = vst.msk [vmem:[#allocation4 + $0x98] sm:$0x3] %vm2664_vm11, %v13111_v0 }
  0x9b   : > { %1833 = vrot.lane.b32.xlu1 %v2149_v62, %s9322_s16 }
  0x9c   : > { %1499 = vrot.lane.b32.xlu0 %v2149_v62, %s9321_s28  ;;  %v643_v62 = vld [vmem:[#allocation2 + $0x8] sm:$0xff] }
  0x9d   : > { %2545 = vmatpush.bf16.msra.mxu0 %v9200_v38  ;;  %v675_v2 = vpack.c.bf16 %v643_v62, %v643_v62 }
  0x9f   : > { %v1105_v46 = vld [vmem:[#allocation2 + $0xd9] sm:$0xff] }
  0xa1   : > { %2546 = vmatpush.bf16.msra.mxu0 %v9199_v44  ;;  %v536_v44 = vmax.f32 %v455_v36, 0.0 }
  0xa2   : > { %1387 = vrot.lane.b32.xlu2 %v2037_v61, %s9320_s27  ;;  %v1902_v61 = vunpack.c.l.b16 %v1070_v56  ;;  %v459_v56 = vld [vmem:[%s9510_s15 + $0x98] sm:$0xff] }
  0xa3   : > { %2169 = vrot.lane.b32.xlu1 %v9607_v25, %s9327_s21  ;;  %625 = vst.msk [vmem:[#allocation2 + $0xc9] sm:$0xff] %vm553_vm0, %v536_v44 }
  0xa4   : > { %1835 = vrot.lane.b32.xlu0 %v9607_v25, %s9322_s16  ;;  %v9670_v1 = vpack.c.b16 %v1902_v61, %v1901_v60  ;;  %v539_v60 = vmax.f32 %v458_v55, 0.0  ;;  %v540_v61 = vmax.f32 %v459_v56, 0.0  ;;  %v649_v55 = vld [vmem:[#allocation2 + $0x50] sm:$0xff] }
  0xa5   : > { %2547 = vmatpush.bf16.msra.mxu0 %v9198_v51 }
  0xa6   : > { %628 = vst.msk [vmem:[#allocation2 + $0xf1] sm:$0xff] %vm553_vm0, %v539_v60 }
  0xa7   : > { %629 = vst.msk [vmem:[#allocation2 + $0xf9] sm:$0xff] %vm553_vm0, %v540_v61 }
  0xa9   : > { %2548 = vmatpush.bf16.msra.mxu0 %v9197_v57 }
  0xaa   : > { %1723 = vrot.lane.b32.xlu2 %v9590_v8, %s9326_s20  ;;  %v1104_v62 = vld [vmem:[#allocation2 + $0xc9] sm:$0xff] }
  0xab   : > { %1611 = vrot.lane.b32.xlu1 %v1926_v17, %s9323_s17  ;;  %v2013_v17 = vunpack.c.l.b16 %v1133_v12  ;;  %v1136_v5 = vpack.c.bf16 %v1104_v62, %v1104_v62  ;;  %v1168_v7 = vld [vmem:[#allocation2 + $0xca] sm:$0xff]  ;;  %v681_v62 = vpack.c.bf16 %v649_v55, %v649_v55 }
  0xac   : > { %v9628_v48 = vpop.permute.xlu2 %1827  ;;  %2171 = vrot.lane.b32.xlu0 %v9618_v42, %s9327_s21  ;;  %v1200_v12 = vpack.c.bf16 %v1168_v7, %v1168_v7  ;;  %v463_v55 = vld [vmem:[%s9510_s15 + $0xb8] sm:$0xff] }
  0xad   : > { %v9717_v24 = vpack.c.b16 %v2014_v18, %v2013_v17  ;;  %v2016_v14 = vunpack.c.l.b16 %v1136_v5 }
  0xb2   : > { %2059 = vrot.lane.b32.xlu2 %v9639_v54, %s9324_s18 }
  0xb3   : > { %1947 = vrot.lane.b32.xlu1 %v1927_v52, %s9325_s19 }
  0xb4   : > { %v9659_v59 = vpop.permute.xlu2 %1939  ;;  %1613 = vrot.lane.b32.xlu0 %v1927_v52, %s9323_s17 }
  0xba   : > { %1501 = vrot.lane.b32.xlu2 %v9607_v25, %s9321_s28  ;;  %v9719_v25 = vpack.c.b16 %v2126_v20, %v2125_v19  ;;  %v2128_v20 = vunpack.c.l.b16 %v1200_v12  ;;  %v1258_v12 = vunpack.c.l.b16 %v681_v62 }
  0xbb   : > { %1389 = vrot.lane.b32.xlu1 %v9590_v8, %s9320_s27  ;;  %v1252_v8 = vunpack.c.l.b16 %v675_v2 }
  0xbc   : > { %v9684_v9 = vpop.permute.xlu2 %1381  ;;  %1949 = vrot.lane.b32.xlu0 %v9670_v1, %s9325_s19 }
  0xbd   : > { %v1283_v16 = vpack.c.b16 %v1252_v8, %v1251_v11  ;;  %v2200_v47 = vsel %vm553_vm0, %v9542_v53, %v9684_v9 }
  0xbf   : > { %v2197_v23 = vsel %vm553_vm0, %v1283_v16, %v1380_v58 }
  0xc0   : > { %v2245_v27 = vsel %vm2243_vm4, %v2197_v23, %v1492_v10 }
  0xc2   : > { %1837 = vrot.lane.b32.xlu2 %v9618_v42, %s9322_s16 }
  0xc3   : > { %1725 = vrot.lane.b32.xlu1 %v9639_v54, %s9326_s20 }
  0xc4   : > { %v9708_v22 = vpop.permute.xlu2 %1717  ;;  %1391 = vrot.lane.b32.xlu0 %v9639_v54, %s9320_s27  ;;  %v646_v54 = vld [vmem:[#allocation2 + $0x30] sm:$0xff] }
  0xc5   : > { %v1604_v21 = vpop.permute.xlu1 %1603  ;;  %v678_v10 = vpack.c.bf16 %v646_v54, %v646_v54 }
  0xc6   : > { %v2052_v26 = vpop.permute.xlu0 %2051  ;;  %v2278_v28 = vsel %vm2276_vm5, %v2245_v27, %v1604_v21 }
  0xca   : > { %2173 = vrot.lane.b32.xlu2 %v9719_v25, %s9327_s21 }
  0xcb   : > { %2061 = vrot.lane.b32.xlu1 %v9717_v24, %s9324_s18 }
  0xcc   : > { %v9741_v30 = vpop.permute.xlu2 %2053  ;;  %1727 = vrot.lane.b32.xlu0 %v9717_v24, %s9326_s20 }
  0xcd   : > { %v1716_v29 = vpop.permute.xlu1 %1715 }
  0xce   : > { %v2311_v31 = vsel %vm2309_vm3, %v2278_v28, %v1716_v29  ;;  %v1494_v33 = vpop.permute.xlu0 %1493 }
  0xcf   : > { %v2344_v32 = vsel %vm2342_vm6, %v2311_v31, %v9628_v48  ;;  %v538_v48 = vmax.f32 %v457_v43, 0.0  ;;  %v2247_v49 = vsel %vm2243_vm4, %v2200_v47, %v1494_v33  ;;  %v1255_v31 = vunpack.c.l.b16 %v678_v10  ;;  %v1041_v33 = vld [vmem:[#allocation2 + $0xd8] sm:$0xff] }
  0xd0   : > { %v2377_v34 = vsel %vm2375_vm7, %v2344_v32, %v9659_v59  ;;  %v647_v59 = vld [vmem:[#allocation2 + $0x38] sm:$0xff] }
  0xd1   : > { %v2410_v39 = vsel %vm2408_vm8, %v2377_v34, %v2052_v26  ;;  %627 = vst.msk [vmem:[#allocation2 + $0xe1] sm:$0xff] %vm553_vm0, %v538_v48  ;;  %v679_v13 = vpack.c.bf16 %v647_v59, %v647_v59 }
  0xd2   : > { %1615 = vrot.lane.b32.xlu2 %v9670_v1, %s9323_s17 }
  0xd3   : > { %1503 = vrot.lane.b32.xlu1 %v9618_v42, %s9321_s28  ;;  %v535_v42 = vmax.f32 %v454_v35, 0.0  ;;  %v1256_v32 = vunpack.c.l.b16 %v679_v13 }
  0xd4   : > { %v9772_v38 = vpop.permute.xlu2 %1495 }
  0xd5   : > { %v2164_v37 = vpop.permute.xlu1 %2163  ;;  %624 = vst.msk [vmem:[#allocation2 + $0xc1] sm:$0xff] %vm553_vm0, %v535_v42 }
  0xd6   : > { %v2443_v41 = vsel %vm2441_vm9, %v2410_v39, %v2164_v37  ;;  %v1830_v45 = vpop.permute.xlu0 %1829  ;;  %v1073_v37 = vpack.c.bf16 %v1041_v33, %v1041_v33 }
  0xd7   : > { %8845 = vmatmul.msk.bf16.vlgmr.msra.gmra.mxu0 %vm2504_vm10, %v2443_v41 }
  0xd8   : > { %v1042_v34 = vld [vmem:[#allocation2 + $0xe0] sm:$0xff]  ;;  %v1905_v44 = vunpack.c.l.b16 %v1073_v37 }
  0xd9   : > { %v1074_v39 = vpack.c.bf16 %v1042_v34, %v1042_v34  ;;  %v1169_v42 = vld [vmem:[#allocation2 + $0xda] sm:$0xff]  ;;  %v1170_v43 = vld [vmem:[#allocation2 + $0xe2] sm:$0xff] }
  0xda   : > { %v1106_v47 = vld [vmem:[#allocation2 + $0xe1] sm:$0xff] }
  0xdb   : > { %1839 = vrot.lane.b32.xlu1 %v9719_v25, %s9322_s16  ;;  %v651_v34 = vld [vmem:[#allocation2 + $0x68] sm:$0xff] }
  0xdc   : > { %v9796_v51 = vpop.permute.xlu2 %1831  ;;  %v1103_v57 = vld [vmem:[#allocation2 + $0xc1] sm:$0xff] }
  0xdd   : > { %v1606_v50 = vpop.permute.xlu1 %1605  ;;  %v1039_v58 = vld [vmem:[#allocation2 + $0xc0] sm:$0xff]  ;;  %v1135_v63 = vpack.c.bf16 %v1103_v57, %v1103_v57  ;;  %v1040_v1 = vld [vmem:[#allocation2 + $0xc8] sm:$0xff] }
  0xde   : > { %v2280_v53 = vsel %vm2276_vm5, %v2247_v49, %v1606_v50  ;;  %v2166_v52 = vpop.permute.xlu0 %2165  ;;  %v1071_v2 = vpack.c.bf16 %v1039_v58, %v1039_v58  ;;  %v1167_v4 = vld [vmem:[#allocation2 + $0xc2] sm:$0xff]  ;;  %v1072_v6 = vpack.c.bf16 %v1040_v1, %v1040_v1  ;;  %v1201_v49 = vpack.c.bf16 %v1169_v42, %v1169_v42  ;;  %v1172_v42 = vld [vmem:[#allocation2 + $0xfa] sm:$0xff] }
  0xdf   : > { %v2313_v3 = vsel %vm2309_vm3, %v2280_v53, %v9708_v22  ;;  %v1199_v9 = vpack.c.bf16 %v1167_v4, %v1167_v4  ;;  %v2015_v8 = vunpack.c.l.b16 %v1135_v63  ;;  %v1202_v50 = vpack.c.bf16 %v1170_v43, %v1170_v43  ;;  %v460_v63 = vld [vmem:[%s9510_s15 + $0xa0] sm:$0xff]  ;;  %v461_v1 = vld [vmem:[%s9510_s15 + $0xa8] sm:$0xff] }
  0xe0   : > { %v1903_v11 = vunpack.c.l.b16 %v1071_v2  ;;  %v1904_v15 = vunpack.c.l.b16 %v1072_v6  ;;  %v2346_v16 = vsel %vm2342_vm6, %v2313_v3, %v1830_v45  ;;  %v1906_v45 = vunpack.c.l.b16 %v1074_v39 }
  0xe1   : > { %v2127_v17 = vunpack.c.l.b16 %v1199_v9  ;;  %v9810_v22 = vpack.c.b16 %v2016_v14, %v2015_v8  ;;  %v1137_v53 = vpack.c.bf16 %v1105_v46, %v1105_v46  ;;  %v2129_v60 = vunpack.c.l.b16 %v1201_v49 }
  0xe2   : > { %v1929_v23 = vpack.c.b16 %v1904_v15, %v1903_v11  ;;  %v1930_v57 = vpack.c.b16 %v1906_v45, %v1905_v44  ;;  %v2130_v61 = vunpack.c.l.b16 %v1202_v50  ;;  %v541_v4 = vmax.f32 %v460_v63, 0.0 }
  0xe3   : > { %v9814_v28 = vpack.c.b16 %v2128_v20, %v2127_v17  ;;  %2063 = vrot.lane.b32.xlu0 %v9810_v22, %s9324_s18  ;;  %v2017_v2 = vunpack.c.l.b16 %v1137_v53  ;;  %v542_v5 = vmax.f32 %v461_v1, 0.0  ;;  %v1043_v17 = vld [vmem:[#allocation2 + $0xf0] sm:$0xff]  ;;  %v683_v45 = vpack.c.bf16 %v651_v34, %v651_v34 }
  0xe4   : > { %v9807_v19 = vpop.permute.xlu2 %2167  ;;  %1951 = vrot.lane.b32.xlu2 %v1929_v23, %s9325_s19  ;;  %630 = vst.msk [vmem:[#allocation2 + $0x109] sm:$0xff] %vm553_vm0, %v541_v4  ;;  %v9847_v7 = vpack.c.b16 %v2130_v61, %v2129_v60  ;;  %v1107_v20 = vld [vmem:[#allocation2 + $0xf1] sm:$0xff] }
  0xe5   : > { %v1942_v18 = vpop.permute.xlu1 %1941  ;;  %2175 = vrot.lane.b32.xlu1 %v9814_v28, %s9327_s21  ;;  %631 = vst.msk [vmem:[#allocation2 + $0x111] sm:$0xff] %vm553_vm0, %v542_v5 }
  0xe6   : > { %v2379_v21 = vsel %vm2375_vm7, %v2346_v16, %v1942_v18  ;;  %v1608_v27 = vpop.permute.xlu0 %1607  ;;  %v1044_v18 = vld [vmem:[#allocation2 + $0xf8] sm:$0xff] }
  0xe7   : > { %v2412_v26 = vsel %vm2408_vm8, %v2379_v21, %v9741_v30  ;;  %v1285_v30 = vpack.c.b16 %v1256_v32, %v1255_v31  ;;  %v1108_v21 = vld [vmem:[#allocation2 + $0xf9] sm:$0xff] }
  0xe8   : > { %v2445_v29 = vsel %vm2441_vm9, %v2412_v26, %v2166_v52  ;;  %v1076_v26 = vpack.c.bf16 %v1044_v18, %v1044_v18  ;;  %v1140_v31 = vpack.c.bf16 %v1108_v21, %v1108_v21 }
  0xe9   : > { %8846 = vmatmul.msk.bf16.gmra.mxu0 %vm2504_vm10, %v2445_v29  ;;  %v1139_v29 = vpack.c.bf16 %v1107_v20, %v1107_v20 }
  0xeb   : > { %1505 = vrot.lane.b32.xlu0 %v9719_v25, %s9321_s28  ;;  %v1138_v25 = vpack.c.bf16 %v1106_v47, %v1106_v47  ;;  %v2019_v39 = vunpack.c.l.b16 %v1139_v29  ;;  %v1204_v47 = vpack.c.bf16 %v1172_v42, %v1172_v42  ;;  %v1045_v4 = vld [vmem:[#allocation2 + $0x108] sm:$0xff]  ;;  %v652_v29 = vld [vmem:[#allocation2 + $0x78] sm:$0xff] }
  0xec   : > { %v9823_v36 = vpop.permute.xlu2 %1609  ;;  %1393 = vrot.lane.b32.xlu2 %v9717_v24, %s9320_s27  ;;  %v648_v24 = vld [vmem:[#allocation2 + $0x48] sm:$0xff]  ;;  %v1110_v5 = vld [vmem:[#allocation2 + $0x111] sm:$0xff] }
  0xed   : > { %v1384_v35 = vpop.permute.xlu1 %1383  ;;  %1617 = vrot.lane.b32.xlu1 %v1929_v23, %s9323_s17  ;;  %v2018_v3 = vunpack.c.l.b16 %v1138_v25 }
  0xee   : > { %v1944_v40 = vpop.permute.xlu0 %1943  ;;  %v2203_v41 = vsel %vm553_vm0, %v1285_v30, %v1384_v35  ;;  %v1908_v35 = vunpack.c.l.b16 %v1076_v26 }
  0xef   : > { %v2249_v48 = vsel %vm2243_vm4, %v2203_v41, %v9772_v38  ;;  %v680_v38 = vpack.c.bf16 %v648_v24, %v648_v24  ;;  %v9850_v9 = vpack.c.b16 %v2018_v3, %v2017_v2  ;;  %v1171_v41 = vld [vmem:[#allocation2 + $0xf2] sm:$0xff]  ;;  %v462_v24 = vld [vmem:[%s9510_s15 + $0xb0] sm:$0xff] }
  0xf0   : > { %v2282_v56 = vsel %vm2276_vm5, %v2249_v48, %v1608_v27  ;;  %v1203_v46 = vpack.c.bf16 %v1171_v41, %v1171_v41 }
  0xf1   : > { %v1257_v11 = vunpack.c.l.b16 %v680_v38 }
  0xf3   : > { %1841 = vrot.lane.b32.xlu0 %v9814_v28, %s9322_s16  ;;  %v1286_v16 = vpack.c.b16 %v1258_v12, %v1257_v11  ;;  %v1174_v11 = vld [vmem:[#allocation2 + $0x112] sm:$0xff] }
  0xf4   : > { %v9833_v54 = vpop.permute.xlu2 %1945  ;;  %1729 = vrot.lane.b32.xlu2 %v9810_v22, %s9326_s20  ;;  %v1206_v18 = vpack.c.bf16 %v1174_v11, %v1174_v11 }
  0xf5   : > { %v1720_v52 = vpop.permute.xlu1 %1719  ;;  %1953 = vrot.lane.b32.xlu1 %v1930_v57, %s9325_s19 }
  0xf6   : > { %v2315_v58 = vsel %vm2309_vm3, %v2282_v56, %v1720_v52  ;;  %v1386_v59 = vpop.permute.xlu0 %1385  ;;  %v1260_v52 = vunpack.c.l.b16 %v683_v45  ;;  %v2132_v56 = vunpack.c.l.b16 %v1204_v47 }
  0xf7   : > { %v2348_v6 = vsel %vm2342_vm6, %v2315_v58, %v9796_v51  ;;  %v2206_v23 = vsel %vm553_vm0, %v1286_v16, %v1386_v59  ;;  %v543_v58 = vmax.f32 %v462_v24, 0.0  ;;  %v544_v59 = vmax.f32 %v463_v55, 0.0 }
  0xf8   : > { %v2381_v10 = vsel %vm2375_vm7, %v2348_v6, %v1944_v40  ;;  %v2020_v40 = vunpack.c.l.b16 %v1140_v31  ;;  %v1046_v6 = vld [vmem:[#allocation2 + $0x110] sm:$0xff]  ;;  %v653_v31 = vld [vmem:[#allocation2 + $0x80] sm:$0xff] }
  0xf9   : > { %632 = vst.msk [vmem:[#allocation2 + $0x121] sm:$0xff] %vm553_vm0, %v543_v58 }
  0xfa   : > { %v9877_v50 = vpack.c.b16 %v2020_v40, %v2019_v39  ;;  %633 = vst.msk [vmem:[#allocation2 + $0x129] sm:$0xff] %vm553_vm0, %v544_v59  ;;  %v685_v39 = vpack.c.bf16 %v653_v31, %v653_v31 }
  0xfb   : > { %2177 = vrot.lane.b32.xlu0 %v9847_v7, %s9327_s21 }
  0xfc   : > { %v9853_v13 = vpop.permute.xlu2 %1387  ;;  %2065 = vrot.lane.b32.xlu2 %v9850_v9, %s9324_s18 }
  0xfd   : > { %v2056_v8 = vpop.permute.xlu1 %2055  ;;  %1395 = vrot.lane.b32.xlu1 %v9810_v22, %s9320_s27  ;;  %v650_v22 = vld [vmem:[#allocation2 + $0x60] sm:$0xff] }
  0xfe   : > { %v2414_v14 = vsel %vm2408_vm8, %v2381_v10, %v2056_v8  ;;  %v1722_v15 = vpop.permute.xlu0 %1721  ;;  %v682_v44 = vpack.c.bf16 %v650_v22, %v650_v22  ;;  %v1173_v8 = vld [vmem:[#allocation2 + $0x10a] sm:$0xff] }
  0xff   : > { %v2447_v51 = vsel %vm2441_vm9, %v2414_v14, %v9807_v19  ;;  %v1075_v19 = vpack.c.bf16 %v1043_v17, %v1043_v17  ;;  %v1142_v14 = vpack.c.bf16 %v1110_v5, %v1110_v5  ;;  %v1205_v17 = vpack.c.bf16 %v1173_v8, %v1173_v8 }
 0x100   : > { %8847 = vmatmul.msk.bf16.gmra.mxu0 %vm2504_vm10, %v2447_v51  ;;  %v1259_v25 = vunpack.c.l.b16 %v682_v44  ;;  %v1078_v51 = vpack.c.bf16 %v1046_v6, %v1046_v6  ;;  %v1111_v59 = vld [vmem:[#allocation2 + $0x121] sm:$0xff] }
 0x101   : > { %v1907_v30 = vunpack.c.l.b16 %v1075_v19  ;;  %v465_v19 = vld [vmem:[%s9510_s15 + $0xc8] sm:$0xff]  ;;  %v2022_v26 = vunpack.c.l.b16 %v1142_v14 }
 0x102   : > { %v1287_v38 = vpack.c.b16 %v1260_v52, %v1259_v25  ;;  %v546_v22 = vmax.f32 %v465_v19, 0.0  ;;  %v1048_v25 = vld [vmem:[#allocation2 + $0x128] sm:$0xff]  ;;  %v654_v19 = vld [vmem:[#allocation2 + $0x90] sm:$0xff] }
 0x103   : > { %1619 = vrot.lane.b32.xlu0 %v1930_v57, %s9323_s17  ;;  %v1175_v58 = vld [vmem:[#allocation2 + $0x122] sm:$0xff]  ;;  %v686_v31 = vpack.c.bf16 %v654_v19, %v654_v19 }
 0x104   : > { %v9866_v32 = vpop.permute.xlu2 %1723  ;;  %1507 = vrot.lane.b32.xlu2 %v9814_v28, %s9321_s28  ;;  %v1931_v28 = vpack.c.b16 %v1908_v35, %v1907_v30  ;;  %v2209_v3 = vsel %vm553_vm0, %v1287_v38, %v9853_v13  ;;  %v2133_v30 = vunpack.c.l.b16 %v1205_v17  ;;  %v2134_v35 = vunpack.c.l.b16 %v1206_v18  ;;  %635 = vst.msk [vmem:[#allocation2 + $0x141] sm:$0xff] %vm553_vm0, %v546_v22 }
 0x105   : > { %v1498_v27 = vpop.permute.xlu1 %1497  ;;  %1731 = vrot.lane.b32.xlu1 %v9850_v9, %s9326_s20 }
 0x106   : > { %v2251_v33 = vsel %vm2243_vm4, %v2206_v23, %v1498_v27  ;;  %v2058_v37 = vpop.permute.xlu0 %2057  ;;  %v464_v23 = vld [vmem:[%s9510_s15 + $0xc0] sm:$0xff]  ;;  %v1910_v27 = vunpack.c.l.b16 %v1078_v51  ;;  %v9924_v45 = vpack.c.b16 %v2134_v35, %v2133_v30 }
 0x107   : > { %v2284_v43 = vsel %vm2276_vm5, %v2251_v33, %v9823_v36  ;;  %v2131_v36 = vunpack.c.l.b16 %v1203_v46  ;;  %v545_v33 = vmax.f32 %v464_v23, 0.0 }
 0x108   : > { %v2317_v49 = vsel %vm2309_vm3, %v2284_v43, %v1722_v15 }
 0x109   : > { %v9893_v62 = vpack.c.b16 %v2132_v56, %v2131_v36  ;;  %634 = vst.msk [vmem:[#allocation2 + $0x139] sm:$0xff] %vm553_vm0, %v545_v33  ;;  %v1080_v36 = vpack.c.bf16 %v1048_v25, %v1048_v25 }
 0x10b   : > { %1955 = vrot.lane.b32.xlu0 %v1931_v28, %s9325_s19  ;;  %v1912_v38 = vunpack.c.l.b16 %v1080_v36 }
 0x10c   : > { %1843 = vrot.lane.b32.xlu2 %v9847_v7, %s9322_s16  ;;  %v9885_v57 = vpop.permute.xlu2 %2059 }
 0x10d   : > { %v1834_v48 = vpop.permute.xlu1 %1833  ;;  %2067 = vrot.lane.b32.xlu1 %v9877_v50, %s9324_s18 }
 0x10e   : > { %v2350_v53 = vsel %vm2342_vm6, %v2317_v49, %v1834_v48  ;;  %v1500_v61 = vpop.permute.xlu0 %1499  ;;  %v1262_v49 = vunpack.c.l.b16 %v685_v39  ;;  %v1263_v39 = vunpack.c.l.b16 %v686_v31 }
 0x10f   : > { %v2383_v60 = vsel %vm2375_vm7, %v2350_v53, %v9833_v54  ;;  %v1109_v54 = vld [vmem:[#allocation2 + $0x109] sm:$0xff]  ;;  %v2253_v12 = vsel %vm2243_vm4, %v2209_v3, %v1500_v61  ;;  %v1047_v53 = vld [vmem:[#allocation2 + $0x120] sm:$0xff]  ;;  %v1207_v3 = vpack.c.bf16 %v1175_v58, %v1175_v58 }
 0x110   : > { %v2416_v63 = vsel %vm2408_vm8, %v2383_v60, %v2058_v37  ;;  %v1141_v13 = vpack.c.bf16 %v1109_v54, %v1109_v54  ;;  %v684_v37 = vpack.c.bf16 %v652_v29, %v652_v29  ;;  %v1079_v55 = vpack.c.bf16 %v1047_v53, %v1047_v53  ;;  %v1049_v22 = vld [vmem:[#allocation2 + $0x138] sm:$0xff] }
 0x111   : > { %v1143_v54 = vpack.c.bf16 %v1111_v59, %v1111_v59  ;;  %v2135_v11 = vunpack.c.l.b16 %v1207_v3  ;;  %v1113_v35 = vld [vmem:[#allocation2 + $0x139] sm:$0xff]  ;;  %v656_v59 = vld [vmem:[#allocation2 + $0xa8] sm:$0xff] }
 0x112   : > { %v2021_v20 = vunpack.c.l.b16 %v1141_v13  ;;  %v1261_v48 = vunpack.c.l.b16 %v684_v37  ;;  %v1911_v61 = vunpack.c.l.b16 %v1079_v55  ;;  %v466_v13 = vld [vmem:[%s9510_s15 + $0xd0] sm:$0xff]  ;;  %v1177_v25 = vld [vmem:[#allocation2 + $0x13a] sm:$0xff] }
 0x113   : > { %1397 = vrot.lane.b32.xlu0 %v9850_v9, %s9320_s27  ;;  %v1077_v9 = vpack.c.bf16 %v1045_v4, %v1045_v4  ;;  %v1114_v37 = vld [vmem:[#allocation2 + $0x141] sm:$0xff]  ;;  %v1209_v36 = vpack.c.bf16 %v1177_v25, %v1177_v25 }
 0x114   : > { %2179 = vrot.lane.b32.xlu2 %v9893_v62, %s9327_s21  ;;  %v9906_v10 = vpop.permute.xlu2 %1501  ;;  %v9921_v40 = vpack.c.b16 %v2022_v26, %v2021_v20  ;;  %v1288_v52 = vpack.c.b16 %v1262_v49, %v1261_v48  ;;  %v1933_v6 = vpack.c.b16 %v1912_v38, %v1911_v61  ;;  %v655_v26 = vld [vmem:[#allocation2 + $0x98] sm:$0xff] }
 0x115   : > { %v2170_v1 = vpop.permute.xlu1 %2169  ;;  %1509 = vrot.lane.b32.xlu1 %v9847_v7, %s9321_s28  ;;  %v1909_v21 = vunpack.c.l.b16 %v1077_v9  ;;  %v467_v9 = vld [vmem:[%s9510_s15 + $0xd8] sm:$0xff]  ;;  %v687_v33 = vpack.c.bf16 %v655_v26, %v655_v26  ;;  %v2137_v38 = vunpack.c.l.b16 %v1209_v36 }
 0x116   : > { %v2449_v2 = vsel %vm2441_vm9, %v2416_v63, %v2170_v1  ;;  %v1836_v16 = vpop.permute.xlu0 %1835  ;;  %v1176_v63 = vld [vmem:[#allocation2 + $0x12a] sm:$0xff] }
 0x117   : > { %8848 = vmatmul.msk.bf16.gmra.mxu0 %vm2504_vm10, %v2449_v2  ;;  %v1932_v41 = vpack.c.b16 %v1910_v27, %v1909_v21  ;;  %v1112_v1 = vld [vmem:[#allocation2 + $0x129] sm:$0xff] }
 0x118   : > { %v1144_v4 = vpack.c.bf16 %v1112_v1, %v1112_v1  ;;  %v10008_v1 = vld [vmem:[%s13099_s2] ss:$0 sm:$0xff] }
 0x11a   : > { %v2024_v51 = vunpack.c.l.b16 %v1144_v4 }
 0x11b   : > { %1733 = vrot.lane.b32.xlu0 %v9877_v50, %s9326_s20 }
 0x11c   : > { %1621 = vrot.lane.b32.xlu2 %v1931_v28, %s9323_s17  ;;  %v1838_v43 = vpop.permute.xlu2 %1837 }
 0x11d   : > { %v1612_v15 = vpop.permute.xlu1 %1611  ;;  %1845 = vrot.lane.b32.xlu1 %v9893_v62, %s9322_s16 }
 0x11e   : > { %v2286_v7 = vsel %vm2276_vm5, %v2253_v12, %v1612_v15  ;;  %v2023_v12 = vunpack.c.l.b16 %v1143_v54  ;;  %v547_v15 = vmax.f32 %v466_v13, 0.0 }
 0x11f   : > { %v2319_v34 = vsel %vm2309_vm3, %v2286_v7, %v9866_v32  ;;  %v2172_v32 = vpop.permute.xlu0 %2171 }
 0x120   : > { %v2352_v42 = vsel %vm2342_vm6, %v2319_v34, %v1836_v16  ;;  %v548_v16 = vmax.f32 %v467_v9, 0.0  ;;  %636 = vst.msk [vmem:[#allocation2 + $0x151] sm:$0xff] %vm553_vm0, %v547_v15  ;;  %v9960_v20 = vpack.c.b16 %v2024_v51, %v2023_v12  ;;  %v1050_v34 = vld [vmem:[#allocation2 + $0x140] sm:$0xff] }
 0x122   : > { %637 = vst.msk [vmem:[#allocation2 + $0x159] sm:$0xff] %vm553_vm0, %v548_v16 }
 0x123   : > { %2069 = vrot.lane.b32.xlu0 %v9921_v40, %s9324_s18 }
 0x124   : > { %1957 = vrot.lane.b32.xlu2 %v1932_v41, %s9325_s19  ;;  %v2174_v56 = vpop.permute.xlu2 %2173 }
 0x125   : > { %v1948_v44 = vpop.permute.xlu1 %1947  ;;  %2181 = vrot.lane.b32.xlu1 %v9924_v45, %s9327_s21 }
 0x126   : > { %v2385_v28 = vsel %vm2375_vm7, %v2352_v42, %v1948_v44  ;;  %v1081_v42 = vpack.c.bf16 %v1049_v22, %v1049_v22  ;;  %v1145_v44 = vpack.c.bf16 %v1113_v35, %v1113_v35 }
 0x127   : > { %v2418_v46 = vsel %vm2408_vm8, %v2385_v28, %v9885_v57  ;;  %v1614_v60 = vpop.permute.xlu0 %1613  ;;  %v1146_v28 = vpack.c.bf16 %v1114_v37, %v1114_v37  ;;  %v1051_v51 = vld [vmem:[#allocation2 + $0x150] sm:$0xff] }
 0x128   : > { %v2451_v47 = vsel %vm2441_vm9, %v2418_v46, %v2172_v32  ;;  %v2025_v49 = vunpack.c.l.b16 %v1145_v44 }
 0x129   : > { %8849 = vmatmul.msk.bf16.gmra.mxu0 %vm2504_vm10, %v2451_v47  ;;  %v2026_v53 = vunpack.c.l.b16 %v1146_v28  ;;  %v1116_v15 = vld [vmem:[#allocation2 + $0x159] sm:$0xff] }
 0x12a   : > { %v1052_v16 = vld [vmem:[#allocation2 + $0x158] sm:$0xff] }
 0x12b   : > { %1511 = vrot.lane.b32.xlu0 %v9893_v62, %s9321_s28  ;;  %v1208_v62 = vpack.c.bf16 %v1176_v63, %v1176_v63  ;;  %v1084_v22 = vpack.c.bf16 %v1052_v16, %v1052_v16  ;;  %v468_v28 = vld [vmem:[%s9510_s15 + $0xe0] sm:$0xff] }
 0x12c   : > { %1399 = vrot.lane.b32.xlu2 %v9877_v50, %s9320_s27  ;;  %v549_v25 = vmax.f32 %v468_v28, 0.0 }
 0x12d   : > { %v1390_v24 = vpop.permute.xlu1 %1389  ;;  %1623 = vrot.lane.b32.xlu1 %v1932_v41, %s9323_s17  ;;  %v2136_v14 = vunpack.c.l.b16 %v1208_v62  ;;  %v1264_v41 = vunpack.c.l.b16 %v687_v33  ;;  %v688_v62 = vpack.c.bf16 %v656_v59, %v656_v59  ;;  %v1148_v33 = vpack.c.bf16 %v1116_v15, %v1116_v15 }
 0x12e   : > { %v2212_v57 = vsel %vm553_vm0, %v1288_v52, %v1390_v24  ;;  %v1178_v52 = vld [vmem:[#allocation2 + $0x142] sm:$0xff]  ;;  %v1916_v44 = vunpack.c.l.b16 %v1084_v22  ;;  %638 = vst.msk [vmem:[#allocation2 + $0x169] sm:$0xff] %vm553_vm0, %v549_v25 }
 0x12f   : > { %v2255_v2 = vsel %vm2243_vm4, %v2212_v57, %v9906_v10  ;;  %v9952_v10 = vpop.permute.xlu2 %1615  ;;  %v1950_v18 = vpop.permute.xlu0 %1949  ;;  %v9958_v7 = vpack.c.b16 %v2136_v14, %v2135_v11  ;;  %v1289_v46 = vpack.c.b16 %v1264_v41, %v1263_v39  ;;  %v9992_v57 = vpack.c.b16 %v2026_v53, %v2025_v49  ;;  %v1115_v14 = vld [vmem:[#allocation2 + $0x151] sm:$0xff] }
 0x130   : > { %v2288_v50 = vsel %vm2276_vm5, %v2255_v2, %v1614_v60  ;;  %v657_v60 = vld [vmem:[#allocation2 + $0xb0] sm:$0xff]  ;;  %v1265_v13 = vunpack.c.l.b16 %v688_v62 }
 0x131   : > { %v689_v4 = vpack.c.bf16 %v657_v60, %v657_v60  ;;  %v658_v60 = vld [vmem:[#allocation2 + $0xc0] sm:$0xff] }
 0x133   : > { %1847 = vrot.lane.b32.xlu0 %v9924_v45, %s9322_s16  ;;  %v1266_v9 = vunpack.c.l.b16 %v689_v4  ;;  %v690_v4 = vpack.c.bf16 %v658_v60, %v658_v60 }
 0x134   : > { %1735 = vrot.lane.b32.xlu2 %v9921_v40, %s9326_s20 }
 0x135   : > { %v1726_v5 = vpop.permute.xlu1 %1725  ;;  %1959 = vrot.lane.b32.xlu1 %v1933_v6, %s9325_s19 }
 0x136   : > { %v2321_v8 = vsel %vm2309_vm3, %v2288_v50, %v1726_v5 }
 0x137   : > { %v2354_v17 = vsel %vm2342_vm6, %v2321_v8, %v1838_v43  ;;  %v1082_v43 = vpack.c.bf16 %v1050_v34, %v1050_v34  ;;  %v1392_v32 = vpop.permute.xlu0 %1391 }
 0x138   : > { %v2387_v21 = vsel %vm2375_vm7, %v2354_v17, %v1950_v18 }
 0x139   : > { %v1914_v48 = vunpack.c.l.b16 %v1082_v43 }
 0x13b   : > { %2183 = vrot.lane.b32.xlu0 %v9958_v7, %s9327_s21 }
 0x13c   : > { %2071 = vrot.lane.b32.xlu2 %v9960_v20, %s9324_s18 }
 0x13d   : > { %v2062_v23 = vpop.permute.xlu1 %2061  ;;  %1401 = vrot.lane.b32.xlu1 %v9921_v40, %s9320_s27  ;;  %v1913_v40 = vunpack.c.l.b16 %v1081_v42  ;;  %v2028_v42 = vunpack.c.l.b16 %v1148_v33 }
 0x13e   : > { %v2420_v27 = vsel %vm2408_vm8, %v2387_v21, %v2062_v23  ;;  %v9972_v30 = vpop.permute.xlu2 %1951  ;;  %v1180_v21 = vld [vmem:[#allocation2 + $0x15a] sm:$0xff]  ;;  %v1290_v23 = vpack.c.b16 %v1266_v9, %v1265_v13  ;;  %v13120_v13 = vmov -inf  }
 0x13f   : > { %v2453_v29 = vsel %vm2441_vm9, %v2420_v27, %v2174_v56  ;;  %v9988_v55 = vpack.c.b16 %v1914_v48, %v1913_v40  ;;  %v1210_v56 = vpack.c.bf16 %v1178_v52, %v1178_v52  ;;  %v1728_v61 = vpop.permute.xlu0 %1727  ;;  %v1147_v27 = vpack.c.bf16 %v1115_v14, %v1115_v14  ;;  %v9218_v52 = vld [vmem:[%s13100_s3 + $0x88] sm:$0xff] }
 0x140   : > { %8850 = vmatmul.msk.bf16.gmra.mxu0 %vm2504_vm10, %v2453_v29  ;;  %v1083_v29 = vpack.c.bf16 %v1051_v51, %v1051_v51  ;;  %v1212_v35 = vpack.c.bf16 %v1180_v21, %v1180_v21  ;;  %4839 = vmatpush.bf16.msra.mxu3 %v9218_v52 }
 0x141   : > { %v2138_v63 = vunpack.c.l.b16 %v1210_v56  ;;  %v2027_v39 = vunpack.c.l.b16 %v1147_v27 }
 0x142   : > { %v1915_v43 = vunpack.c.l.b16 %v1083_v29 }
 0x143   : > { %1625 = vrot.lane.b32.xlu0 %v1933_v6, %s9323_s17  ;;  %v10025_v6 = vpack.c.b16 %v2138_v63, %v2137_v38 }
 0x144   : > { %1513 = vrot.lane.b32.xlu2 %v9924_v45, %s9321_s28  ;;  %v2215_v45 = vsel %vm553_vm0, %v1289_v46, %v1392_v32  ;;  %v2140_v46 = vunpack.c.l.b16 %v1212_v35 }
 0x145   : > { %v1504_v47 = vpop.permute.xlu1 %1503  ;;  %1737 = vrot.lane.b32.xlu1 %v9960_v20, %s9326_s20 }
 0x146   : > { %v9981_v24 = vpop.permute.xlu2 %1393  ;;  %v2257_v58 = vsel %vm2243_vm4, %v2215_v45, %v1504_v47  ;;  %v469_v47 = vld [vmem:[%s9510_s15 + $0xe8] sm:$0xff]  ;;  %v1935_v45 = vpack.c.b16 %v1916_v44, %v1915_v43  ;;  %v470_v44 = vld [vmem:[%s9510_s15 + $0xf0] sm:$0xff] }
 0x147   : > { %v2290_v2 = vsel %vm2276_vm5, %v2257_v58, %v9952_v10  ;;  %v2218_v41 = vsel %vm553_vm0, %v1290_v23, %v9981_v24  ;;  %v10089_v24 = vpack.c.b16 %v2028_v42, %v2027_v39  ;;  %v1053_v23 = vld [vmem:[#allocation2 + $0x168] sm:$0xff] }
 0x148   : > { %v2323_v50 = vsel %vm2309_vm3, %v2290_v2, %v1728_v61  ;;  %v659_v61 = vld [vmem:[#allocation2 + $0xc8] sm:$0xff]  ;;  %v9217_v2 = vld [vmem:[%s13100_s3 + $0x80] sm:$0xff] }
 0x149   : > { %4840 = vmatpush.bf16.msra.mxu3 %v9217_v2 }
 0x14b   : > { %1961 = vrot.lane.b32.xlu0 %v9988_v55, %s9325_s19 }
 0x14c   : > { %1849 = vrot.lane.b32.xlu2 %v9958_v7, %s9322_s16 }
 0x14d   : > { %2073 = vrot.lane.b32.xlu1 %v9992_v57, %s9324_s18  ;;  %v1840_v3 = vpop.permute.xlu1 %1839 }
 0x14e   : > { %v10018_v54 = vpop.permute.xlu2 %1729  ;;  %v2356_v11 = vsel %vm2342_vm6, %v2323_v50, %v1840_v3 }
 0x14f   : > { %v2389_v10 = vsel %vm2375_vm7, %v2356_v11, %v9972_v30 }
 0x153   : > { %1403 = vrot.lane.b32.xlu0 %v9960_v20, %s9320_s27  ;;  %v1179_v20 = vld [vmem:[#allocation2 + $0x152] sm:$0xff] }
 0x154   : > { %v2550_v5 = vpop.f32.mrf.mxu0  ;;  %2185 = vrot.lane.b32.xlu2 %v10025_v6, %s9327_s21  ;;  %v1211_v30 = vpack.c.bf16 %v1179_v20, %v1179_v20 }
 0x155   : > { %v2551_v8 = vadd.f32 %v10008_v1, %v2550_v5  ;;  %1515 = vrot.lane.b32.xlu1 %v9958_v7, %s9321_s28  ;;  %v2064_v17 = vpop.permute.xlu0 %2063  ;;  %v691_v5 = vpack.c.bf16 %v659_v61, %v659_v61  ;;  %v10168_v61 = vld [vmem:[#allocation3 + $0x1] sm:$0xff] }
 0x156   : > { %v10048_v18 = vpop.permute.xlu2 %2065  ;;  %v2422_v19 = vsel %vm2408_vm8, %v2389_v10, %v2064_v17  ;;  %v2139_v32 = vunpack.c.l.b16 %v1211_v30  ;;  %v1267_v17 = vunpack.c.l.b16 %v690_v4 }
 0x157   : > { %v2630_v12 = vmax.f32 %v2551_v8, 0.0  ;;  %v2176_v26 = vpop.permute.xlu1 %2175  ;;  %v10116_v8 = vld [vmem:[#allocation3 + $0xa] sm:$0xff]  ;;  %v1268_v20 = vunpack.c.l.b16 %v691_v5 }
 0x158   : > { %v2455_v31 = vsel %vm2441_vm9, %v2422_v19, %v2176_v26  ;;  %v10095_v36 = vpack.c.b16 %v2140_v46, %v2139_v32  ;;  %v471_v46 = vld [vmem:[%s9510_s15 + $0xf8] sm:$0xff]  ;;  %v2911_v5 = vpack.c.bf16 %v10116_v8, %v10116_v8 }
 0x159   : > { %2718 = vst.msk [vmem:[#allocation3 + $0x19] sm:$0xff] %vm2309_vm3, %v2630_v12  ;;  %8851 = vmatmul.msk.bf16.gmra.mxu0 %vm2504_vm10, %v2455_v31 }
 0x15b   : > { %1739 = vrot.lane.b32.xlu0 %v9992_v57, %s9326_s20 }
 0x15c   : > { %v2552_v7 = vpop.f32.mrf.mxu0  ;;  %1627 = vrot.lane.b32.xlu2 %v9988_v55, %s9323_s17  ;;  %v550_v55 = vmax.f32 %v469_v47, 0.0 }
 0x15d   : > { %v2553_v34 = vadd.f32 %v10008_v1, %v2552_v7  ;;  %1851 = vrot.lane.b32.xlu1 %v10025_v6, %s9322_s16  ;;  %v1506_v40 = vpop.permute.xlu0 %1505  ;;  %v1085_v7 = vpack.c.bf16 %v1053_v23, %v1053_v23 }
 0x15e   : > { %v10079_v48 = vpop.permute.xlu2 %1507  ;;  %v2259_v49 = vsel %vm2243_vm4, %v2218_v41, %v1506_v40  ;;  %639 = vst.msk [vmem:[#allocation2 + $0x171] sm:$0xff] %vm553_vm0, %v550_v55 }
 0x15f   : > { %v2631_v37 = vmax.f32 %v2553_v34, 0.0  ;;  %v1618_v53 = vpop.permute.xlu1 %1617  ;;  %v1917_v35 = vunpack.c.l.b16 %v1085_v7 }
 0x160   : > { %v2292_v56 = vsel %vm2276_vm5, %v2259_v49, %v1618_v53  ;;  %v10125_v9 = vld [vmem:[#allocation3 + $0x18] sm:$0xff]  ;;  %v551_v53 = vmax.f32 %v470_v44, 0.0 }
 0x161   : > { %2719 = vst.msk [vmem:[#allocation3 + $0x21] sm:$0xff] %vm2309_vm3, %v2631_v37  ;;  %v2325_v38 = vsel %vm2309_vm3, %v2292_v56, %v10018_v54  ;;  %v10118_v54 = vld [vmem:[#allocation3 + $0x9] sm:$0xff]  ;;  %v10132_v15 = vld [vmem:[#allocation3 + $0x19] sm:$0xff] }
 0x162   : > { %4924 = vst.msk [vmem:[#allocation3 + $0x10] sm:$0x3] %vm2664_vm11, %v13120_v13  ;;  %v10136_v16 = vld [vmem:[#allocation3 + $0x18] sm:$0xff]  ;;  %v2878_v56 = vld [vmem:[#allocation3 + $0x2] sm:$0xff] }
 0x163   : > { %2075 = vrot.lane.b32.xlu0 %v10089_v24, %s9324_s18  ;;  %v1117_v37 = vld [vmem:[#allocation2 + $0x169] sm:$0xff]  ;;  %v2784_v25 = vpack.c.bf16 %v10136_v16, %v10136_v16  ;;  %640 = vst.msk [vmem:[#allocation2 + $0x181] sm:$0xff] %vm553_vm0, %v551_v53  ;;  %v2910_v4 = vpack.c.bf16 %v2878_v56, %v2878_v56  ;;  %v3552_v56 = vunpack.c.l.b16 %v2911_v5 }
 0x164   : > { %1963 = vrot.lane.b32.xlu2 %v1935_v45, %s9325_s19  ;;  %v1149_v47 = vpack.c.bf16 %v1117_v37, %v1117_v37 }
 0x165   : > { %2187 = vrot.lane.b32.xlu1 %v10095_v36, %s9327_s21  ;;  %v1842_v3 = vpop.permute.xlu0 %1841  ;;  %v1054_v29 = vld [vmem:[#allocation2 + $0x170] sm:$0xff]  ;;  %v10194_v8 = vunpack.c.l.b16 %v2784_v25 }
 0x166   : > { %v2555_v58 = vpop.f32.mrf.mxu0  ;;  %v10113_v62 = vpop.permute.xlu2 %1843  ;;  %v2358_v11 = vsel %vm2342_vm6, %v2325_v38, %v1842_v3  ;;  %v1086_v33 = vpack.c.bf16 %v1054_v29, %v1054_v29  ;;  %v1181_v22 = vld [vmem:[#allocation2 + $0x16a] sm:$0xff]  ;;  %v1182_v34 = vld [vmem:[#allocation2 + $0x172] sm:$0xff] }
 0x167   : > { %v2556_v59 = vadd.f32 %v10008_v1, %v2555_v58  ;;  %v1954_v50 = vpop.permute.xlu1 %1953  ;;  %v1118_v39 = vld [vmem:[#allocation2 + $0x171] sm:$0xff]  ;;  %v1214_v32 = vpack.c.bf16 %v1182_v34, %v1182_v34  ;;  %v552_v58 = vmax.f32 %v471_v46, 0.0 }
 0x168   : > { %v10121_v12 = vld [vmem:[#allocation3 + $0x22] sm:$0xff]  ;;  %v2391_v14 = vsel %vm2375_vm7, %v2358_v11, %v1954_v50  ;;  %v10130_v51 = vld [vmem:[#allocation3 + $0x1a] sm:$0xff]  ;;  %v1918_v43 = vunpack.c.l.b16 %v1086_v33  ;;  %v1150_v40 = vpack.c.bf16 %v1118_v39, %v1118_v39 }
 0x169   : > { %v2632_v63 = vmax.f32 %v2556_v59, 0.0  ;;  %v10127_v10 = vld [vmem:[#allocation3 + $0x21] sm:$0xff]  ;;  %4925 = vst.msk [vmem:[#allocation3 + $0x18] sm:$0xff] %vm2309_vm3, %v13120_v13  ;;  %v2424_v31 = vsel %vm2408_vm8, %v2391_v14, %v10048_v18  ;;  %v1213_v18 = vpack.c.bf16 %v1181_v22, %v1181_v22  ;;  %v3103_v55 = vpack.c.bf16 %v10121_v12, %v10121_v12 }
 0x16a   : > { %4927 = vst.msk [vmem:[#allocation3 + $0x28] sm:$0x3] %vm2664_vm11, %v13120_v13  ;;  %v10138_v19 = vld [vmem:[#allocation3 + $0x20] sm:$0xff]  ;;  %v10159_v49 = vpack.c.b16 %v1918_v43, %v1917_v35  ;;  %v2142_v60 = vunpack.c.l.b16 %v1214_v32  ;;  %v2030_v2 = vunpack.c.l.b16 %v1150_v40  ;;  %v660_v50 = vld [vmem:[#allocation2 + $0xd8] sm:$0xff]  ;;  %v2847_v22 = vpack.c.bf16 %v10118_v54, %v10118_v54 }
 0x16b   : > { %2720 = vst.msk [vmem:[#allocation3 + $0x31] sm:$0xff] %vm2309_vm3, %v2632_v63  ;;  %v2753_v26 = vld [vmem:[#allocation3 + $0x20] sm:$0xff]  ;;  %1517 = vrot.lane.b32.xlu0 %v10025_v6, %s9321_s28  ;;  %v1291_v6 = vpack.c.b16 %v1268_v20, %v1267_v17  ;;  %v2141_v59 = vunpack.c.l.b16 %v1213_v18  ;;  %v2029_v63 = vunpack.c.l.b16 %v1149_v47  ;;  %v692_v46 = vpack.c.bf16 %v660_v50, %v660_v50 }
 0x16c   : > { %4926 = vst.msk [vmem:[#allocation3 + $0x20] sm:$0xff] %vm2309_vm3, %v13120_v13  ;;  %1405 = vrot.lane.b32.xlu2 %v9992_v57, %s9320_s27  ;;  %v2785_v38 = vpack.c.bf16 %v2753_v26, %v2753_v26  ;;  %v2846_v26 = vpack.c.bf16 %v10168_v61, %v10168_v61 }
 0x16d   : > { %1629 = vrot.lane.b32.xlu1 %v1935_v45, %s9323_s17  ;;  %v2178_v41 = vpop.permute.xlu0 %2177  ;;  %v3102_v45 = vpack.c.bf16 %v10130_v51, %v10130_v51  ;;  %641 = vst.msk [vmem:[#allocation2 + $0x189] sm:$0xff] %vm553_vm0, %v552_v58  ;;  %v10196_v29 = vpack.c.b16 %v2142_v60, %v2141_v59  ;;  %v10205_v39 = vpack.c.b16 %v2030_v2, %v2029_v63  ;;  %v3440_v60 = vunpack.c.l.b16 %v2847_v22 }
 0x16e   : > { %v2557_v21 = vpop.f32.mrf.mxu0  ;;  %v10152_v42 = vpop.permute.xlu2 %2179  ;;  %v2457_v57 = vsel %vm2441_vm9, %v2424_v31, %v2178_v41  ;;  %v10186_v14 = vunpack.c.l.b16 %v2785_v38  ;;  %v661_v41 = vld [vmem:[#allocation2 + $0xe0] sm:$0xff]  ;;  %v3439_v59 = vunpack.c.l.b16 %v2846_v26 }
 0x16f   : > { %v2558_v27 = vadd.f32 %v10008_v1, %v2557_v21  ;;  %v1396_v28 = vpop.permute.xlu1 %1395  ;;  %8852 = vmatmul.msk.bf16.gmra.mxu0 %vm2504_vm10, %v2457_v57  ;;  %v3855_v20 = vunpack.c.l.b16 %v3102_v45  ;;  %v693_v53 = vpack.c.bf16 %v661_v41, %v661_v41 }
 0x170   : > { %v2221_v52 = vsel %vm553_vm0, %v1291_v6, %v1396_v28 }
 0x171   : > { %v2633_v30 = vmax.f32 %v2558_v27, 0.0  ;;  %v2261_v3 = vsel %vm2243_vm4, %v2221_v52, %v10079_v48  ;;  %v3856_v48 = vunpack.c.l.b16 %v3103_v55  ;;  %v3551_v55 = vunpack.c.l.b16 %v2910_v4 }
 0x172   : > { %v10182_v11 = vld [vmem:[#allocation3 + $0x31] sm:$0xff]  ;;  %v1270_v4 = vunpack.c.l.b16 %v693_v53 }
 0x173   : > { %2721 = vst.msk [vmem:[#allocation3 + $0x39] sm:$0xff] %vm2309_vm3, %v2633_v30  ;;  %1853 = vrot.lane.b32.xlu0 %v10095_v36, %s9322_s16  ;;  %v10184_v12 = vld [vmem:[#allocation3 + $0x30] sm:$0xff]  ;;  %v10217_v40 = vpack.c.b16 %v3856_v48, %v3855_v20  ;;  %v3583_v50 = vpack.c.b16 %v3552_v56, %v3551_v55  ;;  %v3471_v48 = vpack.c.b16 %v3440_v60, %v3439_v59 }
 0x174   : > { %1741 = vrot.lane.b32.xlu2 %v10089_v24, %s9326_s20  ;;  %v2754_v51 = vld [vmem:[#allocation3 + $0x30] sm:$0xff] }
 0x175   : > { %1965 = vrot.lane.b32.xlu1 %v10159_v49, %s9325_s19  ;;  %v1620_v16 = vpop.permute.xlu0 %1619  ;;  %v10192_v27 = vld [vmem:[#allocation3 + $0x31] sm:$0xff]  ;;  %v2786_v44 = vpack.c.bf16 %v2754_v51, %v2754_v51 }
 0x176   : > { %v10188_v17 = vpop.permute.xlu2 %1621  ;;  %v2294_v37 = vsel %vm2276_vm5, %v2261_v3, %v1620_v16  ;;  %v1269_v3 = vunpack.c.l.b16 %v692_v46  ;;  %v1055_v46 = vld [vmem:[#allocation2 + $0x180] sm:$0xff] }
 0x177   : > { %v1732_v7 = vpop.permute.xlu1 %1731  ;;  %v10234_v61 = vunpack.c.l.b16 %v2786_v44 }
 0x178   : > { %v2327_v57 = vsel %vm2309_vm3, %v2294_v37, %v1732_v7  ;;  %v1292_v7 = vpack.c.b16 %v1270_v4, %v1269_v3 }
 0x179   : > { %v2360_v45 = vsel %vm2342_vm6, %v2327_v57, %v10113_v62  ;;  %v662_v57 = vld [vmem:[#allocation2 + $0xf0] sm:$0xff] }
 0x17a   : > { %v3263_v21 = vld [vmem:[#allocation3 + $0x32] sm:$0xff]  ;;  %v3264_v23 = vld [vmem:[#allocation3 + $0x3a] sm:$0xff]  ;;  %v694_v3 = vpack.c.bf16 %v662_v57, %v662_v57 }
 0x17b   : > { %v3295_v31 = vpack.c.bf16 %v3263_v21, %v3263_v21  ;;  %v3296_v33 = vpack.c.bf16 %v3264_v23, %v3264_v23  ;;  %v3200_v34 = vld [vmem:[#allocation3 + $0x39] sm:$0xff]  ;;  %4928 = vst.msk [vmem:[#allocation3 + $0x30] sm:$0xff] %vm2309_vm3, %v13120_v13  ;;  %2189 = vrot.lane.b32.xlu0 %v10196_v29, %s9327_s21  ;;  %v2975_v21 = vpack.c.bf16 %v10138_v19, %v10138_v19 }
 0x17c   : > { %v10200_v30 = vld [vmem:[#allocation3 + $0x39] sm:$0xff]  ;;  %2077 = vrot.lane.b32.xlu2 %v10205_v39, %s9324_s18  ;;  %v3232_v26 = vpack.c.bf16 %v3200_v34, %v3200_v34 }
 0x17d   : > { %v2755_v35 = vld [vmem:[#allocation3 + $0x38] sm:$0xff]  ;;  %v2560_v6 = vpop.f32.mrf.mxu0  ;;  %4930 = vst.msk [vmem:[#allocation3 + $0x40] sm:$0x3] %vm2664_vm11, %v13120_v13  ;;  %v4191_v18 = vunpack.c.l.b16 %v3295_v31  ;;  %v4192_v32 = vunpack.c.l.b16 %v3296_v33  ;;  %3903 = vrot.lane.b32.xlu1 %v10217_v40, %s9326_s20  ;;  %v1956_v38 = vpop.permute.xlu0 %1955  ;;  %v2974_v31 = vpack.c.bf16 %v10125_v9, %v10125_v9  ;;  %v3664_v19 = vunpack.c.l.b16 %v2975_v21 }
 0x17e   : > { %v10207_v43 = vld [vmem:[#allocation3 + $0x38] sm:$0xff]  ;;  %v2561_v28 = vadd.f32 %v10008_v1, %v2560_v6  ;;  %v2787_v47 = vpack.c.bf16 %v2755_v35, %v2755_v35  ;;  %v10236_v63 = vpop.permute.xlu2 %1957  ;;  %v2393_v62 = vsel %vm2375_vm7, %v2360_v45, %v1956_v38  ;;  %v4080_v35 = vunpack.c.l.b16 %v3232_v26 }
 0x17f   : > { %4929 = vst.msk [vmem:[#allocation3 + $0x38] sm:$0xff] %vm2309_vm3, %v13120_v13  ;;  %v10219_v52 = vpack.c.b16 %v4192_v32, %v4191_v18  ;;  %v2068_v2 = vpop.permute.xlu1 %2067  ;;  %v3663_v37 = vunpack.c.l.b16 %v2974_v31  ;;  %v3167_v18 = vpack.c.bf16 %v10184_v12, %v10184_v12  ;;  %v3168_v32 = vpack.c.bf16 %v10207_v43, %v10207_v43 }
 0x180   : > { %v2634_v25 = vmax.f32 %v2561_v28, 0.0  ;;  %v10227_v58 = vunpack.c.l.b16 %v2787_v47  ;;  %v2426_v51 = vsel %vm2408_vm8, %v2393_v62, %v2068_v2  ;;  %v1056_v47 = vld [vmem:[#allocation2 + $0x188] sm:$0xff] }
 0x181   : > { %8933 = vmatmul.msk.bf16.vlgmr.msra.gmra.mxu3 %vm2309_vm3, %v10219_v52  ;;  %v2459_v20 = vsel %vm2441_vm9, %v2426_v51, %v10152_v42  ;;  %v3231_v42 = vpack.c.bf16 %v10182_v11, %v10182_v11  ;;  %v3695_v44 = vpack.c.b16 %v3664_v19, %v3663_v37  ;;  %v1087_v19 = vpack.c.bf16 %v1055_v46, %v1055_v46 }
 0x182   : > { %2722 = vst.msk [vmem:[#allocation3 + $0x49] sm:$0xff] %vm2309_vm3, %v2634_v25  ;;  %8853 = vmatmul.msk.bf16.gmra.mxu0 %vm2504_vm10, %v2459_v20  ;;  %v1119_v20 = vld [vmem:[#allocation2 + $0x181] sm:$0xff] }
 0x183   : > { %3599 = vrot.lane.b32.xlu0 %v3583_v50, %s9327_s21  ;;  %v4079_v6 = vunpack.c.l.b16 %v3231_v42 }
 0x184   : > { %1407 = vrot.lane.b32.xlu2 %v10089_v24, %s9320_s27  ;;  %v663_v24 = vld [vmem:[#allocation2 + $0xf8] sm:$0xff] }
 0x185   : > { %v2562_v16 = vpop.f32.mrf.mxu0  ;;  %3487 = vrot.lane.b32.xlu1 %v3471_v48, %s9326_s20  ;;  %v1398_v22 = vpop.permute.xlu0 %1397  ;;  %v10260_v28 = vpack.c.b16 %v4080_v35, %v4079_v6  ;;  %v695_v4 = vpack.c.bf16 %v663_v24, %v663_v24  ;;  %v1120_v48 = vld [vmem:[#allocation2 + $0x189] sm:$0xff]  ;;  %v1271_v24 = vunpack.c.l.b16 %v694_v3 }
 0x186   : > { %v2563_v23 = vadd.f32 %v10008_v1, %v2562_v16  ;;  %v10257_v34 = vpop.permute.xlu2 %1399  ;;  %v2224_v9 = vsel %vm553_vm0, %v1292_v7, %v1398_v22  ;;  %v3967_v16 = vunpack.c.l.b16 %v3167_v18  ;;  %v1088_v22 = vpack.c.bf16 %v1056_v47, %v1056_v47 }
 0x187   : > { %v1510_v41 = vpop.permute.xlu1 %1509  ;;  %v1152_v6 = vpack.c.bf16 %v1120_v48, %v1120_v48  ;;  %v1919_v47 = vunpack.c.l.b16 %v1087_v19 }
 0x188   : > { %v2635_v33 = vmax.f32 %v2563_v23, 0.0  ;;  %v2263_v11 = vsel %vm2243_vm4, %v2224_v9, %v1510_v41  ;;  %v1151_v41 = vpack.c.bf16 %v1119_v20, %v1119_v20 }
 0x189   : > { %v10267_v53 = vld [vmem:[#allocation3 + $0x48] sm:$0xff]  ;;  %v2296_v43 = vsel %vm2276_vm5, %v2263_v11, %v10188_v17  ;;  %v3968_v17 = vunpack.c.l.b16 %v3168_v32  ;;  %v1272_v11 = vunpack.c.l.b16 %v695_v4 }
 0x18a   : > { %2723 = vst.msk [vmem:[#allocation3 + $0x51] sm:$0xff] %vm2309_vm3, %v2635_v33  ;;  %v10269_v25 = vld [vmem:[#allocation3 + $0x49] sm:$0xff]  ;;  %v3169_v19 = vpack.c.bf16 %v10267_v53, %v10267_v53 }
 0x18b   : > { %v10271_v45 = vld [vmem:[#allocation3 + $0x49] sm:$0xff]  ;;  %4127 = vrot.lane.b32.xlu0 %v10260_v28, %s9329_s30  ;;  %v1293_v3 = vpack.c.b16 %v1272_v11, %v1271_v24  ;;  %v2849_v24 = vpack.c.bf16 %v10127_v10, %v10127_v10  ;;  %v664_v11 = vld [vmem:[#allocation2 + $0x108] sm:$0xff] }
 0x18c   : > { %3711 = vrot.lane.b32.xlu2 %v3695_v44, %s9329_s30  ;;  %v2756_v12 = vld [vmem:[#allocation3 + $0x48] sm:$0xff]  ;;  %v10299_v44 = vpack.c.b16 %v3968_v17, %v3967_v16 }
 0x18d   : > { %1519 = vrot.lane.b32.xlu1 %v10095_v36, %s9321_s28  ;;  %v1734_v50 = vpop.permute.xlu0 %1733  ;;  %v2788_v31 = vpack.c.bf16 %v2756_v12, %v2756_v12  ;;  %v2031_v12 = vunpack.c.l.b16 %v1151_v41 }
 0x18e   : > { %v10286_v51 = vpop.permute.xlu2 %1735  ;;  %v2329_v42 = vsel %vm2309_vm3, %v2296_v43, %v1734_v50  ;;  %v2032_v43 = vunpack.c.l.b16 %v1152_v6  ;;  %v3969_v6 = vunpack.c.l.b16 %v3169_v19 }
 0x18f   : > { %v1846_v21 = vpop.permute.xlu1 %1845  ;;  %v10303_v18 = vunpack.c.l.b16 %v2788_v31  ;;  %v2227_v31 = vsel %vm553_vm0, %v1293_v3, %v10257_v34 }
 0x190   : > { %v2362_v9 = vsel %vm2342_vm6, %v2329_v42, %v1846_v21 }
 0x191   : > { %v3265_v55 = vld [vmem:[#allocation3 + $0x4a] sm:$0xff]  ;;  %v3266_v56 = vld [vmem:[#allocation3 + $0x52] sm:$0xff]  ;;  %v2395_v46 = vsel %vm2375_vm7, %v2362_v9, %v10236_v63 }
 0x192   : > { %v3297_v59 = vpack.c.bf16 %v3265_v55, %v3265_v55  ;;  %v3298_v60 = vpack.c.bf16 %v3266_v56, %v3266_v56  ;;  %v10280_v38 = vld [vmem:[#allocation3 + $0x51] sm:$0xff]  ;;  %4931 = vst.msk [vmem:[#allocation3 + $0x48] sm:$0xff] %vm2309_vm3, %v13120_v13  ;;  %v1920_v55 = vunpack.c.l.b16 %v1088_v22 }
 0x193   : > { %v10282_v62 = vld [vmem:[#allocation3 + $0x51] sm:$0xff]  ;;  %1631 = vrot.lane.b32.xlu0 %v10159_v49, %s9323_s17 }
 0x194   : > { %v2757_v2 = vld [vmem:[#allocation3 + $0x50] sm:$0xff]  ;;  %4933 = vst.msk [vmem:[#allocation3 + $0x58] sm:$0x3] %vm2664_vm11, %v13120_v13  ;;  %v2565_v23 = vpop.f32.mrf.mxu0  ;;  %v4193_v26 = vunpack.c.l.b16 %v3297_v59  ;;  %v4194_v7 = vunpack.c.l.b16 %v3298_v60  ;;  %4015 = vrot.lane.b32.xlu2 %v10299_v44, %s9327_s21  ;;  %v1184_v59 = vld [vmem:[#allocation2 + $0x18a] sm:$0xff]  ;;  %v10321_v17 = vpack.c.b16 %v1920_v55, %v1919_v47 }
 0x195   : > { %v10288_v36 = vld [vmem:[#allocation3 + $0x50] sm:$0xff]  ;;  %v2789_v33 = vpack.c.bf16 %v2757_v2, %v2757_v2  ;;  %v2566_v35 = vadd.f32 %v10008_v1, %v2565_v23  ;;  %1743 = vrot.lane.b32.xlu1 %v10205_v39, %s9326_s20  ;;  %v2070_v60 = vpop.permute.xlu0 %2069  ;;  %v1216_v48 = vpack.c.bf16 %v1184_v59, %v1184_v59  ;;  %v10326_v23 = vpack.c.b16 %v2032_v43, %v2031_v12 }
 0x196   : > { %4932 = vst.msk [vmem:[#allocation3 + $0x50] sm:$0xff] %vm2309_vm3, %v13120_v13  ;;  %v10297_v37 = vpack.c.b16 %v4194_v7, %v4193_v26  ;;  %v1183_v56 = vld [vmem:[#allocation2 + $0x182] sm:$0xff]  ;;  %v10318_v2 = vpop.permute.xlu2 %2071  ;;  %v2428_v63 = vsel %vm2408_vm8, %v2395_v46, %v2070_v60  ;;  %v3170_v7 = vpack.c.bf16 %v10288_v36, %v10288_v36  ;;  %v665_v46 = vld [vmem:[#allocation2 + $0x110] sm:$0xff]  ;;  %v2848_v59 = vpack.c.bf16 %v10132_v15, %v10132_v15 }
 0x197   : > { %v2636_v57 = vmax.f32 %v2566_v35, 0.0  ;;  %v10305_v32 = vunpack.c.l.b16 %v2789_v33  ;;  %v2182_v4 = vpop.permute.xlu1 %2181  ;;  %v1215_v50 = vpack.c.bf16 %v1183_v56, %v1183_v56  ;;  %v2144_v42 = vunpack.c.l.b16 %v1216_v48 }
 0x198   : > { %8934 = vmatmul.msk.bf16.gmra.mxu3 %vm2309_vm3, %v10297_v37  ;;  %v2461_v20 = vsel %vm2441_vm9, %v2428_v63, %v2182_v4  ;;  %v3970_v9 = vunpack.c.l.b16 %v3170_v7  ;;  %v3233_v63 = vpack.c.bf16 %v10269_v25, %v10269_v25 }
 0x199   : > { %2724 = vst.msk [vmem:[#allocation3 + $0x61] sm:$0xff] %vm2309_vm3, %v2636_v57  ;;  %8854 = vmatmul.msk.bf16.gmra.mxu0 %vm2504_vm10, %v2461_v20  ;;  %v2143_v33 = vunpack.c.l.b16 %v1215_v50  ;;  %v3234_v57 = vpack.c.bf16 %v10280_v38, %v10280_v38  ;;  %v3442_v20 = vunpack.c.l.b16 %v2849_v24 }
 0x19a   : > { %v10357_v43 = vpack.c.b16 %v3970_v9, %v3969_v6  ;;  %v4081_v6 = vunpack.c.l.b16 %v3233_v63 }
 0x19b   : > { %1967 = vrot.lane.b32.xlu0 %v10321_v17, %s9325_s19  ;;  %v10344_v41 = vpack.c.b16 %v2144_v42, %v2143_v33  ;;  %v697_v33 = vpack.c.bf16 %v665_v46, %v665_v46 }
 0x19c   : > { %v2567_v16 = vpop.f32.mrf.mxu0  ;;  %1855 = vrot.lane.b32.xlu2 %v10196_v29, %s9322_s16 }
 0x19d   : > { %v2568_v21 = vadd.f32 %v10008_v1, %v2567_v16  ;;  %2079 = vrot.lane.b32.xlu1 %v10326_v23, %s9324_s18  ;;  %v1512_v36 = vpop.permute.xlu0 %1511  ;;  %v4082_v16 = vunpack.c.l.b16 %v3234_v57 }
 0x19e   : > { %v10341_v22 = vpop.permute.xlu2 %1513  ;;  %v2265_v34 = vsel %vm2243_vm4, %v2227_v31, %v1512_v36  ;;  %v696_v31 = vpack.c.bf16 %v664_v11, %v664_v11 }
 0x19f   : > { %v2637_v26 = vmax.f32 %v2568_v21, 0.0  ;;  %v1624_v35 = vpop.permute.xlu1 %1623  ;;  %v10393_v46 = vpack.c.b16 %v4082_v16, %v4081_v6  ;;  %v1186_v6 = vld [vmem:[#allocation2 + $0x1a2] sm:$0xff] }
 0x1a0   : > { %v2298_v53 = vsel %vm2276_vm5, %v2265_v34, %v1624_v35  ;;  %v10351_v55 = vld [vmem:[#allocation3 + $0x60] sm:$0xff] }
 0x1a1   : > { %2725 = vst.msk [vmem:[#allocation3 + $0x69] sm:$0xff] %vm2309_vm3, %v2637_v26  ;;  %v10353_v56 = vld [vmem:[#allocation3 + $0x61] sm:$0xff]  ;;  %v2331_v15 = vsel %vm2309_vm3, %v2298_v53, %v10286_v51  ;;  %v3441_v51 = vunpack.c.l.b16 %v2848_v59  ;;  %v1273_v53 = vunpack.c.l.b16 %v696_v31 }
 0x1a2   : > { %v10355_v12 = vld [vmem:[#allocation3 + $0x61] sm:$0xff] }
 0x1a3   : > { %v2758_v3 = vld [vmem:[#allocation3 + $0x60] sm:$0xff]  ;;  %3905 = vrot.lane.b32.xlu0 %v10219_v52, %s9326_s20  ;;  %v10390_v24 = vpack.c.b16 %v3442_v20, %v3441_v51  ;;  %v1057_v31 = vld [vmem:[#allocation2 + $0x198] sm:$0xff] }
 0x1a4   : > { %2191 = vrot.lane.b32.xlu2 %v10344_v41, %s9327_s21  ;;  %v1185_v51 = vld [vmem:[#allocation2 + $0x19a] sm:$0xff] }
 0x1a5   : > { %4017 = vrot.lane.b32.xlu1 %v10357_v43, %s9327_s21  ;;  %v1848_v7 = vpop.permute.xlu0 %1847  ;;  %v1217_v0 = vpack.c.bf16 %v1185_v51, %v1185_v51 }
 0x1a6   : > { %v2570_v47 = vpop.f32.mrf.mxu0  ;;  %v10378_v25 = vpop.permute.xlu2 %1849  ;;  %v2364_v9 = vsel %vm2342_vm6, %v2331_v15, %v1848_v7 }
 0x1a7   : > { %v2571_v38 = vadd.f32 %v10008_v1, %v2570_v47  ;;  %v1960_v36 = vpop.permute.xlu1 %1959  ;;  %v1274_v47 = vunpack.c.l.b16 %v697_v33  ;;  %v1058_v33 = vld [vmem:[#allocation2 + $0x1a0] sm:$0xff] }
 0x1a8   : > { %v3267_v60 = vld [vmem:[#allocation3 + $0x62] sm:$0xff]  ;;  %v3268_v10 = vld [vmem:[#allocation3 + $0x6a] sm:$0xff]  ;;  %v2397_v11 = vsel %vm2375_vm7, %v2364_v9, %v1960_v36 }
 0x1a9   : > { %v3299_v4 = vpack.c.bf16 %v3267_v60, %v3267_v60  ;;  %v3300_v50 = vpack.c.bf16 %v3268_v10, %v3268_v10  ;;  %4934 = vst.msk [vmem:[#allocation3 + $0x60] sm:$0xff] %vm2309_vm3, %v13120_v13  ;;  %v2638_v48 = vmax.f32 %v2571_v38, 0.0  ;;  %v10374_v21 = vld [vmem:[#allocation3 + $0x69] sm:$0xff]  ;;  %v2790_v38 = vpack.c.bf16 %v2758_v3, %v2758_v3 }
 0x1aa   : > { %v10376_v26 = vld [vmem:[#allocation3 + $0x69] sm:$0xff]  ;;  %v2430_v63 = vsel %vm2408_vm8, %v2397_v11, %v10318_v2  ;;  %v1294_v16 = vpack.c.b16 %v1274_v47, %v1273_v53  ;;  %v1218_v2 = vpack.c.bf16 %v1186_v6, %v1186_v6 }
 0x1ab   : > { %v4195_v42 = vunpack.c.l.b16 %v3299_v4  ;;  %v4196_v19 = vunpack.c.l.b16 %v3300_v50  ;;  %4936 = vst.msk [vmem:[#allocation3 + $0x70] sm:$0x3] %vm2664_vm11, %v13120_v13  ;;  %v10383_v34 = vld [vmem:[#allocation3 + $0x68] sm:$0xff]  ;;  %3489 = vrot.lane.b32.xlu0 %v10390_v24, %s9326_s20  ;;  %v10410_v20 = vunpack.c.l.b16 %v2790_v38  ;;  %v666_v9 = vld [vmem:[#allocation2 + $0x120] sm:$0xff] }
 0x1ac   : > { %2726 = vst.msk [vmem:[#allocation3 + $0x79] sm:$0xff] %vm2309_vm3, %v2638_v48  ;;  %v2759_v35 = vld [vmem:[#allocation3 + $0x68] sm:$0xff]  ;;  %4129 = vrot.lane.b32.xlu2 %v10393_v46, %s9329_s30 }
 0x1ad   : > { %v10386_v57 = vpack.c.b16 %v4196_v19, %v4195_v42  ;;  %4935 = vst.msk [vmem:[#allocation3 + $0x68] sm:$0xff] %vm2309_vm3, %v13120_v13  ;;  %v2791_v10 = vpack.c.bf16 %v2759_v35, %v2759_v35  ;;  %1409 = vrot.lane.b32.xlu1 %v10205_v39, %s9320_s27  ;;  %v2184_v15 = vpop.permute.xlu0 %2183  ;;  %v1121_v42 = vld [vmem:[#allocation2 + $0x199] sm:$0xff]  ;;  %v1122_v19 = vld [vmem:[#allocation2 + $0x1a1] sm:$0xff] }
 0x1ae   : > { %v2572_v59 = vpop.f32.mrf.mxu0  ;;  %v10408_v3 = vpop.permute.xlu2 %2185  ;;  %13139 = vst [vmem:[#allocation6_spill] sm:$0xff] %v10410_v20  ;;  %v2463_v48 = vsel %vm2441_vm9, %v2430_v63, %v2184_v15  ;;  %v1153_v38 = vpack.c.bf16 %v1121_v42, %v1121_v42 }
 0x1af   : > { %8935 = vmatmul.msk.bf16.gmra.mxu3 %vm2309_vm3, %v10386_v57  ;;  %v2573_v60 = vadd.f32 %v10008_v1, %v2572_v59  ;;  %v10406_v50 = vunpack.c.l.b16 %v2791_v10  ;;  %v1402_v7 = vpop.permute.xlu1 %1401  ;;  %8855 = vmatmul.msk.bf16.gmra.mxu0 %vm2504_vm10, %v2463_v48  ;;  %v1089_v59 = vpack.c.bf16 %v1057_v31, %v1057_v31 }
 0x1b0   : > { %v2230_v39 = vsel %vm553_vm0, %v1294_v16, %v1402_v7 }
 0x1b1   : > { %v2639_v4 = vmax.f32 %v2573_v60, 0.0  ;;  %13138 = vst [vmem:[#allocation5_spill] sm:$0xff] %v10406_v50  ;;  %v2267_v35 = vsel %vm2243_vm4, %v2230_v39, %v10341_v22 }
 0x1b3   : > { %2727 = vst.msk [vmem:[#allocation3 + $0x81] sm:$0xff] %vm2309_vm3, %v2639_v4  ;;  %1521 = vrot.lane.b32.xlu0 %v10196_v29, %s9321_s28  ;;  %v2760_v36 = vld [vmem:[#allocation3 + $0x78] sm:$0xff]  ;;  %v1090_v29 = vpack.c.bf16 %v1058_v33, %v1058_v33  ;;  %v1154_v4 = vpack.c.bf16 %v1122_v19, %v1122_v19  ;;  %s8828_s28 = sshll.u32 %s13237_s26, 2 }
 0x1b4   : > { %3601 = vrot.lane.b32.xlu2 %v10217_v40, %s9327_s21  ;;  %v10426_v11 = vld [vmem:[#allocation3 + $0x78] sm:$0xff]  ;;  %v2792_v39 = vpack.c.bf16 %v2760_v36, %v2760_v36  ;;  %s438_s14 = scalar_lea.vmem %s13110_s13, %s8828_s28 }
 0x1b5   : > { %3713 = vrot.lane.b32.xlu1 %v10299_v44, %s9329_s30  ;;  %v10428_v53 = vld [vmem:[#allocation3 + $0x79] sm:$0xff]  ;;  %v1626_v47 = vpop.permute.xlu0 %1625 }
 0x1b6   : > { %v10430_v40 = vpop.permute.xlu2 %1627  ;;  %v10432_v63 = vld [vmem:[#allocation3 + $0x79] sm:$0xff]  ;;  %v2300_v31 = vsel %vm2276_vm5, %v2267_v35, %v1626_v47  ;;  %v1921_v35 = vunpack.c.l.b16 %v1089_v59  ;;  %v698_v47 = vpack.c.bf16 %v666_v9, %v666_v9  ;;  %v10453_v50 = vunpack.c.l.b16 %v2792_v39 }
 0x1b7   : > { %v1738_v22 = vpop.permute.xlu1 %1737  ;;  %v667_v33 = vld [vmem:[#allocation2 + $0x128] sm:$0xff]  ;;  %v2033_v59 = vunpack.c.l.b16 %v1153_v38  ;;  %v2034_v9 = vunpack.c.l.b16 %v1154_v4 }
 0x1b8   : > { %v699_v51 = vpack.c.bf16 %v667_v33, %v667_v33  ;;  %v1275_v38 = vunpack.c.l.b16 %v698_v47  ;;  %v9208_v33 = vld [vmem:[%s13100_s3 + $0x38] sm:$0xff]  ;;  %v3236_v47 = vpack.c.bf16 %v10374_v21, %v10374_v21  ;;  %v9207_v21 = vld [vmem:[%s13100_s3 + $0x30] sm:$0xff] }
 0x1b9   : > { %4655 = vmatpush.bf16.msra.mxu1 %v9208_v33 }
 0x1ba   : > { %v3269_v60 = vld [vmem:[#allocation3 + $0x7a] sm:$0xff]  ;;  %v3270_v10 = vld [vmem:[#allocation3 + $0x82] sm:$0xff]  ;;  %v1276_v4 = vunpack.c.l.b16 %v699_v51 }
 0x1bb   : > { %v3301_v15 = vpack.c.bf16 %v3269_v60, %v3269_v60  ;;  %v3302_v44 = vpack.c.bf16 %v3270_v10, %v3270_v10  ;;  %v10434_v16 = vld [vmem:[#allocation3 + $0x81] sm:$0xff]  ;;  %4937 = vst.msk [vmem:[#allocation3 + $0x78] sm:$0xff] %vm2309_vm3, %v13120_v13  ;;  %v2333_v60 = vsel %vm2309_vm3, %v2300_v31, %v1738_v22  ;;  %1745 = vrot.lane.b32.xlu0 %v10326_v23, %s9326_s20  ;;  %v9215_v51 = vld [vmem:[%s13100_s3 + $0x70] sm:$0xff] }
 0x1bc   : > { %v10436_v48 = vld [vmem:[#allocation3 + $0x81] sm:$0xff]  ;;  %1633 = vrot.lane.b32.xlu2 %v10321_v17, %s9323_s17  ;;  %v2366_v22 = vsel %vm2342_vm6, %v2333_v60, %v10378_v25  ;;  %v2050_v31 = vpack.c.b16 %v2034_v9, %v2033_v59  ;;  %v9214_v9 = vld [vmem:[%s13100_s3 + $0x68] sm:$0xff] }
 0x1bd   : > { %v2761_v7 = vld [vmem:[#allocation3 + $0x80] sm:$0xff]  ;;  %v2575_v42 = vpop.f32.mrf.mxu0  ;;  %4939 = vst.msk [vmem:[#allocation3 + $0x88] sm:$0x3] %vm2664_vm11, %v13120_v13  ;;  %v4197_v36 = vunpack.c.l.b16 %v3301_v15  ;;  %v4198_v5 = vunpack.c.l.b16 %v3302_v44  ;;  %v1922_v15 = vunpack.c.l.b16 %v1090_v29  ;;  %1857 = vrot.lane.b32.xlu1 %v10344_v41, %s9322_s16  ;;  %v2146_v44 = vunpack.c.l.b16 %v1218_v2  ;;  %v1962_v23 = vpop.permute.xlu0 %1961  ;;  %4656 = vmatpush.bf16.msra.mxu1 %v9207_v21 }
 0x1be   : > { %v10441_v49 = vld [vmem:[#allocation3 + $0x80] sm:$0xff]  ;;  %v2793_v19 = vpack.c.bf16 %v2761_v7, %v2761_v7  ;;  %v2576_v10 = vadd.f32 %v10008_v1, %v2575_v42  ;;  %v10468_v7 = vpop.permute.xlu2 %1963  ;;  %v2399_v25 = vsel %vm2375_vm7, %v2366_v22, %v1962_v23  ;;  %v668_v23 = vld [vmem:[#allocation2 + $0x138] sm:$0xff] }
 0x1bf   : > { %4938 = vst.msk [vmem:[#allocation3 + $0x80] sm:$0xff] %vm2309_vm3, %v13120_v13  ;;  %v10451_v20 = vpack.c.b16 %v4198_v5, %v4197_v36  ;;  %v2145_v5 = vunpack.c.l.b16 %v1217_v0  ;;  %v2074_v29 = vpop.permute.xlu1 %2073  ;;  %v9216_v41 = vld [vmem:[%s13100_s3 + $0x78] sm:$0xff]  ;;  %v1938_v39 = vpack.c.b16 %v1922_v15, %v1921_v35  ;;  %v1295_v36 = vpack.c.b16 %v1276_v4, %v1275_v38  ;;  %v669_v4 = vld [vmem:[#allocation2 + $0x140] sm:$0xff] }
 0x1c0   : > { %v10449_v54 = vunpack.c.l.b16 %v2793_v19  ;;  %v2640_v6 = vmax.f32 %v2576_v10, 0.0  ;;  %v2432_v0 = vsel %vm2408_vm8, %v2399_v25, %v2074_v29  ;;  %4744 = vmatpush.bf16.msra.mxu2 %v9216_v41  ;;  %v3172_v10 = vpack.c.bf16 %v10383_v34, %v10383_v34 }
 0x1c1   : > { %8936 = vmatmul.msk.bf16.gmra.mxu3 %vm2309_vm3, %v10451_v20  ;;  %v2465_v42 = vsel %vm2441_vm9, %v2432_v0, %v10408_v3  ;;  %v2162_v19 = vpack.c.b16 %v2146_v44, %v2145_v5  ;;  %v3235_v34 = vpack.c.bf16 %v10353_v56, %v10353_v56  ;;  %v9206_v56 = vld [vmem:[%s13100_s3 + $0x28] sm:$0xff] }
 0x1c2   : > { %2728 = vst.msk [vmem:[#allocation3 + $0x91] sm:$0xff] %vm2309_vm3, %v2640_v6  ;;  %v3396_v17 = vpack.c.b16 %v10449_v54, %v10453_v50  ;;  %8856 = vmatmul.msk.bf16.gmra.mxu0 %vm2504_vm10, %v2465_v42  ;;  %v3972_v22 = vunpack.c.l.b16 %v3172_v10  ;;  %4657 = vmatpush.bf16.msra.mxu1 %v9206_v56 }
 0x1c3   : > { %2081 = vrot.lane.b32.xlu0 %v2050_v31, %s9324_s18  ;;  %v4083_v44 = vunpack.c.l.b16 %v3235_v34 }
 0x1c4   : > { %1969 = vrot.lane.b32.xlu2 %v1938_v39, %s9325_s19  ;;  %4745 = vmatpush.bf16.msra.mxu2 %v9215_v51  ;;  %v9213_v39 = vld [vmem:[%s13100_s3 + $0x60] sm:$0xff] }
 0x1c5   : > { %v2577_v2 = vpop.f32.mrf.mxu0  ;;  %2193 = vrot.lane.b32.xlu1 %v2162_v19, %s9327_s21  ;;  %v1404_v3 = vpop.permute.xlu0 %1403 }
 0x1c6   : > { %v2578_v60 = vadd.f32 %v10008_v1, %v2577_v2  ;;  %v3171_v1 = vpack.c.bf16 %v10351_v55, %v10351_v55  ;;  %v10500_v6 = vpop.permute.xlu2 %1405  ;;  %v2233_v15 = vsel %vm553_vm0, %v1295_v36, %v1404_v3  ;;  %v4084_v55 = vunpack.c.l.b16 %v3236_v47  ;;  %v9205_v36 = vld [vmem:[%s13100_s3 + $0x20] sm:$0xff] }
 0x1c7   : > { %v1516_v59 = vpop.permute.xlu1 %1515  ;;  %v700_v3 = vpack.c.bf16 %v668_v23, %v668_v23  ;;  %4658 = vmatpush.bf16.msra.mxu1 %v9205_v36  ;;  %v9204_v23 = vld [vmem:[%s13100_s3 + $0x18] sm:$0xff]  ;;  %v3237_v36 = vpack.c.bf16 %v10428_v53, %v10428_v53 }
 0x1c8   : > { %v2641_v35 = vmax.f32 %v2578_v60, 0.0  ;;  %v3971_v5 = vunpack.c.l.b16 %v3171_v1  ;;  %4746 = vmatpush.bf16.msra.mxu2 %v9214_v9  ;;  %v2269_v29 = vsel %vm2243_vm4, %v2233_v15, %v1516_v59  ;;  %v10514_v41 = vpack.c.b16 %v4084_v55, %v4083_v44  ;;  %v9212_v55 = vld [vmem:[%s13100_s3 + $0x58] sm:$0xff] }
 0x1c9   : > { %v10512_v38 = vld [vmem:[#allocation3 + $0x90] sm:$0xff]  ;;  %v2302_v19 = vsel %vm2276_vm5, %v2269_v29, %v10430_v40  ;;  %v701_v9 = vpack.c.bf16 %v669_v4, %v669_v4  ;;  %v1277_v4 = vunpack.c.l.b16 %v700_v3 }
 0x1ca   : > { %2729 = vst.msk [vmem:[#allocation3 + $0x99] sm:$0xff] %vm2309_vm3, %v2641_v35  ;;  %v10509_v25 = vpack.c.b16 %v3972_v22, %v3971_v5  ;;  %v10519_v31 = vld [vmem:[#allocation3 + $0x91] sm:$0xff] }
 0x1cb   : > { %v2762_v0 = vld [vmem:[#allocation3 + $0x90] sm:$0xff]  ;;  %4659 = vmatpush.bf16.msra.mxu1 %v9204_v23 }
 0x1cc   : > { %3907 = vrot.lane.b32.xlu2 %v10297_v37, %s9326_s20  ;;  %4019 = vrot.lane.b32.xlu0 %v10509_v25, %s9327_s21  ;;  %v10525_v42 = vld [vmem:[#allocation3 + $0x91] sm:$0xff]  ;;  %v2794_v21 = vpack.c.bf16 %v2762_v0, %v2762_v0 }
 0x1cd   : > { %4131 = vrot.lane.b32.xlu1 %v10514_v41, %s9329_s30  ;;  %4747 = vmatpush.bf16.msra.mxu2 %v9213_v39  ;;  %v1740_v51 = vpop.permute.xlu0 %1739  ;;  %v3174_v39 = vpack.c.bf16 %v10441_v49, %v10441_v49 }
 0x1ce   : > { %v10540_v1 = vpop.permute.xlu2 %1741  ;;  %v2335_v56 = vsel %vm2309_vm3, %v2302_v19, %v1740_v51  ;;  %v10560_v0 = vunpack.c.l.b16 %v2794_v21  ;;  %v9211_v19 = vld [vmem:[%s13100_s3 + $0x50] sm:$0xff] }
 0x1cf   : > { %v1852_v22 = vpop.permute.xlu1 %1851 }
 0x1d0   : > { %v2368_v44 = vsel %vm2342_vm6, %v2335_v56, %v1852_v22  ;;  %v4085_v56 = vunpack.c.l.b16 %v3237_v36 }
 0x1d1   : > { %v3271_v2 = vld [vmem:[#allocation3 + $0x92] sm:$0xff]  ;;  %v3272_v33 = vld [vmem:[#allocation3 + $0x9a] sm:$0xff]  ;;  %4748 = vmatpush.bf16.msra.mxu2 %v9212_v55  ;;  %v2401_v49 = vsel %vm2375_vm7, %v2368_v44, %v10468_v7  ;;  %v3974_v7 = vunpack.c.l.b16 %v3174_v39  ;;  %v10607_v44 = vld [vmem:[#allocation3 + $0x8] sm:$0xff] }
 0x1d2   : > { %v3303_v60 = vpack.c.bf16 %v3271_v2, %v3271_v2  ;;  %v3304_v10 = vpack.c.bf16 %v3272_v33, %v3272_v33  ;;  %v10534_v35 = vld [vmem:[#allocation3 + $0x99] sm:$0xff]  ;;  %4940 = vst.msk [vmem:[#allocation3 + $0x90] sm:$0xff] %vm2309_vm3, %v13120_v13  ;;  %v3238_v33 = vpack.c.bf16 %v10434_v16, %v10434_v16 }
 0x1d3   : > { %v10536_v47 = vld [vmem:[#allocation3 + $0x99] sm:$0xff]  ;;  %4923 = vst.msk [vmem:[#allocation3 + $0x8] sm:$0xff] %vm2309_vm3, %v13120_v13 }
 0x1d4   : > { %v10542_v40 = vld [vmem:[#allocation3 + $0x98] sm:$0xff]  ;;  %4942 = vst.msk [vmem:[#allocation3 + $0xa0] sm:$0x3] %vm2664_vm11, %v13120_v13  ;;  %v4199_v15 = vunpack.c.l.b16 %v3303_v60  ;;  %v4200_v59 = vunpack.c.l.b16 %v3304_v10  ;;  %v1278_v60 = vunpack.c.l.b16 %v701_v9  ;;  %3603 = vrot.lane.b32.xlu0 %v10219_v52, %s9327_s21  ;;  %3491 = vrot.lane.b32.xlu2 %v10260_v28, %s9326_s20  ;;  %v3173_v10 = vpack.c.bf16 %v10426_v11, %v10426_v11  ;;  %v10601_v9 = vld [vmem:[#allocation3] sm:$0xff] }
 0x1d5   : > { %v2763_v34 = vld [vmem:[#allocation3 + $0x98] sm:$0xff]  ;;  %3715 = vrot.lane.b32.xlu1 %v10357_v43, %s9329_s30  ;;  %4749 = vmatpush.bf16.msra.mxu2 %v9211_v19  ;;  %v2076_v28 = vpop.permute.xlu0 %2075  ;;  %v4086_v3 = vunpack.c.l.b16 %v3238_v33  ;;  %v9210_v43 = vld [vmem:[%s13100_s3 + $0x48] sm:$0xff]  ;;  %4922 = vst.msk [vmem:[#allocation3] sm:$0xff] %vm2309_vm3, %v13120_v13  ;;  %v9209_v33 = vld [vmem:[%s13100_s3 + $0x40] sm:$0xff] }
 0x1d6   : > { %4941 = vst.msk [vmem:[#allocation3 + $0x98] sm:$0xff] %vm2309_vm3, %v13120_v13  ;;  %v2795_v5 = vpack.c.bf16 %v2763_v34, %v2763_v34  ;;  %v10553_v29 = vpack.c.b16 %v4200_v59, %v4199_v15  ;;  %v9203_v52 = vld [vmem:[%s13100_s3 + $0x10] sm:$0xff]  ;;  %v10588_v51 = vpop.permute.xlu2 %2077  ;;  %v2434_v11 = vsel %vm2408_vm8, %v2401_v49, %v2076_v28  ;;  %v2580_v34 = vpop.f32.mrf.mxu0  ;;  %v1296_v53 = vpack.c.b16 %v1278_v60, %v1277_v4  ;;  %v10597_v15 = vld [vmem:[%s13099_s2] ss:$0 sm:$0xff] }
 0x1d7   : > { %v2188_v21 = vpop.permute.xlu1 %2187  ;;  %4660 = vmatpush.bf16.msra.mxu1 %v9203_v52  ;;  %v3973_v22 = vunpack.c.l.b16 %v3173_v10  ;;  %v2581_v59 = vadd.f32 %v10597_v15, %v2580_v34  ;;  %v10615_v4 = vpack.c.b16 %v4086_v3, %v4085_v56  ;;  %v9201_v60 = vld [vmem:[%s13100_s3] sm:$0xff]  ;;  %v3176_v34 = vpack.c.bf16 %v10542_v40, %v10542_v40 }
 0x1d8   : > { %v10562_v2 = vunpack.c.l.b16 %v2795_v5  ;;  %8937 = vmatmul.msk.bf16.gmra.mxu3 %vm2309_vm3, %v10553_v29  ;;  %v2467_v55 = vsel %vm2441_vm9, %v2434_v11, %v2188_v21  ;;  %v9202_v5 = vld [vmem:[%s13100_s3 + $0x8] sm:$0xff]  ;;  %v2236_v19 = vsel %vm553_vm0, %v1296_v53, %v10500_v6  ;;  %v3240_v21 = vpack.c.bf16 %v10534_v35, %v10534_v35 }
 0x1d9   : > { %8857 = vmatmul.msk.bf16.gmra.mxu0 %vm2504_vm10, %v2467_v55  ;;  %4750 = vmatpush.bf16.msra.mxu2 %v9210_v43  ;;  %v10611_v23 = vpack.c.b16 %v3974_v7, %v3973_v22  ;;  %v2642_v39 = vmax.f32 %v2581_v59, 0.0  ;;  %v3175_v3 = vpack.c.bf16 %v10512_v38, %v10512_v38  ;;  %v3239_v35 = vpack.c.bf16 %v10519_v31, %v10519_v31 }
 0x1da   : > { %v3397_v16 = vpack.c.b16 %v10562_v2, %v10560_v0 }
 0x1db   : > { %4661 = vmatpush.bf16.msra.mxu1 %v9202_v5  ;;  %2730 = vst.msk [vmem:[#allocation3 + $0xa9] sm:$0xff] %vm2309_vm3, %v2642_v39  ;;  %v3975_v55 = vunpack.c.l.b16 %v3175_v3  ;;  %v4087_v5 = vunpack.c.l.b16 %v3239_v35 }
 0x1dc   : > { %4021 = vrot.lane.b32.xlu0 %v10611_v23, %s9327_s21  ;;  %3909 = vrot.lane.b32.xlu2 %v10386_v57, %s9326_s20 }
 0x1dd   : > { %4133 = vrot.lane.b32.xlu1 %v10615_v4, %s9329_s30  ;;  %4751 = vmatpush.bf16.msra.mxu2 %v9209_v33  ;;  %v1518_v49 = vpop.permute.xlu0 %1517 }
 0x1de   : > { %v10632_v10 = vpop.permute.xlu2 %1407  ;;  %v2271_v6 = vsel %vm2243_vm4, %v2236_v19, %v1518_v49  ;;  %v2582_v36 = vpop.f32.mrf.mxu0  ;;  %v2783_v49 = vpack.c.bf16 %v10607_v44, %v10607_v44 }
 0x1df   : > { %v1630_v52 = vpop.permute.xlu1 %1629  ;;  %4662 = vmatpush.bf16.msra.mxu1 %v9201_v60  ;;  %v2583_v28 = vadd.f32 %v10597_v15, %v2582_v36  ;;  %v2782_v60 = vpack.c.bf16 %v10601_v9, %v10601_v9 }
 0x1e0   : > { %v2304_v11 = vsel %vm2276_vm5, %v2271_v6, %v1630_v52 }
 0x1e1   : > { %v2643_v7 = vmax.f32 %v2583_v28, 0.0  ;;  %v2337_v43 = vsel %vm2309_vm3, %v2304_v11, %v10540_v1 }
 0x1e2   : > { %v2764_v56 = vld [vmem:[#allocation3 + $0xa8] sm:$0xff] }
 0x1e3   : > { %2731 = vst.msk [vmem:[#allocation3 + $0xb1] sm:$0xff] %vm2309_vm3, %v2643_v7  ;;  %v3145_v39 = vld [vmem:[#allocation3 + $0xa8] sm:$0xff]  ;;  %v2796_v36 = vpack.c.bf16 %v2764_v56, %v2764_v56 }
 0x1e4   : > { %3605 = vrot.lane.b32.xlu0 %v10297_v37, %s9327_s21  ;;  %3493 = vrot.lane.b32.xlu2 %v10393_v46, %s9326_s20  ;;  %v3976_v37 = vunpack.c.l.b16 %v3176_v34  ;;  %v4088_v46 = vunpack.c.l.b16 %v3240_v21  ;;  %v10668_v6 = vld [vmem:[#allocation3 + $0xa9] sm:$0xff] }
 0x1e5   : > { %3717 = vrot.lane.b32.xlu1 %v10509_v25, %s9329_s30  ;;  %v1854_v40 = vpop.permute.xlu0 %1853  ;;  %v10660_v25 = vld [vmem:[#allocation3 + $0xa9] sm:$0xff] }
 0x1e6   : > { %v10654_v53 = vpop.permute.xlu2 %3711  ;;  %v2370_v59 = vsel %vm2342_vm6, %v2337_v43, %v1854_v40  ;;  %v10658_v1 = vpack.c.b16 %v3976_v37, %v3975_v55  ;;  %v10662_v33 = vpack.c.b16 %v4088_v46, %v4087_v5  ;;  %v3359_v5 = vunpack.c.l.b16 %v2782_v60 }
 0x1e7   : > { %v1966_v22 = vpop.permute.xlu1 %1965 }
 0x1e8   : > { %v2403_v38 = vsel %vm2375_vm7, %v2370_v59, %v1966_v22  ;;  %v10688_v59 = vunpack.c.l.b16 %v2796_v36 }
 0x1e9   : > { %v2436_v52 = vsel %vm2408_vm8, %v2403_v38, %v10588_v51 }
 0x1ea   : > { %v3273_v31 = vld [vmem:[#allocation3 + $0xaa] sm:$0xff]  ;;  %v3274_v19 = vld [vmem:[#allocation3 + $0xb2] sm:$0xff] }
 0x1eb   : > { %v3305_v28 = vpack.c.bf16 %v3273_v31, %v3273_v31  ;;  %v3306_v7 = vpack.c.bf16 %v3274_v19, %v3274_v19  ;;  %v3210_v11 = vld [vmem:[#allocation3 + $0xb1] sm:$0xff]  ;;  %4943 = vst.msk [vmem:[#allocation3 + $0xa8] sm:$0xff] %vm2309_vm3, %v13120_v13  ;;  %v3360_v31 = vunpack.c.l.b16 %v2783_v49  ;;  %v671_v49 = vld [vmem:[#allocation2 + $0x158] sm:$0xff] }
 0x1ec   : > { %4023 = vrot.lane.b32.xlu0 %v10658_v1, %s9327_s21  ;;  %3911 = vrot.lane.b32.xlu2 %v10451_v20, %s9326_s20  ;;  %v10676_v34 = vld [vmem:[#allocation3 + $0xb1] sm:$0xff]  ;;  %v2585_v44 = vpop.f32.mrf.mxu0  ;;  %v3242_v36 = vpack.c.bf16 %v3210_v11, %v3210_v11 }
 0x1ed   : > { %v2765_v9 = vld [vmem:[#allocation3 + $0xb0] sm:$0xff]  ;;  %4135 = vrot.lane.b32.xlu1 %v10662_v33, %s9329_s30  ;;  %4945 = vst.msk [vmem:[#allocation3 + $0xb8] sm:$0x3] %vm2664_vm11, %v13120_v13  ;;  %v2190_v43 = vpop.permute.xlu0 %2189  ;;  %v2586_v35 = vadd.f32 %v10597_v15, %v2585_v44  ;;  %v4201_v40 = vunpack.c.l.b16 %v3305_v28  ;;  %v4202_v37 = vunpack.c.l.b16 %v3306_v7  ;;  %v670_v28 = vld [vmem:[#allocation2 + $0x150] sm:$0xff]  ;;  %v3177_v7 = vpack.c.bf16 %v3145_v39, %v3145_v39 }
 0x1ee   : > { %v3146_v21 = vld [vmem:[#allocation3 + $0xb0] sm:$0xff]  ;;  %v2797_v3 = vpack.c.bf16 %v2765_v9, %v2765_v9  ;;  %v4016_v51 = vpop.permute.xlu2 %4015  ;;  %v2469_v22 = vsel %vm2441_vm9, %v2436_v52, %v2190_v43  ;;  %v3391_v60 = vpack.c.b16 %v3360_v31, %v3359_v5  ;;  %v3241_v44 = vpack.c.bf16 %v10660_v25, %v10660_v25 }
 0x1ef   : > { %4944 = vst.msk [vmem:[#allocation3 + $0xb0] sm:$0xff] %vm2309_vm3, %v13120_v13  ;;  %v3904_v46 = vpop.permute.xlu1 %3903  ;;  %v2644_v56 = vmax.f32 %v2586_v35, 0.0  ;;  %8858 = vmatmul.msk.bf16.gmra.mxu0 %vm2504_vm10, %v2469_v22  ;;  %v10693_v38 = vpack.c.b16 %v4202_v37, %v4201_v40  ;;  %v3178_v52 = vpack.c.bf16 %v3146_v21, %v3146_v21  ;;  %v4090_v40 = vunpack.c.l.b16 %v3242_v36 }
 0x1f0   : > { %v10690_v55 = vunpack.c.l.b16 %v2797_v3  ;;  %v3977_v37 = vunpack.c.l.b16 %v3177_v7  ;;  %v4370_v31 = vsel %vm2309_vm3, %v10390_v24, %v3904_v46 }
 0x1f1   : > { %2732 = vst.msk [vmem:[#allocation3 + $0xc1] sm:$0xff] %vm2309_vm3, %v2644_v56  ;;  %8938 = vmatmul.msk.bf16.gmra.mxu3 %vm2309_vm3, %v10693_v38  ;;  %v3978_v43 = vunpack.c.l.b16 %v3178_v52  ;;  %v4089_v56 = vunpack.c.l.b16 %v3241_v44 }
 0x1f3   : > { %v10714_v25 = vpack.c.b16 %v3978_v43, %v3977_v37  ;;  %v10720_v52 = vpack.c.b16 %v4090_v40, %v4089_v56 }
 0x1f4   : > { %3607 = vrot.lane.b32.xlu0 %v10386_v57, %s9327_s21  ;;  %3495 = vrot.lane.b32.xlu2 %v10514_v41, %s9326_s20  ;;  %v2587_v9 = vpop.f32.mrf.mxu0  ;;  %v702_v57 = vpack.c.bf16 %v670_v28, %v670_v28  ;;  %v703_v41 = vpack.c.bf16 %v671_v49, %v671_v49 }
 0x1f5   : > { %3719 = vrot.lane.b32.xlu1 %v10611_v23, %s9329_s30  ;;  %v3600_v3 = vpop.permute.xlu0 %3599  ;;  %v2588_v11 = vadd.f32 %v10597_v15, %v2587_v9 }
 0x1f6   : > { %v10708_v21 = vpop.permute.xlu2 %1855  ;;  %v1279_v36 = vunpack.c.l.b16 %v702_v57  ;;  %v1280_v28 = vunpack.c.l.b16 %v703_v41 }
 0x1f7   : > { %v3488_v35 = vpop.permute.xlu1 %3487  ;;  %v2645_v39 = vmax.f32 %v2588_v11, 0.0 }
 0x1f8   : > { %v4241_v22 = vsel %vm2309_vm3, %v3391_v60, %v3488_v35  ;;  %v3147_v9 = vld [vmem:[#allocation3 + $0xc0] sm:$0xff]  ;;  %v1297_v44 = vpack.c.b16 %v1280_v28, %v1279_v36 }
 0x1f9   : > { %v4288_v23 = vsel %vm2441_vm9, %v4241_v22, %v3600_v3  ;;  %2733 = vst.msk [vmem:[#allocation3 + $0xc9] sm:$0xff] %vm2309_vm3, %v2645_v39  ;;  %v3211_v11 = vld [vmem:[#allocation3 + $0xc1] sm:$0xff] }
 0x1fa   : > { %v4321_v5 = vsel %vm4319_vm12, %v4288_v23, %v10654_v53  ;;  %v4417_v53 = vsel %vm2441_vm9, %v4370_v31, %v4016_v51  ;;  %v10733_v43 = vld [vmem:[#allocation3 + $0xc1] sm:$0xff]  ;;  %v2239_v36 = vsel %vm553_vm0, %v1297_v44, %v10632_v10 }
 0x1fb   : > { %4663 = vmatmul.bf16.vlgmr.msra.gmra.mxu1 %v4321_v5  ;;  %v2766_v57 = vld [vmem:[#allocation3 + $0xc0] sm:$0xff] }
 0x1fc   : > { %4025 = vrot.lane.b32.xlu0 %v10714_v25, %s9327_s21  ;;  %3913 = vrot.lane.b32.xlu2 %v10553_v29, %s9326_s20  ;;  %v2798_v31 = vpack.c.bf16 %v2766_v57, %v2766_v57 }
 0x1fd   : > { %4137 = vrot.lane.b32.xlu1 %v10720_v52, %s9329_s30  ;;  %v4128_v7 = vpop.permute.xlu0 %4127 }
 0x1fe   : > { %v10728_v60 = vpop.permute.xlu2 %2191  ;;  %v4449_v24 = vsel %vm4319_vm12, %v4417_v53, %v4128_v7  ;;  %v3179_v53 = vpack.c.bf16 %v3147_v9, %v3147_v9 }
 0x1ff   : > { %v1520_v46 = vpop.permute.xlu1 %1519  ;;  %v2590_v49 = vpop.f32.mrf.mxu0  ;;  %4752 = vmatmul.bf16.vlgmr.msra.gmra.mxu2 %v4449_v24 }
 0x200   : > { %v2591_v3 = vadd.f32 %v10597_v15, %v2590_v49  ;;  %v3275_v35 = vld [vmem:[#allocation3 + $0xc2] sm:$0xff]  ;;  %v3276_v40 = vld [vmem:[#allocation3 + $0xca] sm:$0xff]  ;;  %v2273_v49 = vsel %vm2243_vm4, %v2239_v36, %v1520_v46 }
 0x201   : > { %v3148_v41 = vld [vmem:[#allocation3 + $0xc8] sm:$0xff]  ;;  %v3307_v37 = vpack.c.bf16 %v3275_v35, %v3275_v35  ;;  %v3308_v22 = vpack.c.bf16 %v3276_v40, %v3276_v40  ;;  %4946 = vst.msk [vmem:[#allocation3 + $0xc0] sm:$0xff] %vm2309_vm3, %v13120_v13  ;;  %v10757_v40 = vunpack.c.l.b16 %v2798_v31  ;;  %v3041_v31 = vpack.c.bf16 %v10200_v30, %v10200_v30 }
 0x202   : > { %v2646_v39 = vmax.f32 %v2591_v3, 0.0  ;;  %v3180_v51 = vpack.c.bf16 %v3148_v41, %v3148_v41  ;;  %v3212_v23 = vld [vmem:[#allocation3 + $0xc9] sm:$0xff]  ;;  %v3243_v3 = vpack.c.bf16 %v3211_v11, %v3211_v11  ;;  %v3979_v41 = vunpack.c.l.b16 %v3179_v53 }
 0x203   : > { %v3244_v56 = vpack.c.bf16 %v3212_v23, %v3212_v23  ;;  %v2767_v5 = vld [vmem:[#allocation3 + $0xc8] sm:$0xff]  ;;  %v4203_v28 = vunpack.c.l.b16 %v3307_v37  ;;  %v4204_v7 = vunpack.c.l.b16 %v3308_v22 }
 0x204   : > { %3609 = vrot.lane.b32.xlu0 %v10451_v20, %s9327_s21  ;;  %3497 = vrot.lane.b32.xlu2 %v10615_v4, %s9326_s20  ;;  %2734 = vst.msk [vmem:[#allocation3 + $0xd9] sm:$0xff] %vm2309_vm3, %v2646_v39  ;;  %v10744_v24 = vld [vmem:[#allocation3 + $0xc9] sm:$0xff]  ;;  %v2799_v20 = vpack.c.bf16 %v2767_v5, %v2767_v5  ;;  %v3980_v57 = vunpack.c.l.b16 %v3180_v51  ;;  %v4091_v22 = vunpack.c.l.b16 %v3243_v3  ;;  %v3778_v3 = vunpack.c.l.b16 %v3041_v31 }
 0x205   : > { %3721 = vrot.lane.b32.xlu1 %v10658_v1, %s9329_s30  ;;  %4948 = vst.msk [vmem:[#allocation3 + $0xd0] sm:$0x3] %vm2664_vm11, %v13120_v13  ;;  %v1632_v10 = vpop.permute.xlu0 %1631  ;;  %v10753_v4 = vpack.c.b16 %v4204_v7, %v4203_v28  ;;  %v4092_v46 = vunpack.c.l.b16 %v3244_v56  ;;  %v3040_v28 = vpack.c.bf16 %v10192_v27, %v10192_v27 }
 0x206   : > { %v10751_v44 = vpop.permute.xlu2 %4129  ;;  %4947 = vst.msk [vmem:[#allocation3 + $0xc8] sm:$0xff] %vm2309_vm3, %v13120_v13  ;;  %v10759_v1 = vunpack.c.l.b16 %v2799_v20  ;;  %v2306_v11 = vsel %vm2276_vm5, %v2273_v49, %v1632_v10  ;;  %v10768_v23 = vpack.c.b16 %v3980_v57, %v3979_v41 }
 0x207   : > { %v1744_v9 = vpop.permute.xlu1 %1743  ;;  %v2592_v35 = vpop.f32.mrf.mxu0  ;;  %8939 = vmatmul.msk.bf16.gmra.mxu3 %vm2309_vm3, %v10753_v4  ;;  %v10770_v5 = vpack.c.b16 %v4092_v46, %v4091_v22 }
 0x208   : > { %v2593_v39 = vadd.f32 %v10597_v15, %v2592_v35  ;;  %v2339_v37 = vsel %vm2309_vm3, %v2306_v11, %v1744_v9  ;;  %v3777_v9 = vunpack.c.l.b16 %v3040_v28 }
 0x209   : > { %v2372_v36 = vsel %vm2342_vm6, %v2339_v37, %v10708_v21 }
 0x20a   : > { %v2647_v56 = vmax.f32 %v2593_v39, 0.0  ;;  %v3808_v11 = vpack.c.b16 %v3778_v3, %v3777_v9 }
 0x20b   : > { %v3149_v20 = vld [vmem:[#allocation3 + $0xd8] sm:$0xff] }
 0x20c   : > { %4027 = vrot.lane.b32.xlu0 %v10768_v23, %s9327_s21  ;;  %3915 = vrot.lane.b32.xlu2 %v10693_v38, %s9326_s20  ;;  %2735 = vst.msk [vmem:[#allocation3 + $0xe1] sm:$0xff] %vm2309_vm3, %v2647_v56  ;;  %v2768_v57 = vld [vmem:[#allocation3 + $0xd8] sm:$0xff]  ;;  %v3181_v35 = vpack.c.bf16 %v3149_v20, %v3149_v20 }
 0x20d   : > { %4139 = vrot.lane.b32.xlu1 %v10770_v5, %s9329_s30  ;;  %v1968_v7 = vpop.permute.xlu0 %1967  ;;  %v3213_v46 = vld [vmem:[#allocation3 + $0xd9] sm:$0xff]  ;;  %v2800_v22 = vpack.c.bf16 %v2768_v57, %v2768_v57 }
 0x20e   : > { %v10785_v53 = vpop.permute.xlu2 %3601  ;;  %v2405_v30 = vsel %vm2375_vm7, %v2372_v36, %v1968_v7  ;;  %v10792_v27 = vld [vmem:[#allocation3 + $0xd9] sm:$0xff]  ;;  %v3981_v57 = vunpack.c.l.b16 %v3181_v35 }
 0x20f   : > { %v2080_v49 = vpop.permute.xlu1 %2079 }
 0x210   : > { %v2438_v10 = vsel %vm2408_vm8, %v2405_v30, %v2080_v49  ;;  %v3245_v30 = vpack.c.bf16 %v3213_v46, %v3213_v46 }
 0x211   : > { %v2471_v21 = vsel %vm2441_vm9, %v2438_v10, %v10728_v60 }
 0x212   : > { %8859 = vmatmul.msk.bf16.gmra.mxu0 %vm2504_vm10, %v2471_v21 }
 0x213   : > { %v3277_v41 = vld [vmem:[#allocation3 + $0xda] sm:$0xff]  ;;  %v3278_v39 = vld [vmem:[#allocation3 + $0xe2] sm:$0xff] }
 0x214   : > { %v3150_v37 = vld [vmem:[#allocation3 + $0xe0] sm:$0xff]  ;;  %3611 = vrot.lane.b32.xlu0 %v10553_v29, %s9327_s21  ;;  %3499 = vrot.lane.b32.xlu2 %v10662_v33, %s9326_s20  ;;  %v3309_v56 = vpack.c.bf16 %v3277_v41, %v3277_v41  ;;  %v3310_v31 = vpack.c.bf16 %v3278_v39, %v3278_v39  ;;  %4949 = vst.msk [vmem:[#allocation3 + $0xd8] sm:$0xff] %vm2309_vm3, %v13120_v13  ;;  %v10811_v39 = vunpack.c.l.b16 %v2800_v22 }
 0x215   : > { %v3182_v60 = vpack.c.bf16 %v3150_v37, %v3150_v37  ;;  %v3214_v36 = vld [vmem:[#allocation3 + $0xe1] sm:$0xff]  ;;  %3723 = vrot.lane.b32.xlu1 %v10714_v25, %s9329_s30  ;;  %v3906_v3 = vpop.permute.xlu0 %3905 }
 0x216   : > { %v10798_v28 = vld [vmem:[#allocation3 + $0xe1] sm:$0xff]  ;;  %v3246_v49 = vpack.c.bf16 %v3214_v36, %v3214_v36  ;;  %v10806_v33 = vpop.permute.xlu2 %1633  ;;  %v4205_v20 = vunpack.c.l.b16 %v3309_v56  ;;  %v4206_v10 = vunpack.c.l.b16 %v3310_v31  ;;  %v4373_v21 = vsel %vm2309_vm3, %v3808_v11, %v3906_v3  ;;  %v2595_v41 = vpop.f32.mrf.mxu0  ;;  %v672_v11 = vld [vmem:[#allocation2 + $0x168] sm:$0xff] }
 0x217   : > { %v2769_v7 = vld [vmem:[#allocation3 + $0xe0] sm:$0xff]  ;;  %4951 = vst.msk [vmem:[#allocation3 + $0xe8] sm:$0x3] %vm2664_vm11, %v13120_v13  ;;  %v3982_v9 = vunpack.c.l.b16 %v3182_v60  ;;  %v4018_v25 = vpop.permute.xlu1 %4017  ;;  %v2596_v36 = vadd.f32 %v10597_v15, %v2595_v41  ;;  %v4093_v60 = vunpack.c.l.b16 %v3245_v30 }
 0x218   : > { %v2801_v29 = vpack.c.bf16 %v2769_v7, %v2769_v7  ;;  %4950 = vst.msk [vmem:[#allocation3 + $0xe0] sm:$0xff] %vm2309_vm3, %v13120_v13  ;;  %v4094_v46 = vunpack.c.l.b16 %v3246_v49  ;;  %v4419_v7 = vsel %vm2441_vm9, %v4373_v21, %v4018_v25  ;;  %v10817_v56 = vpack.c.b16 %v4206_v10, %v4205_v20  ;;  %v673_v3 = vld [vmem:[#allocation2 + $0x170] sm:$0xff]  ;;  %v519_v21 = vld [vmem:[%s13102_s5] sm:$0xf] }
 0x219   : > { %v10819_v35 = vpack.c.b16 %v3982_v9, %v3981_v57  ;;  %v4452_v31 = vsel %vm4319_vm12, %v4419_v7, %v10751_v44  ;;  %v2648_v49 = vmax.f32 %v2596_v36, 0.0  ;;  %v704_v44 = vpack.c.bf16 %v672_v11, %v672_v11 }
 0x21a   : > { %v10813_v37 = vunpack.c.l.b16 %v2801_v29  ;;  %4757 = vmatmul.bf16.gmra.mxu2 %v4452_v31  ;;  %8940 = vmatmul.msk.bf16.gmra.mxu3 %vm2309_vm3, %v10817_v56  ;;  %v10827_v29 = vpack.c.b16 %v4094_v46, %v4093_v60  ;;  %v705_v30 = vpack.c.bf16 %v673_v3, %v673_v3  ;;  %v6149_v36 = vsel %vm2537_vm2, %v519_v21, 0 }
 0x21b   : > { %2736 = vst.msk [vmem:[#allocation3 + $0xf1] sm:$0xff] %vm2309_vm3, %v2648_v49  ;;  %v1281_v25 = vunpack.c.l.b16 %v704_v44  ;;  %6158 = vmatpush.bf16.msrb.mxu3 %v6149_v36  ;;  %v13140_v31 = vpack.c.b16 %v10186_v14, %v10194_v8  ;;  %vm6026_vm2 = vcmask 1045509  }
 0x21c   : > { %3917 = vrot.lane.b32.xlu2 %v10753_v4, %s9326_s20  ;;  %4029 = vrot.lane.b32.xlu0 %v10819_v35, %s9327_s21  ;;  %v1282_v46 = vunpack.c.l.b16 %v705_v30 }
 0x21d   : > { %4141 = vrot.lane.b32.xlu1 %v10827_v29, %s9329_s30  ;;  %v3490_v10 = vpop.permute.xlu0 %3489 }
 0x21e   : > { %v10836_v20 = vpop.permute.xlu2 %1969  ;;  %v2597_v57 = vpop.f32.mrf.mxu0  ;;  %v4244_v60 = vsel %vm2309_vm3, %v13140_v31, %v3490_v10  ;;  %v1298_v11 = vpack.c.b16 %v1282_v46, %v1281_v25 }
 0x21f   : > { %v1410_v9 = vpop.permute.xlu1 %1409  ;;  %v2598_v41 = vadd.f32 %v10597_v15, %v2597_v57  ;;  %v4290_v8 = vsel %vm2441_vm9, %v4244_v60, %v10785_v53 }
 0x221   : > { %v2649_v7 = vmax.f32 %v2598_v41, 0.0 }
 0x222   : > { %v3215_v44 = vld [vmem:[#allocation3 + $0xf1] sm:$0xff] }
 0x223   : > { %2737 = vst.msk [vmem:[#allocation3 + $0xf9] sm:$0xff] %vm2309_vm3, %v2649_v7  ;;  %v3151_v30 = vld [vmem:[#allocation3 + $0xf0] sm:$0xff]  ;;  %v3247_v21 = vpack.c.bf16 %v3215_v44, %v3215_v44 }
 0x224   : > { %3501 = vrot.lane.b32.xlu2 %v10720_v52, %s9326_s20  ;;  %3613 = vrot.lane.b32.xlu0 %v10693_v38, %s9327_s21  ;;  %v2242_v52 = vsel %vm553_vm0, %v1298_v11, %v1410_v9  ;;  %v2770_v57 = vld [vmem:[#allocation3 + $0xf0] sm:$0xff]  ;;  %v3183_v38 = vpack.c.bf16 %v3151_v30, %v3151_v30 }
 0x225   : > { %3725 = vrot.lane.b32.xlu1 %v10768_v23, %s9329_s30  ;;  %v1522_v49 = vpop.permute.xlu0 %1521  ;;  %v2802_v36 = vpack.c.bf16 %v2770_v57, %v2770_v57  ;;  %v4095_v44 = vunpack.c.l.b16 %v3247_v21 }
 0x226   : > { %v10854_v3 = vpop.permute.xlu2 %3907  ;;  %v2275_v41 = vsel %vm2243_vm4, %v2242_v52, %v1522_v49  ;;  %vm6029_vm4 = vcmask 1046534  }
 0x227   : > { %v3714_v14 = vpop.permute.xlu1 %3713  ;;  %v2308_v21 = vsel %vm2276_vm5, %v2275_v41, %v10806_v33  ;;  %v3043_v41 = vpack.c.bf16 %v10282_v62, %v10282_v62  ;;  %vm6032_vm5 = vcmask 1047559  }
 0x228   : > { %v4324_v10 = vsel %vm4319_vm12, %v4290_v8, %v3714_v14  ;;  %v3983_v14 = vunpack.c.l.b16 %v3183_v38 }
 0x229   : > { %4668 = vmatmul.bf16.gmra.mxu1 %v4324_v10 }
 0x22a   : > { %v3279_v23 = vld [vmem:[#allocation3 + $0xf2] sm:$0xff]  ;;  %v3280_v25 = vld [vmem:[#allocation3 + $0xfa] sm:$0xff] }
 0x22b   : > { %v3216_v46 = vld [vmem:[#allocation3 + $0xf9] sm:$0xff]  ;;  %v3311_v7 = vpack.c.bf16 %v3279_v23, %v3279_v23  ;;  %v3312_v31 = vpack.c.bf16 %v3280_v25, %v3280_v25  ;;  %4952 = vst.msk [vmem:[#allocation3 + $0xf0] sm:$0xff] %vm2309_vm3, %v13120_v13 }
 0x22c   : > { %3919 = vrot.lane.b32.xlu2 %v10817_v56, %s9326_s20  ;;  %v3248_v53 = vpack.c.bf16 %v3216_v46, %v3216_v46  ;;  %v3152_v60 = vld [vmem:[#allocation3 + $0xf8] sm:$0xff]  ;;  %4954 = vst.msk [vmem:[#allocation3 + $0x100] sm:$0x3] %vm2664_vm11, %v13120_v13  ;;  %v2600_v11 = vpop.f32.mrf.mxu0 }
 0x22d   : > { %v2771_v9 = vld [vmem:[#allocation3 + $0xf8] sm:$0xff]  ;;  %v3184_v30 = vpack.c.bf16 %v3152_v60, %v3152_v60  ;;  %v1746_v8 = vpop.permute.xlu0 %1745  ;;  %v2601_v10 = vadd.f32 %v10597_v15, %v2600_v11  ;;  %v4207_v57 = vunpack.c.l.b16 %v3311_v7  ;;  %v4208_v23 = vunpack.c.l.b16 %v3312_v31 }
 0x22e   : > { %v2803_v49 = vpack.c.bf16 %v2771_v9, %v2771_v9  ;;  %v10867_v52 = vpop.permute.xlu2 %3491  ;;  %v4096_v25 = vunpack.c.l.b16 %v3248_v53  ;;  %4953 = vst.msk [vmem:[#allocation3 + $0xf8] sm:$0xff] %vm2309_vm3, %v13120_v13  ;;  %v10874_v60 = vunpack.c.l.b16 %v2802_v36  ;;  %v2341_v22 = vsel %vm2309_vm3, %v2308_v21, %v1746_v8 }
 0x22f   : > { %v1858_v46 = vpop.permute.xlu1 %1857  ;;  %v3984_v38 = vunpack.c.l.b16 %v3184_v30  ;;  %v2650_v51 = vmax.f32 %v2601_v10, 0.0  ;;  %v10879_v19 = vpack.c.b16 %v4208_v23, %v4207_v57  ;;  %v3780_v8 = vunpack.c.l.b16 %v3043_v41 }
 0x230   : > { %v10876_v9 = vunpack.c.l.b16 %v2803_v49  ;;  %v10881_v7 = vpack.c.b16 %v4096_v25, %v4095_v44  ;;  %v2374_v31 = vsel %vm2342_vm6, %v2341_v22, %v1858_v46  ;;  %vm8658_vm6 = vcmask 1043458  }
 0x231   : > { %v10884_v53 = vpack.c.b16 %v3984_v38, %v3983_v14  ;;  %2738 = vst.msk [vmem:[#allocation3 + $0x109] sm:$0xff] %vm2309_vm3, %v2650_v51  ;;  %8941 = vmatmul.msk.bf16.gmra.mxu3 %vm2309_vm3, %v10879_v19  ;;  %v2407_v22 = vsel %vm2375_vm7, %v2374_v31, %v10836_v20  ;;  %v3042_v51 = vpack.c.bf16 %v10271_v45, %v10271_v45 }
 0x232   : > { %v3401_v33 = vpack.c.b16 %v10876_v9, %v10874_v60  ;;  %4143 = vrot.lane.b32.xlu1 %v10881_v7, %s9329_s30 }
 0x233   : > { %4031 = vrot.lane.b32.xlu0 %v10884_v53, %s9327_s21 }
 0x234   : > { %3503 = vrot.lane.b32.xlu2 %v10770_v5, %s9326_s20  ;;  %v2602_v36 = vpop.f32.mrf.mxu0  ;;  %v3779_v5 = vunpack.c.l.b16 %v3042_v51 }
 0x235   : > { %v2082_v11 = vpop.permute.xlu0 %2081  ;;  %v2603_v30 = vadd.f32 %v10597_v15, %v2602_v36 }
 0x236   : > { %v10903_v44 = vpop.permute.xlu2 %3909  ;;  %v2440_v14 = vsel %vm2408_vm8, %v2407_v22, %v2082_v11  ;;  %v3809_v45 = vpack.c.b16 %v3780_v8, %v3779_v5 }
 0x237   : > { %v2194_v49 = vpop.permute.xlu1 %2193  ;;  %v2651_v62 = vmax.f32 %v2603_v30, 0.0 }
 0x238   : > { %v2473_v10 = vsel %vm2441_vm9, %v2440_v14, %v2194_v49  ;;  %v3217_v20 = vld [vmem:[#allocation3 + $0x109] sm:$0xff]  ;;  %v4376_v57 = vsel %vm2309_vm3, %v3809_v45, %v10854_v3  ;;  %v3045_v45 = vpack.c.bf16 %v10376_v26, %v10376_v26  ;;  %v13141_v26 = vpack.c.b16 %v10227_v58, %v10234_v61 }
 0x239   : > { %8860 = vmatmul.msk.bf16.gmra.mxu0 %vm2504_vm10, %v2473_v10  ;;  %2739 = vst.msk [vmem:[#allocation3 + $0x111] sm:$0xff] %vm2309_vm3, %v2651_v62  ;;  %v3153_v21 = vld [vmem:[#allocation3 + $0x108] sm:$0xff]  ;;  %v3249_v22 = vpack.c.bf16 %v3217_v20, %v3217_v20 }
 0x23a   : > { %3727 = vrot.lane.b32.xlu1 %v10819_v35, %s9329_s30  ;;  %v2772_v46 = vld [vmem:[#allocation3 + $0x108] sm:$0xff]  ;;  %v3185_v30 = vpack.c.bf16 %v3153_v21, %v3153_v21  ;;  %v3782_v61 = vunpack.c.l.b16 %v3045_v45 }
 0x23b   : > { %3615 = vrot.lane.b32.xlu0 %v10753_v4, %s9327_s21  ;;  %v2804_v3 = vpack.c.bf16 %v2772_v46, %v2772_v46  ;;  %v4097_v46 = vunpack.c.l.b16 %v3249_v22 }
 0x23c   : > { %3921 = vrot.lane.b32.xlu2 %v10879_v19, %s9326_s20 }
 0x23e   : > { %v4020_v23 = vpop.permute.xlu0 %4019  ;;  %v10918_v25 = vpop.permute.xlu2 %3493 }
 0x23f   : > { %v4421_v38 = vsel %vm2441_vm9, %v4376_v57, %v4020_v23  ;;  %v2605_v31 = vpop.f32.mrf.mxu0  ;;  %v4132_v35 = vpop.permute.xlu1 %4131 }
 0x240   : > { %v2606_v41 = vadd.f32 %v10597_v15, %v2605_v31  ;;  %v4455_v4 = vsel %vm4319_vm12, %v4421_v38, %v4132_v35  ;;  %v3281_v36 = vld [vmem:[#allocation3 + $0x10a] sm:$0xff]  ;;  %v3282_v51 = vld [vmem:[#allocation3 + $0x112] sm:$0xff]  ;;  %v3985_v31 = vunpack.c.l.b16 %v3185_v30 }
 0x241   : > { %4762 = vmatmul.bf16.gmra.mxu2 %v4455_v4  ;;  %v3218_v11 = vld [vmem:[#allocation3 + $0x111] sm:$0xff]  ;;  %v3313_v49 = vpack.c.bf16 %v3281_v36, %v3281_v36  ;;  %v3314_v8 = vpack.c.bf16 %v3282_v51, %v3282_v51  ;;  %4955 = vst.msk [vmem:[#allocation3 + $0x108] sm:$0xff] %vm2309_vm3, %v13120_v13  ;;  %v3044_v36 = vpack.c.bf16 %v10355_v12, %v10355_v12 }
 0x242   : > { %v2652_v14 = vmax.f32 %v2606_v41, 0.0  ;;  %v3250_v62 = vpack.c.bf16 %v3218_v11, %v3218_v11  ;;  %v3154_v10 = vld [vmem:[#allocation3 + $0x110] sm:$0xff]  ;;  %4957 = vst.msk [vmem:[#allocation3 + $0x118] sm:$0x3] %vm2664_vm11, %v13120_v13  ;;  %v10932_v41 = vunpack.c.l.b16 %v2804_v3 }
 0x243   : > { %v2773_v5 = vld [vmem:[#allocation3 + $0x110] sm:$0xff]  ;;  %v3186_v57 = vpack.c.bf16 %v3154_v10, %v3154_v10  ;;  %v4209_v23 = vunpack.c.l.b16 %v3313_v49  ;;  %v4210_v21 = vunpack.c.l.b16 %v3314_v8 }
 0x244   : > { %v2805_v20 = vpack.c.bf16 %v2773_v5, %v2773_v5  ;;  %3505 = vrot.lane.b32.xlu2 %v10827_v29, %s9326_s20  ;;  %2740 = vst.msk [vmem:[#allocation3 + $0x121] sm:$0xff] %vm2309_vm3, %v2652_v14  ;;  %v4098_v38 = vunpack.c.l.b16 %v3250_v62  ;;  %v4247_v29 = vsel %vm2309_vm3, %v13141_v26, %v10867_v52  ;;  %v3781_v62 = vunpack.c.l.b16 %v3044_v36 }
 0x245   : > { %v3986_v35 = vunpack.c.l.b16 %v3186_v57  ;;  %4956 = vst.msk [vmem:[#allocation3 + $0x110] sm:$0xff] %vm2309_vm3, %v13120_v13  ;;  %v10947_v11 = vpack.c.b16 %v4210_v21, %v4209_v23  ;;  %v3046_v36 = vpack.c.bf16 %v10432_v63, %v10432_v63  ;;  %v13142_v63 = vpack.c.b16 %v10305_v32, %v10303_v18 }
 0x246   : > { %v10934_v4 = vunpack.c.l.b16 %v2805_v20  ;;  %v3604_v22 = vpop.permute.xlu0 %3603  ;;  %v10945_v51 = vpop.permute.xlu2 %3911  ;;  %v10949_v30 = vpack.c.b16 %v4098_v38, %v4097_v46  ;;  %v3810_v5 = vpack.c.b16 %v3782_v61, %v3781_v62 }
 0x247   : > { %v4292_v3 = vsel %vm2441_vm9, %v4247_v29, %v3604_v22  ;;  %v10952_v14 = vpack.c.b16 %v3986_v35, %v3985_v31  ;;  %v2607_v49 = vpop.f32.mrf.mxu0  ;;  %v3716_v8 = vpop.permute.xlu1 %3715  ;;  %8942 = vmatmul.msk.bf16.gmra.mxu3 %vm2309_vm3, %v10947_v11  ;;  %v3047_v31 = vpack.c.bf16 %v10436_v48, %v10436_v48  ;;  %v4250_v62 = vsel %vm2309_vm3, %v13142_v63, %v10918_v25 }
 0x248   : > { %4145 = vrot.lane.b32.xlu1 %v10949_v30, %s9329_s30  ;;  %v2608_v12 = vadd.f32 %v10597_v15, %v2607_v49  ;;  %v4327_v52 = vsel %vm4319_vm12, %v4292_v3, %v3716_v8  ;;  %v4379_v45 = vsel %vm2309_vm3, %v3810_v5, %v10903_v44 }
 0x249   : > { %4033 = vrot.lane.b32.xlu0 %v10952_v14, %s9327_s21  ;;  %4673 = vmatmul.bf16.gmra.mxu1 %v4327_v52  ;;  %v3784_v48 = vunpack.c.l.b16 %v3047_v31 }
 0x24a   : > { %v2653_v10 = vmax.f32 %v2608_v12, 0.0 }
 0x24b   : > { %v3219_v23 = vld [vmem:[#allocation3 + $0x121] sm:$0xff] }
 0x24c   : > { %3923 = vrot.lane.b32.xlu2 %v10947_v11, %s9326_s20  ;;  %2741 = vst.msk [vmem:[#allocation3 + $0x129] sm:$0xff] %vm2309_vm3, %v2653_v10  ;;  %v3155_v38 = vld [vmem:[#allocation3 + $0x120] sm:$0xff]  ;;  %v3251_v44 = vpack.c.bf16 %v3219_v23, %v3219_v23 }
 0x24d   : > { %v2774_v26 = vld [vmem:[#allocation3 + $0x120] sm:$0xff]  ;;  %v3187_v29 = vpack.c.bf16 %v3155_v38, %v3155_v38 }
 0x24e   : > { %v4022_v57 = vpop.permute.xlu0 %4021  ;;  %v10969_v20 = vpop.permute.xlu2 %3495  ;;  %v2806_v8 = vpack.c.bf16 %v2774_v26, %v2774_v26  ;;  %v4099_v10 = vunpack.c.l.b16 %v3251_v44 }
 0x24f   : > { %v4423_v21 = vsel %vm2441_vm9, %v4379_v45, %v4022_v57  ;;  %v4134_v46 = vpop.permute.xlu1 %4133  ;;  %v3987_v31 = vunpack.c.l.b16 %v3187_v29 }
 0x250   : > { %3729 = vrot.lane.b32.xlu1 %v10884_v53, %s9329_s30  ;;  %v4458_v35 = vsel %vm4319_vm12, %v4423_v21, %v4134_v46  ;;  %v10997_v26 = vunpack.c.l.b16 %v2806_v8  ;;  %v3783_v8 = vunpack.c.l.b16 %v3046_v36 }
 0x251   : > { %3617 = vrot.lane.b32.xlu0 %v10817_v56, %s9327_s21  ;;  %4767 = vmatmul.bf16.gmra.mxu2 %v4458_v35 }
 0x253   : > { %v3283_v22 = vld [vmem:[#allocation3 + $0x122] sm:$0xff]  ;;  %v3284_v3 = vld [vmem:[#allocation3 + $0x12a] sm:$0xff] }
 0x254   : > { %v3220_v49 = vld [vmem:[#allocation3 + $0x129] sm:$0xff]  ;;  %3507 = vrot.lane.b32.xlu2 %v10881_v7, %s9326_s20  ;;  %v3315_v53 = vpack.c.bf16 %v3283_v22, %v3283_v22  ;;  %v3316_v61 = vpack.c.bf16 %v3284_v3, %v3284_v3  ;;  %4958 = vst.msk [vmem:[#allocation3 + $0x120] sm:$0xff] %vm2309_vm3, %v13120_v13  ;;  %v11001_v22 = vpop.f32.mrf.mxu3 }
 0x255   : > { %v3252_v12 = vpack.c.bf16 %v3220_v49, %v3220_v49  ;;  %v3156_v52 = vld [vmem:[#allocation3 + $0x128] sm:$0xff]  ;;  %4960 = vst.msk [vmem:[#allocation3 + $0x130] sm:$0x3] %vm2664_vm11, %v13120_v13 }
 0x256   : > { %v2775_v56 = vld [vmem:[#allocation3 + $0x128] sm:$0xff]  ;;  %v3188_v5 = vpack.c.bf16 %v3156_v52, %v3156_v52  ;;  %v3606_v57 = vpop.permute.xlu0 %3605  ;;  %v10992_v23 = vpop.permute.xlu2 %3913  ;;  %v4211_v21 = vunpack.c.l.b16 %v3315_v53  ;;  %v4212_v46 = vunpack.c.l.b16 %v3316_v61 }
 0x257   : > { %v2807_v45 = vpack.c.bf16 %v2775_v56, %v2775_v56  ;;  %v4100_v38 = vunpack.c.l.b16 %v3252_v12  ;;  %4959 = vst.msk [vmem:[#allocation3 + $0x128] sm:$0xff] %vm2309_vm3, %v13120_v13  ;;  %v4294_v18 = vsel %vm2441_vm9, %v4250_v62, %v3606_v57  ;;  %v2610_v32 = vpop.f32.mrf.mxu0  ;;  %v3718_v25 = vpop.permute.xlu1 %3717  ;;  %v3811_v56 = vpack.c.b16 %v3784_v48, %v3783_v8 }
 0x258   : > { %v3988_v35 = vunpack.c.l.b16 %v3188_v5  ;;  %v2611_v3 = vadd.f32 %v10597_v15, %v2610_v32  ;;  %v4330_v49 = vsel %vm4319_vm12, %v4294_v18, %v3718_v25  ;;  %v11005_v53 = vpack.c.b16 %v4212_v46, %v4211_v21 }
 0x259   : > { %v10999_v44 = vunpack.c.l.b16 %v2807_v45  ;;  %v11007_v29 = vpack.c.b16 %v4100_v38, %v4099_v10  ;;  %4678 = vmatmul.bf16.gmra.mxu1 %v4330_v49  ;;  %v4382_v63 = vsel %vm2309_vm3, %v3811_v56, %v10945_v51  ;;  %v3049_v51 = vpack.c.bf16 %v10536_v47, %v10536_v47  ;;  %v13143_v38 = vld [vmem:[#allocation5_spill] sm:$0xff] }
 0x25a   : > { %v11009_v61 = vpack.c.b16 %v3988_v35, %v3987_v31  ;;  %v2654_v52 = vmax.f32 %v2611_v3, 0.0  ;;  %8943 = vmatmul.msk.bf16.gmra.mxu3 %vm2309_vm3, %v11005_v53  ;;  %v13144_v31 = vld [vmem:[#allocation6_spill] sm:$0xff] }
 0x25b   : > { %4147 = vrot.lane.b32.xlu1 %v11007_v29, %s9329_s30  ;;  %v13145_v18 = vpack.c.b16 %v13143_v38, %v13144_v31  ;;  %v3786_v47 = vunpack.c.l.b16 %v3049_v51 }
 0x25c   : > { %4035 = vrot.lane.b32.xlu0 %v11009_v61, %s9327_s21  ;;  %2742 = vst.msk [vmem:[#allocation3 + $0x139] sm:$0xff] %vm2309_vm3, %v2654_v52  ;;  %3925 = vrot.lane.b32.xlu2 %v11005_v53, %s9326_s20  ;;  %v11029_v48 = vpop.f32.mrf.mxu3 }
 0x25e   : > { %v4024_v36 = vpop.permute.xlu0 %4023  ;;  %v11025_v45 = vpop.permute.xlu2 %3497 }
 0x25f   : > { %v4425_v62 = vsel %vm2441_vm9, %v4382_v63, %v4024_v36  ;;  %v2612_v10 = vpop.f32.mrf.mxu0  ;;  %v4136_v5 = vpop.permute.xlu1 %4135 }
 0x260   : > { %v2613_v57 = vadd.f32 %v10597_v15, %v2612_v10  ;;  %v4461_v21 = vsel %vm4319_vm12, %v4425_v62, %v4136_v5  ;;  %v3048_v15 = vpack.c.bf16 %v10525_v42, %v10525_v42 }
 0x261   : > { %4772 = vmatmul.bf16.gmra.mxu2 %v4461_v21 }
 0x262   : > { %v2655_v46 = vmax.f32 %v2613_v57, 0.0  ;;  %v3785_v8 = vunpack.c.l.b16 %v3048_v15 }
 0x263   : > { %3731 = vrot.lane.b32.xlu1 %v10952_v14, %s9329_s30  ;;  %v4253_v14 = vsel %vm2309_vm3, %v13145_v18, %v10969_v20  ;;  %v3221_v25 = vld [vmem:[#allocation3 + $0x139] sm:$0xff] }
 0x264   : > { %3619 = vrot.lane.b32.xlu0 %v10879_v19, %s9327_s21  ;;  %2743 = vst.msk [vmem:[#allocation3 + $0x141] sm:$0xff] %vm2309_vm3, %v2655_v46  ;;  %3509 = vrot.lane.b32.xlu2 %v10949_v30, %s9326_s20  ;;  %v3157_v49 = vld [vmem:[#allocation3 + $0x138] sm:$0xff]  ;;  %v3253_v52 = vpack.c.bf16 %v3221_v25, %v3221_v25  ;;  %v11049_v56 = vpop.f32.mrf.mxu3  ;;  %v3812_v63 = vpack.c.b16 %v3786_v47, %v3785_v8 }
 0x265   : > { %v3189_v20 = vpack.c.bf16 %v3157_v49, %v3157_v49 }
 0x266   : > { %v3608_v32 = vpop.permute.xlu0 %3607  ;;  %v3916_v42 = vpop.permute.xlu2 %3915  ;;  %v4385_v51 = vsel %vm2309_vm3, %v3812_v63, %v10992_v23  ;;  %v4101_v38 = vunpack.c.l.b16 %v3253_v52 }
 0x267   : > { %v4296_v35 = vsel %vm2441_vm9, %v4253_v14, %v3608_v32  ;;  %v3720_v19 = vpop.permute.xlu1 %3719  ;;  %v11060_v14 = vld [vmem:[%s13099_s2] ss:$0 sm:$0xff] }
 0x268   : > { %v4333_v3 = vsel %vm4319_vm12, %v4296_v35, %v3720_v19 }
 0x269   : > { %4683 = vmatmul.bf16.gmra.mxu1 %v4333_v3  ;;  %v3989_v3 = vunpack.c.l.b16 %v3189_v20  ;;  %v3051_v20 = vpack.c.bf16 %v10676_v34, %v10676_v34 }
 0x26b   : > { %v3285_v36 = vld [vmem:[#allocation3 + $0x13a] sm:$0xff]  ;;  %v3286_v62 = vld [vmem:[#allocation3 + $0x142] sm:$0xff] }
 0x26c   : > { %v3222_v10 = vld [vmem:[#allocation3 + $0x141] sm:$0xff]  ;;  %v3317_v5 = vpack.c.bf16 %v3285_v36, %v3285_v36  ;;  %v3318_v57 = vpack.c.bf16 %v3286_v62, %v3286_v62  ;;  %v2615_v15 = vpop.f32.mrf.mxu0  ;;  %4961 = vst.msk [vmem:[#allocation3 + $0x138] sm:$0xff] %vm2309_vm3, %v13120_v13 }
 0x26d   : > { %v3254_v21 = vpack.c.bf16 %v3222_v10, %v3222_v10  ;;  %v3158_v46 = vld [vmem:[#allocation3 + $0x140] sm:$0xff]  ;;  %4963 = vst.msk [vmem:[#allocation3 + $0x148] sm:$0x3] %vm2664_vm11, %v13120_v13  ;;  %v2616_v32 = vadd.f32 %v11060_v14, %v2615_v15  ;;  %v11082_v10 = vpop.f32.mrf.mxu3 }
 0x26e   : > { %v3190_v31 = vpack.c.bf16 %v3158_v46, %v3158_v46  ;;  %v4026_v18 = vpop.permute.xlu0 %4025  ;;  %v4213_v25 = vunpack.c.l.b16 %v3317_v5  ;;  %v4214_v47 = vunpack.c.l.b16 %v3318_v57  ;;  %4962 = vst.msk [vmem:[#allocation3 + $0x140] sm:$0xff] %vm2309_vm3, %v13120_v13  ;;  %v3500_v5 = vpop.permute.xlu2 %3499  ;;  %v3050_v46 = vpack.c.bf16 %v10668_v6, %v10668_v6 }
 0x26f   : > { %v4102_v35 = vunpack.c.l.b16 %v3254_v21  ;;  %v4427_v23 = vsel %vm2441_vm9, %v4385_v51, %v4026_v18  ;;  %v4138_v19 = vpop.permute.xlu1 %4137  ;;  %v2656_v8 = vmax.f32 %v2616_v32, 0.0  ;;  %v4256_v21 = vsel %vm2309_vm3, %v3396_v17, %v11025_v45 }
 0x270   : > { %v3990_v49 = vunpack.c.l.b16 %v3190_v31  ;;  %v11066_v52 = vpack.c.b16 %v4214_v47, %v4213_v25  ;;  %v4464_v36 = vsel %vm4319_vm12, %v4427_v23, %v4138_v19  ;;  %v3788_v18 = vunpack.c.l.b16 %v3051_v20 }
 0x271   : > { %v11068_v63 = vpack.c.b16 %v4102_v35, %v4101_v38  ;;  %4777 = vmatmul.bf16.gmra.mxu2 %v4464_v36  ;;  %2744 = vst.msk [vmem:[#allocation3 + $0x151] sm:$0xff] %vm2309_vm3, %v2656_v8  ;;  %v3787_v25 = vunpack.c.l.b16 %v3050_v46  ;;  %v3052_v36 = vpack.c.bf16 %v10733_v43, %v10733_v43 }
 0x272   : > { %v11071_v62 = vpack.c.b16 %v3990_v49, %v3989_v3  ;;  %8944 = vmatmul.msk.bf16.gmra.mxu3 %vm2309_vm3, %v11066_v52  ;;  %3927 = vrot.lane.b32.xlu2 %v11066_v52, %s9326_s20 }
 0x273   : > { %4149 = vrot.lane.b32.xlu1 %v11068_v63, %s9329_s30  ;;  %v3813_v50 = vpack.c.b16 %v3788_v18, %v3787_v25 }
 0x274   : > { %13146 = vst [vmem:[#allocation5_spill] sm:$0xff] %v11071_v62  ;;  %4037 = vrot.lane.b32.xlu0 %v11071_v62, %s9327_s21  ;;  %v2617_v57 = vpop.f32.mrf.mxu0 }
 0x275   : > { %v2618_v15 = vadd.f32 %v11060_v14, %v2617_v57  ;;  %v11103_v54 = vpop.f32.mrf.mxu3  ;;  %v4388_v45 = vsel %vm2309_vm3, %v3813_v50, %v3916_v42 }
 0x276   : > { %v3610_v51 = vpop.permute.xlu0 %3609  ;;  %v11106_v47 = vpop.permute.xlu2 %3917 }
 0x277   : > { %v4298_v38 = vsel %vm2441_vm9, %v4256_v21, %v3610_v51  ;;  %v3722_v31 = vpop.permute.xlu1 %3721  ;;  %v2657_v32 = vmax.f32 %v2618_v15, 0.0 }
 0x278   : > { %v4336_v34 = vsel %vm4319_vm12, %v4298_v38, %v3722_v31  ;;  %v3223_v17 = vld [vmem:[#allocation3 + $0x151] sm:$0xff]  ;;  %v4664_v6 = vpop.f32.mrf.mxu1 }
 0x279   : > { %4688 = vmatmul.bf16.gmra.mxu1 %v4336_v34  ;;  %2745 = vst.msk [vmem:[#allocation3 + $0x159] sm:$0xff] %vm2309_vm3, %v2657_v32  ;;  %v3159_v23 = vld [vmem:[#allocation3 + $0x150] sm:$0xff]  ;;  %v3255_v49 = vpack.c.bf16 %v3223_v17, %v3223_v17  ;;  %v3053_v34 = vpack.c.bf16 %v10744_v24, %v10744_v24 }
 0x27a   : > { %3511 = vrot.lane.b32.xlu2 %v11007_v29, %s9326_s20  ;;  %v3191_v21 = vpack.c.bf16 %v3159_v23, %v3159_v23 }
 0x27b   : > { %3733 = vrot.lane.b32.xlu1 %v11009_v61, %s9329_s30  ;;  %v11111_v61 = vld [vmem:[%s13101_s4] ss:$0 sm:$0xff]  ;;  %v4103_v25 = vunpack.c.l.b16 %v3255_v49  ;;  %v4259_v49 = vsel %vm2309_vm3, %v3397_v16, %v3500_v5  ;;  %v3789_v16 = vunpack.c.l.b16 %v3052_v36 }
 0x27c   : > { %3621 = vrot.lane.b32.xlu0 %v10947_v11, %s9327_s21  ;;  %v2778_v11 = vld [vmem:[#allocation3 + $0x150] sm:$0xff]  ;;  %v4665_v51 = vadd.f32 %v11111_v61, %v4664_v6 }
 0x27d   : > { %v2810_v46 = vpack.c.bf16 %v2778_v11, %v2778_v11  ;;  %v3991_v11 = vunpack.c.l.b16 %v3191_v21  ;;  %v11130_v24 = vpop.f32.mrf.mxu3 }
 0x27e   : > { %v4028_v35 = vpop.permute.xlu0 %4027  ;;  %v3502_v0 = vpop.permute.xlu2 %3501 }
 0x27f   : > { %v4429_v19 = vsel %vm2441_vm9, %v4388_v45, %v4028_v35  ;;  %v4140_v3 = vpop.permute.xlu1 %4139 }
 0x280   : > { %v4467_v8 = vsel %vm4319_vm12, %v4429_v19, %v4140_v3  ;;  %v3287_v42 = vld [vmem:[#allocation3 + $0x152] sm:$0xff]  ;;  %v3288_v20 = vld [vmem:[#allocation3 + $0x15a] sm:$0xff]  ;;  %v11126_v3 = vunpack.c.l.b16 %v2810_v46  ;;  %v4666_v46 = vpop.f32.mrf.mxu1 }
 0x281   : > { %4782 = vmatmul.bf16.gmra.mxu2 %v4467_v8  ;;  %v3224_v57 = vld [vmem:[#allocation3 + $0x159] sm:$0xff]  ;;  %v3319_v15 = vpack.c.bf16 %v3287_v42, %v3287_v42  ;;  %v3320_v38 = vpack.c.bf16 %v3288_v20, %v3288_v20  ;;  %4964 = vst.msk [vmem:[#allocation3 + $0x150] sm:$0xff] %vm2309_vm3, %v13120_v13 }
 0x282   : > { %v3256_v31 = vpack.c.bf16 %v3224_v57, %v3224_v57  ;;  %v3160_v18 = vld [vmem:[#allocation3 + $0x158] sm:$0xff]  ;;  %4966 = vst.msk [vmem:[#allocation3 + $0x160] sm:$0x3] %vm2664_vm11, %v13120_v13  ;;  %v4753_v43 = vpop.f32.mrf.mxu2 }
 0x283   : > { %v2779_v32 = vld [vmem:[#allocation3 + $0x158] sm:$0xff]  ;;  %v3192_v50 = vpack.c.bf16 %v3160_v18, %v3160_v18  ;;  %v4754_v45 = vadd.f32 %v4753_v43, %v4665_v51  ;;  %v4215_v6 = vunpack.c.l.b16 %v3319_v15  ;;  %v4216_v35 = vunpack.c.l.b16 %v3320_v38  ;;  %13147 = vst [vmem:[#allocation6_spill] sm:$0xff] %v11126_v3 }
 0x284   : > { %v2811_v17 = vpack.c.bf16 %v2779_v32, %v2779_v32  ;;  %v4104_v23 = vunpack.c.l.b16 %v3256_v31  ;;  %4965 = vst.msk [vmem:[#allocation3 + $0x158] sm:$0xff] %vm2309_vm3, %v13120_v13  ;;  %v3790_v18 = vunpack.c.l.b16 %v3053_v34 }
 0x285   : > { %v3992_v19 = vunpack.c.l.b16 %v3192_v50  ;;  %v4843_v42 = vadd.f32 %v11001_v22, %v4754_v45  ;;  %v11137_v57 = vpack.c.b16 %v4216_v35, %v4215_v6  ;;  %v4667_v22 = vadd.f32 %v11111_v61, %v4666_v46  ;;  %v11157_v43 = vpop.f32.mrf.mxu3 }
 0x286   : > { %v11128_v8 = vunpack.c.l.b16 %v2811_v17  ;;  %v3612_v20 = vpop.permute.xlu0 %3611  ;;  %v11139_v51 = vpack.c.b16 %v4104_v23, %v4103_v25  ;;  %v3814_v32 = vpack.c.b16 %v3790_v18, %v3789_v16  ;;  %v3055_v18 = vpack.c.bf16 %v10798_v28, %v10798_v28 }
 0x287   : > { %v4300_v21 = vsel %vm2441_vm9, %v4259_v49, %v3612_v20  ;;  %v11142_v15 = vpack.c.b16 %v3992_v19, %v3991_v11  ;;  %v3724_v38 = vpop.permute.xlu1 %3723  ;;  %4976 = vst.msk [vmem:[#allocation3 + $0x19] sm:$0xff] %vm2309_vm3, %v4843_v42  ;;  %8945 = vmatmul.msk.bf16.gmra.mxu3 %vm2309_vm3, %v11137_v57  ;;  %3929 = vrot.lane.b32.xlu2 %v11137_v57, %s9326_s20 }
 0x288   : > { %13148 = vst [vmem:[#allocation7_spill] sm:$0xff] %v11128_v8  ;;  %4151 = vrot.lane.b32.xlu1 %v11139_v51, %s9329_s30  ;;  %v4339_v2 = vsel %vm4319_vm12, %v4300_v21, %v3724_v38  ;;  %v4391_v25 = vsel %vm2309_vm3, %v3814_v32, %v11106_v47  ;;  %v13149_v11 = vpack.c.b16 %v10690_v55, %v10688_v59 }
 0x289   : > { %4039 = vrot.lane.b32.xlu0 %v11142_v15, %s9327_s21  ;;  %4693 = vmatmul.bf16.gmra.mxu1 %v4339_v2  ;;  %v3054_v59 = vpack.c.bf16 %v10792_v27, %v10792_v27 }
 0x28a   : > { %v4755_v5 = vpop.f32.mrf.mxu2  ;;  %v4262_v19 = vsel %vm2309_vm3, %v13149_v11, %v3502_v0  ;;  %v3792_v0 = vunpack.c.l.b16 %v3055_v18 }
 0x28b   : > { %v4756_v34 = vadd.f32 %v4755_v5, %v4667_v22  ;;  %v3791_v32 = vunpack.c.l.b16 %v3054_v59 }
 0x28d   : > { %v4845_v50 = vadd.f32 %v11029_v48, %v4756_v34  ;;  %v3920_v48 = vpop.permute.xlu2 %3919  ;;  %v11178_v46 = vpop.f32.mrf.mxu3 }
 0x28e   : > { %v4030_v17 = vpop.permute.xlu0 %4029 }
 0x28f   : > { %v4431_v45 = vsel %vm2441_vm9, %v4391_v25, %v4030_v17  ;;  %v2620_v6 = vpop.f32.mrf.mxu0  ;;  %v4142_v35 = vpop.permute.xlu1 %4141  ;;  %4977 = vst.msk [vmem:[#allocation3 + $0x21] sm:$0xff] %vm2309_vm3, %v4845_v50  ;;  %3513 = vrot.lane.b32.xlu2 %v11068_v63, %s9326_s20  ;;  %v3815_v17 = vpack.c.b16 %v3792_v0, %v3791_v32 }
 0x290   : > { %3735 = vrot.lane.b32.xlu1 %v11071_v62, %s9329_s30  ;;  %v2621_v36 = vadd.f32 %v11060_v14, %v2620_v6  ;;  %v4470_v23 = vsel %vm4319_vm12, %v4431_v45, %v4142_v35 }
 0x291   : > { %3623 = vrot.lane.b32.xlu0 %v11005_v53, %s9327_s21  ;;  %4787 = vmatmul.bf16.gmra.mxu2 %v4470_v23 }
 0x292   : > { %v2658_v47 = vmax.f32 %v2621_v36, 0.0  ;;  %v4394_v36 = vsel %vm2309_vm3, %v3815_v17, %v3920_v48 }
 0x294   : > { %2746 = vst.msk [vmem:[#allocation3 + $0x169] sm:$0xff] %vm2309_vm3, %v2658_v47 }
 0x295   : > { %v3504_v55 = vpop.permute.xlu2 %3503  ;;  %v11187_v5 = vpop.f32.mrf.mxu3 }
 0x296   : > { %v3614_v49 = vpop.permute.xlu0 %3613 }
 0x297   : > { %v4302_v42 = vsel %vm2441_vm9, %v4262_v19, %v3614_v49  ;;  %v2622_v20 = vpop.f32.mrf.mxu0  ;;  %v3726_v21 = vpop.permute.xlu1 %3725 }
 0x298   : > { %v2623_v53 = vadd.f32 %v11060_v14, %v2622_v20  ;;  %v4342_v38 = vsel %vm4319_vm12, %v4302_v42, %v3726_v21 }
 0x299   : > { %4698 = vmatmul.bf16.gmra.mxu1 %v4342_v38 }
 0x29a   : > { %v2659_v2 = vmax.f32 %v2623_v53, 0.0 }
 0x29b   : > { %v3225_v16 = vld [vmem:[#allocation3 + $0x169] sm:$0xff] }
 0x29c   : > { %2747 = vst.msk [vmem:[#allocation3 + $0x171] sm:$0xff] %vm2309_vm3, %v2659_v2  ;;  %v3161_v22 = vld [vmem:[#allocation3 + $0x168] sm:$0xff]  ;;  %v3257_v25 = vpack.c.bf16 %v3225_v16, %v3225_v16 }
 0x29d   : > { %v2780_v34 = vld [vmem:[#allocation3 + $0x168] sm:$0xff]  ;;  %v3193_v50 = vpack.c.bf16 %v3161_v22, %v3161_v22  ;;  %v3922_v18 = vpop.permute.xlu2 %3921  ;;  %v4758_v16 = vpop.f32.mrf.mxu2 }
 0x29e   : > { %v2812_v35 = vpack.c.bf16 %v2780_v34, %v2780_v34  ;;  %v4105_v20 = vunpack.c.l.b16 %v3257_v25 }
 0x29f   : > { %v3993_v53 = vunpack.c.l.b16 %v3193_v50 }
 0x2a0   : > { %v11198_v25 = vunpack.c.l.b16 %v2812_v35 }
 0x2a2   : > { %13150 = vst [vmem:[#allocation8_spill] sm:$0xff] %v11198_v25 }
 0x2a3   : > { %v3289_v45 = vld [vmem:[#allocation3 + $0x16a] sm:$0xff]  ;;  %v3290_v28 = vld [vmem:[#allocation3 + $0x172] sm:$0xff] }
 0x2a4   : > { %v3226_v6 = vld [vmem:[#allocation3 + $0x171] sm:$0xff]  ;;  %v4144_v27 = vpop.permute.xlu1 %4143  ;;  %v3321_v23 = vpack.c.bf16 %v3289_v45, %v3289_v45  ;;  %v3322_v47 = vpack.c.bf16 %v3290_v28, %v3290_v28  ;;  %4967 = vst.msk [vmem:[#allocation3 + $0x168] sm:$0xff] %vm2309_vm3, %v13120_v13 }
 0x2a5   : > { %v3258_v11 = vpack.c.bf16 %v3226_v6, %v3226_v6  ;;  %v3162_v19 = vld [vmem:[#allocation3 + $0x170] sm:$0xff]  ;;  %4969 = vst.msk [vmem:[#allocation3 + $0x178] sm:$0x3] %vm2664_vm11, %v13120_v13  ;;  %v4032_v42 = vpop.permute.xlu0 %4031 }
 0x2a6   : > { %v2781_v49 = vld [vmem:[#allocation3 + $0x170] sm:$0xff]  ;;  %v3194_v21 = vpack.c.bf16 %v3162_v19, %v3162_v19  ;;  %v4433_v48 = vsel %vm2441_vm9, %v4394_v36, %v4032_v42  ;;  %v4217_v2 = vunpack.c.l.b16 %v3321_v23  ;;  %v4218_v59 = vunpack.c.l.b16 %v3322_v47  ;;  %v4669_v22 = vpop.f32.mrf.mxu1  ;;  %v11211_v23 = vpop.f32.mrf.mxu3 }
 0x2a7   : > { %v2813_v38 = vpack.c.bf16 %v2781_v49, %v2781_v49  ;;  %v4106_v0 = vunpack.c.l.b16 %v3258_v11  ;;  %4968 = vst.msk [vmem:[#allocation3 + $0x170] sm:$0xff] %vm2309_vm3, %v13120_v13  ;;  %v4473_v32 = vsel %vm4319_vm12, %v4433_v48, %v4144_v27  ;;  %v4670_v17 = vadd.f32 %v11111_v61, %v4669_v22  ;;  %v4760_v48 = vpop.f32.mrf.mxu2 }
 0x2a8   : > { %v3994_v34 = vunpack.c.l.b16 %v3194_v21  ;;  %4792 = vmatmul.bf16.gmra.mxu2 %v4473_v32  ;;  %v11203_v45 = vpack.c.b16 %v4218_v59, %v4217_v2  ;;  %v13152_v11 = vpack.c.b16 %v10759_v1, %v10757_v40 }
 0x2a9   : > { %v11200_v50 = vunpack.c.l.b16 %v2813_v38  ;;  %v11205_v28 = vpack.c.b16 %v4106_v0, %v4105_v20  ;;  %v4759_v27 = vadd.f32 %v4758_v16, %v4670_v17  ;;  %v3506_v38 = vpop.permute.xlu2 %3505  ;;  %v4397_v16 = vsel %vm2309_vm3, %v10881_v7, %v3922_v18 }
 0x2aa   : > { %v11207_v6 = vpack.c.b16 %v3994_v34, %v3993_v53  ;;  %8946 = vmatmul.msk.bf16.gmra.mxu3 %vm2309_vm3, %v11203_v45  ;;  %3931 = vrot.lane.b32.xlu2 %v11203_v45, %s9326_s20  ;;  %v4265_v19 = vsel %vm2309_vm3, %v13152_v11, %v3504_v55 }
 0x2ab   : > { %13151 = vst [vmem:[#allocation9_spill] sm:$0xff] %v11200_v50  ;;  %4153 = vrot.lane.b32.xlu1 %v11205_v28, %s9329_s30  ;;  %v4848_v35 = vadd.f32 %v11049_v56, %v4759_v27  ;;  %v5008_v27 = vld [vmem:[#allocation3] sm:$0xff]  ;;  %v9294_v50 = vld [vmem:[%s9510_s15 + $0x28] sm:$0xff] }
 0x2ac   : > { %4041 = vrot.lane.b32.xlu0 %v11207_v6, %s9327_s21  ;;  %v3728_v47 = vpop.permute.xlu1 %3727 }
 0x2ad   : > { %v3616_v49 = vpop.permute.xlu0 %3615  ;;  %4978 = vst.msk [vmem:[#allocation3 + $0x31] sm:$0xff] %vm2309_vm3, %v4848_v35  ;;  %v5011_v35 = vld [vmem:[#allocation3 + $0x18] sm:$0xff] }
 0x2ae   : > { %v4304_v42 = vsel %vm2441_vm9, %v4265_v19, %v3616_v49  ;;  %v4671_v20 = vpop.f32.mrf.mxu1  ;;  %v11230_v56 = vpop.f32.mrf.mxu3  ;;  %v13153_v49 = vpack.c.b16 %v10813_v37, %v10811_v39  ;;  %v3166_v39 = vld [vmem:[#allocation3 + $0x1a0] sm:$0xff] }
 0x2af   : > { %v4345_v21 = vsel %vm4319_vm12, %v4304_v42, %v3728_v47  ;;  %v4672_v53 = vadd.f32 %v11111_v61, %v4671_v20 }
 0x2b0   : > { %4703 = vmatmul.bf16.gmra.mxu1 %v4345_v21  ;;  %v4268_v42 = vsel %vm2309_vm3, %v13153_v49, %v3506_v38  ;;  %v3293_v21 = vld [vmem:[#allocation3 + $0x19a] sm:$0xff] }
 0x2b1   : > { %v4761_v2 = vadd.f32 %v4760_v48, %v4672_v53  ;;  %v3924_v22 = vpop.permute.xlu2 %3923  ;;  %v3294_v53 = vld [vmem:[#allocation3 + $0x1a2] sm:$0xff]  ;;  %v3229_v48 = vld [vmem:[#allocation3 + $0x199] sm:$0xff] }
 0x2b2   : > { %3515 = vrot.lane.b32.xlu2 %v11139_v51, %s9326_s20 }
 0x2b3   : > { %3737 = vrot.lane.b32.xlu1 %v11142_v15, %s9329_s30  ;;  %v4850_v40 = vadd.f32 %v11082_v10, %v4761_v2  ;;  %v5059_v2 = vmax.f32 %v5008_v27, %v5011_v35  ;;  %v11262_v27 = vld [vmem:[#allocation3 + $0x20] sm:$0xff] }
 0x2b4   : > { %3625 = vrot.lane.b32.xlu0 %v11066_v52, %s9327_s21  ;;  %v5014_v18 = vld [vmem:[#allocation3 + $0x30] sm:$0xff]  ;;  %13155 = vst [vmem:[#allocation11_spill] sm:$0xff] %v11262_v27 }
 0x2b5   : > { %4979 = vst.msk [vmem:[#allocation3 + $0x39] sm:$0xff] %vm2309_vm3, %v4850_v40 }
 0x2b6   : > { %v2625_v1 = vpop.f32.mrf.mxu0  ;;  %v11244_v52 = vpop.f32.mrf.mxu3 }
 0x2b7   : > { %v2626_v55 = vadd.f32 %v11060_v14, %v2625_v1 }
 0x2b9   : > { %v2660_v59 = vmax.f32 %v2626_v55, 0.0  ;;  %v3325_v55 = vpack.c.bf16 %v3293_v21, %v3293_v21  ;;  %v3508_v37 = vpop.permute.xlu2 %3507  ;;  %v11277_v21 = vmax.f32 %v5059_v2, %v5014_v18 }
 0x2ba   : > { %v4146_v0 = vpop.permute.xlu1 %4145 }
 0x2bb   : > { %v4034_v15 = vpop.permute.xlu0 %4033  ;;  %2748 = vst.msk [vmem:[#allocation3 + $0x181] sm:$0xff] %vm2309_vm3, %v2660_v59  ;;  %v3326_v59 = vpack.c.bf16 %v3294_v53, %v3294_v53  ;;  %v4400_v53 = vsel %vm2309_vm3, %v10949_v30, %v3924_v22 }
 0x2bc   : > { %v4435_v32 = vsel %vm2441_vm9, %v4397_v16, %v4034_v15  ;;  %v3261_v16 = vpack.c.bf16 %v3229_v48, %v3229_v48  ;;  %v3165_v15 = vld [vmem:[#allocation3 + $0x198] sm:$0xff]  ;;  %13156 = vst [vmem:[#allocation12_spill] sm:$0xff] %v11277_v21  ;;  %v11285_v48 = vsel %vm2309_vm3, %v3401_v33, %v3508_v37  ;;  %v11299_v33 = vld [vmem:[%s9510_s15] sm:$0xff] }
 0x2bd   : > { %v4476_v10 = vsel %vm4319_vm12, %v4435_v32, %v4146_v0  ;;  %v3230_v0 = vld [vmem:[#allocation3 + $0x1a1] sm:$0xff]  ;;  %v11266_v49 = vunpack.c.l.b16 %v3326_v59  ;;  %4973 = vst.msk [vmem:[#allocation3 + $0x198] sm:$0xff] %vm2309_vm3, %v13120_v13  ;;  %v5722_v2 = vrot.slane %v11299_v33, 2 }
 0x2be   : > { %4797 = vmatmul.bf16.gmra.mxu2 %v4476_v10  ;;  %v2627_v34 = vpop.f32.mrf.mxu0  ;;  %4975 = vst.msk [vmem:[#allocation3 + $0x1a8] sm:$0x3] %vm2664_vm11, %v13120_v13 }
 0x2bf   : > { %v2628_v17 = vadd.f32 %v11060_v14, %v2627_v34  ;;  %v11254_v14 = vpop.f32.mrf.mxu3  ;;  %v3262_v34 = vpack.c.bf16 %v3230_v0, %v3230_v0  ;;  %4974 = vst.msk [vmem:[#allocation3 + $0x1a0] sm:$0xff] %vm2309_vm3, %v13120_v13 }
 0x2c0   : > { %5227 = vst.sshfl [vmem:[#allocation1] sm:$0xff pattern:$0x73625140] %v11277_v21  ;;  %v5731_v21 = vrot.slane %v9294_v50, 2 }
 0x2c1   : > { %v2661_v47 = vmax.f32 %v2628_v17, 0.0  ;;  %v11260_v17 = vld [vmem:[#allocation3 + $0x8] sm:$0xff] }
 0x2c2   : > { %v3730_v11 = vpop.permute.xlu1 %3729  ;;  %v3227_v19 = vld [vmem:[#allocation3 + $0x181] sm:$0xff]  ;;  %13154 = vst [vmem:[#allocation10_spill] sm:$0xff] %v11260_v17 }
 0x2c3   : > { %v3163_v7 = vld [vmem:[#allocation3 + $0x180] sm:$0xff]  ;;  %v3618_v20 = vpop.permute.xlu0 %3617  ;;  %2749 = vst.msk [vmem:[#allocation3 + $0x189] sm:$0xff] %vm2309_vm3, %v2661_v47  ;;  %v3259_v32 = vpack.c.bf16 %v3227_v19, %v3227_v19  ;;  %v11264_v47 = vunpack.c.l.b16 %v3325_v55  ;;  %v11273_v19 = vunpack.c.l.b16 %v3262_v34 }
 0x2c4   : > { %v4306_v40 = vsel %vm2441_vm9, %v4268_v42, %v3618_v20  ;;  %v4763_v1 = vpop.f32.mrf.mxu2  ;;  %v3195_v10 = vpack.c.bf16 %v3163_v7, %v3163_v7  ;;  %v11268_v42 = vunpack.c.l.b16 %v3261_v16  ;;  %v3197_v20 = vpack.c.bf16 %v3165_v15, %v3165_v15 }
 0x2c5   : > { %v4348_v38 = vsel %vm4319_vm12, %v4306_v40, %v3730_v11  ;;  %v3198_v7 = vpack.c.bf16 %v3166_v39, %v3166_v39  ;;  %v4107_v0 = vunpack.c.l.b16 %v3259_v32 }
 0x2c6   : > { %4708 = vmatmul.bf16.gmra.mxu1 %v4348_v38  ;;  %v4674_v35 = vpop.f32.mrf.mxu1  ;;  %v11287_v40 = vunpack.c.l.b16 %v3197_v20  ;;  %v3995_v16 = vunpack.c.l.b16 %v3195_v10 }
 0x2c7   : > { %v4675_v11 = vadd.f32 %v11111_v61, %v4674_v35  ;;  %v11291_v15 = vunpack.c.l.b16 %v3198_v7  ;;  %v11309_v7 = vld [vmem:[%s9510_s15 + $0x20] sm:$0xff]  ;;  %v11317_v31 = vpop.f32.mrf.mxu3 }
 0x2c8   : > { %v5728_v36 = vrot.slane %v11309_v7, 2 }
 0x2c9   : > { %v4764_v59 = vadd.f32 %v4763_v1, %v4675_v11  ;;  %v5723_v1 = vrot.slane %v11299_v33, 4  ;;  %v9293_v11 = vld [vmem:[%s9510_s15 + $0x8] sm:$0xff] }
 0x2ca   : > { %v3291_v18 = vld [vmem:[#allocation3 + $0x182] sm:$0xff]  ;;  %v3292_v30 = vld [vmem:[#allocation3 + $0x18a] sm:$0xff]  ;;  %v5725_v9 = vrot.slane %v9293_v11, 2  ;;  %v5726_v60 = vrot.slane %v9293_v11, 4 }
 0x2cb   : > { %v3228_v22 = vld [vmem:[#allocation3 + $0x189] sm:$0xff]  ;;  %v4853_v39 = vadd.f32 %v11103_v54, %v4764_v59  ;;  %v3323_v37 = vpack.c.bf16 %v3291_v18, %v3291_v18  ;;  %v3324_v38 = vpack.c.bf16 %v3292_v30, %v3292_v30  ;;  %4970 = vst.msk [vmem:[#allocation3 + $0x180] sm:$0xff] %vm2309_vm3, %v13120_v13  ;;  %v5729_v54 = vrot.slane %v11309_v7, 4 }
 0x2cc   : > { %v3260_v32 = vpack.c.bf16 %v3228_v22, %v3228_v22  ;;  %v3164_v10 = vld [vmem:[#allocation3 + $0x188] sm:$0xff]  ;;  %v4765_v34 = vpop.f32.mrf.mxu2  ;;  %4972 = vst.msk [vmem:[#allocation3 + $0x190] sm:$0x3] %vm2664_vm11, %v13120_v13 }
 0x2cd   : > { %v4148_v35 = vpop.permute.xlu1 %4147  ;;  %v3196_v20 = vpack.c.bf16 %v3164_v10, %v3164_v10  ;;  %4980 = vst.msk [vmem:[#allocation3 + $0x49] sm:$0xff] %vm2309_vm3, %v4853_v39  ;;  %v4219_v18 = vunpack.c.l.b16 %v3323_v37  ;;  %v4220_v30 = vunpack.c.l.b16 %v3324_v38  ;;  %v5724_v10 = vrot.slane %v11299_v33, 6  ;;  %v11323_v39 = vpop.permute.xlu2 %3925 }
 0x2ce   : > { %v4036_v59 = vpop.permute.xlu0 %4035  ;;  %v4108_v22 = vunpack.c.l.b16 %v3260_v32  ;;  %v4676_v12 = vpop.f32.mrf.mxu1  ;;  %4971 = vst.msk [vmem:[#allocation3 + $0x188] sm:$0xff] %vm2309_vm3, %v13120_v13 }
 0x2cf   : > { %v4437_v55 = vsel %vm2441_vm9, %v4400_v53, %v4036_v59  ;;  %v3996_v58 = vunpack.c.l.b16 %v3196_v20  ;;  %v4677_v37 = vadd.f32 %v11111_v61, %v4676_v12  ;;  %v4237_v32 = vpack.c.b16 %v4220_v30, %v4219_v18 }
 0x2d0   : > { %v4479_v38 = vsel %vm4319_vm12, %v4437_v55, %v4148_v35  ;;  %v11327_v25 = vpack.c.b16 %v4108_v22, %v4107_v0  ;;  %v5727_v59 = vrot.slane %v9293_v11, 6  ;;  %v5730_v20 = vrot.slane %v11309_v7, 6 }
 0x2d1   : > { %4802 = vmatmul.bf16.gmra.mxu2 %v4479_v38  ;;  %v11329_v53 = vpack.c.b16 %v3996_v58, %v3995_v16  ;;  %v4766_v3 = vadd.f32 %v4765_v34, %v4677_v37  ;;  %8947 = vmatmul.msk.bf16.gmra.mxu3 %vm2309_vm3, %v4237_v32  ;;  %v5732_v12 = vrot.slane %v9294_v50, 4  ;;  %v5818_v55 = vpack.c.bf16 %v11299_v33, %v11299_v33 }
 0x2d2   : > { %13157 = vst [vmem:[#allocation13_spill] sm:$0xff] %v11327_v25  ;;  %4155 = vrot.lane.b32.xlu1 %v11327_v25, %s9329_s30  ;;  %v5819_v0 = vpack.c.bf16 %v5722_v2, %v5722_v2  ;;  %3933 = vrot.lane.b32.xlu2 %v4237_v32, %s9326_s20  ;;  %v5733_v58 = vrot.slane %v9294_v50, 6  ;;  %v5820_v16 = vpack.c.bf16 %v5723_v1, %v5723_v1 }
 0x2d3   : > { %4043 = vrot.lane.b32.xlu0 %v11329_v53, %s9327_s21  ;;  %v5821_v35 = vpack.c.bf16 %v5724_v10, %v5724_v10  ;;  %v5822_v18 = vpack.c.bf16 %v9293_v11, %v9293_v11  ;;  %v4855_v34 = vadd.f32 %v11130_v24, %v4766_v3  ;;  %v5823_v30 = vpack.c.bf16 %v5725_v9, %v5725_v9  ;;  %v11349_v3 = vpop.f32.mrf.mxu3 }
 0x2d4   : > { %v5824_v22 = vpack.c.bf16 %v5726_v60, %v5726_v60  ;;  %v4768_v38 = vpop.f32.mrf.mxu2  ;;  %v5825_v13 = vpack.c.bf16 %v5727_v59, %v5727_v59  ;;  %v5826_v33 = vpack.c.bf16 %v11309_v7, %v11309_v7  ;;  %v5827_v2 = vpack.c.bf16 %v5728_v36, %v5728_v36 }
 0x2d5   : > { %v3732_v37 = vpop.permute.xlu1 %3731  ;;  %v5828_v25 = vpack.c.bf16 %v5729_v54, %v5729_v54  ;;  %4981 = vst.msk [vmem:[#allocation3 + $0x51] sm:$0xff] %vm2309_vm3, %v4855_v34  ;;  %v5829_v8 = vpack.c.bf16 %v5730_v20, %v5730_v20  ;;  %v5830_v1 = vpack.c.bf16 %v9294_v50, %v9294_v50  ;;  %v11345_v10 = vpack.c.bf16 %v5731_v21, %v5731_v21  ;;  %v3510_v27 = vpop.permute.xlu2 %3509 }
 0x2d6   : > { %v3620_v32 = vpop.permute.xlu0 %3619  ;;  %v11347_v11 = vpack.c.bf16 %v5732_v12, %v5732_v12  ;;  %v4679_v60 = vpop.f32.mrf.mxu1  ;;  %v11353_v9 = vpack.c.bf16 %v5733_v58, %v5733_v58  ;;  %v5949_v7 = vunpack.c.l.b16 %v5818_v55  ;;  %v5950_v36 = vunpack.c.l.b16 %v5819_v0 }
 0x2d7   : > { %v4308_v24 = vsel %vm2441_vm9, %v11285_v48, %v3620_v32  ;;  %v4680_v54 = vadd.f32 %v11111_v61, %v4679_v60  ;;  %v5951_v20 = vunpack.c.l.b16 %v5820_v16  ;;  %v5952_v50 = vunpack.c.l.b16 %v5821_v35 }
 0x2d8   : > { %v4351_v59 = vsel %vm4319_vm12, %v4308_v24, %v3732_v37  ;;  %v5953_v21 = vunpack.c.l.b16 %v5822_v18  ;;  %v5954_v12 = vunpack.c.l.b16 %v5823_v30  ;;  %v5955_v34 = vunpack.c.l.b16 %v5824_v22 }
 0x2d9   : > { %4713 = vmatmul.bf16.gmra.mxu1 %v4351_v59  ;;  %v5956_v62 = vunpack.c.l.b16 %v5825_v13  ;;  %v4769_v17 = vadd.f32 %v4768_v38, %v4680_v54  ;;  %v5957_v48 = vunpack.c.l.b16 %v5826_v33  ;;  %v5958_v58 = vunpack.c.l.b16 %v5827_v2 }
 0x2da   : > { %3739 = vrot.lane.b32.xlu1 %v11207_v6, %s9329_s30  ;;  %v5959_v55 = vunpack.c.l.b16 %v5828_v25  ;;  %3517 = vrot.lane.b32.xlu2 %v11205_v28, %s9326_s20  ;;  %v5960_v0 = vunpack.c.l.b16 %v5829_v8  ;;  %v5961_v16 = vunpack.c.l.b16 %v5830_v1  ;;  %v5962_v35 = vunpack.c.l.b16 %v11345_v10 }
 0x2db   : > { %3627 = vrot.lane.b32.xlu0 %v11137_v57, %s9327_s21  ;;  %v5963_v13 = vunpack.c.l.b16 %v11347_v11  ;;  %v4858_v18 = vadd.f32 %v11157_v43, %v4769_v17  ;;  %v5964_v30 = vunpack.c.l.b16 %v11353_v9  ;;  %v6013_v6 = vrot.slane %v5950_v36, 7  ;;  %v11372_v11 = vpop.f32.mrf.mxu3 }
 0x2dc   : > { %v6016_v22 = vrot.slane %v5951_v20, 6  ;;  %v4770_v37 = vpop.f32.mrf.mxu2  ;;  %v6019_v25 = vrot.slane %v5952_v50, 5  ;;  %v6022_v57 = vrot.slane %v5953_v21, 4  ;;  %v6025_v38 = vrot.slane %v5954_v12, 3 }
 0x2dd   : > { %4982 = vst.msk [vmem:[#allocation3 + $0x61] sm:$0xff] %vm2309_vm3, %v4858_v18  ;;  %v6015_v8 = vsel %vm6014_vm13, %v6013_v6, %v5949_v7  ;;  %v6028_v43 = vrot.slane %v5955_v34, 2  ;;  %v6031_v17 = vrot.slane %v5956_v62, 1  ;;  %v6034_v10 = vrot.slane %v5958_v58, 7  ;;  %v3928_v36 = vpop.permute.xlu2 %3927  ;;  %v9296_v18 = vld [vmem:[%s9510_s15 + $0x48] sm:$0xff] }
 0x2de   : > { %v4681_v33 = vpop.f32.mrf.mxu1  ;;  %v6018_v2 = vsel %vm6017_vm14, %v6016_v22, %v6015_v8  ;;  %v6036_v60 = vrot.slane %v5959_v55, 6  ;;  %v6038_v9 = vrot.slane %v5960_v0, 5  ;;  %v6040_v7 = vrot.slane %v5961_v16, 4 }
 0x2df   : > { %v4682_v32 = vadd.f32 %v11111_v61, %v4681_v33  ;;  %v6021_v1 = vsel %vm6020_vm15, %v6019_v25, %v6018_v2  ;;  %v13158_v59 = vpack.c.b16 %v11266_v49, %v11264_v47  ;;  %v13159_v62 = vpack.c.b16 %v11273_v19, %v11268_v42  ;;  %v9297_v33 = vld [vmem:[%s9510_s15 + $0x60] sm:$0xff] }
 0x2e0   : > { %v6024_v24 = vsel %vm6023_vm1, %v6022_v57, %v6021_v1  ;;  %v6035_v50 = vsel %vm6014_vm13, %v6034_v10, %v5957_v48  ;;  %v6042_v21 = vrot.slane %v5962_v35, 3  ;;  %v4403_v12 = vsel %vm2309_vm3, %v11007_v29, %v11323_v39  ;;  %v9298_v10 = vld [vmem:[%s9510_s15 + $0x68] sm:$0xff] }
 0x2e1   : > { %v4771_v54 = vadd.f32 %v4770_v37, %v4682_v32  ;;  %8948 = vmatmul.msk.bf16.gmra.mxu3 %vm2309_vm3, %v13158_v59  ;;  %v6027_v20 = vsel %vm6026_vm2, %v6025_v38, %v6024_v24  ;;  %v13160_v47 = vpack.c.b16 %v11291_v15, %v11287_v40  ;;  %v6037_v42 = vsel %vm6017_vm14, %v6036_v60, %v6035_v50 }
 0x2e2   : > { %4157 = vrot.lane.b32.xlu1 %v13159_v62, %s9329_s30  ;;  %v6030_v49 = vsel %vm6029_vm4, %v6028_v43, %v6027_v20  ;;  %v6044_v19 = vrot.slane %v5963_v13, 2  ;;  %v13161_v34 = vpack.c.b16 %v10934_v4, %v10932_v41  ;;  %v6039_v29 = vsel %vm6020_vm15, %v6038_v9, %v6037_v42  ;;  %v9295_v41 = vld [vmem:[%s9510_s15 + $0x40] sm:$0xff] }
 0x2e3   : > { %4045 = vrot.lane.b32.xlu0 %v13160_v47, %s9327_s21  ;;  %v4860_v58 = vadd.f32 %v11178_v46, %v4771_v54  ;;  %v6046_v39 = vrot.slane %v5964_v30, 1  ;;  %v11402_v40 = vsel %vm2309_vm3, %v11068_v63, %v3928_v36  ;;  %v11405_v0 = vsel %vm6032_vm5, %v6031_v17, %v6030_v49  ;;  %v11418_v43 = vpop.f32.mrf.mxu3 }
 0x2e4   : > { %v4274_v48 = vsel %vm2309_vm3, %v13161_v34, %v3510_v27  ;;  %v4773_v55 = vpop.f32.mrf.mxu2  ;;  %v6041_v16 = vsel %vm6023_vm1, %v6040_v7, %v6039_v29  ;;  %v5734_v4 = vrot.slane %v9295_v41, 2  ;;  %v5735_v35 = vrot.slane %v9295_v41, 4 }
 0x2e5   : > { %v4150_v15 = vpop.permute.xlu1 %4149  ;;  %4983 = vst.msk [vmem:[#allocation3 + $0x69] sm:$0xff] %vm2309_vm3, %v4860_v58  ;;  %v6043_v27 = vsel %vm6026_vm2, %v6042_v21, %v6041_v16  ;;  %v5736_v13 = vrot.slane %v9295_v41, 6  ;;  %v5737_v63 = vrot.slane %v9296_v18, 2  ;;  %v5738_v37 = vrot.slane %v9296_v18, 4 }
 0x2e6   : > { %v4038_v46 = vpop.permute.xlu0 %4037  ;;  %v4684_v6 = vpop.f32.mrf.mxu1  ;;  %v6045_v22 = vsel %vm6029_vm4, %v6044_v19, %v6043_v27  ;;  %v5739_v25 = vrot.slane %v9296_v18, 6  ;;  %v5740_v2 = vrot.slane %v9297_v33, 2  ;;  %v5741_v32 = vrot.slane %v9297_v33, 4 }
 0x2e7   : > { %v4439_v30 = vsel %vm2441_vm9, %v4403_v12, %v4038_v46  ;;  %v4685_v57 = vadd.f32 %v11111_v61, %v4684_v6  ;;  %v6047_v38 = vsel %vm6032_vm5, %v6046_v39, %v6045_v22  ;;  %v5742_v1 = vrot.slane %v9297_v33, 6 }
 0x2e8   : > { %v4482_v8 = vsel %vm4319_vm12, %v4439_v30, %v4150_v15  ;;  %v6132_v17 = vpack.c.b16 %v6047_v38, %v11405_v0  ;;  %v5743_v24 = vrot.slane %v9298_v10, 2  ;;  %v5744_v9 = vrot.slane %v9298_v10, 4 }
 0x2e9   : > { %4807 = vmatmul.bf16.gmra.mxu2 %v4482_v8  ;;  %v4774_v60 = vadd.f32 %v4773_v55, %v4685_v57  ;;  %v5745_v7 = vrot.slane %v9298_v10, 6  ;;  %v5834_v36 = vpack.c.bf16 %v9295_v41, %v9295_v41  ;;  %v5835_v54 = vpack.c.bf16 %v5734_v4, %v5734_v4 }
 0x2ea   : > { %3741 = vrot.lane.b32.xlu1 %v11329_v53, %s9329_s30  ;;  %v5836_v59 = vpack.c.bf16 %v5735_v35, %v5735_v35  ;;  %v5837_v62 = vpack.c.bf16 %v5736_v13, %v5736_v13  ;;  %v5838_v20 = vpack.c.bf16 %v9296_v18, %v9296_v18  ;;  %v5839_v21 = vpack.c.bf16 %v5737_v63, %v5737_v63 }
 0x2eb   : > { %3629 = vrot.lane.b32.xlu0 %v11203_v45, %s9327_s21  ;;  %v4863_v50 = vadd.f32 %v11187_v5, %v4774_v60  ;;  %v5840_v12 = vpack.c.bf16 %v5738_v37, %v5738_v37  ;;  %v5841_v47 = vpack.c.bf16 %v5739_v25, %v5739_v25  ;;  %v5842_v19 = vpack.c.bf16 %v9297_v33, %v9297_v33  ;;  %v11432_v57 = vpop.f32.mrf.mxu3 }
 0x2ec   : > { %v4775_v42 = vpop.f32.mrf.mxu2  ;;  %v5843_v34 = vpack.c.bf16 %v5740_v2, %v5740_v2  ;;  %v5844_v53 = vpack.c.bf16 %v5741_v32, %v5741_v32  ;;  %v5845_v58 = vpack.c.bf16 %v5742_v1, %v5742_v1  ;;  %v5846_v39 = vpack.c.bf16 %v9298_v10, %v9298_v10  ;;  %v3512_v32 = vpop.permute.xlu2 %3511 }
 0x2ed   : > { %v3734_v49 = vpop.permute.xlu1 %3733  ;;  %4984 = vst.msk [vmem:[#allocation3 + $0x79] sm:$0xff] %vm2309_vm3, %v4863_v50  ;;  %v5847_v45 = vpack.c.bf16 %v5743_v24, %v5743_v24  ;;  %v5848_v15 = vpack.c.bf16 %v5744_v9, %v5744_v9  ;;  %v5849_v55 = vpack.c.bf16 %v5745_v7, %v5745_v7  ;;  %v5965_v5 = vunpack.c.l.b16 %v5834_v36 }
 0x2ee   : > { %v3622_v29 = vpop.permute.xlu0 %3621  ;;  %v4686_v16 = vpop.f32.mrf.mxu1  ;;  %v5966_v41 = vunpack.c.l.b16 %v5835_v54  ;;  %v5967_v4 = vunpack.c.l.b16 %v5836_v59  ;;  %v5968_v35 = vunpack.c.l.b16 %v5837_v62  ;;  %v5969_v13 = vunpack.c.l.b16 %v5838_v20 }
 0x2ef   : > { %v4310_v0 = vsel %vm2441_vm9, %v4274_v48, %v3622_v29  ;;  %v4687_v46 = vadd.f32 %v11111_v61, %v4686_v16  ;;  %v5970_v18 = vunpack.c.l.b16 %v5839_v21  ;;  %v5971_v63 = vunpack.c.l.b16 %v5840_v12 }
 0x2f0   : > { %v4354_v27 = vsel %vm4319_vm12, %v4310_v0, %v3734_v49  ;;  %v5972_v30 = vunpack.c.l.b16 %v5841_v47  ;;  %v5973_v6 = vunpack.c.l.b16 %v5842_v19  ;;  %v5974_v37 = vunpack.c.l.b16 %v5843_v34  ;;  %v9299_v0 = vld [vmem:[%s9510_s15 + $0x80] sm:$0xff] }
 0x2f1   : > { %4718 = vmatmul.bf16.gmra.mxu1 %v4354_v27  ;;  %v4776_v22 = vadd.f32 %v4775_v42, %v4687_v46  ;;  %9013 = vmatmul.msk.bf16.vlgmr.msrb.gmra.mxu3 %vm553_vm0, %v6132_v17  ;;  %v5975_v48 = vunpack.c.l.b16 %v5844_v53  ;;  %v5976_v25 = vunpack.c.l.b16 %v5845_v58  ;;  %v5977_v8 = vunpack.c.l.b16 %v5846_v39 }
 0x2f2   : > { %v5978_v38 = vunpack.c.l.b16 %v5847_v45  ;;  %v5979_v33 = vunpack.c.l.b16 %v5848_v15  ;;  %v6048_v2 = vrot.slane %v5966_v41, 7  ;;  %v6050_v10 = vrot.slane %v5967_v4, 6 }
 0x2f3   : > { %v4865_v1 = vadd.f32 %v11211_v23, %v4776_v22  ;;  %v6052_v24 = vrot.slane %v5968_v35, 5  ;;  %v6054_v60 = vrot.slane %v5969_v13, 4  ;;  %v5980_v7 = vunpack.c.l.b16 %v5849_v55 }
 0x2f4   : > { %v4778_v9 = vpop.f32.mrf.mxu2  ;;  %v6049_v36 = vsel %vm6014_vm13, %v6048_v2, %v5965_v5  ;;  %v6056_v17 = vrot.slane %v5970_v18, 3  ;;  %v6058_v54 = vrot.slane %v5971_v63, 2  ;;  %v6062_v62 = vrot.slane %v5974_v37, 7  ;;  %v11453_v5 = vpop.f32.mrf.mxu3 }
 0x2f5   : > { %4985 = vst.msk [vmem:[#allocation3 + $0x81] sm:$0xff] %vm2309_vm3, %v4865_v1  ;;  %v6051_v59 = vsel %vm6017_vm14, %v6050_v10, %v6049_v36  ;;  %v6064_v20 = vrot.slane %v5975_v48, 6  ;;  %v6066_v50 = vrot.slane %v5976_v25, 5  ;;  %v13162_v21 = vpack.c.b16 %v10999_v44, %v10997_v26 }
 0x2f6   : > { %v4689_v12 = vpop.f32.mrf.mxu1  ;;  %v6053_v47 = vsel %vm6020_vm15, %v6052_v24, %v6051_v59  ;;  %v6060_v49 = vrot.slane %v5972_v30, 1  ;;  %v6068_v42 = vrot.slane %v5977_v8, 4  ;;  %v6063_v53 = vsel %vm6014_vm13, %v6062_v62, %v5973_v6  ;;  %v9300_v30 = vld [vmem:[%s9510_s15 + $0x88] sm:$0xff] }
 0x2f7   : > { %v11442_v23 = vsel %vm2309_vm3, %v13162_v21, %v3512_v32  ;;  %v4690_v19 = vadd.f32 %v11111_v61, %v4689_v12  ;;  %v6055_v34 = vsel %vm6023_vm1, %v6054_v60, %v6053_v47  ;;  %v6070_v58 = vrot.slane %v5978_v38, 3  ;;  %v9301_v38 = vld [vmem:[%s9510_s15 + $0xa0] sm:$0xff]  ;;  %v9302_v60 = vld [vmem:[%s9510_s15 + $0xa8] sm:$0xff] }
 0x2f8   : > { %v6057_v29 = vsel %vm6026_vm2, %v6056_v17, %v6055_v34  ;;  %v6065_v26 = vsel %vm6017_vm14, %v6064_v20, %v6063_v53  ;;  %v6072_v44 = vrot.slane %v5979_v33, 2  ;;  %v6074_v39 = vrot.slane %v5980_v7, 1 }
 0x2f9   : > { %v4779_v45 = vadd.f32 %v4778_v9, %v4690_v19  ;;  %v6059_v15 = vsel %vm6029_vm4, %v6058_v54, %v6057_v29  ;;  %v6067_v55 = vsel %vm6020_vm15, %v6066_v50, %v6065_v26  ;;  %v5746_v16 = vrot.slane %v9299_v0, 2 }
 0x2fa   : > { %v4152_v41 = vpop.permute.xlu1 %4151  ;;  %v6061_v4 = vsel %vm6032_vm5, %v6060_v49, %v6059_v15  ;;  %v6069_v46 = vsel %vm6023_vm1, %v6068_v42, %v6067_v55  ;;  %v5747_v27 = vrot.slane %v9299_v0, 4  ;;  %v5748_v35 = vrot.slane %v9299_v0, 6 }
 0x2fb   : > { %v4040_v13 = vpop.permute.xlu0 %4039  ;;  %v4868_v18 = vadd.f32 %v11230_v56, %v4779_v45  ;;  %v6071_v63 = vsel %vm6026_vm2, %v6070_v58, %v6069_v46  ;;  %v5749_v6 = vrot.slane %v9300_v30, 2  ;;  %v5750_v22 = vrot.slane %v9300_v30, 4 }
 0x2fc   : > { %v4441_v37 = vsel %vm2441_vm9, %v11402_v40, %v4040_v13  ;;  %v4780_v48 = vpop.f32.mrf.mxu2  ;;  %v6073_v25 = vsel %vm6029_vm4, %v6072_v44, %v6071_v63  ;;  %v5751_v8 = vrot.slane %v9300_v30, 6  ;;  %v5752_v33 = vrot.slane %v9301_v38, 2  ;;  %v11471_v15 = vpop.f32.mrf.mxu3 }
 0x2fd   : > { %4986 = vst.msk [vmem:[#allocation3 + $0x91] sm:$0xff] %vm2309_vm3, %v4868_v18  ;;  %v4485_v2 = vsel %vm4319_vm12, %v4441_v37, %v4152_v41  ;;  %v6075_v56 = vsel %vm6032_vm5, %v6074_v39, %v6073_v25  ;;  %v5753_v32 = vrot.slane %v9301_v38, 4  ;;  %v5754_v1 = vrot.slane %v9301_v38, 6  ;;  %v11480_v25 = vld [vmem:[%s13101_s4] ss:$0 sm:$0xff] }
 0x2fe   : > { %4812 = vmatmul.bf16.gmra.mxu2 %v4485_v2  ;;  %v4691_v10 = vpop.f32.mrf.mxu1  ;;  %v6133_v24 = vpack.c.b16 %v6075_v56, %v6061_v4  ;;  %v5755_v9 = vrot.slane %v9302_v60, 2  ;;  %v5756_v40 = vrot.slane %v9302_v60, 4  ;;  %v5757_v7 = vrot.slane %v9302_v60, 6 }
 0x2ff   : > { %v4692_v36 = vadd.f32 %v11111_v61, %v4691_v10  ;;  %v5850_v17 = vpack.c.bf16 %v9299_v0, %v9299_v0  ;;  %v5851_v54 = vpack.c.bf16 %v5746_v16, %v5746_v16  ;;  %v5852_v59 = vpack.c.bf16 %v5747_v27, %v5747_v27 }
 0x300   : > { %v5853_v62 = vpack.c.bf16 %v5748_v35, %v5748_v35  ;;  %v5854_v20 = vpack.c.bf16 %v9300_v30, %v9300_v30  ;;  %v5855_v50 = vpack.c.bf16 %v5749_v6, %v5749_v6  ;;  %v5856_v21 = vpack.c.bf16 %v5750_v22, %v5750_v22 }
 0x301   : > { %v4781_v12 = vadd.f32 %v4780_v48, %v4692_v36  ;;  %9014 = vmatmul.msk.bf16.gmra.mxu3 %vm553_vm0, %v6133_v24  ;;  %v5857_v47 = vpack.c.bf16 %v5751_v8, %v5751_v8  ;;  %v5858_v49 = vpack.c.bf16 %v9301_v38, %v9301_v38  ;;  %v5859_v42 = vpack.c.bf16 %v5752_v33, %v5752_v33  ;;  %v11483_v24 = vld [vmem:[#allocation3 + $0x10] sm:$0x3]  ;;  %v11486_v36 = vld [vmem:[#allocation3 + $0x28] sm:$0x3] }
 0x302   : > { %v3736_v19 = vpop.permute.xlu1 %3735  ;;  %v5860_v34 = vpack.c.bf16 %v5753_v32, %v5753_v32  ;;  %v5861_v53 = vpack.c.bf16 %v5754_v1, %v5754_v1  ;;  %v5862_v58 = vpack.c.bf16 %v9302_v60, %v9302_v60  ;;  %v5863_v29 = vpack.c.bf16 %v5755_v9, %v5755_v9 }
 0x303   : > { %v3624_v26 = vpop.permute.xlu0 %3623  ;;  %v4870_v61 = vadd.f32 %v11244_v52, %v4781_v12  ;;  %v5864_v44 = vpack.c.bf16 %v5756_v40, %v5756_v40  ;;  %v5865_v39 = vpack.c.bf16 %v5757_v7, %v5757_v7  ;;  %v5981_v45 = vunpack.c.l.b16 %v5850_v17  ;;  %v3930_v17 = vpop.permute.xlu2 %3929 }
 0x304   : > { %v4312_v55 = vsel %vm2441_vm9, %v11442_v23, %v3624_v26  ;;  %v4783_v0 = vpop.f32.mrf.mxu2  ;;  %v5982_v16 = vunpack.c.l.b16 %v5851_v54  ;;  %v5983_v41 = vunpack.c.l.b16 %v5852_v59  ;;  %v5984_v4 = vunpack.c.l.b16 %v5853_v62 }
 0x305   : > { %4987 = vst.msk [vmem:[#allocation3 + $0x99] sm:$0xff] %vm2309_vm3, %v4870_v61  ;;  %v4357_v46 = vsel %vm4319_vm12, %v4312_v55, %v3736_v19  ;;  %v5985_v27 = vunpack.c.l.b16 %v5854_v20  ;;  %v5986_v35 = vunpack.c.l.b16 %v5855_v50  ;;  %v5987_v13 = vunpack.c.l.b16 %v5856_v21  ;;  %v11489_v50 = vpop.f32.mrf.mxu3  ;;  %v9304_v55 = vld [vmem:[%s9510_s15 + $0xc0] sm:$0xff] }
 0x306   : > { %4723 = vmatmul.bf16.gmra.mxu1 %v4357_v46  ;;  %v5988_v52 = vunpack.c.l.b16 %v5857_v47  ;;  %v5989_v18 = vunpack.c.l.b16 %v5858_v49  ;;  %v5990_v63 = vunpack.c.l.b16 %v5859_v42  ;;  %v5991_v30 = vunpack.c.l.b16 %v5860_v34  ;;  %v4694_v6 = vpop.f32.mrf.mxu1 }
 0x307   : > { %v5992_v22 = vunpack.c.l.b16 %v5861_v53  ;;  %v5993_v37 = vunpack.c.l.b16 %v5862_v58  ;;  %v5994_v23 = vunpack.c.l.b16 %v5863_v29  ;;  %v5995_v48 = vunpack.c.l.b16 %v5864_v44 }
 0x308   : > { %v4695_v8 = vadd.f32 %v11480_v25, %v4694_v6  ;;  %v6076_v38 = vrot.slane %v5982_v16, 7  ;;  %v6078_v33 = vrot.slane %v5983_v41, 6  ;;  %v6080_v2 = vrot.slane %v5984_v4, 5  ;;  %v9305_v16 = vld [vmem:[%s9510_s15 + $0xe0] sm:$0xff] }
 0x309   : > { %v5996_v56 = vunpack.c.l.b16 %v5865_v39  ;;  %v6082_v32 = vrot.slane %v5985_v27, 4  ;;  %v6084_v1 = vrot.slane %v5986_v35, 3  ;;  %v6086_v10 = vrot.slane %v5987_v13, 2 }
 0x30a   : > { %v4784_v60 = vadd.f32 %v4783_v0, %v4695_v8  ;;  %v6077_v9 = vsel %vm6014_vm13, %v6076_v38, %v5981_v45  ;;  %v6090_v40 = vrot.slane %v5990_v63, 7  ;;  %v6092_v7 = vrot.slane %v5991_v30, 6  ;;  %v9307_v8 = vld [vmem:[%s9510_s15 + $0xe8] sm:$0xff] }
 0x30b   : > { %v6079_v54 = vsel %vm6017_vm14, %v6078_v33, %v6077_v9  ;;  %v6088_v59 = vrot.slane %v5988_v52, 1  ;;  %v6094_v62 = vrot.slane %v5992_v22, 5  ;;  %v6096_v20 = vrot.slane %v5993_v37, 4 }
 0x30c   : > { %v4873_v21 = vadd.f32 %v11254_v14, %v4784_v60  ;;  %v6081_v12 = vsel %vm6020_vm15, %v6080_v2, %v6079_v54  ;;  %v6091_v47 = vsel %vm6014_vm13, %v6090_v40, %v5989_v18  ;;  %v6098_v49 = vrot.slane %v5994_v23, 3  ;;  %v4785_v42 = vpop.f32.mrf.mxu2  ;;  %v9306_v23 = vld [vmem:[%s9510_s15 + $0xc8] sm:$0xff] }
 0x30d   : > { %v6083_v19 = vsel %vm6023_vm1, %v6082_v32, %v6081_v12  ;;  %v6093_v34 = vsel %vm6017_vm14, %v6092_v7, %v6091_v47  ;;  %v6100_v53 = vrot.slane %v5995_v48, 2  ;;  %v5061_v58 = vmax.f32 %v11483_v24, %v11486_v36  ;;  %v11518_v7 = vpop.f32.mrf.mxu3 }
 0x30e   : > { %v11500_v29 = vsel %vm2309_vm3, %v11139_v51, %v3930_v17  ;;  %4988 = vst.msk [vmem:[#allocation3 + $0xa9] sm:$0xff] %vm2309_vm3, %v4873_v21  ;;  %v6085_v14 = vsel %vm6026_vm2, %v6084_v1, %v6083_v19  ;;  %v6095_v26 = vsel %vm6020_vm15, %v6094_v62, %v6093_v34  ;;  %v6102_v61 = vrot.slane %v5996_v56, 1  ;;  %v4696_v44 = vpop.f32.mrf.mxu1 }
 0x30f   : > { %v6087_v39 = vsel %vm6029_vm4, %v6086_v10, %v6085_v14  ;;  %v6097_v45 = vsel %vm6023_vm1, %v6096_v20, %v6095_v26  ;;  %v5758_v0 = vrot.slane %v9304_v55, 2  ;;  %v5764_v41 = vrot.slane %v9305_v16, 2 }
 0x310   : > { %v4697_v51 = vadd.f32 %v11480_v25, %v4696_v44  ;;  %v6089_v4 = vsel %vm6032_vm5, %v6088_v59, %v6087_v39  ;;  %v6099_v46 = vsel %vm6026_vm2, %v6098_v49, %v6097_v45  ;;  %v5759_v27 = vrot.slane %v9304_v55, 4 }
 0x311   : > { %v6101_v35 = vsel %vm6029_vm4, %v6100_v53, %v6099_v46  ;;  %v5760_v13 = vrot.slane %v9304_v55, 6  ;;  %v5765_v52 = vrot.slane %v9305_v16, 4  ;;  %v5766_v18 = vrot.slane %v9305_v16, 6 }
 0x312   : > { %v4786_v63 = vadd.f32 %v4785_v42, %v4697_v51  ;;  %v6103_v30 = vsel %vm6032_vm5, %v6102_v61, %v6101_v35  ;;  %v5867_v6 = vpack.c.bf16 %v5758_v0, %v5758_v0  ;;  %v5868_v22 = vpack.c.bf16 %v5759_v27, %v5759_v27 }
 0x313   : > { %v6134_v37 = vpack.c.b16 %v6103_v30, %v6089_v4  ;;  %v5761_v48 = vrot.slane %v9306_v23, 2  ;;  %v5767_v38 = vrot.slane %v9307_v8, 2  ;;  %v5866_v33 = vpack.c.bf16 %v9304_v55, %v9304_v55 }
 0x314   : > { %v4875_v2 = vadd.f32 %v11317_v31, %v4786_v63  ;;  %v5762_v56 = vrot.slane %v9306_v23, 4  ;;  %v5768_v32 = vrot.slane %v9307_v8, 4  ;;  %v5869_v1 = vpack.c.bf16 %v5760_v13, %v5760_v13  ;;  %v4788_v20 = vpop.f32.mrf.mxu2 }
 0x315   : > { %9015 = vmatmul.msk.bf16.gmra.mxu3 %vm553_vm0, %v6134_v37  ;;  %v5763_v10 = vrot.slane %v9306_v23, 6  ;;  %v5769_v60 = vrot.slane %v9307_v8, 6  ;;  %v5870_v9 = vpack.c.bf16 %v9306_v23, %v9306_v23  ;;  %v5871_v40 = vpack.c.bf16 %v5761_v48, %v5761_v48  ;;  %v11523_v37 = vpop.f32.mrf.mxu3 }
 0x316   : > { %4989 = vst.msk [vmem:[#allocation3 + $0xb1] sm:$0xff] %vm2309_vm3, %v4875_v2  ;;  %v5872_v17 = vpack.c.bf16 %v5762_v56, %v5762_v56  ;;  %v5874_v54 = vpack.c.bf16 %v9305_v16, %v9305_v16  ;;  %v5875_v59 = vpack.c.bf16 %v5764_v41, %v5764_v41  ;;  %v5876_v62 = vpack.c.bf16 %v5765_v52, %v5765_v52  ;;  %v4699_v21 = vpop.f32.mrf.mxu1 }
 0x317   : > { %v5873_v31 = vpack.c.bf16 %v5763_v10, %v5763_v10  ;;  %v5877_v12 = vpack.c.bf16 %v5766_v18, %v5766_v18  ;;  %v5878_v47 = vpack.c.bf16 %v9307_v8, %v9307_v8  ;;  %v5879_v49 = vpack.c.bf16 %v5767_v38, %v5767_v38 }
 0x318   : > { %v4700_v42 = vadd.f32 %v11480_v25, %v4699_v21  ;;  %v5880_v19 = vpack.c.bf16 %v5768_v32, %v5768_v32  ;;  %v5881_v34 = vpack.c.bf16 %v5769_v60, %v5769_v60  ;;  %v5997_v53 = vunpack.c.l.b16 %v5866_v33  ;;  %v3514_v21 = vpop.permute.xlu2 %3513 }
 0x319   : > { %v5998_v14 = vunpack.c.l.b16 %v5867_v6  ;;  %v5999_v26 = vunpack.c.l.b16 %v5868_v22  ;;  %v6000_v61 = vunpack.c.l.b16 %v5869_v1  ;;  %v6001_v44 = vunpack.c.l.b16 %v5870_v9 }
 0x31a   : > { %v4789_v39 = vadd.f32 %v4788_v20, %v4700_v42  ;;  %v6002_v45 = vunpack.c.l.b16 %v5871_v40  ;;  %v6003_v55 = vunpack.c.l.b16 %v5872_v17  ;;  %v6004_v0 = vunpack.c.l.b16 %v5873_v31  ;;  %v11532_v40 = vld [vmem:[#allocation3 + $0x38] sm:$0xff]  ;;  %v11536_v20 = vld [vmem:[#allocation3 + $0x40] sm:$0x3] }
 0x31b   : > { %v6005_v16 = vunpack.c.l.b16 %v5874_v54  ;;  %v6006_v41 = vunpack.c.l.b16 %v5875_v59  ;;  %v6007_v51 = vunpack.c.l.b16 %v5876_v62  ;;  %v6008_v4 = vunpack.c.l.b16 %v5877_v12 }
 0x31c   : > { %v4878_v46 = vadd.f32 %v11349_v3, %v4789_v39  ;;  %v6009_v35 = vunpack.c.l.b16 %v5878_v47  ;;  %v6010_v13 = vunpack.c.l.b16 %v5879_v49  ;;  %v6011_v52 = vunpack.c.l.b16 %v5880_v19 }
 0x31d   : > { %v4154_v27 = vpop.permute.xlu1 %4153  ;;  %v6012_v63 = vunpack.c.l.b16 %v5881_v34  ;;  %v6104_v30 = vrot.slane %v5998_v14, 7  ;;  %v6106_v6 = vrot.slane %v5999_v26, 6  ;;  %v6108_v22 = vrot.slane %v6000_v61, 5  ;;  %v13164_v14 = vld [vmem:[#allocation11_spill] sm:$0xff] }
 0x31e   : > { %v4042_v18 = vpop.permute.xlu0 %4041  ;;  %4990 = vst.msk [vmem:[#allocation3 + $0xc1] sm:$0xff] %vm2309_vm3, %v4878_v46  ;;  %v6110_v48 = vrot.slane %v6001_v44, 4  ;;  %v6112_v8 = vrot.slane %v6002_v45, 3  ;;  %v6114_v38 = vrot.slane %v6003_v55, 2  ;;  %v4701_v3 = vpop.f32.mrf.mxu1  ;;  %v6116_v56 = vrot.slane %v6004_v0, 1 }
 0x31f   : > { %v4443_v23 = vsel %vm2441_vm9, %v11500_v29, %v4042_v18  ;;  %v6105_v2 = vsel %vm6014_vm13, %v6104_v30, %v5997_v53  ;;  %v6118_v32 = vrot.slane %v6006_v41, 7  ;;  %v4702_v1 = vadd.f32 %v11480_v25, %v4701_v3  ;;  %v4790_v29 = vpop.f32.mrf.mxu2  ;;  %v13163_v53 = vld [vmem:[#allocation10_spill] sm:$0xff] }
 0x320   : > { %v4488_v33 = vsel %vm4319_vm12, %v4443_v23, %v4154_v27  ;;  %v6107_v10 = vsel %vm6017_vm14, %v6106_v6, %v6105_v2  ;;  %v6120_v60 = vrot.slane %v6007_v51, 6  ;;  %v6122_v9 = vrot.slane %v6008_v4, 5  ;;  %v11557_v41 = vld [vmem:[#allocation1 + $0x2] ss:$4 sm:$0xff]  ;;  %v11559_v51 = vld [vmem:[#allocation1 + $0x3] ss:$4 sm:$0xff] }
 0x321   : > { %4817 = vmatmul.bf16.gmra.mxu2 %v4488_v33  ;;  %v6109_v17 = vsel %vm6020_vm15, %v6108_v22, %v6107_v10  ;;  %v6119_v54 = vsel %vm6014_vm13, %v6118_v32, %v6005_v16  ;;  %v6124_v59 = vrot.slane %v6009_v35, 4  ;;  %v6126_v62 = vrot.slane %v6010_v13, 3  ;;  %v11555_v16 = vld [vmem:[#allocation1 + $0x1] ss:$4 sm:$0xff] }
 0x322   : > { %v4791_v31 = vadd.f32 %v4790_v29, %v4702_v1  ;;  %v6111_v12 = vsel %vm6023_vm1, %v6110_v48, %v6109_v17  ;;  %v6121_v47 = vsel %vm6017_vm14, %v6120_v60, %v6119_v54  ;;  %v6128_v49 = vrot.slane %v6011_v52, 2  ;;  %v13166_v4 = vld [vmem:[#allocation5_spill] sm:$0xff]  ;;  %v11571_v52 = vpop.f32.mrf.mxu3  ;;  %v5017_v48 = vld [vmem:[#allocation3 + $0x48] sm:$0xff]  ;;  %v11579_v2 = vld [vmem:[#allocation3 + $0x60] sm:$0xff] }
 0x323   : > { %v6113_v42 = vsel %vm6026_vm2, %v6112_v8, %v6111_v12  ;;  %v6123_v19 = vsel %vm6020_vm15, %v6122_v9, %v6121_v47  ;;  %v6130_v34 = vrot.slane %v6012_v63, 1  ;;  %v13165_v26 = vmax.f32 %v13163_v53, %v13164_v14  ;;  %v5019_v17 = vld [vmem:[#allocation3 + $0x58] sm:$0x3]  ;;  %v5018_v54 = vld [vmem:[#allocation3 + $0x50] sm:$0xff]  ;;  %v3932_v47 = vpop.permute.xlu2 %3931 }
 0x324   : > { %v4880_v44 = vadd.f32 %v11372_v11, %v4791_v31  ;;  %v6115_v45 = vsel %vm6029_vm4, %v6114_v38, %v6113_v42  ;;  %v6125_v55 = vsel %vm6023_vm1, %v6124_v59, %v6123_v19  ;;  %v5085_v0 = vmax.f32 %v5061_v58, %v11536_v20  ;;  %v9308_v38 = vld [vmem:[#allocation3 + $0x30] sm:$0xff]  ;;  %v11603_v42 = vld [vmem:[#allocation3 + $0x68] sm:$0xff] }
 0x325   : > { %v11546_v61 = vmax.f32 %v13165_v26, %v11532_v40  ;;  %v3738_v39 = vpop.permute.xlu1 %3737  ;;  %v4280_v46 = vsel %vm2309_vm3, %v13166_v4, %v3514_v21  ;;  %v6117_v27 = vsel %vm6032_vm5, %v6116_v56, %v6115_v45  ;;  %v6127_v35 = vsel %vm6026_vm2, %v6126_v62, %v6125_v55  ;;  %v11597_v21 = vld [vmem:[#allocation3 + $0x70] sm:$0x3] }
 0x326   : > { %v3626_v11 = vpop.permute.xlu0 %3625  ;;  %4991 = vst.msk [vmem:[#allocation3 + $0xc9] sm:$0xff] %vm2309_vm3, %v4880_v44  ;;  %v6129_v36 = vsel %vm6029_vm4, %v6128_v49, %v6127_v35  ;;  %v5062_v3 = vmax.f32 %v9308_v38, %v5017_v48  ;;  %v5064_v31 = vmax.f32 %v11536_v20, %v5019_v17  ;;  %v5063_v12 = vmax.f32 %v11532_v40, %v5018_v54 }
 0x327   : > { %5228 = vst.sshfl [vmem:[#allocation1 + $0x20] sm:$0xff pattern:$0x73625140] %v11546_v61  ;;  %v4314_v24 = vsel %vm2441_vm9, %v4280_v46, %v3626_v11  ;;  %v6131_v13 = vsel %vm6032_vm5, %v6130_v34, %v6129_v36  ;;  %v13171_v36 = vld [vmem:[#allocation7_spill] sm:$0xff] }
 0x328   : > { %v4360_v58 = vsel %vm4319_vm12, %v4314_v24, %v3738_v39  ;;  %5243 = vst.sshfl [vmem:[#allocation1] sm:$0xff pattern:$0x73625140] %v5085_v0  ;;  %v6135_v18 = vpack.c.b16 %v6131_v13, %v6117_v27  ;;  %v11585_v1 = vmax.f32 %v5062_v3, %v11579_v2  ;;  %v5088_v49 = vmax.f32 %v5064_v31, %v11597_v21  ;;  %v5023_v3 = vld [vmem:[#allocation3 + $0x78] sm:$0xff] }
 0x329   : > { %4728 = vmatmul.bf16.gmra.mxu1 %v4360_v58  ;;  %v11608_v34 = vmax.f32 %v5063_v12, %v11603_v42  ;;  %v4412_v39 = vsel %vm2309_vm3, %v11205_v28, %v3932_v47  ;;  %v13172_v58 = vld [vmem:[#allocation6_spill] sm:$0xff]  ;;  %v5065_v54 = vmax.f32 %v11579_v2, %v5023_v3  ;;  %v11643_v47 = vld [vmem:[#allocation3 + $0x90] sm:$0xff] }
 0x32a   : > { %9016 = vmatmul.msk.bf16.gmra.mxu3 %vm553_vm0, %v6135_v18  ;;  %v11575_v22 = vpop.f32.mrf.mxu3  ;;  %v13173_v13 = vpack.c.b16 %v13171_v36, %v13172_v58  ;;  %vm8656_vm0 = vcmask 1041408  }
 0x32b   : > { %v4793_v63 = vpop.f32.mrf.mxu2  ;;  %13167 = vst [vmem:[#allocation10_spill] sm:$0xff] %v11575_v22  ;;  %v3516_v11 = vpop.permute.xlu2 %3515 }
 0x32c   : > { %v4283_v28 = vsel %vm2309_vm3, %v13173_v13, %v3516_v11 }
 0x32d   : > { %v4704_v30 = vpop.f32.mrf.mxu1 }
 0x32e   : > { %v4705_v6 = vadd.f32 %v11480_v25, %v4704_v30  ;;  %v11582_v32 = vld [vmem:[#allocation1 + $0x20] ss:$4 sm:$0xff]  ;;  %v11587_v60 = vld [vmem:[#allocation1 + $0x21] ss:$4 sm:$0xff]  ;;  %v11589_v9 = vld [vmem:[#allocation1 + $0x22] ss:$4 sm:$0xff] }
 0x32f   : > { %v11605_v19 = vld [vmem:[#allocation1] ss:$4 sm:$0xff] }
 0x330   : > { %v4794_v23 = vadd.f32 %v4793_v63, %v4705_v6  ;;  %5249 = vst.sshfl [vmem:[#allocation1] sm:$0xff pattern:$0x73625140] %v11608_v34 }
 0x332   : > { %v4883_v8 = vadd.f32 %v11418_v43, %v4794_v23  ;;  %v11591_v43 = vld [vmem:[#allocation1 + $0x23] ss:$4 sm:$0xff]  ;;  %v11594_v59 = vpop.f32.mrf.mxu3 }
 0x333   : > { %v4795_v10 = vpop.f32.mrf.mxu2  ;;  %5245 = vst.sshfl [vmem:[#allocation1 + $0x20] sm:$0xff pattern:$0x73625140] %v11585_v1 }
 0x334   : > { %4992 = vst.msk [vmem:[#allocation3 + $0xd9] sm:$0xff] %vm2309_vm3, %v4883_v8  ;;  %v3934_v8 = vpop.permute.xlu2 %3933 }
 0x335   : > { %v4706_v33 = vpop.f32.mrf.mxu1  ;;  %13168 = vst [vmem:[#allocation11_spill] sm:$0xff] %v11594_v59 }
 0x336   : > { %v4707_v56 = vadd.f32 %v11480_v25, %v4706_v33 }
 0x337   : > { %v11656_v2 = vld [vmem:[#allocation1 + $0x3] ss:$4 sm:$0xff] }
 0x338   : > { %v4796_v29 = vadd.f32 %v4795_v10, %v4707_v56  ;;  %v13175_v56 = vld [vmem:[#allocation13_spill] sm:$0xff] }
 0x339   : > { %v4415_v10 = vsel %vm2309_vm3, %v13175_v56, %v3934_v8  ;;  %v5128_v8 = vrot.slane %v11546_v61, 6 }
 0x33a   : > { %v4885_v62 = vadd.f32 %v11432_v57, %v4796_v29  ;;  %v11610_v53 = vld [vmem:[#allocation1 + $0x21] ss:$4 sm:$0xff]  ;;  %v11612_v57 = vld [vmem:[#allocation1 + $0x22] ss:$4 sm:$0xff]  ;;  %v11614_v14 = vld [vmem:[#allocation1 + $0x23] ss:$4 sm:$0xff]  ;;  %v11617_v40 = vpop.f32.mrf.mxu3 }
 0x33b   : > { %13169 = vst [vmem:[#allocation5_spill] sm:$0xff] %v11614_v14 }
 0x33c   : > { %4993 = vst.msk [vmem:[#allocation3 + $0xe1] sm:$0xff] %vm2309_vm3, %v4885_v62 }
 0x33d   : > { %5250 = vst.sshfl [vmem:[#allocation1 + $0x20] sm:$0xff pattern:$0x73625140] %v5088_v49 }
 0x33e   : > { %13170 = vst [vmem:[#allocation14_spill] sm:$0xff] %v11617_v40 }
 0x341   : > { %v4798_v20 = vpop.f32.mrf.mxu2 }
 0x342   : > { %v11630_v18 = vpop.f32.mrf.mxu3 }
 0x343   : > { %v4709_v26 = vpop.f32.mrf.mxu1  ;;  %13174 = vst [vmem:[#allocation7_spill] sm:$0xff] %v11630_v18 }
 0x344   : > { %v4156_v44 = vpop.permute.xlu1 %4155  ;;  %v4710_v45 = vadd.f32 %v11480_v25, %v4709_v26  ;;  %v11650_v26 = vmax.f32 %v5065_v54, %v11643_v47  ;;  %v11680_v54 = vld [vmem:[#allocation3 + $0x98] sm:$0xff] }
 0x345   : > { %v4044_v55 = vpop.permute.xlu0 %4043 }
 0x346   : > { %v4445_v0 = vsel %vm2441_vm9, %v4412_v39, %v4044_v55  ;;  %v4799_v4 = vadd.f32 %v4798_v20, %v4710_v45  ;;  %v11647_v20 = vld [vmem:[#allocation1] ss:$4 sm:$0xff]  ;;  %v11654_v39 = vld [vmem:[#allocation1 + $0x2] ss:$4 sm:$0xff] }
 0x347   : > { %v4491_v46 = vsel %vm4319_vm12, %v4445_v0, %v4156_v44  ;;  %13177 = vst [vmem:[#allocation13_spill] sm:$0xff] %v11647_v20  ;;  %v11652_v44 = vld [vmem:[#allocation1 + $0x1] ss:$4 sm:$0xff]  ;;  %v3518_v0 = vpop.permute.xlu2 %3517 }
 0x348   : > { %4822 = vmatmul.bf16.gmra.mxu2 %v4491_v46  ;;  %v4888_v27 = vadd.f32 %v11453_v5, %v4799_v4  ;;  %13178 = vst [vmem:[#allocation15_spill] sm:$0xff] %v11652_v44  ;;  %v5025_v55 = vld [vmem:[#allocation3 + $0x88] sm:$0x3] }
 0x349   : > { %v4800_v6 = vpop.f32.mrf.mxu2  ;;  %5256 = vst.sshfl [vmem:[#allocation1] sm:$0xff pattern:$0x73625140] %v11650_v26  ;;  %v13179_v4 = vld [vmem:[#allocation12_spill] sm:$0xff]  ;;  %v5067_v13 = vmax.f32 %v11597_v21, %v5025_v55 }
 0x34a   : > { %4994 = vst.msk [vmem:[#allocation3 + $0xf1] sm:$0xff] %vm2309_vm3, %v4888_v27  ;;  %v5123_v46 = vrot.slane %v13179_v4, 2  ;;  %v5124_v11 = vrot.slane %v13179_v4, 4  ;;  %v5024_v27 = vld [vmem:[#allocation3 + $0x80] sm:$0xff]  ;;  %v5125_v36 = vrot.slane %v13179_v4, 6 }
 0x34b   : > { %v4711_v35 = vpop.f32.mrf.mxu1  ;;  %v5066_v21 = vmax.f32 %v11603_v42, %v5024_v27 }
 0x34c   : > { %v3740_v24 = vpop.permute.xlu1 %3739  ;;  %v4712_v63 = vadd.f32 %v11480_v25, %v4711_v35 }
 0x34d   : > { %v3628_v30 = vpop.permute.xlu0 %3627 }
 0x34e   : > { %v4316_v23 = vsel %vm2441_vm9, %v4283_v28, %v3628_v30  ;;  %v4801_v48 = vadd.f32 %v4800_v6, %v4712_v63  ;;  %v5126_v28 = vrot.slane %v11546_v61, 2  ;;  %v5127_v63 = vrot.slane %v11546_v61, 4  ;;  %v13180_v30 = vld [vmem:[#allocation9_spill] sm:$0xff]  ;;  %v13181_v6 = vld [vmem:[#allocation8_spill] sm:$0xff] }
 0x34f   : > { %v4363_v5 = vsel %vm4319_vm12, %v4316_v23, %v3740_v24  ;;  %v11662_v24 = vld [vmem:[#allocation3 + $0xa0] sm:$0x3]  ;;  %v13182_v23 = vpack.c.b16 %v13180_v30, %v13181_v6  ;;  %13184 = vst [vmem:[#allocation9_spill] sm:$0xff] %v11680_v54 }
 0x350   : > { %4733 = vmatmul.bf16.gmra.mxu1 %v4363_v5  ;;  %v4890_v38 = vadd.f32 %v11471_v15, %v4801_v48  ;;  %v5091_v56 = vmax.f32 %v5067_v13, %v11662_v24  ;;  %v11691_v55 = vld [vmem:[#allocation1 + $0x2] ss:$4 sm:$0xff]  ;;  %v8954_v13 = vrot.slane %v5126_v28, 9  ;;  %v8955_v30 = vrot.slane %v5127_v63, 9 }
 0x351   : > { %v4286_v48 = vsel %vm2309_vm3, %v13182_v23, %v3518_v0  ;;  %v11693_v0 = vld [vmem:[#allocation1 + $0x3] ss:$4 sm:$0xff]  ;;  %v5129_v23 = vrot.slane %v11585_v1, 2 }
 0x352   : > { %4995 = vst.msk [vmem:[#allocation3 + $0xf9] sm:$0xff] %vm2309_vm3, %v4890_v38  ;;  %v8949_v38 = vrot.slane %v13179_v4, 9 }
 0x353   : > { %13185 = vst [vmem:[#allocation8_spill] sm:$0xff] %v11693_v0 }
 0x354   : > { %v4158_v33 = vpop.permute.xlu1 %4157  ;;  %v11639_v17 = vpop.f32.mrf.mxu3 }
 0x355   : > { %v4046_v29 = vpop.permute.xlu0 %4045  ;;  %13176 = vst [vmem:[#allocation6_spill] sm:$0xff] %v11639_v17  ;;  %v4803_v62 = vpop.f32.mrf.mxu2 }
 0x356   : > { %v4447_v31 = vsel %vm2441_vm9, %v4415_v10, %v4046_v29  ;;  %v4714_v12 = vpop.f32.mrf.mxu1  ;;  %v8950_v10 = vrot.slane %v5123_v46, 9  ;;  %v8951_v29 = vrot.slane %v5124_v11, 9 }
 0x357   : > { %v4715_v15 = vadd.f32 %v11480_v25, %v4714_v12  ;;  %v4494_v49 = vsel %vm4319_vm12, %v4447_v31, %v4158_v33  ;;  %v8952_v12 = vrot.slane %v5125_v36, 9 }
 0x358   : > { %4827 = vmatmul.bf16.gmra.mxu2 %v4494_v49  ;;  %v11687_v49 = vmax.f32 %v5066_v21, %v11680_v54  ;;  %v11703_v21 = vmax.f32 %v5123_v46, %v8950_v10  ;;  %v5132_v10 = vrot.slane %v11608_v34, 2  ;;  %v11786_v54 = vld [vmem:[#allocation3 + $0xe8] sm:$0x3] }
 0x359   : > { %v4804_v45 = vadd.f32 %v4803_v62, %v4715_v15  ;;  %v11684_v15 = vld [vmem:[#allocation1 + $0x20] ss:$4 sm:$0xff]  ;;  %13189 = vst [vmem:[#allocation19_spill] sm:$0xff] %v11786_v54 }
 0x35a   : > { %5257 = vst.sshfl [vmem:[#allocation1 + $0x20] sm:$0xff pattern:$0x73625140] %v11687_v49  ;;  %v5140_v40 = vrot.slane %v11687_v49, 6 }
 0x35b   : > { %v4893_v35 = vadd.f32 %v11489_v50, %v4804_v45  ;;  %v11689_v45 = vld [vmem:[#allocation1 + $0x1] ss:$4 sm:$0xff] }
 0x35c   : > { %v3742_v58 = vpop.permute.xlu1 %3741  ;;  %v11673_v50 = vpop.f32.mrf.mxu3  ;;  %5265 = vst.sshfl [vmem:[#allocation1] sm:$0xff pattern:$0x73625140] %v5091_v56  ;;  %v11711_v56 = vld [vmem:[#allocation3 + $0xb8] sm:$0x3] }
 0x35d   : > { %4996 = vst.msk [vmem:[#allocation3 + $0x109] sm:$0xff] %vm2309_vm3, %v4893_v35  ;;  %v3630_v5 = vpop.permute.xlu0 %3629  ;;  %v4805_v42 = vpop.f32.mrf.mxu2  ;;  %v8953_v35 = vrot.slane %v11546_v61, 9 }
 0x35e   : > { %13183 = vst [vmem:[#allocation12_spill] sm:$0xff] %v11673_v50  ;;  %v4318_v3 = vsel %vm2441_vm9, %v4286_v48, %v3630_v5  ;;  %v4716_v33 = vpop.f32.mrf.mxu1  ;;  %v5130_v48 = vrot.slane %v11585_v1, 4  ;;  %v11701_v5 = vmax.f32 %v13179_v4, %v8949_v38  ;;  %v11720_v4 = vmax.f32 %v5127_v63, %v8955_v30 }
 0x35f   : > { %v4717_v62 = vadd.f32 %v11480_v25, %v4716_v33  ;;  %v4366_v31 = vsel %vm4319_vm12, %v4318_v3, %v3742_v58  ;;  %v8956_v58 = vrot.slane %v5128_v8, 9  ;;  %v11705_v3 = vmax.f32 %v5124_v11, %v8951_v29 }
 0x360   : > { %4738 = vmatmul.bf16.gmra.mxu1 %v4366_v31  ;;  %v5131_v33 = vrot.slane %v11585_v1, 6  ;;  %v11716_v31 = vmax.f32 %v11546_v61, %v8953_v35  ;;  %v8957_v61 = vrot.slane %v11585_v1, 9  ;;  %v8958_v29 = vrot.slane %v5129_v23, 9 }
 0x361   : > { %v4806_v27 = vadd.f32 %v4805_v42, %v4717_v62  ;;  %v11718_v42 = vmax.f32 %v5126_v28, %v8954_v13  ;;  %v11722_v46 = vmax.f32 %v5128_v8, %v8956_v58  ;;  %v8959_v28 = vrot.slane %v5130_v48, 9 }
 0x362   : > { %v5133_v8 = vrot.slane %v11608_v34, 4  ;;  %v8962_v38 = vrot.slane %v5132_v10, 9  ;;  %v5135_v11 = vrot.slane %v11650_v26, 2  ;;  %v11749_v63 = vmax.f32 %v11585_v1, %v8957_v61  ;;  %v520_v1 = vld [vmem:[%s13103_s6] sm:$0x1] }
 0x363   : > { %v4895_v6 = vadd.f32 %v11518_v7, %v4806_v27  ;;  %v11713_v7 = vmax.f32 %v5125_v36, %v8952_v12  ;;  %v5134_v12 = vrot.slane %v11608_v34, 6  ;;  %v8960_v27 = vrot.slane %v5131_v33, 9 }
 0x364   : > { %v11709_v62 = vpop.f32.mrf.mxu3  ;;  %v8961_v36 = vrot.slane %v11608_v34, 9  ;;  %v11751_v35 = vmax.f32 %v5129_v23, %v8958_v29  ;;  %v11753_v13 = vmax.f32 %v5130_v48, %v8959_v28  ;;  %v5136_v30 = vrot.slane %v11650_v26, 4 }
 0x365   : > { %4997 = vst.msk [vmem:[#allocation3 + $0x111] sm:$0xff] %vm2309_vm3, %v4895_v6  ;;  %v8964_v50 = vrot.slane %v5134_v12, 9  ;;  %v11756_v58 = vmax.f32 %v5131_v33, %v8960_v27  ;;  %v5137_v6 = vrot.slane %v11650_v26, 6  ;;  %v8965_v48 = vrot.slane %v11650_v26, 9 }
 0x366   : > { %13186 = vst [vmem:[#allocation16_spill] sm:$0xff] %v11709_v62  ;;  %v8963_v62 = vrot.slane %v5133_v8, 9  ;;  %v11769_v33 = vmax.f32 %v11608_v34, %v8961_v36  ;;  %v11771_v28 = vmax.f32 %v5132_v10, %v8962_v38  ;;  %v5138_v27 = vrot.slane %v11687_v49, 2  ;;  %v5029_v38 = vld [vmem:[#allocation3 + $0xa8] sm:$0xff] }
 0x367   : > { %13187 = vst [vmem:[#allocation17_spill] sm:$0xff] %v11753_v13  ;;  %v5139_v23 = vrot.slane %v11687_v49, 4  ;;  %v8967_v59 = vrot.slane %v5136_v30, 9  ;;  %v11782_v34 = vmax.f32 %v5134_v12, %v8964_v50  ;;  %v8968_v10 = vrot.slane %v5137_v6, 9 }
 0x368   : > { %v11780_v22 = vmax.f32 %v5133_v8, %v8963_v62  ;;  %v11793_v13 = vmax.f32 %v11650_v26, %v8965_v48  ;;  %v11795_v62 = vperm.slane %v520_v1, 0  ;;  %v8969_v50 = vrot.slane %v11687_v49, 9  ;;  %v11828_v48 = vld [vmem:[#allocation1 + $0x20] ss:$4 sm:$0xff] }
 0x369   : > { %v8970_v8 = vrot.slane %v5138_v27, 9  ;;  %v8971_v20 = vrot.slane %v5139_v23, 9  ;;  %v11803_v44 = vmax.f32 %v5136_v30, %v8967_v59  ;;  %v11837_v30 = vld [vmem:[#allocation3 + $0xc0] sm:$0xff] }
 0x36a   : > { %v11833_v59 = vmax.f32 %v11687_v49, %v8969_v50  ;;  %13192 = vst [vmem:[#allocation21_spill] sm:$0xff] %v11837_v30 }
 0x36b   : > { %v11835_v1 = vmax.f32 %v5138_v27, %v8970_v8  ;;  %v11849_v27 = vld [vmem:[#allocation1 + $0x23] ss:$4 sm:$0xff] }
 0x36c   : > { %v11759_v17 = vpop.f32.mrf.mxu3  ;;  %v4808_v61 = vpop.f32.mrf.mxu2 }
 0x36d   : > { %13188 = vst [vmem:[#allocation18_spill] sm:$0xff] %v11759_v17  ;;  %v8966_v17 = vrot.slane %v5135_v11, 9 }
 0x36e   : > { %v4719_v29 = vpop.f32.mrf.mxu1 }
 0x36f   : > { %v4720_v18 = vadd.f32 %v11480_v25, %v4719_v29  ;;  %v11798_v12 = vmax.f32 %v5135_v11, %v8966_v17  ;;  %v8972_v29 = vrot.slane %v5140_v40, 9  ;;  %v11811_v17 = vmax.f32 %v5137_v6, %v8968_v10  ;;  %v11830_v11 = vld [vmem:[#allocation1 + $0x21] ss:$4 sm:$0xff] }
 0x370   : > { %v13191_v6 = vmax.f32 %v11662_v24, %v11711_v56  ;;  %v11842_v24 = vmax.f32 %v5139_v23, %v8971_v20 }
 0x371   : > { %v4809_v36 = vadd.f32 %v4808_v61, %v4720_v18  ;;  %v11801_v61 = vld [vmem:[#allocation3 + $0xd0] sm:$0x3]  ;;  %v11844_v56 = vmax.f32 %v5140_v40, %v8972_v29  ;;  %v13199_v40 = vmax.f32 %v11713_v7, %v11582_v32 }
 0x372   : > { %13190 = vst [vmem:[#allocation20_spill] sm:$0xff] %v11801_v61  ;;  %v11825_v10 = vmax.f32 %v13191_v6, %v11801_v61 }
 0x373   : > { %v4898_v18 = vadd.f32 %v11523_v37, %v4809_v36  ;;  %v5068_v36 = vmax.f32 %v11643_v47, %v5029_v38  ;;  %v11840_v38 = vld [vmem:[#allocation1 + $0x22] ss:$4 sm:$0xff] }
 0x374   : > { %v6160_v37 = vpop.f32.mrf.mxu3  ;;  %v4810_v6 = vpop.f32.mrf.mxu2  ;;  %v5663_v32 = vmax.f32 %v11835_v1, %v11840_v38  ;;  %v11981_v1 = vld [vmem:[%s13101_s4] ss:$0 sm:$0xff] }
 0x375   : > { %4998 = vst.msk [vmem:[#allocation3 + $0x121] sm:$0xff] %vm2309_vm3, %v4898_v18  ;;  %v6161_v18 = vadd.f32 %v6160_v37, %v11795_v62  ;;  %v11847_v37 = vmax.f32 %v5068_v36, %v11837_v30  ;;  %v13195_v30 = vmax.f32 %v11703_v21, %v11557_v41  ;;  %v13200_v41 = vmax.f32 %v11718_v42, %v11589_v9 }
 0x376   : > { %v4721_v26 = vpop.f32.mrf.mxu1 }
 0x377   : > { %v4722_v47 = vadd.f32 %v11480_v25, %v4721_v26  ;;  %13193 = vst [vmem:[#allocation22_spill] sm:$0xff] %v11847_v37  ;;  %v6188_v14 = vrot.slane %v6161_v18, 2  ;;  %v6189_v54 = vrot.slane %v6161_v18, 4  ;;  %v6190_v49 = vrot.slane %v6161_v18, 6 }
 0x378   : > { %v6212_v50 = vrot.slane %v6161_v18, 1  ;;  %v13194_v26 = vmax.f32 %v11701_v5, %v11555_v16  ;;  %5267 = vst.sshfl [vmem:[#allocation1 + $0x20] sm:$0xff pattern:$0x73625140] %v11847_v37  ;;  %v13196_v16 = vmax.f32 %v11705_v3, %v11559_v51  ;;  %v13201_v51 = vmax.f32 %v11722_v46, %v11605_v19 }
 0x379   : > { %v4811_v8 = vadd.f32 %v4810_v6, %v4722_v47  ;;  %v6213_v23 = vrot.slane %v6188_v14, 1  ;;  %v6214_v29 = vrot.slane %v6189_v54, 1  ;;  %v6215_v36 = vrot.slane %v6190_v49, 1 }
 0x37a   : > { %v6308_v61 = vadd.f32 %v6161_v18, %v13194_v26  ;;  %v6309_v0 = vadd.f32 %v6212_v50, %v13195_v30  ;;  %v6310_v5 = vadd.f32 %v6188_v14, %v13196_v16  ;;  %v13197_v18 = vmax.f32 %v11716_v31, %v11587_v60 }
 0x37b   : > { %v4900_v47 = vadd.f32 %v11571_v52, %v4811_v8  ;;  %v13198_v26 = vmax.f32 %v11720_v4, %v11591_v43  ;;  %v6311_v37 = vadd.f32 %v6213_v23, %v13199_v40  ;;  %v6313_v52 = vadd.f32 %v6214_v29, %v13200_v41 }
 0x37c   : > { %v6312_v6 = vadd.f32 %v6189_v54, %v13197_v18  ;;  %v6315_v14 = vadd.f32 %v6215_v36, %v13201_v51  ;;  %v6451_v21 = vmax.f32 %v6308_v61, 0.0  ;;  %v6452_v60 = vmax.f32 %v6309_v0, 0.0 }
 0x37d   : > { %v6314_v20 = vadd.f32 %v6190_v49, %v13198_v26  ;;  %4999 = vst.msk [vmem:[#allocation3 + $0x129] sm:$0xff] %vm2309_vm3, %v4900_v47  ;;  %v6453_v54 = vmax.f32 %v6310_v5, 0.0  ;;  %v6454_v31 = vmax.f32 %v6311_v37, 0.0  ;;  %v6456_v4 = vmax.f32 %v6313_v52, 0.0  ;;  %v6162_v49 = vpop.f32.mrf.mxu3 }
 0x37e   : > { %v6455_v3 = vmax.f32 %v6312_v6, 0.0  ;;  %v6458_v30 = vmax.f32 %v6315_v14, 0.0  ;;  %v6599_v7 = vperm.slane %v6451_v21, 0  ;;  %v6600_v9 = vperm.slane %v6452_v60, 0 }
 0x37f   : > { %v6457_v43 = vmax.f32 %v6314_v20, 0.0  ;;  %v6601_v42 = vperm.slane %v6453_v54, 0  ;;  %v5664_v19 = vmax.f32 %v11842_v24, %v11849_v27  ;;  %v6602_v46 = vperm.slane %v6454_v31, 0  ;;  %v11886_v40 = vld [vmem:[#allocation1 + $0x21] ss:$4 sm:$0xff] }
 0x380   : > { %v6603_v50 = vperm.slane %v6455_v3, 0  ;;  %v8539_v0 = vpack.c.bf16 %v6308_v61, %v6308_v61  ;;  %v6663_v37 = vsel %vm6014_vm13, %v6600_v9, %v6599_v7  ;;  %v8540_v23 = vpack.c.bf16 %v6310_v5, %v6310_v5  ;;  %v11889_v47 = vld [vmem:[#allocation1 + $0x22] ss:$4 sm:$0xff]  ;;  %v11891_v16 = vld [vmem:[#allocation1 + $0x23] ss:$4 sm:$0xff] }
 0x381   : > { %v6605_v8 = vperm.slane %v6457_v43, 0  ;;  %v8541_v29 = vpack.c.bf16 %v6312_v6, %v6312_v6  ;;  %v8542_v36 = vpack.c.bf16 %v6314_v20, %v6314_v20  ;;  %v6604_v18 = vperm.slane %v6456_v4, 0  ;;  %5272 = vst.sshfl [vmem:[#allocation1 + $0x20] sm:$0xff pattern:$0x73625140] %v11825_v10 }
 0x382   : > { %v6606_v26 = vperm.slane %v6458_v30, 0  ;;  %v6664_v41 = vsel %vm6017_vm14, %v6601_v42, %v6663_v37  ;;  %v6163_v52 = vadd.f32 %v6162_v49, %v11795_v62  ;;  %v8575_v51 = vunpack.c.l.b16 %v8540_v23 }
 0x383   : > { %v6665_v61 = vsel %vm6020_vm15, %v6602_v46, %v6664_v41  ;;  %v8576_v14 = vunpack.c.l.b16 %v8541_v29  ;;  %v8577_v21 = vunpack.c.l.b16 %v8542_v36  ;;  %v8574_v3 = vunpack.c.l.b16 %v8539_v0  ;;  %v13204_v29 = vld [vmem:[#allocation17_spill] sm:$0xff] }
 0x384   : > { %v6666_v5 = vsel %vm6023_vm1, %v6603_v50, %v6665_v61  ;;  %v6191_v20 = vrot.slane %v6163_v52, 2  ;;  %v6192_v6 = vrot.slane %v6163_v52, 4  ;;  %v6193_v60 = vrot.slane %v6163_v52, 6  ;;  %v13205_v36 = vld [vmem:[#allocation5_spill] sm:$0xff] }
 0x385   : > { %v6667_v54 = vsel %vm6026_vm2, %v6604_v18, %v6666_v5  ;;  %v8590_v43 = vrot.slane %v8575_v51, 7  ;;  %v8592_v31 = vrot.slane %v8576_v14, 6  ;;  %v8594_v30 = vrot.slane %v8577_v21, 5  ;;  %v13207_v61 = vld [vmem:[#allocation13_spill] sm:$0xff]  ;;  %v13209_v21 = vld [vmem:[#allocation15_spill] sm:$0xff] }
 0x386   : > { %v6668_v4 = vsel %vm6029_vm4, %v6605_v8, %v6667_v54  ;;  %v6216_v7 = vrot.slane %v6163_v52, 1  ;;  %v6217_v10 = vrot.slane %v6191_v20, 1  ;;  %v6218_v49 = vrot.slane %v6192_v6, 1 }
 0x387   : > { %v6669_v9 = vsel %vm6032_vm5, %v6606_v26, %v6668_v4  ;;  %v8591_v42 = vsel %vm6014_vm13, %v8590_v43, %v8574_v3  ;;  %v6219_v46 = vrot.slane %v6193_v60, 1  ;;  %v13202_v0 = vmax.f32 %v11749_v63, %v11610_v53  ;;  %v5030_v4 = vld [vmem:[#allocation3 + $0xb0] sm:$0xff] }
 0x388   : > { %6728 = vst.msk [vmem:[#allocation4 + $0x11] sm:$0xff] %vm2309_vm3, %v6669_v9  ;;  %v8593_v50 = vsel %vm6017_vm14, %v8592_v31, %v8591_v42  ;;  %v13203_v8 = vmax.f32 %v11751_v35, %v11612_v57  ;;  %v13206_v18 = vmax.f32 %v13204_v29, %v13205_v36  ;;  %v13208_v51 = vmax.f32 %v11756_v58, %v13207_v61  ;;  %v4724_v58 = vpop.f32.mrf.mxu1  ;;  %v5266_v31 = vld [vmem:[#allocation1] ss:$4 sm:$0xff] }
 0x389   : > { %v6316_v37 = vadd.f32 %v6163_v52, %v13202_v0  ;;  %v11914_v41 = vsel %vm6020_vm15, %v8594_v30, %v8593_v50  ;;  %v13210_v5 = vmax.f32 %v11769_v33, %v13209_v21  ;;  %v13211_v63 = vmax.f32 %v11771_v28, %v11654_v39 }
 0x38a   : > { %v6317_v23 = vadd.f32 %v6216_v7, %v13203_v8  ;;  %v6318_v26 = vadd.f32 %v6191_v20, %v13206_v18  ;;  %v6319_v14 = vadd.f32 %v6217_v10, %v13208_v51  ;;  %v13212_v35 = vmax.f32 %v11780_v22, %v11656_v2  ;;  %v6840_v10 = vld [vmem:[#allocation4 + $0x90] sm:$0xff]  ;;  %v6165_v22 = vpop.f32.mrf.mxu3 }
 0x38b   : > { %v6320_v53 = vadd.f32 %v6192_v6, %v13210_v5  ;;  %v6321_v57 = vadd.f32 %v6218_v49, %v13211_v63  ;;  %v13213_v20 = vmax.f32 %v11782_v34, %v11684_v15  ;;  %v6459_v3 = vmax.f32 %v6316_v37, 0.0  ;;  %v11932_v34 = vld [vmem:[#allocation3 + $0xc8] sm:$0xff]  ;;  %v13214_v49 = vld [vmem:[#allocation9_spill] sm:$0xff] }
 0x38c   : > { %v6322_v52 = vadd.f32 %v6193_v60, %v13212_v35  ;;  %v6460_v43 = vmax.f32 %v6317_v23, 0.0  ;;  %v6461_v30 = vmax.f32 %v6318_v26, 0.0  ;;  %v6462_v33 = vmax.f32 %v6319_v14, 0.0  ;;  %v4813_v23 = vpop.f32.mrf.mxu2 }
 0x38d   : > { %v6323_v54 = vadd.f32 %v6219_v46, %v13213_v20  ;;  %v6463_v6 = vmax.f32 %v6320_v53, 0.0  ;;  %v6464_v7 = vmax.f32 %v6321_v57, 0.0  ;;  %v6607_v9 = vperm.slane %v6459_v3, 0  ;;  %v13215_v57 = vld [vmem:[#allocation10_spill] sm:$0xff] }
 0x38e   : > { %v6465_v39 = vmax.f32 %v6322_v52, 0.0  ;;  %v6608_v42 = vperm.slane %v6460_v43, 0  ;;  %v6609_v2 = vperm.slane %v6461_v30, 0  ;;  %v6610_v60 = vperm.slane %v6462_v33, 0 }
 0x38f   : > { %v6466_v28 = vmax.f32 %v6323_v54, 0.0  ;;  %v5665_v15 = vmax.f32 %v11844_v56, %v5266_v31  ;;  %v5069_v46 = vmax.f32 %v13214_v49, %v5030_v4  ;;  %v6611_v50 = vperm.slane %v6463_v6, 0  ;;  %v13218_v6 = vld [vmem:[#allocation8_spill] sm:$0xff] }
 0x390   : > { %v6670_v0 = vsel %vm6014_vm13, %v6608_v42, %v6607_v9  ;;  %v4725_v37 = vadd.f32 %v11480_v25, %v4724_v58  ;;  %v6848_v8 = vpack.c.bf16 %v6840_v10, %v6840_v10  ;;  %v6612_v29 = vperm.slane %v6464_v7, 0 }
 0x391   : > { %v6613_v36 = vperm.slane %v6465_v39, 0  ;;  %v6671_v18 = vsel %vm6017_vm14, %v6609_v2, %v6670_v0  ;;  %v6166_v26 = vadd.f32 %v6165_v22, %v11795_v62  ;;  %v6614_v61 = vperm.slane %v6466_v28, 0  ;;  %v4726_v39 = vpop.f32.mrf.mxu1  ;;  %v13222_v22 = vld [vmem:[#allocation22_spill] sm:$0xff] }
 0x392   : > { %v6672_v56 = vsel %vm6020_vm15, %v6610_v60, %v6671_v18  ;;  %v4814_v51 = vadd.f32 %v4813_v23, %v4725_v37  ;;  %v11941_v14 = vmax.f32 %v5069_v46, %v11932_v34  ;;  %v13216_v20 = vmax.f32 %v11793_v13, %v11689_v45 }
 0x393   : > { %v6673_v21 = vsel %vm6023_vm1, %v6611_v50, %v6672_v56  ;;  %v6194_v5 = vrot.slane %v6166_v26, 2  ;;  %v6195_v53 = vrot.slane %v6166_v26, 4  ;;  %v6196_v25 = vrot.slane %v6166_v26, 6  ;;  %v11989_v56 = vld [vmem:[#allocation3 + $0x100] sm:$0x3] }
 0x394   : > { %v6674_v63 = vsel %vm6026_vm2, %v6612_v29, %v6673_v21  ;;  %v4903_v35 = vadd.f32 %v13215_v57, %v4814_v51  ;;  %v6220_v52 = vrot.slane %v6166_v26, 1  ;;  %v6324_v54 = vadd.f32 %v6166_v26, %v13216_v20  ;;  %5271 = vst.sshfl [vmem:[#allocation1] sm:$0xff pattern:$0x73625140] %v11941_v14  ;;  %v4815_v0 = vpop.f32.mrf.mxu2 }
 0x395   : > { %v6675_v3 = vsel %vm6029_vm4, %v6613_v36, %v6674_v63  ;;  %v6221_v43 = vrot.slane %v6194_v5, 1  ;;  %v6222_v58 = vrot.slane %v6195_v53, 1  ;;  %v6223_v31 = vrot.slane %v6196_v25, 1 }
 0x396   : > { %v6676_v4 = vsel %vm6032_vm5, %v6614_v61, %v6675_v3  ;;  %5000 = vst.msk [vmem:[#allocation3 + $0x139] sm:$0xff] %vm2309_vm3, %v4903_v35  ;;  %v13217_v30 = vmax.f32 %v11798_v12, %v11691_v55  ;;  %v13219_v7 = vmax.f32 %v11803_v44, %v13218_v6  ;;  %v13220_v13 = vmax.f32 %v11833_v59, %v11830_v11  ;;  %v13223_v35 = vld [vmem:[#allocation11_spill] sm:$0xff] }
 0x397   : > { %6729 = vst.msk [vmem:[#allocation4 + $0x21] sm:$0xff] %vm2309_vm3, %v6676_v4  ;;  %v13221_v28 = vmax.f32 %v11811_v17, %v11828_v48  ;;  %v6329_v55 = vadd.f32 %v6222_v58, %v5663_v32  ;;  %v11974_v44 = vadd.f32 %v6196_v25, %v5664_v19  ;;  %v6331_v12 = vadd.f32 %v6223_v31, %v5665_v15  ;;  %v13224_v58 = vld [vmem:[#allocation20_spill] sm:$0xff]  ;;  %v13225_v31 = vld [vmem:[#allocation19_spill] sm:$0xff] }
 0x398   : > { %v6325_v33 = vadd.f32 %v6220_v52, %v13217_v30  ;;  %v6326_v45 = vadd.f32 %v6194_v5, %v13219_v7  ;;  %v11962_v10 = vadd.f32 %v6195_v53, %v13220_v13  ;;  %v6467_v11 = vmax.f32 %v6324_v54, 0.0 }
 0x399   : > { %v6327_v9 = vadd.f32 %v6221_v43, %v13221_v28  ;;  %v5141_v2 = vrot.slane %v13222_v22, 2  ;;  %v7056_v48 = vunpack.c.l.b16 %v6848_v8  ;;  %v4727_v17 = vadd.f32 %v11981_v1, %v4726_v39 }
 0x39a   : > { %v6468_v59 = vmax.f32 %v6325_v33, 0.0  ;;  %v6469_v42 = vmax.f32 %v6326_v45, 0.0  ;;  %v6471_v49 = vmax.f32 %v11962_v10, 0.0  ;;  %v6472_v38 = vmax.f32 %v6329_v55, 0.0 }
 0x39b   : > { %v6470_v60 = vmax.f32 %v6327_v9, 0.0  ;;  %v6615_v24 = vperm.slane %v6467_v11, 0  ;;  %v6473_v19 = vmax.f32 %v11974_v44, 0.0  ;;  %v6474_v15 = vmax.f32 %v6331_v12, 0.0  ;;  %v5273_v55 = vld [vmem:[#allocation1] ss:$4 sm:$0xff] }
 0x39c   : > { %v6616_v27 = vperm.slane %v6468_v59, 0  ;;  %v6617_v32 = vperm.slane %v6469_v42, 0  ;;  %v5142_v50 = vrot.slane %v13222_v22, 4  ;;  %v8543_v8 = vpack.c.bf16 %v6324_v54, %v6324_v54  ;;  %v5277_v12 = vld [vmem:[#allocation1 + $0x20] ss:$4 sm:$0xff] }
 0x39d   : > { %v6618_v46 = vperm.slane %v6470_v60, 0  ;;  %v8544_v23 = vpack.c.bf16 %v6326_v45, %v6326_v45  ;;  %v5143_v29 = vrot.slane %v13222_v22, 6  ;;  %v6619_v36 = vperm.slane %v6471_v49, 0  ;;  %v5274_v60 = vld [vmem:[#allocation1 + $0x1] ss:$4 sm:$0xff] }
 0x39e   : > { %v6677_v37 = vsel %vm6014_vm13, %v6616_v27, %v6615_v24  ;;  %v7064_v26 = vpack.c.b16 %v7056_v48, %v7056_v48  ;;  %v4816_v61 = vadd.f32 %v4815_v0, %v4727_v17  ;;  %v6620_v51 = vperm.slane %v6472_v38, 0  ;;  %v5275_v38 = vld [vmem:[#allocation1 + $0x2] ss:$4 sm:$0xff]  ;;  %v5276_v24 = vld [vmem:[#allocation1 + $0x3] ss:$4 sm:$0xff] }
 0x39f   : > { %v6678_v18 = vsel %vm6017_vm14, %v6617_v32, %v6677_v37  ;;  %v8578_v5 = vunpack.c.l.b16 %v8543_v8  ;;  %v8579_v53 = vunpack.c.l.b16 %v8544_v23  ;;  %v6621_v25 = vperm.slane %v6473_v19, 0  ;;  %v5035_v0 = vld [vmem:[#allocation3 + $0xd8] sm:$0xff] }
 0x3a0   : > { %v6679_v21 = vsel %vm6020_vm15, %v6618_v46, %v6678_v18  ;;  %v6622_v63 = vperm.slane %v6474_v15, 0  ;;  %7079 = vrot.lane.b32.xlu2 %v7064_v26, %s9327_s21  ;;  %v4905_v52 = vadd.f32 %v13223_v35, %v4816_v61  ;;  %v5144_v43 = vrot.slane %v11941_v14, 2  ;;  %v6167_v46 = vpop.f32.mrf.mxu3  ;;  %v6856_v18 = vld [vmem:[#allocation4 + $0x91] sm:$0xff]  ;;  %v6752_v26 = vld [vmem:[#allocation4 + $0x1] sm:$0xff] }
 0x3a1   : > { %v6680_v57 = vsel %vm6023_vm1, %v6619_v36, %v6679_v21  ;;  %v8596_v54 = vrot.slane %v8578_v5, 4  ;;  %v8598_v3 = vrot.slane %v8579_v53, 3  ;;  %v13226_v4 = vmax.f32 %v13224_v58, %v13225_v31  ;;  %v12019_v61 = vld [vmem:[#allocation3 + $0xe0] sm:$0xff]  ;;  %v12024_v53 = vld [vmem:[#allocation3 + $0xf0] sm:$0xff] }
 0x3a2   : > { %v6681_v20 = vsel %vm6026_vm2, %v6620_v51, %v6680_v57  ;;  %5001 = vst.msk [vmem:[#allocation3 + $0x141] sm:$0xff] %vm2309_vm3, %v4905_v52  ;;  %v5145_v6 = vrot.slane %v11941_v14, 4  ;;  %v5146_v7 = vrot.slane %v11941_v14, 6  ;;  %v8973_v39 = vrot.slane %v13222_v22, 9 }
 0x3a3   : > { %v12001_v30 = vmax.f32 %v13226_v4, %v11989_v56  ;;  %v6682_v33 = vsel %vm6029_vm4, %v6621_v25, %v6681_v20  ;;  %v8597_v13 = vsel %vm6023_vm1, %v8596_v54, %v11914_v41  ;;  %v8974_v28 = vrot.slane %v5141_v2, 9 }
 0x3a4   : > { %v6683_v45 = vsel %vm6032_vm5, %v6622_v63, %v6682_v33  ;;  %v12013_v9 = vsel %vm6026_vm2, %v8598_v3, %v8597_v13  ;;  %v8975_v11 = vrot.slane %v5142_v50, 9  ;;  %v8976_v59 = vrot.slane %v5143_v29, 9 }
 0x3a5   : > { %6730 = vst.msk [vmem:[#allocation4 + $0x31] sm:$0xff] %vm2309_vm3, %v6683_v45  ;;  %v8977_v42 = vrot.slane %v11941_v14, 9  ;;  %v8978_v49 = vrot.slane %v5144_v43, 9  ;;  %v8979_v48 = vrot.slane %v5145_v6, 9  ;;  %v8980_v17 = vrot.slane %v5146_v7, 9 }
 0x3a6   : > { %v5602_v41 = vmax.f32 %v13222_v22, %v8973_v39  ;;  %v5603_v27 = vmax.f32 %v5141_v2, %v8974_v28  ;;  %v5604_v32 = vmax.f32 %v5142_v50, %v8975_v11  ;;  %v5605_v19 = vmax.f32 %v5143_v29, %v8976_v59 }
 0x3a7   : > { %v5606_v15 = vmax.f32 %v11941_v14, %v8977_v42  ;;  %v5607_v37 = vmax.f32 %v5144_v43, %v8978_v49  ;;  %v5608_v8 = vmax.f32 %v5145_v6, %v8979_v48  ;;  %v5609_v23 = vmax.f32 %v5146_v7, %v8980_v17  ;;  %v9234_v42 = vld [vmem:[%s13104_s7 + $0x78] sm:$0xff] }
 0x3a8   : > { %v5666_v36 = vmax.f32 %v5602_v41, %v11886_v40  ;;  %v5667_v22 = vmax.f32 %v5603_v27, %v11889_v47  ;;  %v5668_v51 = vmax.f32 %v5604_v32, %v11891_v16  ;;  %v5669_v2 = vmax.f32 %v5605_v19, %v5273_v55  ;;  %v13227_v40 = vld [vmem:[#allocation21_spill] sm:$0xff]  ;;  %v12040_v41 = vld [vmem:[#allocation3 + $0xf8] sm:$0xff]  ;;  %v12042_v19 = vld [vmem:[#allocation4 + $0x12] sm:$0xff]  ;;  %9257 = vmatpush.bf16.msrb.mxu2 %v9234_v42 }
 0x3a9   : > { %v5670_v50 = vmax.f32 %v5606_v15, %v5274_v60  ;;  %v5671_v29 = vmax.f32 %v5607_v37, %v5275_v38  ;;  %v5672_v21 = vmax.f32 %v5608_v8, %v5276_v24  ;;  %v5673_v14 = vmax.f32 %v5609_v23, %v5277_v12  ;;  %v12044_v15 = vld [vmem:[#allocation4 + $0x11] sm:$0xff]  ;;  %7453 = vmatpush.bf16.msrb.mxu1 %v9234_v42  ;;  %v6170_v23 = vpop.f32.mrf.mxu3 }
 0x3aa   : > { %v6168_v5 = vadd.f32 %v6167_v46, %v11795_v62  ;;  %v6864_v25 = vpack.c.bf16 %v6856_v18, %v6856_v18  ;;  %v6760_v63 = vpack.c.bf16 %v6752_v26, %v6752_v26  ;;  %v5071_v57 = vmax.f32 %v13227_v40, %v5035_v0 }
 0x3ab   : > { %v5072_v35 = vmax.f32 %v11932_v34, %v12019_v61  ;;  %v12033_v34 = vld [vmem:[#allocation4 + $0x2] sm:$0xff]  ;;  %v13228_v59 = vmov 0.0  }
 0x3ac   : > { %v6197_v52 = vrot.slane %v6168_v5, 2  ;;  %v6198_v47 = vrot.slane %v6168_v5, 4  ;;  %v6199_v20 = vrot.slane %v6168_v5, 6  ;;  %v6224_v16 = vrot.slane %v6168_v5, 1  ;;  %7520 = vst.msk [vmem:[#allocation4 + $0x8] sm:$0x3] %vm2664_vm11, %v13228_v59 }
 0x3ad   : > { %v6332_v54 = vadd.f32 %v6168_v5, %v5666_v36  ;;  %v7096_v3 = vunpack.c.l.b16 %v6864_v25  ;;  %v6889_v43 = vunpack.c.l.b16 %v6760_v63  ;;  %v12030_v58 = vmax.f32 %v5071_v57, %v12024_v53  ;;  %7522 = vst.msk [vmem:[#allocation4 + $0x18] sm:$0x3] %vm2664_vm11, %v13228_v59 }
 0x3ae   : > { %v6225_v31 = vrot.slane %v6197_v52, 1  ;;  %v6226_v4 = vrot.slane %v6198_v47, 1  ;;  %v6227_v33 = vrot.slane %v6199_v20, 1  ;;  %v6333_v6 = vadd.f32 %v6224_v16, %v5667_v22 }
 0x3af   : > { %v6334_v7 = vadd.f32 %v6197_v52, %v5668_v51  ;;  %v6336_v45 = vadd.f32 %v6198_v47, %v5670_v50  ;;  %v6338_v13 = vadd.f32 %v6199_v20, %v5672_v21  ;;  %v6475_v39 = vmax.f32 %v6332_v54, 0.0  ;;  %5278 = vst.sshfl [vmem:[#allocation1] sm:$0xff pattern:$0x73625140] %v12030_v58 }
 0x3b0   : > { %v6335_v28 = vadd.f32 %v6225_v31, %v5669_v2  ;;  %v6337_v55 = vadd.f32 %v6226_v4, %v5671_v29  ;;  %v6339_v12 = vadd.f32 %v6227_v33, %v5673_v14  ;;  %v6476_v11 = vmax.f32 %v6333_v6, 0.0 }
 0x3b1   : > { %v6477_v60 = vmax.f32 %v6334_v7, 0.0  ;;  %v6479_v49 = vmax.f32 %v6336_v45, 0.0  ;;  %v6481_v48 = vmax.f32 %v6338_v13, 0.0  ;;  %v6623_v17 = vperm.slane %v6475_v39, 0 }
 0x3b2   : > { %v6478_v38 = vmax.f32 %v6335_v28, 0.0  ;;  %v6480_v24 = vmax.f32 %v6337_v55, 0.0  ;;  %v6482_v27 = vmax.f32 %v6339_v12, 0.0  ;;  %v6624_v32 = vperm.slane %v6476_v11, 0 }
 0x3b3   : > { %v6625_v46 = vperm.slane %v6477_v60, 0  ;;  %v6627_v0 = vperm.slane %v6479_v49, 0  ;;  %v6629_v37 = vperm.slane %v6481_v48, 0  ;;  %v7104_v8 = vpack.c.b16 %v7096_v3, %v7096_v3 }
 0x3b4   : > { %v6626_v36 = vperm.slane %v6478_v38, 0  ;;  %v6628_v18 = vperm.slane %v6480_v24, 0  ;;  %v6630_v26 = vperm.slane %v6482_v27, 0  ;;  %v6684_v61 = vsel %vm6014_vm13, %v6624_v32, %v6623_v17 }
 0x3b5   : > { %v6685_v22 = vsel %vm6017_vm14, %v6625_v46, %v6684_v61  ;;  %7119 = vrot.lane.b32.xlu1 %v7104_v8, %s9329_s30  ;;  %v6897_v51 = vpack.c.b16 %v6889_v43, %v6889_v43  ;;  %v5096_v2 = vmax.f32 %v5072_v35, %v12040_v41  ;;  %v5147_v50 = vrot.slane %v12030_v58, 2 }
 0x3b6   : > { %v6686_v29 = vsel %vm6020_vm15, %v6626_v36, %v6685_v22  ;;  %v5148_v21 = vrot.slane %v12030_v58, 4  ;;  %v5149_v14 = vrot.slane %v12030_v58, 6  ;;  %v5280_v5 = vld [vmem:[#allocation1 + $0x1] ss:$4 sm:$0xff]  ;;  %v5281_v25 = vld [vmem:[#allocation1 + $0x2] ss:$4 sm:$0xff]  ;;  %v6171_v63 = vadd.f32 %v6170_v23, %v11795_v62 }
 0x3b7   : > { %v6687_v40 = vsel %vm6023_vm1, %v6627_v0, %v6686_v29  ;;  %6905 = vrot.lane.b32.xlu2 %v6897_v51, %s9326_s20  ;;  %v5150_v57 = vrot.slane %v5096_v2, 2  ;;  %v5151_v52 = vrot.slane %v5096_v2, 4  ;;  %v5152_v47 = vrot.slane %v5096_v2, 6  ;;  %5279 = vst.sshfl [vmem:[#allocation1 + $0x20] sm:$0xff pattern:$0x73625140] %v5096_v2 }
 0x3b8   : > { %v6688_v35 = vsel %vm6026_vm2, %v6628_v18, %v6687_v40  ;;  %v5282_v20 = vld [vmem:[#allocation1 + $0x3] ss:$4 sm:$0xff]  ;;  %v8981_v16 = vrot.slane %v12030_v58, 9  ;;  %v8982_v54 = vrot.slane %v5147_v50, 9  ;;  %v8983_v3 = vrot.slane %v5148_v21, 9 }
 0x3b9   : > { %v6689_v43 = vsel %vm6029_vm4, %v6629_v37, %v6688_v35  ;;  %5287 = vst.sshfl [vmem:[#allocation1] sm:$0xff pattern:$0x73625140] %v12001_v30  ;;  %v8984_v31 = vrot.slane %v5149_v14, 9  ;;  %v8985_v4 = vrot.slane %v5096_v2, 9  ;;  %v8986_v33 = vrot.slane %v5150_v57, 9 }
 0x3ba   : > { %v6690_v6 = vsel %vm6032_vm5, %v6630_v26, %v6689_v43  ;;  %v8987_v7 = vrot.slane %v5151_v52, 9  ;;  %v8988_v45 = vrot.slane %v5152_v47, 9  ;;  %v5610_v13 = vmax.f32 %v12030_v58, %v8981_v16 }
 0x3bb   : > { %6731 = vst.msk [vmem:[#allocation4 + $0x41] sm:$0xff] %vm2309_vm3, %v6690_v6  ;;  %v5611_v39 = vmax.f32 %v5147_v50, %v8982_v54  ;;  %v5612_v28 = vmax.f32 %v5148_v21, %v8983_v3  ;;  %v5613_v55 = vmax.f32 %v5149_v14, %v8984_v31  ;;  %v5614_v12 = vmax.f32 %v5096_v2, %v8985_v4 }
 0x3bc   : > { %v5615_v11 = vmax.f32 %v5150_v57, %v8986_v33  ;;  %v5616_v42 = vmax.f32 %v5151_v52, %v8987_v7  ;;  %v5617_v60 = vmax.f32 %v5152_v47, %v8988_v45  ;;  %v5674_v49 = vmax.f32 %v5610_v13, %v5280_v5 }
 0x3bd   : > { %v5675_v30 = vmax.f32 %v5611_v39, %v5281_v25  ;;  %v5676_v48 = vmax.f32 %v5612_v28, %v5282_v20  ;;  %v6200_v17 = vrot.slane %v6171_v63, 2  ;;  %v6201_v38 = vrot.slane %v6171_v63, 4 }
 0x3be   : > { %v5283_v24 = vld [vmem:[#allocation1 + $0x20] ss:$4 sm:$0xff]  ;;  %v5284_v27 = vld [vmem:[#allocation1 + $0x21] ss:$4 sm:$0xff]  ;;  %v5285_v32 = vld [vmem:[#allocation1 + $0x22] ss:$4 sm:$0xff]  ;;  %v6340_v46 = vadd.f32 %v6171_v63, %v5674_v49  ;;  %v6776_v58 = vpack.c.bf16 %v12033_v34, %v12033_v34  ;;  %v6777_v0 = vpack.c.bf16 %v12042_v19, %v12042_v19  ;;  %v12072_v37 = vpack.c.bf16 %v12044_v15, %v12044_v15 }
 0x3bf   : > { %v5286_v8 = vld [vmem:[#allocation1 + $0x23] ss:$4 sm:$0xff]  ;;  %v5677_v23 = vmax.f32 %v5613_v55, %v5283_v24  ;;  %v5678_v36 = vmax.f32 %v5614_v12, %v5284_v27  ;;  %v5679_v18 = vmax.f32 %v5615_v11, %v5285_v32  ;;  %v6202_v26 = vrot.slane %v6171_v63, 6 }
 0x3c0   : > { %v5288_v61 = vld [vmem:[#allocation1] ss:$4 sm:$0xff]  ;;  %v5680_v22 = vmax.f32 %v5616_v42, %v5286_v8  ;;  %v6228_v51 = vrot.slane %v6171_v63, 1  ;;  %v6229_v2 = vrot.slane %v6200_v17, 1  ;;  %v6230_v50 = vrot.slane %v6201_v38, 1 }
 0x3c1   : > { %v5681_v29 = vmax.f32 %v5617_v60, %v5288_v61  ;;  %v6231_v21 = vrot.slane %v6202_v26, 1  ;;  %v6342_v34 = vadd.f32 %v6200_v17, %v5676_v48  ;;  %v6344_v14 = vadd.f32 %v6201_v38, %v5678_v36  ;;  %v5041_v17 = vld [vmem:[#allocation3 + $0x108] sm:$0xff]  ;;  %v5042_v38 = vld [vmem:[#allocation3 + $0x110] sm:$0xff] }
 0x3c2   : > { %v6341_v5 = vadd.f32 %v6228_v51, %v5675_v30  ;;  %v6343_v19 = vadd.f32 %v6229_v2, %v5677_v23  ;;  %v6345_v25 = vadd.f32 %v6230_v50, %v5679_v18  ;;  %v6346_v40 = vadd.f32 %v6202_v26, %v5680_v22  ;;  %v6784_v23 = vld [vmem:[#allocation4 + $0x10] sm:$0xff]  ;;  %v12081_v61 = vld [vmem:[#allocation3 + $0x128] sm:$0xff]  ;;  %v5043_v51 = vld [vmem:[#allocation3 + $0x118] sm:$0x3] }
 0x3c3   : > { %v6347_v15 = vadd.f32 %v6231_v21, %v5681_v29  ;;  %v6483_v57 = vmax.f32 %v6340_v46, 0.0  ;;  %v6485_v52 = vmax.f32 %v6342_v34, 0.0  ;;  %v6487_v47 = vmax.f32 %v6344_v14, 0.0  ;;  %v9226_v22 = vld [vmem:[%s13104_s7 + $0x38] sm:$0xff]  ;;  %7521 = vst.msk [vmem:[#allocation4 + $0x10] sm:$0xff] %vm2309_vm3, %v13228_v59 }
 0x3c4   : > { %v6484_v35 = vmax.f32 %v6341_v5, 0.0  ;;  %v6486_v20 = vmax.f32 %v6343_v19, 0.0  ;;  %v6488_v16 = vmax.f32 %v6345_v25, 0.0  ;;  %v6489_v54 = vmax.f32 %v6346_v40, 0.0  ;;  %7424 = vmatpush.bf16.msrb.mxu0 %v9226_v22 }
 0x3c5   : > { %v6490_v3 = vmax.f32 %v6347_v15, 0.0  ;;  %v6631_v63 = vperm.slane %v6483_v57, 0  ;;  %v6633_v43 = vperm.slane %v6485_v52, 0  ;;  %v6635_v31 = vperm.slane %v6487_v47, 0 }
 0x3c6   : > { %v6632_v4 = vperm.slane %v6484_v35, 0  ;;  %v6634_v33 = vperm.slane %v6486_v20, 0  ;;  %v6636_v6 = vperm.slane %v6488_v16, 0  ;;  %v6637_v7 = vperm.slane %v6489_v54, 0 }
 0x3c7   : > { %v6638_v45 = vperm.slane %v6490_v3, 0  ;;  %v8547_v13 = vpack.c.bf16 %v6340_v46, %v6340_v46  ;;  %v8548_v39 = vpack.c.bf16 %v6342_v34, %v6342_v34  ;;  %v8549_v28 = vpack.c.bf16 %v6344_v14, %v6344_v14  ;;  %v6172_v46 = vpop.f32.mrf.mxu3 }
 0x3c8   : > { %v6691_v55 = vsel %vm6014_vm13, %v6632_v4, %v6631_v63  ;;  %v8550_v12 = vpack.c.bf16 %v6346_v40, %v6346_v40  ;;  %v6929_v11 = vunpack.c.l.b16 %v6776_v58  ;;  %v6930_v42 = vunpack.c.l.b16 %v6777_v0  ;;  %v12079_v0 = vld [vmem:[#allocation3 + $0x120] sm:$0xff]  ;;  %v6785_v63 = vld [vmem:[#allocation4 + $0x20] sm:$0xff]  ;;  %v4729_v4 = vpop.f32.mrf.mxu1 }
 0x3c9   : > { %v6692_v60 = vsel %vm6017_vm14, %v6633_v43, %v6691_v55  ;;  %v8582_v49 = vunpack.c.l.b16 %v8547_v13  ;;  %v8583_v30 = vunpack.c.l.b16 %v8548_v39  ;;  %v8584_v48 = vunpack.c.l.b16 %v8549_v28 }
 0x3ca   : > { %v6693_v24 = vsel %vm6020_vm15, %v6634_v33, %v6692_v60  ;;  %v8585_v27 = vunpack.c.l.b16 %v8550_v12  ;;  %v6937_v32 = vpack.c.b16 %v6929_v11, %v6929_v11  ;;  %v6938_v8 = vpack.c.b16 %v6930_v42, %v6930_v42  ;;  %v4818_v12 = vpop.f32.mrf.mxu2 }
 0x3cb   : > { %v6694_v36 = vsel %vm6023_vm1, %v6635_v31, %v6693_v24  ;;  %v8604_v18 = vrot.slane %v8583_v30, 7  ;;  %v8606_v26 = vrot.slane %v8584_v48, 6  ;;  %v6890_v58 = vunpack.c.l.b16 %v12072_v37  ;;  %v6817_v30 = vld [vmem:[#allocation4 + $0x22] sm:$0xff] }
 0x3cc   : > { %v6695_v2 = vsel %vm6026_vm2, %v6636_v6, %v6694_v36  ;;  %v8608_v50 = vrot.slane %v8585_v27, 5  ;;  %6945 = vrot.lane.b32.xlu1 %v6937_v32, %s9327_s21  ;;  %6947 = vrot.lane.b32.xlu2 %v6938_v8, %s9327_s21  ;;  %v5074_v29 = vmax.f32 %v12024_v53, %v5041_v17  ;;  %v5075_v21 = vmax.f32 %v12040_v41, %v5042_v38  ;;  %v12102_v53 = vld [vmem:[#allocation3 + $0x130] sm:$0x3]  ;;  %v9233_v48 = vld [vmem:[%s13104_s7 + $0x70] sm:$0xff] }
 0x3cd   : > { %v6696_v34 = vsel %vm6029_vm4, %v6637_v7, %v6695_v2  ;;  %v8605_v14 = vsel %vm6014_vm13, %v8604_v18, %v8582_v49  ;;  %v6898_v5 = vpack.c.b16 %v6890_v58, %v6890_v58  ;;  %v12096_v19 = vadd.f32 %v6172_v46, %v11795_v62  ;;  %v6754_v32 = vld [vmem:[#allocation4 + $0x21] sm:$0xff]  ;;  %9258 = vmatpush.bf16.msrb.mxu2 %v9233_v48 }
 0x3ce   : > { %v6697_v25 = vsel %vm6032_vm5, %v6638_v45, %v6696_v34  ;;  %v8607_v40 = vsel %vm6017_vm14, %v8606_v26, %v8605_v14  ;;  %v5098_v15 = vmax.f32 %v5074_v29, %v12079_v0  ;;  %v5099_v57 = vmax.f32 %v5075_v21, %v12081_v61  ;;  %7454 = vmatpush.bf16.msrb.mxu1 %v9233_v48 }
 0x3cf   : > { %v5076_v41 = vmax.f32 %v11989_v56, %v5043_v51  ;;  %6732 = vst.msk [vmem:[#allocation4 + $0x51] sm:$0xff] %vm2309_vm3, %v6697_v25  ;;  %v12107_v52 = vsel %vm6020_vm15, %v8608_v50, %v8607_v40  ;;  %6907 = vrot.lane.b32.xlu0 %v6898_v5, %s9326_s20  ;;  %v6203_v47 = vrot.slane %v12096_v19, 2  ;;  %v6204_v35 = vrot.slane %v12096_v19, 4 }
 0x3d0   : > { %v5153_v20 = vrot.slane %v5098_v15, 2  ;;  %v5154_v16 = vrot.slane %v5098_v15, 4  ;;  %v5155_v54 = vrot.slane %v5098_v15, 6  ;;  %v5156_v3 = vrot.slane %v5099_v57, 2 }
 0x3d1   : > { %v5157_v43 = vrot.slane %v5099_v57, 4  ;;  %v5158_v31 = vrot.slane %v5099_v57, 6  ;;  %5289 = vst.sshfl [vmem:[#allocation1 + $0x20] sm:$0xff pattern:$0x73625140] %v5098_v15  ;;  %v8989_v56 = vrot.slane %v5098_v15, 9  ;;  %v5100_v33 = vmax.f32 %v5076_v41, %v12102_v53 }
 0x3d2   : > { %5293 = vst.sshfl [vmem:[#allocation1] sm:$0xff pattern:$0x73625140] %v5099_v57  ;;  %v8990_v6 = vrot.slane %v5153_v20, 9  ;;  %v8991_v7 = vrot.slane %v5154_v16, 9  ;;  %v8992_v45 = vrot.slane %v5155_v54, 9  ;;  %v8545_v13 = vpack.c.bf16 %v11962_v10, %v11962_v10 }
 0x3d3   : > { %v8993_v39 = vrot.slane %v5099_v57, 9  ;;  %v12115_v28 = vpack.c.bf16 %v6784_v23, %v6784_v23  ;;  %v12117_v55 = vpack.c.bf16 %v6785_v63, %v6785_v63  ;;  %v8994_v11 = vrot.slane %v5156_v3, 9 }
 0x3d4   : > { %v8995_v42 = vrot.slane %v5157_v43, 9  ;;  %v8996_v60 = vrot.slane %v5158_v31, 9  ;;  %v6205_v49 = vrot.slane %v12096_v19, 6  ;;  %7025 = vrot.lane.b32.xlu2 %v6938_v8, %s9326_s20  ;;  %v5618_v17 = vmax.f32 %v5098_v15, %v8989_v56 }
 0x3d5   : > { %v5619_v38 = vmax.f32 %v5153_v20, %v8990_v6  ;;  %v5620_v24 = vmax.f32 %v5154_v16, %v8991_v7  ;;  %v5621_v27 = vmax.f32 %v5155_v54, %v8992_v45  ;;  %v5622_v46 = vmax.f32 %v5099_v57, %v8993_v39 }
 0x3d6   : > { %v6232_v23 = vrot.slane %v12096_v19, 1  ;;  %v6233_v36 = vrot.slane %v6203_v47, 1  ;;  %v6234_v18 = vrot.slane %v6204_v35, 1  ;;  %v6969_v8 = vunpack.c.l.b16 %v12115_v28 }
 0x3d7   : > { %v6970_v26 = vunpack.c.l.b16 %v12117_v55  ;;  %v4730_v58 = vadd.f32 %v11981_v1, %v4729_v4  ;;  %v6825_v22 = vpack.c.bf16 %v6817_v30, %v6817_v30  ;;  %v5623_v29 = vmax.f32 %v5156_v3, %v8994_v11  ;;  %v13229_v11 = vld [vmem:[#allocation14_spill] sm:$0xff] }
 0x3d8   : > { %v5290_v51 = vld [vmem:[#allocation1 + $0x21] ss:$4 sm:$0xff]  ;;  %v5291_v2 = vld [vmem:[#allocation1 + $0x22] ss:$4 sm:$0xff]  ;;  %v5292_v50 = vld [vmem:[#allocation1 + $0x23] ss:$4 sm:$0xff]  ;;  %v5624_v21 = vmax.f32 %v5157_v43, %v8995_v42  ;;  %v5625_v34 = vmax.f32 %v5158_v31, %v8996_v60  ;;  %v12132_v14 = vpack.c.bf16 %v6754_v32, %v6754_v32  ;;  %v6977_v57 = vpack.c.b16 %v6969_v8, %v6969_v8  ;;  %v4731_v31 = vpop.f32.mrf.mxu1 }
 0x3d9   : > { %5294 = vst.sshfl [vmem:[#allocation1 + $0x20] sm:$0xff pattern:$0x73625140] %v5100_v33  ;;  %v5295_v5 = vld [vmem:[#allocation1] ss:$4 sm:$0xff]  ;;  %v5682_v25 = vmax.f32 %v5618_v17, %v5290_v51  ;;  %v5683_v40 = vmax.f32 %v5619_v38, %v5291_v2  ;;  %v5684_v15 = vmax.f32 %v5620_v24, %v5292_v50  ;;  %v6978_v63 = vpack.c.b16 %v6970_v26, %v6970_v26  ;;  %v4820_v17 = vpop.f32.mrf.mxu2 }
 0x3da   : > { %v5296_v41 = vld [vmem:[#allocation1 + $0x1] ss:$4 sm:$0xff]  ;;  %v5297_v20 = vld [vmem:[#allocation1 + $0x2] ss:$4 sm:$0xff]  ;;  %v5298_v16 = vld [vmem:[#allocation1 + $0x3] ss:$4 sm:$0xff]  ;;  %v5685_v54 = vmax.f32 %v5621_v27, %v5295_v5  ;;  %v4819_v56 = vadd.f32 %v4818_v12, %v4730_v58  ;;  %v7010_v4 = vunpack.c.l.b16 %v6825_v22  ;;  %6985 = vrot.lane.b32.xlu0 %v6977_v57, %s9329_s30  ;;  %v4732_v32 = vadd.f32 %v11981_v1, %v4731_v31 }
 0x3db   : > { %v5686_v6 = vmax.f32 %v5622_v46, %v5296_v41  ;;  %v5687_v7 = vmax.f32 %v5623_v29, %v5297_v20  ;;  %v5688_v3 = vmax.f32 %v5624_v21, %v5298_v16  ;;  %v6348_v43 = vadd.f32 %v12096_v19, %v5682_v25  ;;  %6987 = vrot.lane.b32.xlu1 %v6978_v63, %s9329_s30  ;;  %v6834_v8 = vld [vmem:[#allocation4 + $0x30] sm:$0xff]  ;;  %v5047_v21 = vld [vmem:[#allocation3 + $0x138] sm:$0xff] }
 0x3dc   : > { %v6349_v33 = vadd.f32 %v6232_v23, %v5683_v40  ;;  %v6350_v45 = vadd.f32 %v6203_v47, %v5684_v15  ;;  %v6351_v39 = vadd.f32 %v6233_v36, %v5685_v54  ;;  %v4908_v42 = vadd.f32 %v13229_v11, %v4819_v56  ;;  %v6755_v22 = vld [vmem:[#allocation4 + $0x31] sm:$0xff] }
 0x3dd   : > { %v6352_v12 = vadd.f32 %v6204_v35, %v5686_v6  ;;  %v6353_v60 = vadd.f32 %v6234_v18, %v5687_v7  ;;  %v6354_v30 = vadd.f32 %v6205_v49, %v5688_v3  ;;  %v6491_v48 = vmax.f32 %v6348_v43, 0.0 }
 0x3de   : > { %v6492_v38 = vmax.f32 %v6349_v33, 0.0  ;;  %v6493_v24 = vmax.f32 %v6350_v45, 0.0  ;;  %v6494_v27 = vmax.f32 %v6351_v39, 0.0  ;;  %5002 = vst.msk [vmem:[#allocation3 + $0x151] sm:$0xff] %vm2309_vm3, %v4908_v42  ;;  %v6235_v47 = vrot.slane %v6205_v49, 1  ;;  %v9225_v33 = vld [vmem:[%s13104_s7 + $0x30] sm:$0xff] }
 0x3df   : > { %v6495_v46 = vmax.f32 %v6352_v12, 0.0  ;;  %v6496_v23 = vmax.f32 %v6353_v60, 0.0  ;;  %v6639_v36 = vperm.slane %v6491_v48, 0  ;;  %v6891_v18 = vunpack.c.l.b16 %v12132_v14  ;;  %7425 = vmatpush.bf16.msrb.mxu0 %v9225_v33 }
 0x3e0   : > { %v5299_v26 = vld [vmem:[#allocation1 + $0x20] ss:$4 sm:$0xff]  ;;  %v6640_v58 = vperm.slane %v6492_v38, 0  ;;  %v6641_v19 = vperm.slane %v6493_v24, 0  ;;  %v6642_v35 = vperm.slane %v6494_v27, 0  ;;  %v8546_v51 = vpack.c.bf16 %v11974_v44, %v11974_v44  ;;  %v4734_v45 = vpop.f32.mrf.mxu1 }
 0x3e1   : > { %v5689_v2 = vmax.f32 %v5625_v34, %v5299_v26  ;;  %v6497_v50 = vmax.f32 %v6354_v30, 0.0  ;;  %v7018_v29 = vpack.c.b16 %v7010_v4, %v7010_v4  ;;  %v6899_v5 = vpack.c.b16 %v6891_v18, %v6891_v18  ;;  %v13230_v34 = vld [vmem:[#allocation7_spill] sm:$0xff]  ;;  %v6175_v4 = vpop.f32.mrf.mxu3  ;;  %v4823_v31 = vpop.f32.mrf.mxu2  ;;  %v5049_v27 = vld [vmem:[#allocation3 + $0x148] sm:$0x3] }
 0x3e2   : > { %v6698_v49 = vsel %vm6014_vm13, %v6640_v58, %v6639_v36  ;;  %v4821_v25 = vadd.f32 %v4820_v17, %v4732_v32  ;;  %v12148_v40 = vpack.c.bf16 %v6834_v8, %v6834_v8  ;;  %v6643_v57 = vperm.slane %v6495_v46, 0 }
 0x3e3   : > { %v6355_v15 = vadd.f32 %v6235_v47, %v5689_v2  ;;  %v6699_v41 = vsel %vm6017_vm14, %v6641_v19, %v6698_v49  ;;  %7027 = vrot.lane.b32.xlu0 %v7018_v29, %s9326_s20  ;;  %v12152_v20 = vpack.c.bf16 %v6755_v22, %v6755_v22  ;;  %v6644_v16 = vperm.slane %v6496_v23, 0  ;;  %7065 = vrot.lane.b32.xlu1 %v6978_v63, %s9327_s21  ;;  %v9232_v63 = vld [vmem:[%s13104_s7 + $0x68] sm:$0xff] }
 0x3e4   : > { %v6700_v44 = vsel %vm6020_vm15, %v6642_v35, %v6699_v41  ;;  %6909 = vrot.lane.b32.xlu2 %v6899_v5, %s9326_s20  ;;  %v4910_v54 = vadd.f32 %v13230_v34, %v4821_v25  ;;  %v5077_v56 = vmax.f32 %v12079_v0, %v5047_v21  ;;  %v6645_v7 = vperm.slane %v6497_v50, 0  ;;  %9259 = vmatpush.bf16.msrb.mxu2 %v9232_v63 }
 0x3e5   : > { %v6498_v6 = vmax.f32 %v6355_v15, 0.0  ;;  %v6701_v3 = vsel %vm6023_vm1, %v6643_v57, %v6700_v44  ;;  %v12160_v43 = vld [vmem:[#allocation3 + $0x150] sm:$0xff]  ;;  %v7050_v0 = vunpack.c.l.b16 %v12148_v40  ;;  %v8580_v42 = vunpack.c.l.b16 %v8545_v13  ;;  %7455 = vmatpush.bf16.msrb.mxu1 %v9232_v63  ;;  %v5048_v13 = vld [vmem:[#allocation3 + $0x140] sm:$0xff] }
 0x3e6   : > { %v6702_v39 = vsel %vm6026_vm2, %v6644_v16, %v6701_v3  ;;  %5003 = vst.msk [vmem:[#allocation3 + $0x159] sm:$0xff] %vm2309_vm3, %v4910_v54  ;;  %v12172_v11 = vmax.f32 %v5077_v56, %v12160_v43  ;;  %v12177_v12 = vunpack.c.l.b16 %v8546_v51  ;;  %v6892_v48 = vunpack.c.l.b16 %v12152_v20  ;;  %v13231_v56 = vld [vmem:[#allocation6_spill] sm:$0xff] }
 0x3e7   : > { %v6646_v60 = vperm.slane %v6498_v6, 0  ;;  %v6703_v30 = vsel %vm6029_vm4, %v6645_v7, %v6702_v39  ;;  %v12185_v24 = vadd.f32 %v6175_v4, %v11795_v62  ;;  %v4735_v46 = vadd.f32 %v11981_v1, %v4734_v45 }
 0x3e8   : > { %v5159_v17 = vrot.slane %v12172_v11, 2  ;;  %v5160_v38 = vrot.slane %v12172_v11, 4  ;;  %5300 = vst.sshfl [vmem:[#allocation1] sm:$0xff pattern:$0x73625140] %v12172_v11  ;;  %v5161_v32 = vrot.slane %v12172_v11, 6  ;;  %v12192_v23 = vpack.c.b16 %v7050_v0, %v7050_v0  ;;  %v4736_v25 = vpop.f32.mrf.mxu1 }
 0x3e9   : > { %v6704_v10 = vsel %vm6032_vm5, %v6646_v60, %v6703_v30  ;;  %v8997_v47 = vrot.slane %v12172_v11, 9  ;;  %v8600_v36 = vrot.slane %v8580_v42, 2  ;;  %v8602_v8 = vrot.slane %v12177_v12, 1 }
 0x3ea   : > { %6733 = vst.msk [vmem:[#allocation4 + $0x61] sm:$0xff] %vm2309_vm3, %v6704_v10  ;;  %v8998_v26 = vrot.slane %v5159_v17, 9  ;;  %v8999_v58 = vrot.slane %v5160_v38, 9  ;;  %v6900_v19 = vpack.c.b16 %v6892_v48, %v6892_v48  ;;  %v5078_v35 = vmax.f32 %v12081_v61, %v5048_v13  ;;  %v12220_v13 = vld [vmem:[#allocation4] sm:$0xff] }
 0x3eb   : > { %7105 = vrot.lane.b32.xlu0 %v6899_v5, %s9329_s30  ;;  %6949 = vrot.lane.b32.xlu1 %v7018_v29, %s9327_s21  ;;  %v5079_v18 = vmax.f32 %v12102_v53, %v5049_v27  ;;  %v6206_v22 = vrot.slane %v12185_v24, 2  ;;  %v9000_v50 = vrot.slane %v5161_v32, 9  ;;  %v5626_v21 = vmax.f32 %v12172_v11, %v8997_v47  ;;  %v4825_v5 = vpop.f32.mrf.mxu2  ;;  %7519 = vst.msk [vmem:[#allocation4] sm:$0xff] %vm2309_vm3, %v13228_v59 }
 0x3ec   : > { %7067 = vrot.lane.b32.xlu2 %v12192_v23, %s9327_s21  ;;  %v6207_v49 = vrot.slane %v12185_v24, 4  ;;  %v4824_v29 = vadd.f32 %v4823_v31, %v4735_v46  ;;  %v6236_v53 = vrot.slane %v12185_v24, 1  ;;  %v4737_v57 = vadd.f32 %v11981_v1, %v4736_v25 }
 0x3ed   : > { %v12202_v51 = vld [vmem:[#allocation3 + $0x158] sm:$0xff]  ;;  %v12204_v2 = vld [vmem:[#allocation3 + $0x160] sm:$0x3]  ;;  %v5627_v34 = vmax.f32 %v5159_v17, %v8998_v26  ;;  %v5628_v54 = vmax.f32 %v5160_v38, %v8999_v58  ;;  %v8601_v6 = vsel %vm6029_vm4, %v8600_v36, %v12013_v9  ;;  %v6208_v39 = vrot.slane %v12185_v24, 6  ;;  %v13232_v38 = vld [vmem:[#allocation12_spill] sm:$0xff] }
 0x3ee   : > { %v5102_v15 = vmax.f32 %v5078_v35, %v12202_v51  ;;  %v5103_v61 = vmax.f32 %v5079_v18, %v12204_v2  ;;  %v4913_v4 = vadd.f32 %v13231_v56, %v4824_v29  ;;  %v4826_v0 = vadd.f32 %v4825_v5, %v4737_v57  ;;  %v12228_v29 = vld [vmem:[#allocation4 + $0x22] sm:$0xff] }
 0x3ef   : > { %v5302_v41 = vld [vmem:[#allocation1 + $0x1] ss:$4 sm:$0xff]  ;;  %v5303_v16 = vld [vmem:[#allocation1 + $0x2] ss:$4 sm:$0xff]  ;;  %v5304_v44 = vld [vmem:[#allocation1 + $0x3] ss:$4 sm:$0xff]  ;;  %v5629_v27 = vmax.f32 %v5161_v32, %v9000_v50 }
 0x3f0   : > { %v5162_v7 = vrot.slane %v5102_v15, 2  ;;  %v5163_v3 = vrot.slane %v5102_v15, 4  ;;  %v5164_v31 = vrot.slane %v5102_v15, 6  ;;  %5301 = vst.sshfl [vmem:[#allocation1 + $0x20] sm:$0xff pattern:$0x73625140] %v5102_v15  ;;  %v5690_v33 = vmax.f32 %v5626_v21, %v5302_v41  ;;  %v4739_v21 = vpop.f32.mrf.mxu1 }
 0x3f1   : > { %5309 = vst.sshfl [vmem:[#allocation1] sm:$0xff pattern:$0x73625140] %v5103_v61  ;;  %v5691_v45 = vmax.f32 %v5627_v34, %v5303_v16  ;;  %v5692_v63 = vmax.f32 %v5628_v54, %v5304_v44  ;;  %v9001_v11 = vrot.slane %v5102_v15, 9  ;;  %v4915_v10 = vadd.f32 %v13232_v38, %v4826_v0  ;;  %v12230_v50 = vld [vmem:[#allocation4 + $0x32] sm:$0xff] }
 0x3f2   : > { %v9002_v42 = vrot.slane %v5162_v7, 9  ;;  %v9003_v60 = vrot.slane %v5163_v3, 9  ;;  %v6356_v30 = vadd.f32 %v12185_v24, %v5690_v33  ;;  %5004 = vst.msk [vmem:[#allocation3 + $0x169] sm:$0xff] %vm2309_vm3, %v4913_v4  ;;  %v9004_v9 = vrot.slane %v5164_v31, 9 }
 0x3f3   : > { %6911 = vrot.lane.b32.xlu0 %v6900_v19, %s9326_s20  ;;  %v6357_v48 = vadd.f32 %v6236_v53, %v5691_v45  ;;  %v6358_v17 = vadd.f32 %v6206_v22, %v5692_v63  ;;  %7107 = vrot.lane.b32.xlu1 %v6900_v19, %s9329_s30  ;;  %v6237_v47 = vrot.slane %v6206_v22, 1  ;;  %v6238_v46 = vrot.slane %v6207_v49, 1  ;;  %5005 = vst.msk [vmem:[#allocation3 + $0x171] sm:$0xff] %vm2309_vm3, %v4915_v10  ;;  %v4828_v44 = vpop.f32.mrf.mxu2 }
 0x3f4   : > { %v6499_v36 = vmax.f32 %v6356_v30, 0.0  ;;  %v6239_v26 = vrot.slane %v6208_v39, 1  ;;  %v8551_v35 = vpack.c.bf16 %v6356_v30, %v6356_v30  ;;  %v5630_v5 = vmax.f32 %v5102_v15, %v9001_v11  ;;  %7524 = vst.msk [vmem:[#allocation4 + $0x28] sm:$0x3] %vm2664_vm11, %v13228_v59 }
 0x3f5   : > { %v6500_v58 = vmax.f32 %v6357_v48, 0.0  ;;  %v8552_v18 = vpack.c.bf16 %v6358_v17, %v6358_v17  ;;  %v5631_v19 = vmax.f32 %v5162_v7, %v9002_v42  ;;  %v6501_v32 = vmax.f32 %v6358_v17, 0.0  ;;  %7525 = vst.msk [vmem:[#allocation4 + $0x30] sm:$0xff] %vm2309_vm3, %v13228_v59 }
 0x3f6   : > { %v6647_v22 = vperm.slane %v6499_v36, 0  ;;  %v5632_v57 = vmax.f32 %v5163_v3, %v9003_v60  ;;  %v5633_v41 = vmax.f32 %v5164_v31, %v9004_v9  ;;  %v8586_v16 = vunpack.c.l.b16 %v8551_v35  ;;  %7523 = vst.msk [vmem:[#allocation4 + $0x20] sm:$0xff] %vm2309_vm3, %v13228_v59  ;;  %v9224_v9 = vld [vmem:[%s13104_s7 + $0x28] sm:$0xff]  ;;  %v9310_v35 = vld [vmem:[%s13101_s4] ss:$0 sm:$0xff] }
 0x3f7   : > { %v5305_v25 = vld [vmem:[#allocation1 + $0x20] ss:$4 sm:$0xff]  ;;  %v5306_v61 = vld [vmem:[#allocation1 + $0x21] ss:$4 sm:$0xff]  ;;  %v5307_v53 = vld [vmem:[#allocation1 + $0x22] ss:$4 sm:$0xff]  ;;  %v12237_v34 = vsel %vm6032_vm5, %v8602_v8, %v8601_v6  ;;  %v8587_v3 = vunpack.c.l.b16 %v8552_v18  ;;  %v4740_v0 = vadd.f32 %v11981_v1, %v4739_v21  ;;  %7426 = vmatpush.bf16.msrb.mxu0 %v9224_v9 }
 0x3f8   : > { %v5308_v15 = vld [vmem:[#allocation1 + $0x23] ss:$4 sm:$0xff]  ;;  %v5310_v54 = vld [vmem:[#allocation1] ss:$4 sm:$0xff]  ;;  %v5693_v56 = vmax.f32 %v5629_v27, %v5305_v25  ;;  %v5694_v4 = vmax.f32 %v5630_v5, %v5306_v61  ;;  %v5695_v7 = vmax.f32 %v5631_v19, %v5307_v53  ;;  %v6648_v33 = vperm.slane %v6500_v58, 0 }
 0x3f9   : > { %v5696_v45 = vmax.f32 %v5632_v57, %v5308_v15  ;;  %v5697_v63 = vmax.f32 %v5633_v41, %v5310_v54  ;;  %v8610_v31 = vrot.slane %v8586_v16, 4  ;;  %7526 = vst.msk [vmem:[#allocation4 + $0x38] sm:$0x3] %vm2664_vm11, %v13228_v59  ;;  %v6649_v60 = vperm.slane %v6501_v32, 0  ;;  %v13233_v25 = vld [vmem:[#allocation16_spill] sm:$0xff]  ;;  %v12271_v57 = vld [vmem:[#allocation4 + $0x41] sm:$0xff] }
 0x3fa   : > { %v6359_v12 = vadd.f32 %v6237_v47, %v5693_v56  ;;  %v12245_v8 = vadd.f32 %v6207_v49, %v5694_v4  ;;  %v6361_v6 = vadd.f32 %v6238_v46, %v5695_v7  ;;  %v6705_v1 = vsel %vm6014_vm13, %v6648_v33, %v6647_v22  ;;  %v12273_v41 = vld [vmem:[#allocation4 + $0x40] sm:$0xff]  ;;  %v13234_v54 = vld [vmem:[#allocation18_spill] sm:$0xff]  ;;  %v6177_v4 = vpop.f32.mrf.mxu3  ;;  %v5053_v7 = vld [vmem:[#allocation3 + $0x168] sm:$0xff] }
 0x3fb   : > { %v12250_v11 = vadd.f32 %v6208_v39, %v5696_v45  ;;  %v6363_v42 = vadd.f32 %v6239_v26, %v5697_v63  ;;  %v8611_v30 = vsel %vm6023_vm1, %v8610_v31, %v12107_v52  ;;  %v8612_v38 = vrot.slane %v8587_v3, 3  ;;  %v4741_v39 = vpop.f32.mrf.mxu1  ;;  %v4830_v19 = vpop.f32.mrf.mxu2  ;;  %v12275_v16 = vld [vmem:[#allocation4 + $0x42] sm:$0xff]  ;;  %v12293_v31 = vld [vmem:[#allocation4 + $0x50] sm:$0xff] }
 0x3fc   : > { %v6502_v24 = vmax.f32 %v6359_v12, 0.0  ;;  %v6503_v49 = vmax.f32 %v12245_v8, 0.0  ;;  %v6504_v48 = vmax.f32 %v6361_v6, 0.0  ;;  %v6706_v52 = vsel %vm6017_vm14, %v6649_v60, %v6705_v1  ;;  %7527 = vst.msk [vmem:[#allocation4 + $0x40] sm:$0xff] %vm2309_vm3, %v13228_v59  ;;  %v5054_v45 = vld [vmem:[#allocation3 + $0x170] sm:$0xff]  ;;  %v6773_v12 = vld [vmem:[#allocation4 + $0x52] sm:$0xff] }
 0x3fd   : > { %v6505_v17 = vmax.f32 %v12250_v11, 0.0  ;;  %v6506_v10 = vmax.f32 %v6363_v42, 0.0  ;;  %v12262_v46 = vsel %vm6026_vm2, %v8612_v38, %v8611_v30  ;;  %v4829_v58 = vadd.f32 %v4828_v44, %v4740_v0  ;;  %7528 = vst.msk [vmem:[#allocation4 + $0x48] sm:$0x3] %vm2664_vm11, %v13228_v59  ;;  %v12295_v6 = vld [vmem:[#allocation4 + $0x51] sm:$0xff] }
 0x3fe   : > { %v6650_v27 = vperm.slane %v6502_v24, 0  ;;  %v6651_v47 = vperm.slane %v6503_v49, 0  ;;  %v6652_v36 = vperm.slane %v6504_v48, 0  ;;  %v4742_v18 = vadd.f32 %v9310_v35, %v4741_v39  ;;  %7529 = vst.msk [vmem:[#allocation4 + $0x50] sm:$0xff] %vm2309_vm3, %v13228_v59 }
 0x3ff   : > { %v6653_v21 = vperm.slane %v6505_v17, 0  ;;  %v6654_v32 = vperm.slane %v6506_v10, 0  ;;  %v4918_v61 = vadd.f32 %v13233_v25, %v4829_v58  ;;  %v6779_v33 = vpack.c.bf16 %v12230_v50, %v12230_v50  ;;  %7530 = vst.msk [vmem:[#allocation4 + $0x58] sm:$0x3] %vm2664_vm11, %v13228_v59 }
 0x400   : > { %v6707_v26 = vsel %vm6020_vm15, %v6650_v27, %v6706_v52  ;;  %v4831_v53 = vadd.f32 %v4830_v19, %v4742_v18  ;;  %v12290_v63 = vadd.f32 %v6177_v4, %v11795_v62  ;;  %v5080_v3 = vmax.f32 %v12160_v43, %v5053_v7  ;;  %v5055_v43 = vld [vmem:[#allocation3 + $0x178] sm:$0x3] }
 0x401   : > { %v6708_v5 = vsel %vm6023_vm1, %v6651_v47, %v6707_v26  ;;  %5006 = vst.msk [vmem:[#allocation3 + $0x181] sm:$0xff] %vm2309_vm3, %v4918_v61  ;;  %v5081_v60 = vmax.f32 %v12202_v51, %v5054_v45  ;;  %v12302_v50 = vunpack.c.l.b16 %v6779_v33  ;;  %v6827_v49 = vpack.c.bf16 %v12275_v16, %v12275_v16  ;;  %v9231_v47 = vld [vmem:[%s13104_s7 + $0x60] sm:$0xff]  ;;  %v12326_v61 = vld [vmem:[#allocation4 + $0x61] sm:$0xff] }
 0x402   : > { %v6709_v22 = vsel %vm6026_vm2, %v6652_v36, %v6708_v5  ;;  %v4920_v56 = vadd.f32 %v13234_v54, %v4831_v53  ;;  %v6209_v24 = vrot.slane %v12290_v63, 2  ;;  %v6210_v51 = vrot.slane %v12290_v63, 4  ;;  %9260 = vmatpush.bf16.msrb.mxu2 %v9231_v47  ;;  %7456 = vmatpush.bf16.msrb.mxu1 %v9231_v47  ;;  %v12328_v53 = vld [vmem:[#allocation4 + $0x60] sm:$0xff] }
 0x403   : > { %v6710_v44 = vsel %vm6029_vm4, %v6653_v21, %v6709_v22  ;;  %v6781_v52 = vpack.c.bf16 %v6773_v12, %v6773_v12  ;;  %v5082_v36 = vmax.f32 %v12204_v2, %v5055_v43  ;;  %v6240_v25 = vrot.slane %v12290_v63, 1  ;;  %v12330_v16 = vld [vmem:[#allocation4 + $0x62] sm:$0xff] }
 0x404   : > { %v6711_v15 = vsel %vm6032_vm5, %v6654_v32, %v6710_v44  ;;  %5007 = vst.msk [vmem:[#allocation3 + $0x189] sm:$0xff] %vm2309_vm3, %v4920_v56  ;;  %v6242_v54 = vrot.slane %v6210_v51, 1 }
 0x405   : > { %6734 = vst.msk [vmem:[#allocation4 + $0x71] sm:$0xff] %vm2309_vm3, %v6711_v15  ;;  %v6241_v15 = vrot.slane %v6209_v24, 1  ;;  %v12338_v56 = vunpack.c.l.b16 %v6781_v52 }
 0x406   : > { %7531 = vst.msk [vmem:[#allocation4 + $0x60] sm:$0xff] %vm2309_vm3, %v13228_v59 }
 0x407   : > { %7532 = vst.msk [vmem:[#allocation4 + $0x68] sm:$0x3] %vm2664_vm11, %v13228_v59 }
 0x408   : > { %v5056_v0 = vld [vmem:[#allocation3 + $0x180] sm:$0xff] }
 0x409   : > { %v5104_v30 = vmax.f32 %v5080_v3, %v5056_v0 }
 0x40b   : > { %v5057_v9 = vld [vmem:[#allocation3 + $0x188] sm:$0xff]  ;;  %v5165_v1 = vrot.slane %v5104_v30, 2  ;;  %v5166_v17 = vrot.slane %v5104_v30, 4  ;;  %5311 = vst.sshfl [vmem:[#allocation1 + $0x20] sm:$0xff pattern:$0x73625140] %v5104_v30 }
 0x40c   : > { %v6822_v42 = vld [vmem:[#allocation4 + $0x72] sm:$0xff]  ;;  %v12307_v48 = vmax.f32 %v5081_v60, %v5057_v9  ;;  %v5058_v39 = vld [vmem:[#allocation3 + $0x190] sm:$0x3]  ;;  %v5167_v10 = vrot.slane %v5104_v30, 6  ;;  %v9005_v27 = vrot.slane %v5104_v30, 9 }
 0x40d   : > { %v6830_v62 = vpack.c.bf16 %v6822_v42, %v6822_v42  ;;  %v9006_v21 = vrot.slane %v5165_v1, 9  ;;  %v9007_v5 = vrot.slane %v5166_v17, 9  ;;  %v5106_v32 = vmax.f32 %v5082_v36, %v5058_v39 }
 0x40e   : > { %v5168_v26 = vrot.slane %v12307_v48, 2  ;;  %v5169_v58 = vrot.slane %v12307_v48, 4  ;;  %v5170_v35 = vrot.slane %v12307_v48, 6  ;;  %5315 = vst.sshfl [vmem:[#allocation1] sm:$0xff pattern:$0x73625140] %v12307_v48  ;;  %v5634_v7 = vmax.f32 %v5104_v30, %v9005_v27 }
 0x40f   : > { %v12310_v38 = vunpack.c.l.b16 %v6830_v62  ;;  %v9008_v19 = vrot.slane %v5167_v10, 9  ;;  %v9009_v2 = vrot.slane %v12307_v48, 9  ;;  %v5635_v33 = vmax.f32 %v5165_v1, %v9006_v21 }
 0x410   : > { %v9010_v22 = vrot.slane %v5168_v26, 9  ;;  %v9011_v44 = vrot.slane %v5169_v58, 9  ;;  %v9012_v4 = vrot.slane %v5170_v35, 9  ;;  %v5636_v45 = vmax.f32 %v5166_v17, %v9007_v5 }
 0x411   : > { %v12322_v18 = vpack.c.b16 %v12310_v38, %v12310_v38  ;;  %v5637_v42 = vmax.f32 %v5167_v10, %v9008_v19  ;;  %v5638_v60 = vmax.f32 %v12307_v48, %v9009_v2  ;;  %v12345_v62 = vunpack.c.l.b16 %v6827_v49 }
 0x412   : > { %v5312_v3 = vld [vmem:[#allocation1 + $0x21] ss:$4 sm:$0xff]  ;;  %v5313_v12 = vld [vmem:[#allocation1 + $0x22] ss:$4 sm:$0xff]  ;;  %v5314_v0 = vld [vmem:[#allocation1 + $0x23] ss:$4 sm:$0xff]  ;;  %v5639_v43 = vmax.f32 %v5168_v26, %v9010_v22  ;;  %v6940_v30 = vpack.c.b16 %v12302_v50, %v12302_v50  ;;  %v5640_v52 = vmax.f32 %v5169_v58, %v9011_v44 }
 0x413   : > { %7037 = vrot.lane.b32.xlu2 %v12322_v18, %s9326_s20  ;;  %5316 = vst.sshfl [vmem:[#allocation1 + $0x20] sm:$0xff pattern:$0x73625140] %v5106_v32  ;;  %v5698_v9 = vmax.f32 %v5634_v7, %v5312_v3  ;;  %v5699_v39 = vmax.f32 %v5635_v33, %v5313_v12  ;;  %v5700_v47 = vmax.f32 %v5636_v45, %v5314_v0  ;;  %v6211_v19 = vrot.slane %v12290_v63, 6 }
 0x414   : > { %v7289_v36 = vpack.c.b16 %v12338_v56, %v12345_v62  ;;  %v5641_v12 = vmax.f32 %v5170_v35, %v9012_v4  ;;  %v8553_v35 = vpack.c.bf16 %v12245_v8, %v12245_v8 }
 0x415   : > { %v5317_v1 = vld [vmem:[#allocation1] ss:$4 sm:$0xff]  ;;  %v5318_v17 = vld [vmem:[#allocation1 + $0x1] ss:$4 sm:$0xff]  ;;  %v5319_v27 = vld [vmem:[#allocation1 + $0x2] ss:$4 sm:$0xff]  ;;  %v6364_v5 = vadd.f32 %v12290_v63, %v5698_v9  ;;  %v6365_v32 = vadd.f32 %v6240_v25, %v5699_v39  ;;  %v6366_v2 = vadd.f32 %v6209_v24, %v5700_v47 }
 0x416   : > { %v5320_v10 = vld [vmem:[#allocation1 + $0x3] ss:$4 sm:$0xff]  ;;  %v5701_v21 = vmax.f32 %v5637_v42, %v5317_v1  ;;  %v5702_v48 = vmax.f32 %v5638_v60, %v5318_v17  ;;  %v5703_v49 = vmax.f32 %v5639_v43, %v5319_v27  ;;  %v6243_v25 = vrot.slane %v6211_v19, 1 }
 0x417   : > { %v5704_v26 = vmax.f32 %v5640_v52, %v5320_v10  ;;  %v6507_v7 = vmax.f32 %v6364_v5, 0.0  ;;  %v6508_v45 = vmax.f32 %v6365_v32, 0.0  ;;  %v6509_v3 = vmax.f32 %v6366_v2, 0.0  ;;  %v9223_v1 = vld [vmem:[%s13104_s7 + $0x20] sm:$0xff] }
 0x418   : > { %v6367_v22 = vadd.f32 %v6241_v15, %v5701_v21  ;;  %v6368_v58 = vadd.f32 %v6210_v51, %v5702_v48  ;;  %v6369_v44 = vadd.f32 %v6242_v54, %v5703_v49  ;;  %v8554_v27 = vpack.c.bf16 %v12250_v11, %v12250_v11  ;;  %7427 = vmatpush.bf16.msrb.mxu0 %v9223_v1  ;;  %v9222_v48 = vld [vmem:[%s13104_s7 + $0x18] sm:$0xff] }
 0x419   : > { %v6370_v33 = vadd.f32 %v6211_v19, %v5704_v26  ;;  %v6655_v60 = vperm.slane %v6507_v7, 0  ;;  %v6656_v39 = vperm.slane %v6508_v45, 0  ;;  %v6657_v24 = vperm.slane %v6509_v3, 0  ;;  %v9220_v45 = vld [vmem:[%s13104_s7 + $0x8] sm:$0xff] }
 0x41a   : > { %v6510_v0 = vmax.f32 %v6367_v22, 0.0  ;;  %v6511_v42 = vmax.f32 %v6368_v58, 0.0  ;;  %v5321_v43 = vld [vmem:[#allocation1 + $0x20] ss:$4 sm:$0xff]  ;;  %v6512_v9 = vmax.f32 %v6369_v44, 0.0  ;;  %v12370_v21 = vpack.c.bf16 %v12293_v31, %v12293_v31 }
 0x41b   : > { %6951 = vrot.lane.b32.xlu2 %v6940_v30, %s9327_s21  ;;  %v5705_v15 = vmax.f32 %v5641_v12, %v5321_v43  ;;  %v6513_v47 = vmax.f32 %v6370_v33, 0.0  ;;  %v6712_v54 = vsel %vm6014_vm13, %v6656_v39, %v6655_v60  ;;  %v8588_v11 = vunpack.c.l.b16 %v8553_v35  ;;  %v9221_v58 = vld [vmem:[%s13104_s7 + $0x10] sm:$0xff]  ;;  %v9219_v60 = vld [vmem:[%s13104_s7] sm:$0xff]  ;;  %v12409_v43 = vpop.permute.xlu2 %7079  ;;  %v9230_v39 = vld [vmem:[%s13104_s7 + $0x58] sm:$0xff] }
 0x41c   : > { %v6658_v63 = vperm.slane %v6510_v0, 0  ;;  %v6659_v51 = vperm.slane %v6511_v42, 0  ;;  %v6713_v17 = vsel %vm6017_vm14, %v6657_v24, %v6712_v54  ;;  %v6660_v52 = vperm.slane %v6512_v9, 0  ;;  %7428 = vmatpush.bf16.msrb.mxu0 %v9222_v48  ;;  %v12415_v9 = vld [vmem:[#allocation4 + $0x71] sm:$0xff]  ;;  %9261 = vmatpush.bf16.msrb.mxu2 %v9230_v39 }
 0x41d   : > { %v6371_v4 = vadd.f32 %v6243_v25, %v5705_v15  ;;  %v6661_v8 = vperm.slane %v6513_v47, 0  ;;  %v8589_v2 = vunpack.c.l.b16 %v8554_v27  ;;  %v7052_v31 = vunpack.c.l.b16 %v12370_v21  ;;  %v6838_v25 = vld [vmem:[#allocation4 + $0x70] sm:$0xff]  ;;  %7534 = vst.msk [vmem:[#allocation4 + $0x78] sm:$0x3] %vm2664_vm11, %v13228_v59  ;;  %7457 = vmatpush.bf16.msrb.mxu1 %v9230_v39 }
 0x41e   : > { %v6714_v10 = vsel %vm6020_vm15, %v6658_v63, %v6713_v17  ;;  %v8614_v44 = vrot.slane %v8588_v11, 2  ;;  %7533 = vst.msk [vmem:[#allocation4 + $0x70] sm:$0xff] %vm2309_vm3, %v13228_v59 }
 0x41f   : > { %v6514_v49 = vmax.f32 %v6371_v4, 0.0  ;;  %v6715_v5 = vsel %vm6023_vm1, %v6659_v51, %v6714_v10  ;;  %v8616_v7 = vrot.slane %v8589_v2, 1  ;;  %v12385_v33 = vpack.c.b16 %v7052_v31, %v7052_v31 }
 0x420   : > { %v6716_v26 = vsel %vm6026_vm2, %v6660_v52, %v6715_v5  ;;  %7429 = vmatpush.bf16.msrb.mxu0 %v9221_v58  ;;  %v8615_v3 = vsel %vm6029_vm4, %v8614_v44, %v12262_v46  ;;  %v6829_v46 = vpack.c.bf16 %v12330_v16, %v12330_v16  ;;  %v6942_v16 = vpack.c.b16 %v12338_v56, %v12338_v56  ;;  %v9256_v56 = vld [vmem:[%s13108_s11 + $0x8] sm:$0xff] }
 0x421   : > { %v6662_v19 = vperm.slane %v6514_v49, 0  ;;  %v6717_v32 = vsel %vm6029_vm4, %v6661_v8, %v6716_v26  ;;  %v12400_v0 = vsel %vm6032_vm5, %v8616_v7, %v8615_v3  ;;  %v12441_v52 = vpack.c.bf16 %v12273_v41, %v12273_v41  ;;  %v9229_v49 = vld [vmem:[%s13104_s7 + $0x50] sm:$0xff]  ;;  %v9228_v26 = vld [vmem:[%s13104_s7 + $0x48] sm:$0xff] }
 0x422   : > { %v12426_v51 = vunpack.c.l.b16 %v6829_v46  ;;  %v12454_v41 = vpack.c.bf16 %v6838_v25, %v6838_v25  ;;  %7458 = vmatpush.bf16.msrb.mxu1 %v9229_v49  ;;  %9262 = vmatpush.bf16.msrb.mxu2 %v9229_v49  ;;  %v12473_v3 = vpack.c.bf16 %v12326_v61, %v12326_v61  ;;  %v12485_v46 = vpack.c.bf16 %v12295_v6, %v12295_v6 }
 0x423   : > { %7029 = vrot.lane.b32.xlu2 %v6940_v30, %s9326_s20  ;;  %v6718_v22 = vsel %vm6032_vm5, %v6662_v19, %v6717_v32  ;;  %v12389_v30 = vpack.c.bf16 %v12271_v57, %v12271_v57  ;;  %v8618_v57 = vpack.c.b16 %v12400_v0, %v12237_v34  ;;  %v6906_v10 = vpop.permute.xlu2 %6905  ;;  %v6972_v5 = vunpack.c.l.b16 %v12441_v52  ;;  %v12636_v0 = vld [vmem:[%s13105_s8] ss:$0 sm:$0xff] }
 0x424   : > { %6735 = vst.msk [vmem:[#allocation4 + $0x81] sm:$0xff] %vm2309_vm3, %v6718_v22  ;;  %7430 = vmatpush.bf16.msrb.mxu0 %v9220_v45  ;;  %v7292_v4 = vpack.c.b16 %v12310_v38, %v12426_v51  ;;  %v6744_v32 = vpack.c.bf16 %v12220_v13, %v12220_v13  ;;  %v7054_v58 = vunpack.c.l.b16 %v12454_v41  ;;  %v9227_v13 = vld [vmem:[%s13104_s7 + $0x40] sm:$0xff]  ;;  %v6895_v25 = vunpack.c.l.b16 %v12473_v3 }
 0x425   : > { %v6893_v12 = vunpack.c.l.b16 %v12389_v30  ;;  %v6980_v22 = vpack.c.b16 %v6972_v5, %v6972_v5  ;;  %v7092_v6 = vunpack.c.l.b16 %v12485_v46 }
 0x426   : > { %7459 = vmatpush.bf16.msrb.mxu1 %v9228_v26  ;;  %9263 = vmatpush.bf16.msrb.mxu2 %v9228_v26  ;;  %v7123_v7 = vsel %vm2309_vm3, %v6744_v32, %v6906_v10  ;;  %v12469_v45 = vpack.c.b16 %v7054_v58, %v7054_v58  ;;  %v7020_v10 = vpack.c.b16 %v12345_v62, %v12345_v62 }
 0x427   : > { %v12404_v42 = vpack.c.b16 %v6893_v12, %v6893_v12  ;;  %v12428_v54 = vpop.permute.xlu1 %7119  ;;  %v12504_v26 = vpack.c.bf16 %v12328_v53, %v12328_v53 }
 0x428   : > { %7431 = vmatpush.bf16.msrb.mxu0 %v9219_v60 }
 0x42a   : > { %7460 = vmatpush.bf16.msrb.mxu1 %v9227_v13  ;;  %9264 = vmatpush.bf16.msrb.mxu2 %v9227_v13 }
 0x42b   : > { %7071 = vrot.lane.b32.xlu2 %v12385_v33, %s9327_s21  ;;  %v6823_v24 = vld [vmem:[#allocation4 + $0x82] sm:$0xff]  ;;  %v6948_v44 = vpop.permute.xlu2 %6947 }
 0x42c   : > { %v6839_v15 = vld [vmem:[#allocation4 + $0x80] sm:$0xff]  ;;  %v6831_v47 = vpack.c.bf16 %v6823_v24, %v6823_v24 }
 0x42d   : > { %v6847_v63 = vpack.c.bf16 %v6839_v15, %v6839_v15  ;;  %v6855_v48 = vld [vmem:[#allocation4 + $0x81] sm:$0xff] }
 0x42e   : > { %v12430_v1 = vunpack.c.l.b16 %v6831_v47  ;;  %v12449_v8 = vpack.c.bf16 %v6855_v48, %v6855_v48  ;;  %7535 = vst.msk [vmem:[#allocation4 + $0x80] sm:$0xff] %vm2309_vm3, %v13228_v59  ;;  %v7100_v48 = vpack.c.b16 %v7092_v6, %v7092_v6 }
 0x42f   : > { %v7055_v35 = vunpack.c.l.b16 %v6847_v63  ;;  %7536 = vst.msk [vmem:[#allocation4 + $0x88] sm:$0x3] %vm2664_vm11, %v13228_v59 }
 0x430   : > { %v7024_v17 = vpack.c.b16 %v12430_v1, %v12430_v1  ;;  %v7095_v11 = vunpack.c.l.b16 %v12449_v8 }
 0x431   : > { %v12437_v27 = vpack.c.b16 %v7055_v35, %v7055_v35  ;;  %v6903_v35 = vpack.c.b16 %v6895_v25, %v6895_v25 }
 0x432   : > { %7039 = vrot.lane.b32.xlu0 %v7024_v17, %s9326_s20  ;;  %v7103_v31 = vpack.c.b16 %v7095_v11, %v7095_v11 }
 0x433   : > { %6913 = vrot.lane.b32.xlu2 %v12404_v42, %s9326_s20  ;;  %7077 = vrot.lane.b32.xlu1 %v12437_v27, %s9327_s21 }
 0x43a   : > { %7117 = vrot.lane.b32.xlu0 %v7103_v31, %s9329_s30 }
 0x43b   : > { %6955 = vrot.lane.b32.xlu2 %v6942_v16, %s9327_s21  ;;  %6991 = vrot.lane.b32.xlu1 %v6980_v22, %s9329_s30 }
 0x43e   : > { %v6946_v2 = vpop.permute.xlu1 %6945 }
 0x43f   : > { %v7146_v12 = vsel %vm2441_vm9, %v7123_v7, %v6946_v2  ;;  %v6974_v2 = vunpack.c.l.b16 %v12504_v26 }
 0x441   : > { %v6908_v19 = vpop.permute.xlu0 %6907 }
 0x442   : > { %v7126_v60 = vsel %vm2309_vm3, %v12115_v28, %v6908_v19  ;;  %6989 = vrot.lane.b32.xlu0 %v12192_v23, %s9329_s30 }
 0x443   : > { %7033 = vrot.lane.b32.xlu2 %v6942_v16, %s9326_s20  ;;  %v7148_v24 = vsel %vm2441_vm9, %v7126_v60, %v6948_v44  ;;  %7069 = vrot.lane.b32.xlu1 %v6980_v22, %s9327_s21  ;;  %v7026_v16 = vpop.permute.xlu2 %7025  ;;  %v6982_v22 = vpack.c.b16 %v6974_v2, %v6974_v2 }
 0x44a   : > { %7031 = vrot.lane.b32.xlu0 %v7020_v10, %s9326_s20 }
 0x44b   : > { %7075 = vrot.lane.b32.xlu2 %v12469_v45, %s9327_s21  ;;  %7111 = vrot.lane.b32.xlu1 %v7100_v48, %s9329_s30  ;;  %v6910_v5 = vpop.permute.xlu2 %6909 }
 0x44c   : > { %v6986_v61 = vpop.permute.xlu0 %6985  ;;  %v7129_v11 = vsel %vm2309_vm3, %v12117_v55, %v6910_v5 }
 0x44d   : > { %v7162_v39 = vsel %vm4319_vm12, %v7146_v12, %v6986_v61  ;;  %v6988_v15 = vpop.permute.xlu1 %6987  ;;  %v12527_v61 = vld [vmem:[#allocation4 + $0x92] sm:$0xff] }
 0x44e   : > { %v7257_v28 = vunpack.c.l.b16 %v7162_v39  ;;  %v7164_v47 = vsel %vm4319_vm12, %v7148_v24, %v6988_v15  ;;  %7537 = vst.msk [vmem:[#allocation4 + $0x90] sm:$0xff] %vm2309_vm3, %v13228_v59  ;;  %v7022_v39 = vpack.c.b16 %v12426_v51, %v12426_v51  ;;  %v6880_v38 = vpack.c.bf16 %v12527_v61, %v12527_v61 }
 0x44f   : > { %v7260_v63 = vunpack.c.l.b16 %v7164_v47  ;;  %7538 = vst.msk [vmem:[#allocation4 + $0x98] sm:$0x3] %vm2664_vm11, %v13228_v59 }
 0x451   : > { %v7284_v17 = vpack.c.b16 %v7260_v63, %v7257_v28  ;;  %v9236_v63 = vld [vmem:[%s13104_s7 + $0x88] sm:$0xff] }
 0x452   : > { %7109 = vrot.lane.b32.xlu0 %v12404_v42, %s9329_s30  ;;  %7488 = vmatpush.bf16.msra.mxu2 %v9236_v63 }
 0x453   : > { %6917 = vrot.lane.b32.xlu2 %v6903_v35, %s9326_s20  ;;  %7432 = vmatmul.bf16.vlgmr.msrb.gmra.mxu0 %v7284_v17  ;;  %v7068_v58 = vpop.permute.xlu2 %7067 }
 0x454   : > { %6953 = vrot.lane.b32.xlu1 %v7020_v10, %s9327_s21 }
 0x455   : > { %v7066_v49 = vpop.permute.xlu1 %7065  ;;  %v7028_v23 = vpop.permute.xlu0 %7027 }
 0x456   : > { %v7182_v53 = vsel %vm2309_vm3, %v12132_v14, %v7028_v23  ;;  %v6814_v14 = vpack.c.bf16 %v12415_v9, %v12415_v9  ;;  %v9235_v23 = vld [vmem:[%s13104_s7 + $0x80] sm:$0xff] }
 0x457   : > { %v7204_v7 = vsel %vm2441_vm9, %v7182_v53, %v7068_v58  ;;  %7489 = vmatpush.bf16.msra.mxu2 %v9235_v23  ;;  %v6873_v58 = vpack.c.bf16 %v12228_v29, %v12228_v29 }
 0x458   : > { %v7094_v25 = vunpack.c.l.b16 %v6814_v14 }
 0x45a   : > { %6915 = vrot.lane.b32.xlu0 %v7100_v48, %s9326_s20  ;;  %v7102_v24 = vpack.c.b16 %v7094_v25, %v7094_v25 }
 0x45b   : > { %6959 = vrot.lane.b32.xlu2 %v12322_v18, %s9327_s21  ;;  %v7179_v18 = vsel %vm2309_vm3, %v12072_v37, %v7026_v16 }
 0x45c   : > { %v7202_v55 = vsel %vm2441_vm9, %v7179_v18, %v7066_v49  ;;  %6995 = vrot.lane.b32.xlu1 %v6982_v22, %s9329_s30 }
 0x45d   : > { %v6950_v19 = vpop.permute.xlu1 %6949  ;;  %v7106_v31 = vpop.permute.xlu0 %7105 }
 0x45e   : > { %v12512_v32 = vsel %vm2441_vm9, %v7129_v11, %v6950_v19  ;;  %v7218_v42 = vsel %vm4319_vm12, %v7202_v55, %v7106_v31 }
 0x45f   : > { %v7258_v12 = vunpack.c.l.b16 %v7218_v42 }
 0x462   : > { %6993 = vrot.lane.b32.xlu0 %v12385_v33, %s9329_s30 }
 0x464   : > { %7073 = vrot.lane.b32.xlu1 %v6982_v22, %s9327_s21 }
 0x465   : > { %v7108_v44 = vpop.permute.xlu1 %7107  ;;  %v6912_v33 = vpop.permute.xlu0 %6911 }
 0x466   : > { %v7220_v13 = vsel %vm4319_vm12, %v7204_v7, %v7108_v44  ;;  %v7132_v5 = vsel %vm2309_vm3, %v12148_v40, %v6912_v33 }
 0x467   : > { %v7261_v37 = vunpack.c.l.b16 %v7220_v13  ;;  %v7259_v13 = vunpack.c.l.b16 %v6873_v58 }
 0x469   : > { %v7285_v60 = vpack.c.b16 %v7261_v37, %v7258_v12  ;;  %v7286_v37 = vpack.c.b16 %v12302_v50, %v7259_v13 }
 0x46a   : > { %7035 = vrot.lane.b32.xlu0 %v7022_v39, %s9326_s20 }
 0x46b   : > { %7461 = vmatmul.bf16.vlgmr.msrb.gmra.mxu1 %v7285_v60 }
 0x46c   : > { %7115 = vrot.lane.b32.xlu1 %v7102_v24, %s9329_s30 }
 0x46d   : > { %v7038_v59 = vpop.permute.xlu2 %7037 }
 0x46e   : > { %v7197_v16 = vsel %vm2309_vm3, %v6814_v14, %v7038_v59 }
 0x472   : > { %7113 = vrot.lane.b32.xlu0 %v6903_v35, %s9329_s30 }
 0x474   : > { %6957 = vrot.lane.b32.xlu1 %v7022_v39, %s9327_s21 }
 0x475   : > { %v6952_v9 = vpop.permute.xlu2 %6951 }
 0x476   : > { %v7152_v11 = vsel %vm2441_vm9, %v7132_v5, %v6952_v9 }
 0x47a   : > { %6919 = vrot.lane.b32.xlu0 %v7102_v24, %s9326_s20 }
 0x47c   : > { %6999 = vrot.lane.b32.xlu1 %v12437_v27, %s9329_s30 }
 0x47d   : > { %v7030_v27 = vpop.permute.xlu2 %7029 }
 0x482   : > { %6997 = vrot.lane.b32.xlu0 %v12469_v45, %s9329_s30 }
 0x4a4   : > { %v7040_v15 = vpop.permute.xlu0 %7039 }
 0x4a5   : > { %v7078_v28 = vpop.permute.xlu1 %7077  ;;  %v7200_v47 = vsel %vm2309_vm3, %v12449_v8, %v7040_v15 }
 0x4a6   : > { %v7216_v6 = vsel %vm2441_vm9, %v7200_v47, %v12409_v43  ;;  %v7214_v35 = vsel %vm2441_vm9, %v7197_v16, %v7078_v28 }
 0x4a7   : > { %v7232_v45 = vsel %vm4319_vm12, %v7216_v6, %v12428_v54  ;;  %v7072_v54 = vpop.permute.xlu2 %7071 }
 0x4a8   : > { %v7279_v48 = vunpack.c.l.b16 %v7232_v45 }
 0x4ac   : > { %v7118_v17 = vpop.permute.xlu0 %7117 }
 0x4ad   : > { %v6992_v10 = vpop.permute.xlu1 %6991  ;;  %v7230_v8 = vsel %vm4319_vm12, %v7214_v35, %v7118_v17 }
 0x4ae   : > { %v7276_v49 = vunpack.c.l.b16 %v7230_v8  ;;  %v7168_v19 = vsel %vm4319_vm12, %v7152_v11, %v6992_v10 }
 0x4af   : > { %v7266_v53 = vunpack.c.l.b16 %v7168_v19  ;;  %v6914_v44 = vpop.permute.xlu2 %6913 }
 0x4b0   : > { %v7294_v43 = vpack.c.b16 %v7279_v48, %v7276_v49  ;;  %v7135_v47 = vsel %vm2309_vm3, %v12441_v52, %v6914_v44  ;;  %v9255_v52 = vld [vmem:[%s13108_s11] sm:$0xff] }
 0x4b2   : > { %7476 = vmatmul.bf16.vlgmr.msrb.gmra.mxu2 %v7294_v43 }
 0x4b3   : > { %8640 = vmatpush.bf16.msrb.mxu2 %v9256_v56 }
 0x4b4   : > { %v6990_v2 = vpop.permute.xlu0 %6989 }
 0x4b5   : > { %v7070_v31 = vpop.permute.xlu1 %7069  ;;  %v7166_v18 = vsel %vm4319_vm12, %v12512_v32, %v6990_v2  ;;  %v7185_v32 = vsel %vm2309_vm3, %v12152_v20, %v7030_v27 }
 0x4b6   : > { %v7263_v55 = vunpack.c.l.b16 %v7166_v18  ;;  %v7206_v29 = vsel %vm2441_vm9, %v7185_v32, %v7070_v31 }
 0x4b7   : > { %v6956_v59 = vpop.permute.xlu2 %6955  ;;  %8641 = vmatpush.bf16.msrb.mxu2 %v9255_v52 }
 0x4b8   : > { %v7287_v22 = vpack.c.b16 %v7266_v53, %v7263_v55 }
 0x4ba   : > { %7437 = vmatmul.bf16.gmra.mxu0 %v7287_v22 }
 0x4bc   : > { %v7032_v42 = vpop.permute.xlu0 %7031 }
 0x4bd   : > { %v7112_v40 = vpop.permute.xlu1 %7111  ;;  %v7188_v7 = vsel %vm2309_vm3, %v12389_v30, %v7032_v42 }
 0x4be   : > { %v7208_v12 = vsel %vm2441_vm9, %v7188_v7, %v7072_v54 }
 0x4bf   : > { %v7224_v60 = vsel %vm4319_vm12, %v7208_v12, %v7112_v40  ;;  %v7034_v28 = vpop.permute.xlu2 %7033 }
 0x4c0   : > { %v7267_v24 = vunpack.c.l.b16 %v7224_v60  ;;  %v7191_v49 = vsel %vm2309_vm3, %v12485_v46, %v7034_v28  ;;  %v7579_v60 = vld [vmem:[#allocation4 + $0x2] sm:$0xff] }
 0x4c2   : > { %9089 = vmatmul.msk.bf16.vlgmr.msra.gmra.mxu2 %vm2309_vm3, %v7286_v37 }
 0x4c4   : > { %v7110_v14 = vpop.permute.xlu0 %7109 }
 0x4c5   : > { %v7222_v39 = vsel %vm4319_vm12, %v7206_v29, %v7110_v14  ;;  %v7587_v14 = vpack.c.bf16 %v7579_v60, %v7579_v60 }
 0x4c6   : > { %v6954_v25 = vpop.permute.xlu1 %6953  ;;  %v7264_v30 = vunpack.c.l.b16 %v7222_v39 }
 0x4c7   : > { %v7154_v6 = vsel %vm2441_vm9, %v7135_v47, %v6954_v25  ;;  %v7076_v62 = vpop.permute.xlu2 %7075  ;;  %v13235_v25 = vmov -inf   ;;  %v7739_v34 = vunpack.c.l.b16 %v7587_v14 }
 0x4c8   : > { %v7288_v33 = vpack.c.b16 %v7267_v24, %v7264_v30 }
 0x4ca   : > { %7466 = vmatmul.bf16.gmra.mxu1 %v7288_v33 }
 0x4cc   : > { %v6916_v9 = vpop.permute.xlu0 %6915 }
 0x4cd   : > { %v7138_v15 = vsel %vm2309_vm3, %v12370_v21, %v6916_v9 }
 0x4ce   : > { %v6996_v50 = vpop.permute.xlu1 %6995  ;;  %v7156_v20 = vsel %vm2441_vm9, %v7138_v15, %v6956_v59  ;;  %v9254_v59 = vld [vmem:[%s13106_s9 + $0x88] sm:$0xff]  ;;  %v9253_v15 = vld [vmem:[%s13106_s9 + $0x80] sm:$0xff] }
 0x4cf   : > { %v7172_v63 = vsel %vm4319_vm12, %v7156_v20, %v6996_v50  ;;  %v6918_v11 = vpop.permute.xlu2 %6917  ;;  %8298 = vmatpush.bf16.msra.mxu1 %v9254_v59 }
 0x4d0   : > { %v7272_v21 = vunpack.c.l.b16 %v7172_v63  ;;  %v7141_v58 = vsel %vm2309_vm3, %v12504_v26, %v6918_v11  ;;  %v7433_v29 = vpop.f32.mrf.mxu0 }
 0x4d1   : > { %v7434_v30 = vadd.f32 %v12636_v0, %v7433_v29 }
 0x4d2   : > { %9090 = vmatmul.msk.bf16.gmra.mxu2 %vm2309_vm3, %v7289_v36 }
 0x4d3   : > { %8299 = vmatpush.bf16.msra.mxu1 %v9253_v15 }
 0x4d4   : > { %v6994_v27 = vpop.permute.xlu0 %6993 }
 0x4d5   : > { %v7170_v45 = vsel %vm4319_vm12, %v7154_v6, %v6994_v27 }
 0x4d6   : > { %v7074_v16 = vpop.permute.xlu1 %7073  ;;  %v7269_v35 = vunpack.c.l.b16 %v7170_v45 }
 0x4d7   : > { %v7210_v43 = vsel %vm2441_vm9, %v7191_v49, %v7074_v16  ;;  %v6960_v18 = vpop.permute.xlu2 %6959 }
 0x4d8   : > { %v7290_v17 = vpack.c.b16 %v7272_v21, %v7269_v35  ;;  %v7435_v9 = vpop.f32.mrf.mxu0 }
 0x4d9   : > { %v7436_v63 = vadd.f32 %v12636_v0, %v7435_v9 }
 0x4da   : > { %7442 = vmatmul.bf16.gmra.mxu0 %v7290_v17 }
 0x4dc   : > { %v7036_v36 = vpop.permute.xlu0 %7035 }
 0x4dd   : > { %v7194_v10 = vsel %vm2309_vm3, %v12473_v3, %v7036_v36 }
 0x4de   : > { %v7116_v8 = vpop.permute.xlu1 %7115  ;;  %v7212_v48 = vsel %vm2441_vm9, %v7194_v10, %v7076_v62 }
 0x4df   : > { %v7228_v23 = vsel %vm4319_vm12, %v7212_v48, %v7116_v8 }
 0x4e0   : > { %v7273_v54 = vunpack.c.l.b16 %v7228_v23 }
 0x4e2   : > { %9091 = vmatmul.msk.bf16.gmra.mxu2 %vm2309_vm3, %v7292_v4  ;;  %v7280_v4 = vunpack.c.l.b16 %v6880_v38 }
 0x4e4   : > { %v7114_v5 = vpop.permute.xlu0 %7113  ;;  %v7295_v55 = vpack.c.b16 %v7280_v4, %v12430_v1  ;;  %v7563_v1 = vld [vmem:[#allocation4 + $0x1] sm:$0xff] }
 0x4e5   : > { %v7226_v3 = vsel %vm4319_vm12, %v7210_v43, %v7114_v5  ;;  %v7571_v12 = vpack.c.bf16 %v7563_v1, %v7563_v1  ;;  %8322 = vst.msk [vmem:[#allocation4 + $0x8] sm:$0x3] %vm2664_vm11, %v13235_v25 }
 0x4e6   : > { %v7270_v19 = vunpack.c.l.b16 %v7226_v3  ;;  %v6958_v2 = vpop.permute.xlu1 %6957 }
 0x4e7   : > { %v7158_v61 = vsel %vm2441_vm9, %v7141_v58, %v6958_v2  ;;  %v7699_v26 = vunpack.c.l.b16 %v7571_v12 }
 0x4e8   : > { %v7291_v31 = vpack.c.b16 %v7273_v54, %v7270_v19  ;;  %v7462_v39 = vpop.f32.mrf.mxu1 }
 0x4e9   : > { %v7707_v32 = vpack.c.b16 %v7699_v26, %v7699_v26  ;;  %v7463_v33 = vadd.f32 %v7462_v39, %v7434_v30 }
 0x4ea   : > { %7471 = vmatmul.bf16.gmra.mxu1 %v7291_v31 }
 0x4eb   : > { %7715 = vrot.lane.b32.xlu2 %v7707_v32, %s9326_s20 }
 0x4ec   : > { %v6920_v51 = vpop.permute.xlu0 %6919 }
 0x4ed   : > { %v7144_v46 = vsel %vm2309_vm3, %v12454_v41, %v6920_v51 }
 0x4ee   : > { %v7160_v53 = vsel %vm2441_vm9, %v7144_v46, %v6960_v18  ;;  %v7000_v22 = vpop.permute.xlu1 %6999 }
 0x4ef   : > { %v7176_v42 = vsel %vm4319_vm12, %v7160_v53, %v7000_v22 }
 0x4f0   : > { %v7278_v7 = vunpack.c.l.b16 %v7176_v42  ;;  %v7464_v28 = vpop.f32.mrf.mxu1 }
 0x4f1   : > { %v7465_v6 = vadd.f32 %v7464_v28, %v7436_v63 }
 0x4f2   : > { %9092 = vmatmul.msk.bf16.gmra.mxu2 %vm2309_vm3, %v7295_v55 }
 0x4f4   : > { %v6998_v40 = vpop.permute.xlu0 %6997 }
 0x4f5   : > { %v7174_v44 = vsel %vm4319_vm12, %v7158_v61, %v6998_v40 }
 0x4f6   : > { %v7275_v41 = vunpack.c.l.b16 %v7174_v44 }
 0x4f8   : > { %v7293_v13 = vpack.c.b16 %v7278_v7, %v7275_v41 }
 0x4fa   : > { %7447 = vmatmul.bf16.gmra.mxu0 %v7293_v13 }
 0x502   : > { %9193 = vmatmul.msk.bf16.vlgmr.msrb.gmra.mxu2 %vm2309_vm3, %v8618_v57  ;;  %v7747_v57 = vpack.c.b16 %v7739_v34, %v7739_v34 }
 0x504   : > { %7755 = vrot.lane.b32.xlu1 %v7747_v57, %s9327_s21 }
 0x535   : > { %v12626_v37 = vpop.f32.mrf.mxu2 }
 0x537   : > { %v7438_v27 = vpop.f32.mrf.mxu0 }
 0x538   : > { %v7439_v62 = vadd.f32 %v12636_v0, %v7438_v27 }
 0x53d   : > { %v12631_v24 = vpop.f32.mrf.mxu2 }
 0x53f   : > { %v7440_v54 = vpop.f32.mrf.mxu0 }
 0x540   : > { %v7441_v51 = vadd.f32 %v12636_v0, %v7440_v54 }
 0x545   : > { %v7491_v50 = vpop.f32.mrf.mxu2 }
 0x546   : > { %v7492_v20 = vadd.f32 %v7491_v50, %v7463_v33 }
 0x547   : > { %v7467_v21 = vpop.f32.mrf.mxu1 }
 0x548   : > { %v7511_v47 = vmax.f32 %v7492_v20, 0.0  ;;  %v7468_v8 = vadd.f32 %v7467_v21, %v7439_v62 }
 0x54a   : > { %7539 = vst.msk [vmem:[#allocation4 + $0x11] sm:$0xff] %vm2309_vm3, %v7511_v47 }
 0x54d   : > { %v7493_v16 = vpop.f32.mrf.mxu2 }
 0x54e   : > { %v7494_v45 = vadd.f32 %v7493_v16, %v7465_v6 }
 0x54f   : > { %v7469_v2 = vpop.f32.mrf.mxu1 }
 0x550   : > { %v7512_v35 = vmax.f32 %v7494_v45, 0.0  ;;  %v7470_v53 = vadd.f32 %v7469_v2, %v7441_v51 }
 0x551   : > { %v7580_v17 = vld [vmem:[#allocation4 + $0x12] sm:$0xff] }
 0x552   : > { %v7564_v56 = vld [vmem:[#allocation4 + $0x11] sm:$0xff]  ;;  %7540 = vst.msk [vmem:[#allocation4 + $0x21] sm:$0xff] %vm2309_vm3, %v7512_v35  ;;  %v7588_v36 = vpack.c.bf16 %v7580_v17, %v7580_v17 }
 0x553   : > { %v12650_v52 = vpack.c.bf16 %v7564_v56, %v7564_v56  ;;  %v7595_v10 = vld [vmem:[#allocation4 + $0x10] sm:$0xff]  ;;  %8324 = vst.msk [vmem:[#allocation4 + $0x18] sm:$0x3] %vm2664_vm11, %v13235_v25 }
 0x554   : > { %v7740_v48 = vunpack.c.l.b16 %v7588_v36  ;;  %8323 = vst.msk [vmem:[#allocation4 + $0x10] sm:$0xff] %vm2309_vm3, %v13235_v25  ;;  %v12657_v43 = vpack.c.bf16 %v7595_v10, %v7595_v10 }
 0x555   : > { %v7700_v49 = vunpack.c.l.b16 %v12650_v52  ;;  %v7496_v23 = vpop.f32.mrf.mxu2 }
 0x556   : > { %v7497_v5 = vadd.f32 %v7496_v23, %v7468_v8  ;;  %v7748_v11 = vpack.c.b16 %v7740_v48, %v7740_v48  ;;  %v7779_v31 = vunpack.c.l.b16 %v12657_v43 }
 0x557   : > { %v7708_v3 = vpack.c.b16 %v7700_v49, %v7700_v49  ;;  %v7443_v41 = vpop.f32.mrf.mxu0 }
 0x558   : > { %v7513_v19 = vmax.f32 %v7497_v5, 0.0  ;;  %7757 = vrot.lane.b32.xlu2 %v7748_v11, %s9327_s21  ;;  %v7787_v58 = vpack.c.b16 %v7779_v31, %v7779_v31  ;;  %v7444_v14 = vadd.f32 %v12636_v0, %v7443_v41 }
 0x559   : > { %7717 = vrot.lane.b32.xlu0 %v7708_v3, %s9326_s20  ;;  %v7596_v38 = vld [vmem:[#allocation4 + $0x20] sm:$0xff] }
 0x55a   : > { %7541 = vst.msk [vmem:[#allocation4 + $0x31] sm:$0xff] %vm2309_vm3, %v7513_v19  ;;  %v12664_v4 = vpack.c.bf16 %v7596_v38, %v7596_v38  ;;  %v7628_v46 = vld [vmem:[#allocation4 + $0x22] sm:$0xff] }
 0x55b   : > { %v7565_v18 = vld [vmem:[#allocation4 + $0x21] sm:$0xff]  ;;  %v7636_v40 = vpack.c.bf16 %v7628_v46, %v7628_v46 }
 0x55c   : > { %8326 = vst.msk [vmem:[#allocation4 + $0x28] sm:$0x3] %vm2664_vm11, %v13235_v25  ;;  %v7780_v55 = vunpack.c.l.b16 %v12664_v4  ;;  %v12671_v44 = vpack.c.bf16 %v7565_v18, %v7565_v18 }
 0x55d   : > { %8325 = vst.msk [vmem:[#allocation4 + $0x20] sm:$0xff] %vm2309_vm3, %v13235_v25  ;;  %v7498_v22 = vpop.f32.mrf.mxu2  ;;  %v7820_v1 = vunpack.c.l.b16 %v7636_v40 }
 0x55e   : > { %v7499_v42 = vadd.f32 %v7498_v22, %v7470_v53  ;;  %v7788_v61 = vpack.c.b16 %v7780_v55, %v7780_v55  ;;  %v7701_v12 = vunpack.c.l.b16 %v12671_v44 }
 0x55f   : > { %v7828_v34 = vpack.c.b16 %v7820_v1, %v7820_v1  ;;  %v7445_v20 = vpop.f32.mrf.mxu0 }
 0x560   : > { %v7514_v7 = vmax.f32 %v7499_v42, 0.0  ;;  %7835 = vrot.lane.b32.xlu2 %v7748_v11, %s9326_s20  ;;  %7797 = vrot.lane.b32.xlu1 %v7788_v61, %s9329_s30  ;;  %v7709_v57 = vpack.c.b16 %v7701_v12, %v7701_v12  ;;  %v7446_v47 = vadd.f32 %v12636_v0, %v7445_v20  ;;  %v7682_v20 = vld [vmem:[#allocation4 + $0x92] sm:$0xff] }
 0x561   : > { %7795 = vrot.lane.b32.xlu0 %v7787_v58, %s9329_s30  ;;  %v7676_v13 = vld [vmem:[#allocation4 + $0x32] sm:$0xff] }
 0x562   : > { %7542 = vst.msk [vmem:[#allocation4 + $0x41] sm:$0xff] %vm2309_vm3, %v7514_v7  ;;  %v7684_v26 = vpack.c.bf16 %v7676_v13, %v7676_v13  ;;  %v7660_v32 = vld [vmem:[#allocation4 + $0x31] sm:$0xff] }
 0x563   : > { %v7644_v60 = vld [vmem:[#allocation4 + $0x30] sm:$0xff]  ;;  %8328 = vst.msk [vmem:[#allocation4 + $0x38] sm:$0x3] %vm2664_vm11, %v13235_v25  ;;  %v12692_v6 = vpack.c.bf16 %v7660_v32, %v7660_v32 }
 0x564   : > { %v8072_v29 = vunpack.c.l.b16 %v7684_v26  ;;  %8327 = vst.msk [vmem:[#allocation4 + $0x30] sm:$0xff] %vm2309_vm3, %v13235_v25  ;;  %v12683_v59 = vpack.c.bf16 %v7644_v60, %v7644_v60 }
 0x565   : > { %v7501_v39 = vpop.f32.mrf.mxu2  ;;  %v7900_v62 = vunpack.c.l.b16 %v12692_v6 }
 0x566   : > { %v8096_v30 = vpack.c.b16 %v8072_v29, %v7820_v1  ;;  %v7860_v15 = vunpack.c.l.b16 %v12683_v59  ;;  %v7750_v49 = vpack.c.b16 %v8072_v29, %v8072_v29 }
 0x567   : > { %v7472_v33 = vpop.f32.mrf.mxu1  ;;  %v7908_v48 = vpack.c.b16 %v7900_v62, %v7900_v62  ;;  %v9244_v62 = vld [vmem:[%s13106_s9 + $0x38] sm:$0xff] }
 0x568   : > { %v7473_v9 = vadd.f32 %v7472_v33, %v7444_v14  ;;  %7719 = vrot.lane.b32.xlu2 %v7709_v57, %s9326_s20  ;;  %7875 = vrot.lane.b32.xlu1 %v7788_v61, %s9327_s21  ;;  %v7868_v63 = vpack.c.b16 %v7860_v15, %v7860_v15 }
 0x569   : > { %7837 = vrot.lane.b32.xlu0 %v7828_v34, %s9326_s20  ;;  %9165 = vmatmul.msk.bf16.vlgmr.msra.gmra.mxu1 %vm2309_vm3, %v8096_v30  ;;  %v7677_v27 = vld [vmem:[#allocation4 + $0x42] sm:$0xff] }
 0x56a   : > { %v7502_v50 = vadd.f32 %v7501_v39, %v7473_v9  ;;  %v7567_v16 = vld [vmem:[#allocation4 + $0x41] sm:$0xff]  ;;  %v7685_v10 = vpack.c.bf16 %v7677_v27, %v7677_v27  ;;  %8234 = vmatpush.bf16.msra.mxu3 %v9244_v62 }
 0x56b   : > { %v7598_v35 = vld [vmem:[#allocation4 + $0x40] sm:$0xff]  ;;  %8330 = vst.msk [vmem:[#allocation4 + $0x48] sm:$0x3] %vm2664_vm11, %v13235_v25  ;;  %v12716_v22 = vpack.c.bf16 %v7567_v16, %v7567_v16  ;;  %v7690_v16 = vpack.c.bf16 %v7682_v20, %v7682_v20 }
 0x56c   : > { %v7515_v28 = vmax.f32 %v7502_v50, 0.0  ;;  %8329 = vst.msk [vmem:[#allocation4 + $0x40] sm:$0xff] %vm2309_vm3, %v13235_v25  ;;  %v12703_v3 = vpack.c.bf16 %v7598_v35, %v7598_v35  ;;  %v8075_v2 = vunpack.c.l.b16 %v7685_v10  ;;  %v9243_v10 = vld [vmem:[%s13106_s9 + $0x30] sm:$0xff] }
 0x56d   : > { %v7503_v45 = vpop.f32.mrf.mxu2  ;;  %v7703_v40 = vunpack.c.l.b16 %v12716_v22 }
 0x56e   : > { %7543 = vst.msk [vmem:[#allocation4 + $0x51] sm:$0xff] %vm2309_vm3, %v7515_v28  ;;  %v7782_v18 = vunpack.c.l.b16 %v12703_v3  ;;  %v7830_v1 = vpack.c.b16 %v8075_v2, %v8075_v2  ;;  %8235 = vmatpush.bf16.msra.mxu3 %v9243_v10  ;;  %v9245_v10 = vld [vmem:[%s13106_s9 + $0x40] sm:$0xff] }
 0x56f   : > { %v7474_v21 = vpop.f32.mrf.mxu1  ;;  %v7711_v26 = vpack.c.b16 %v7703_v40, %v7703_v40 }
 0x570   : > { %v7475_v17 = vadd.f32 %v7474_v21, %v7446_v47  ;;  %7877 = vrot.lane.b32.xlu2 %v7868_v63, %s9327_s21  ;;  %7759 = vrot.lane.b32.xlu1 %v7828_v34, %s9327_s21  ;;  %v7790_v42 = vpack.c.b16 %v7782_v18, %v7782_v18  ;;  %v12794_v18 = vpop.permute.xlu2 %7715 }
 0x571   : > { %7915 = vrot.lane.b32.xlu0 %v7709_v57, %s9329_s30 }
 0x572   : > { %v7504_v56 = vadd.f32 %v7503_v45, %v7475_v17 }
 0x574   : > { %v7516_v36 = vmax.f32 %v7504_v56, 0.0  ;;  %v8090_v56 = vunpack.c.l.b16 %v7690_v16 }
 0x575   : > { %v7678_v8 = vld [vmem:[#allocation4 + $0x52] sm:$0xff]  ;;  %v7506_v38 = vpop.f32.mrf.mxu2 }
 0x576   : > { %7544 = vst.msk [vmem:[#allocation4 + $0x61] sm:$0xff] %vm2309_vm3, %v7516_v36  ;;  %v7686_v23 = vpack.c.bf16 %v7678_v8, %v7678_v8  ;;  %v7662_v5 = vld [vmem:[#allocation4 + $0x51] sm:$0xff] }
 0x577   : > { %v7448_v11 = vpop.f32.mrf.mxu0  ;;  %v7646_v54 = vld [vmem:[#allocation4 + $0x50] sm:$0xff]  ;;  %8332 = vst.msk [vmem:[#allocation4 + $0x58] sm:$0x3] %vm2664_vm11, %v13235_v25  ;;  %v12744_v50 = vpack.c.bf16 %v7662_v5, %v7662_v5 }
 0x578   : > { %v7449_v19 = vadd.f32 %v12636_v0, %v7448_v11  ;;  %7761 = vrot.lane.b32.xlu2 %v7750_v49, %s9327_s21  ;;  %v8078_v31 = vunpack.c.l.b16 %v7686_v23  ;;  %8331 = vst.msk [vmem:[#allocation4 + $0x50] sm:$0xff] %vm2309_vm3, %v13235_v25  ;;  %7917 = vrot.lane.b32.xlu1 %v7908_v48, %s9329_s30  ;;  %v12725_v60 = vpack.c.bf16 %v7646_v54, %v7646_v54  ;;  %v9242_v23 = vld [vmem:[%s13106_s9 + $0x28] sm:$0xff]  ;;  %v9241_v11 = vld [vmem:[%s13106_s9 + $0x20] sm:$0xff] }
 0x579   : > { %7721 = vrot.lane.b32.xlu0 %v7908_v48, %s9326_s20  ;;  %v7902_v28 = vunpack.c.l.b16 %v12744_v50  ;;  %8236 = vmatpush.bf16.msra.mxu3 %v9242_v23 }
 0x57a   : > { %v7478_v51 = vadd.f32 %v12626_v37, %v7449_v19  ;;  %v8099_v46 = vpack.c.b16 %v8078_v31, %v8075_v2  ;;  %v7862_v34 = vunpack.c.l.b16 %v12725_v60  ;;  %v7752_v21 = vpack.c.b16 %v8078_v31, %v8078_v31  ;;  %v9240_v31 = vld [vmem:[%s13106_s9 + $0x18] sm:$0xff] }
 0x57b   : > { %v7910_v45 = vpack.c.b16 %v7902_v28, %v7902_v28  ;;  %v9247_v28 = vld [vmem:[%s13106_s9 + $0x50] sm:$0xff] }
 0x57c   : > { %v7507_v53 = vadd.f32 %v7506_v38, %v7478_v51  ;;  %9166 = vmatmul.msk.bf16.gmra.mxu1 %vm2309_vm3, %v8099_v46  ;;  %v7870_v9 = vpack.c.b16 %v7862_v34, %v7862_v34  ;;  %v9239_v51 = vld [vmem:[%s13106_s9 + $0x10] sm:$0xff]  ;;  %v7666_v46 = vld [vmem:[#allocation4 + $0x91] sm:$0xff] }
 0x57d   : > { %v7508_v7 = vpop.f32.mrf.mxu2  ;;  %v7679_v41 = vld [vmem:[#allocation4 + $0x62] sm:$0xff]  ;;  %8237 = vmatpush.bf16.msra.mxu3 %v9241_v11  ;;  %8340 = vst.msk [vmem:[#allocation4 + $0x98] sm:$0x3] %vm2664_vm11, %v13235_v25 }
 0x57e   : > { %v7517_v55 = vmax.f32 %v7507_v53, 0.0  ;;  %v7687_v32 = vpack.c.bf16 %v7679_v41, %v7679_v41  ;;  %v7569_v57 = vld [vmem:[#allocation4 + $0x61] sm:$0xff] }
 0x57f   : > { %v7450_v58 = vpop.f32.mrf.mxu0  ;;  %v7600_v30 = vld [vmem:[#allocation4 + $0x60] sm:$0xff]  ;;  %8334 = vst.msk [vmem:[#allocation4 + $0x68] sm:$0x3] %vm2664_vm11, %v13235_v25  ;;  %v12770_v48 = vpack.c.bf16 %v7569_v57, %v7569_v57 }
 0x580   : > { %7545 = vst.msk [vmem:[#allocation4 + $0x71] sm:$0xff] %vm2309_vm3, %v7517_v55  ;;  %v7451_v61 = vadd.f32 %v12636_v0, %v7450_v58  ;;  %7839 = vrot.lane.b32.xlu2 %v7750_v49, %s9326_s20  ;;  %7801 = vrot.lane.b32.xlu1 %v7790_v42, %s9329_s30  ;;  %v8081_v14 = vunpack.c.l.b16 %v7687_v32  ;;  %v12754_v35 = vpack.c.bf16 %v7600_v30, %v7600_v30  ;;  %v9250_v32 = vld [vmem:[%s13106_s9 + $0x68] sm:$0xff] }
 0x581   : > { %7799 = vrot.lane.b32.xlu0 %v7868_v63, %s9329_s30  ;;  %8333 = vst.msk [vmem:[#allocation4 + $0x60] sm:$0xff] %vm2309_vm3, %v13235_v25  ;;  %v7705_v5 = vunpack.c.l.b16 %v12770_v48  ;;  %8238 = vmatpush.bf16.msra.mxu3 %v9240_v31 }
 0x582   : > { %v7480_v37 = vadd.f32 %v12631_v24, %v7451_v61  ;;  %v12731_v24 = vld [vmem:[#allocation4] sm:$0xff]  ;;  %v7784_v36 = vunpack.c.l.b16 %v12754_v35  ;;  %v7832_v19 = vpack.c.b16 %v8081_v14, %v8081_v14 }
 0x583   : > { %8321 = vst.msk [vmem:[#allocation4] sm:$0xff] %vm2309_vm3, %v13235_v25  ;;  %v7713_v54 = vpack.c.b16 %v7705_v5, %v7705_v5  ;;  %v9238_v61 = vld [vmem:[%s13106_s9 + $0x8] sm:$0xff] }
 0x584   : > { %v7509_v13 = vadd.f32 %v7508_v7, %v7480_v37  ;;  %v7792_v49 = vpack.c.b16 %v7784_v36, %v7784_v36  ;;  %v9252_v37 = vld [vmem:[%s13106_s9 + $0x78] sm:$0xff] }
 0x585   : > { %8239 = vmatpush.bf16.msra.mxu3 %v9239_v51  ;;  %8263 = vmatpush.bf16.msra.mxu0 %v9252_v37 }
 0x586   : > { %v7518_v12 = vmax.f32 %v7509_v13, 0.0 }
 0x587   : > { %v7680_v0 = vld [vmem:[#allocation4 + $0x72] sm:$0xff] }
 0x588   : > { %7546 = vst.msk [vmem:[#allocation4 + $0x81] sm:$0xff] %vm2309_vm3, %v7518_v12  ;;  %7723 = vrot.lane.b32.xlu2 %v7711_v26, %s9326_s20  ;;  %v7688_v29 = vpack.c.bf16 %v7680_v0, %v7680_v0  ;;  %7879 = vrot.lane.b32.xlu1 %v7790_v42, %s9327_s21  ;;  %v7664_v47 = vld [vmem:[#allocation4 + $0x71] sm:$0xff] }
 0x589   : > { %7841 = vrot.lane.b32.xlu0 %v7830_v1, %s9326_s20  ;;  %v7648_v63 = vld [vmem:[#allocation4 + $0x70] sm:$0xff]  ;;  %8336 = vst.msk [vmem:[#allocation4 + $0x78] sm:$0x3] %vm2664_vm11, %v13235_v25  ;;  %v12798_v55 = vpack.c.bf16 %v7664_v47, %v7664_v47  ;;  %8240 = vmatpush.bf16.msra.mxu3 %v9238_v61  ;;  %v9237_v12 = vld [vmem:[%s13106_s9] sm:$0xff]  ;;  %v7756_v47 = vpop.permute.xlu1 %7755 }
 0x58a   : > { %v12733_v39 = vunpack.c.l.b16 %v7688_v29  ;;  %8335 = vst.msk [vmem:[#allocation4 + $0x70] sm:$0xff] %vm2309_vm3, %v13235_v25  ;;  %v12782_v2 = vpack.c.bf16 %v7648_v63, %v7648_v63  ;;  %v7650_v29 = vld [vmem:[#allocation4 + $0x90] sm:$0xff] }
 0x58b   : > { %v7904_v40 = vunpack.c.l.b16 %v12798_v55  ;;  %8339 = vst.msk [vmem:[#allocation4 + $0x90] sm:$0xff] %vm2309_vm3, %v13235_v25 }
 0x58c   : > { %v8102_v33 = vpack.c.b16 %v12733_v39, %v8081_v14  ;;  %v7864_v38 = vunpack.c.l.b16 %v12782_v2  ;;  %v7754_v13 = vpack.c.b16 %v12733_v39, %v12733_v39  ;;  %v7658_v14 = vpack.c.bf16 %v7650_v29, %v7650_v29  ;;  %v9249_v39 = vld [vmem:[%s13106_s9 + $0x60] sm:$0xff] }
 0x58d   : > { %v7912_v41 = vpack.c.b16 %v7904_v40, %v7904_v40  ;;  %8241 = vmatpush.bf16.msra.mxu3 %v9237_v12 }
 0x58e   : > { %9167 = vmatmul.msk.bf16.gmra.mxu1 %vm2309_vm3, %v8102_v33  ;;  %v7872_v53 = vpack.c.b16 %v7864_v38, %v7864_v38  ;;  %v7866_v30 = vunpack.c.l.b16 %v7658_v14  ;;  %v9248_v33 = vld [vmem:[%s13106_s9 + $0x58] sm:$0xff] }
 0x58f   : > { %v7681_v15 = vld [vmem:[#allocation4 + $0x82] sm:$0xff] }
 0x590   : > { %7881 = vrot.lane.b32.xlu2 %v7870_v9, %s9327_s21  ;;  %7763 = vrot.lane.b32.xlu1 %v7830_v1, %s9327_s21  ;;  %v7689_v27 = vpack.c.bf16 %v7681_v15, %v7681_v15  ;;  %v7602_v58 = vld [vmem:[#allocation4 + $0x80] sm:$0xff] }
 0x591   : > { %7919 = vrot.lane.b32.xlu0 %v7711_v26, %s9329_s30  ;;  %v7665_v42 = vld [vmem:[#allocation4 + $0x81] sm:$0xff]  ;;  %v7610_v1 = vpack.c.bf16 %v7602_v58, %v7602_v58 }
 0x592   : > { %v12758_v17 = vunpack.c.l.b16 %v7689_v27  ;;  %8337 = vst.msk [vmem:[#allocation4 + $0x80] sm:$0xff] %vm2309_vm3, %v13235_v25  ;;  %v9251_v26 = vld [vmem:[%s13106_s9 + $0x70] sm:$0xff]  ;;  %v12841_v20 = vpack.c.bf16 %v7665_v42, %v7665_v42 }
 0x593   : > { %8338 = vst.msk [vmem:[#allocation4 + $0x88] sm:$0x3] %vm2664_vm11, %v13235_v25  ;;  %8264 = vmatpush.bf16.msra.mxu0 %v9251_v26  ;;  %v7786_v0 = vunpack.c.l.b16 %v7610_v1  ;;  %v7874_v25 = vpack.c.b16 %v7866_v30, %v7866_v30 }
 0x594   : > { %v8105_v8 = vpack.c.b16 %v8090_v56, %v12758_v17  ;;  %v7834_v15 = vpack.c.b16 %v12758_v17, %v12758_v17  ;;  %v7555_v17 = vpack.c.bf16 %v12731_v24, %v12731_v24 }
 0x595   : > { %v7794_v34 = vpack.c.b16 %v7786_v0, %v7786_v0 }
 0x596   : > { %v7933_v36 = vsel %vm2309_vm3, %v7555_v17, %v12794_v18 }
 0x597   : > { %8265 = vmatpush.bf16.msra.mxu0 %v9250_v32 }
 0x598   : > { %7765 = vrot.lane.b32.xlu2 %v7752_v21, %s9327_s21  ;;  %7921 = vrot.lane.b32.xlu1 %v7910_v45, %s9329_s30 }
 0x599   : > { %7725 = vrot.lane.b32.xlu0 %v7910_v45, %s9326_s20  ;;  %v7905_v45 = vunpack.c.l.b16 %v12841_v20 }
 0x59b   : > { %8266 = vmatpush.bf16.msra.mxu0 %v9249_v39  ;;  %v7913_v62 = vpack.c.b16 %v7905_v45, %v7905_v45 }
 0x59e   : > { %9168 = vmatmul.msk.bf16.gmra.mxu1 %vm2309_vm3, %v8105_v8 }
 0x59f   : > { %8267 = vmatpush.bf16.msra.mxu0 %v9248_v33 }
 0x5a0   : > { %7843 = vrot.lane.b32.xlu2 %v7752_v21, %s9326_s20  ;;  %7805 = vrot.lane.b32.xlu1 %v7792_v49, %s9329_s30  ;;  %v9246_v21 = vld [vmem:[%s13106_s9 + $0x48] sm:$0xff] }
 0x5a1   : > { %7803 = vrot.lane.b32.xlu0 %v7870_v9, %s9329_s30  ;;  %v7674_v9 = vpack.c.bf16 %v7666_v46, %v7666_v46 }
 0x5a3   : > { %v7906_v63 = vunpack.c.l.b16 %v7674_v9  ;;  %8268 = vmatpush.bf16.msra.mxu0 %v9247_v28 }
 0x5a5   : > { %v7914_v56 = vpack.c.b16 %v7906_v63, %v7906_v63 }
 0x5a7   : > { %8269 = vmatpush.bf16.msra.mxu0 %v9246_v21 }
 0x5a8   : > { %7727 = vrot.lane.b32.xlu2 %v7713_v54, %s9326_s20  ;;  %7883 = vrot.lane.b32.xlu1 %v7792_v49, %s9327_s21  ;;  %v7956_v49 = vsel %vm2441_vm9, %v7933_v36, %v7756_v47 }
 0x5a9   : > { %7845 = vrot.lane.b32.xlu0 %v7832_v19, %s9326_s20 }
 0x5ab   : > { %8270 = vmatpush.bf16.msra.mxu0 %v9245_v10 }
 0x5b0   : > { %7885 = vrot.lane.b32.xlu2 %v7872_v53, %s9327_s21  ;;  %7767 = vrot.lane.b32.xlu1 %v7832_v19, %s9327_s21 }
 0x5b1   : > { %7923 = vrot.lane.b32.xlu0 %v7713_v54, %s9329_s30 }
 0x5b2   : > { %v7758_v7 = vpop.permute.xlu2 %7757 }
 0x5b8   : > { %7769 = vrot.lane.b32.xlu2 %v7754_v13, %s9327_s21  ;;  %7925 = vrot.lane.b32.xlu1 %v7912_v41, %s9329_s30 }
 0x5b9   : > { %7729 = vrot.lane.b32.xlu0 %v7912_v41, %s9326_s20 }
 0x5ba   : > { %v7836_v57 = vpop.permute.xlu2 %7835 }
 0x5bb   : > { %v7989_v42 = vsel %vm2309_vm3, %v12650_v52, %v7836_v57 }
 0x5c0   : > { %7847 = vrot.lane.b32.xlu2 %v7754_v13, %s9326_s20  ;;  %7809 = vrot.lane.b32.xlu1 %v7794_v34, %s9329_s30 }
 0x5c1   : > { %7807 = vrot.lane.b32.xlu0 %v7872_v53, %s9329_s30 }
 0x5c2   : > { %v7720_v27 = vpop.permute.xlu2 %7719 }
 0x5c8   : > { %7889 = vrot.lane.b32.xlu2 %v7874_v25, %s9327_s21  ;;  %7887 = vrot.lane.b32.xlu1 %v7794_v34, %s9327_s21 }
 0x5c9   : > { %7849 = vrot.lane.b32.xlu0 %v7834_v15, %s9326_s20 }
 0x5ca   : > { %v7878_v54 = vpop.permute.xlu2 %7877 }
 0x5cb   : > { %v7718_v16 = vpop.permute.xlu0 %7717 }
 0x5cc   : > { %v7936_v8 = vsel %vm2309_vm3, %v12657_v43, %v7718_v16 }
 0x5cd   : > { %v7958_v5 = vsel %vm2441_vm9, %v7936_v8, %v7758_v7 }
 0x5d0   : > { %7929 = vrot.lane.b32.xlu1 %v7914_v56, %s9329_s30 }
 0x5d1   : > { %7927 = vrot.lane.b32.xlu0 %v7913_v62, %s9329_s30 }
 0x5d2   : > { %v7798_v11 = vpop.permute.xlu1 %7797  ;;  %v7762_v18 = vpop.permute.xlu2 %7761 }
 0x5d3   : > { %v7796_v24 = vpop.permute.xlu0 %7795  ;;  %v7974_v31 = vsel %vm4319_vm12, %v7958_v5, %v7798_v11 }
 0x5d4   : > { %v7972_v23 = vsel %vm4319_vm12, %v7956_v49, %v7796_v24  ;;  %v8070_v38 = vunpack.c.l.b16 %v7974_v31 }
 0x5d5   : > { %v8067_v19 = vunpack.c.l.b16 %v7972_v23 }
 0x5d7   : > { %v8094_v51 = vpack.c.b16 %v8070_v38, %v8067_v19 }
 0x5d9   : > { %8242 = vmatmul.bf16.vlgmr.msra.gmra.mxu3 %v8094_v51 }
 0x5da   : > { %v7876_v46 = vpop.permute.xlu1 %7875  ;;  %v7840_v37 = vpop.permute.xlu2 %7839 }
 0x5db   : > { %v7838_v43 = vpop.permute.xlu0 %7837  ;;  %v8012_v40 = vsel %vm2441_vm9, %v7989_v42, %v7876_v46  ;;  %v7995_v16 = vsel %vm2309_vm3, %v12692_v6, %v7840_v37 }
 0x5dc   : > { %v7992_v61 = vsel %vm2309_vm3, %v12671_v44, %v7838_v43  ;;  %v7939_v44 = vsel %vm2309_vm3, %v12664_v4, %v7720_v27 }
 0x5dd   : > { %v8014_v1 = vsel %vm2441_vm9, %v7992_v61, %v7878_v54 }
 0x5e2   : > { %v7760_v58 = vpop.permute.xlu1 %7759  ;;  %v7724_v14 = vpop.permute.xlu2 %7723 }
 0x5e3   : > { %v7916_v53 = vpop.permute.xlu0 %7915  ;;  %v7960_v29 = vsel %vm2441_vm9, %v7939_v44, %v7760_v58 }
 0x5e4   : > { %v8028_v7 = vsel %vm4319_vm12, %v8012_v40, %v7916_v53 }
 0x5e5   : > { %v8068_v26 = vunpack.c.l.b16 %v8028_v7 }
 0x5ea   : > { %v7918_v13 = vpop.permute.xlu1 %7917  ;;  %v7882_v47 = vpop.permute.xlu2 %7881 }
 0x5eb   : > { %v7722_v41 = vpop.permute.xlu0 %7721  ;;  %v8030_v12 = vsel %vm4319_vm12, %v8014_v1, %v7918_v13 }
 0x5ec   : > { %v8071_v32 = vunpack.c.l.b16 %v8030_v12  ;;  %v7942_v52 = vsel %vm2309_vm3, %v12683_v59, %v7722_v41 }
 0x5ed   : > { %v7962_v57 = vsel %vm2441_vm9, %v7942_v52, %v7762_v18 }
 0x5ee   : > { %v8095_v0 = vpack.c.b16 %v8071_v32, %v8068_v26 }
 0x5f0   : > { %8271 = vmatmul.bf16.vlgmr.msra.gmra.mxu0 %v8095_v0 }
 0x5f2   : > { %v7802_v34 = vpop.permute.xlu1 %7801  ;;  %v7766_v27 = vpop.permute.xlu2 %7765 }
 0x5f3   : > { %v7800_v39 = vpop.permute.xlu0 %7799  ;;  %v7978_v33 = vsel %vm4319_vm12, %v7962_v57, %v7802_v34 }
 0x5f4   : > { %v7976_v30 = vsel %vm4319_vm12, %v7960_v29, %v7800_v39  ;;  %v8076_v9 = vunpack.c.l.b16 %v7978_v33 }
 0x5f5   : > { %v8073_v25 = vunpack.c.l.b16 %v7976_v30 }
 0x5f7   : > { %v8097_v15 = vpack.c.b16 %v8076_v9, %v8073_v25 }
 0x5f9   : > { %8247 = vmatmul.bf16.gmra.mxu3 %v8097_v15 }
 0x5fa   : > { %v7880_v28 = vpop.permute.xlu1 %7879  ;;  %v7844_v23 = vpop.permute.xlu2 %7843 }
 0x5fb   : > { %v7842_v59 = vpop.permute.xlu0 %7841  ;;  %v8016_v21 = vsel %vm2441_vm9, %v7995_v16, %v7880_v28  ;;  %v8001_v61 = vsel %vm2309_vm3, %v12744_v50, %v7844_v23 }
 0x5fc   : > { %v7998_v45 = vsel %vm2309_vm3, %v12716_v22, %v7842_v59  ;;  %v7945_v22 = vsel %vm2309_vm3, %v12703_v3, %v7724_v14 }
 0x5fd   : > { %v8018_v36 = vsel %vm2441_vm9, %v7998_v45, %v7882_v47 }
 0x602   : > { %v7764_v63 = vpop.permute.xlu1 %7763  ;;  %v7728_v18 = vpop.permute.xlu2 %7727 }
 0x603   : > { %v7920_v4 = vpop.permute.xlu0 %7919  ;;  %v7964_v5 = vsel %vm2441_vm9, %v7945_v22, %v7764_v63 }
 0x604   : > { %v8032_v17 = vsel %vm4319_vm12, %v8016_v21, %v7920_v4 }
 0x605   : > { %v8074_v8 = vunpack.c.l.b16 %v8032_v17 }
 0x60a   : > { %v7922_v62 = vpop.permute.xlu1 %7921  ;;  %v7886_v42 = vpop.permute.xlu2 %7885 }
 0x60b   : > { %v7726_v56 = vpop.permute.xlu0 %7725  ;;  %v8034_v10 = vsel %vm4319_vm12, %v8018_v36, %v7922_v62  ;;  %v8301_v36 = vpop.f32.mrf.mxu1 }
 0x60c   : > { %v8077_v49 = vunpack.c.l.b16 %v8034_v10  ;;  %v7948_v6 = vsel %vm2309_vm3, %v12725_v60, %v7726_v56 }
 0x60d   : > { %v7966_v19 = vsel %vm2441_vm9, %v7948_v6, %v7766_v27 }
 0x60e   : > { %v8098_v24 = vpack.c.b16 %v8077_v49, %v8074_v8 }
 0x610   : > { %8276 = vmatmul.bf16.gmra.mxu0 %v8098_v24 }
 0x612   : > { %v7806_v54 = vpop.permute.xlu1 %7805  ;;  %v7770_v0 = vpop.permute.xlu2 %7769 }
 0x613   : > { %v7804_v11 = vpop.permute.xlu0 %7803  ;;  %v7982_v38 = vsel %vm4319_vm12, %v7966_v19, %v7806_v54 }
 0x614   : > { %v7980_v31 = vsel %vm4319_vm12, %v7964_v5, %v7804_v11  ;;  %v8082_v43 = vunpack.c.l.b16 %v7982_v38  ;;  %v8303_v5 = vpop.f32.mrf.mxu1 }
 0x615   : > { %v8079_v51 = vunpack.c.l.b16 %v7980_v31 }
 0x617   : > { %v8100_v46 = vpack.c.b16 %v8082_v43, %v8079_v51 }
 0x619   : > { %8252 = vmatmul.bf16.gmra.mxu3 %v8100_v46 }
 0x61a   : > { %v7884_v53 = vpop.permute.xlu1 %7883  ;;  %v7848_v9 = vpop.permute.xlu2 %7847 }
 0x61b   : > { %v7846_v60 = vpop.permute.xlu0 %7845  ;;  %v8020_v40 = vsel %vm2441_vm9, %v8001_v61, %v7884_v53  ;;  %v8007_v28 = vsel %vm2309_vm3, %v12798_v55, %v7848_v9 }
 0x61c   : > { %v8004_v37 = vsel %vm2309_vm3, %v12770_v48, %v7846_v60  ;;  %v7951_v48 = vsel %vm2309_vm3, %v12754_v35, %v7728_v18  ;;  %v8306_v31 = vpop.f32.mrf.mxu1 }
 0x61d   : > { %v8022_v1 = vsel %vm2441_vm9, %v8004_v37, %v7886_v42 }
 0x622   : > { %v7768_v3 = vpop.permute.xlu1 %7767  ;;  %v7890_v59 = vpop.permute.xlu2 %7889 }
 0x623   : > { %v7924_v58 = vpop.permute.xlu0 %7923  ;;  %v7968_v44 = vsel %vm2441_vm9, %v7951_v48, %v7768_v3 }
 0x624   : > { %v8036_v7 = vsel %vm4319_vm12, %v8020_v40, %v7924_v58  ;;  %v8308_v58 = vpop.f32.mrf.mxu1 }
 0x625   : > { %v8080_v26 = vunpack.c.l.b16 %v8036_v7 }
 0x62a   : > { %v7926_v13 = vpop.permute.xlu1 %7925 }
 0x62b   : > { %v7730_v41 = vpop.permute.xlu0 %7729  ;;  %v8038_v12 = vsel %vm4319_vm12, %v8022_v1, %v7926_v13  ;;  %v8643_v13 = vpop.f32.mrf.mxu2 }
 0x62c   : > { %v8083_v32 = vunpack.c.l.b16 %v8038_v12  ;;  %v7954_v50 = vsel %vm2309_vm3, %v12782_v2, %v7730_v41  ;;  %v8311_v37 = vpop.f32.mrf.mxu1  ;;  %v8350_v12 = vld [vmem:[#allocation4 + $0x8] sm:$0x3] }
 0x62d   : > { %v7970_v39 = vsel %vm2441_vm9, %v7954_v50, %v7770_v0 }
 0x62e   : > { %v8101_v52 = vpack.c.b16 %v8083_v32, %v8080_v26  ;;  %v8349_v32 = vld [vmem:[#allocation4] sm:$0xff] }
 0x630   : > { %8281 = vmatmul.bf16.gmra.mxu0 %v8101_v52 }
 0x632   : > { %v7810_v14 = vpop.permute.xlu1 %7809 }
 0x633   : > { %v7808_v29 = vpop.permute.xlu0 %7807  ;;  %v7986_v57 = vsel %vm4319_vm12, %v7970_v39, %v7810_v14 }
 0x634   : > { %v7984_v34 = vsel %vm4319_vm12, %v7968_v44, %v7808_v29  ;;  %v8088_v33 = vunpack.c.l.b16 %v7986_v57  ;;  %v9287_v44 = vld [vmem:[%s13109_s12] ss:$0 sm:$0xff]  ;;  %v8313_v57 = vpop.f32.mrf.mxu1 }
 0x635   : > { %v8085_v30 = vunpack.c.l.b16 %v7984_v34  ;;  %v8644_v9 = vadd.f32 %v9287_v44, %v8643_v13 }
 0x637   : > { %v8103_v25 = vpack.c.b16 %v8088_v33, %v8085_v30 }
 0x639   : > { %8257 = vmatmul.bf16.gmra.mxu3 %v8103_v25 }
 0x63a   : > { %v7888_v15 = vpop.permute.xlu1 %7887 }
 0x63b   : > { %v7850_v2 = vpop.permute.xlu0 %7849  ;;  %v8024_v47 = vsel %vm2441_vm9, %v8007_v28, %v7888_v15  ;;  %v8645_v15 = vpop.f32.mrf.mxu2 }
 0x63c   : > { %v8010_v35 = vsel %vm2309_vm3, %v12841_v20, %v7850_v2  ;;  %v12927_v20 = vld [vmem:[%s13107_s10] ss:$0 sm:$0xff] }
 0x63d   : > { %v8026_v63 = vsel %vm2441_vm9, %v8010_v35, %v7890_v59 }
 0x642   : > { %v7930_v27 = vpop.permute.xlu1 %7929 }
 0x643   : > { %v7928_v4 = vpop.permute.xlu0 %7927  ;;  %v8042_v45 = vsel %vm4319_vm12, %v8026_v63, %v7930_v27 }
 0x644   : > { %v8040_v16 = vsel %vm4319_vm12, %v8024_v47, %v7928_v4  ;;  %v8089_v17 = vunpack.c.l.b16 %v8042_v45  ;;  %v8650_v47 = vrot.slane %v8644_v9, 4  ;;  %v12947_v4 = vadd.f32 %v9287_v44, %v8645_v15 }
 0x645   : > { %v8086_v21 = vunpack.c.l.b16 %v8040_v16 }
 0x647   : > { %v8104_v56 = vpack.c.b16 %v8089_v17, %v8086_v21  ;;  %v8652_v17 = vrot.slane %v8644_v9, 2 }
 0x649   : > { %8286 = vmatmul.bf16.gmra.mxu0 %v8104_v56 }
 0x65c   : > { %v8243_v62 = vpop.f32.mrf.mxu3 }
 0x65d   : > { %v8244_v55 = vadd.f32 %v12927_v20, %v8243_v62  ;;  %v8653_v62 = vrot.slane %v8650_v47, 2 }
 0x664   : > { %v8245_v24 = vpop.f32.mrf.mxu3 }
 0x665   : > { %v8246_v23 = vadd.f32 %v12927_v20, %v8245_v24 }
 0x66d   : > { %v8272_v10 = vpop.f32.mrf.mxu0 }
 0x66e   : > { %v8273_v8 = vadd.f32 %v8272_v10, %v8244_v55  ;;  %v8654_v55 = vrot.slane %v12947_v4, 2 }
 0x670   : > { %v8302_v49 = vadd.f32 %v8301_v36, %v8273_v8 }
 0x672   : > { %8341 = vst.msk [vmem:[#allocation4 + $0x11] sm:$0xff] %vm2309_vm3, %v8302_v49 }
 0x675   : > { %v8274_v6 = vpop.f32.mrf.mxu0 }
 0x676   : > { %v8275_v22 = vadd.f32 %v8274_v6, %v8246_v23  ;;  %v12961_v23 = vsel %vm8658_vm6, %v8644_v9, %v8652_v17 }
 0x678   : > { %v8304_v11 = vadd.f32 %v8303_v5, %v8275_v22 }
 0x679   : > { %v8352_v26 = vld [vmem:[#allocation4 + $0x18] sm:$0x3]  ;;  %v8351_v0 = vld [vmem:[#allocation4 + $0x10] sm:$0xff] }
 0x67a   : > { %8342 = vst.msk [vmem:[#allocation4 + $0x21] sm:$0xff] %vm2309_vm3, %v8304_v11  ;;  %v8368_v50 = vmax.f32 %v8350_v12, %v8352_v26  ;;  %v8367_v34 = vmax.f32 %v8349_v32, %v8351_v0  ;;  %v13003_v32 = vsel %vm8656_vm0, %v8650_v47, %v8653_v62 }
 0x67c   : > { %v8248_v54 = vpop.f32.mrf.mxu3 }
 0x67d   : > { %v8249_v19 = vadd.f32 %v12927_v20, %v8248_v54 }
 0x681   : > { %v8353_v14 = vld [vmem:[#allocation4 + $0x20] sm:$0xff]  ;;  %v8354_v39 = vld [vmem:[#allocation4 + $0x28] sm:$0x3] }
 0x682   : > { %v8376_v30 = vmax.f32 %v8368_v50, %v8354_v39  ;;  %v12943_v25 = vmax.f32 %v8367_v34, %v8353_v14 }
 0x684   : > { %v8250_v46 = vpop.f32.mrf.mxu3  ;;  %8416 = vst.sshfl [vmem:[#allocation1 + $0x20] sm:$0xff pattern:$0x73625140] %v8376_v30  ;;  %v9169_v27 = vrot.slane %v12943_v25, 9 }
 0x685   : > { %v8251_v18 = vadd.f32 %v12927_v20, %v8250_v46  ;;  %8415 = vst.sshfl [vmem:[#allocation1] sm:$0xff pattern:$0x73625140] %v12943_v25  ;;  %v12976_v46 = vsel %vm8656_vm0, %v8644_v9, %v8652_v17  ;;  %v13018_v9 = vsel %vm8656_vm0, %v12947_v4, %v8654_v55 }
 0x686   : > { %v12956_v8 = vmax.f32 %v12943_v25, %v9169_v27 }
 0x68b   : > { %v12953_v10 = vld [vmem:[#allocation1 + $0x20] ss:$4 sm:$0xff] }
 0x68c   : > { %v12958_v24 = vld [vmem:[#allocation1 + $0x1] ss:$4 sm:$0xff]  ;;  %v12966_v5 = vld [vmem:[#allocation1 + $0x2] ss:$4 sm:$0xff]  ;;  %v12968_v11 = vld [vmem:[#allocation1 + $0x3] ss:$4 sm:$0xff] }
 0x68d   : > { %v8277_v38 = vpop.f32.mrf.mxu0  ;;  %v8523_v54 = vmax.f32 %v12956_v8, %v12958_v24 }
 0x68e   : > { %v8278_v51 = vadd.f32 %v8277_v38, %v8249_v19  ;;  %v8316_v19 = vpop.f32.mrf.mxu1 }
 0x690   : > { %v8307_v43 = vadd.f32 %v8306_v31, %v8278_v51 }
 0x692   : > { %8343 = vst.msk [vmem:[#allocation4 + $0x31] sm:$0xff] %vm2309_vm3, %v8307_v43 }
 0x695   : > { %v8279_v60 = vpop.f32.mrf.mxu0 }
 0x696   : > { %v8280_v53 = vadd.f32 %v8279_v60, %v8251_v18  ;;  %v8660_v18 = vrot.slane %v12961_v23, 2  ;;  %v8318_v15 = vpop.f32.mrf.mxu1 }
 0x698   : > { %v8309_v3 = vadd.f32 %v8308_v58, %v8280_v53  ;;  %v12981_v58 = vsel %vm8658_vm6, %v8650_v47, %v8653_v62  ;;  %v12999_v12 = vrot.slane %v8660_v18, 1  ;;  %v8694_v62 = vadd.f32 %v12976_v46, %v8523_v54 }
 0x699   : > { %v8356_v2 = vld [vmem:[#allocation4 + $0x38] sm:$0x3]  ;;  %v8355_v35 = vld [vmem:[#allocation4 + $0x30] sm:$0xff] }
 0x69a   : > { %8344 = vst.msk [vmem:[#allocation4 + $0x41] sm:$0xff] %vm2309_vm3, %v8309_v3  ;;  %v8370_v28 = vmax.f32 %v8354_v39, %v8356_v2  ;;  %v8369_v45 = vmax.f32 %v8353_v14, %v8355_v35  ;;  %v12985_v3 = vsel %vm8658_vm6, %v12947_v4, %v8654_v55  ;;  %v8388_v14 = vrot.slane %v12943_v25, 4 }
 0x69b   : > { %v8666_v26 = vrot.slane %v12985_v3, 2  ;;  %v8387_v39 = vrot.slane %v12943_v25, 2 }
 0x69c   : > { %v8253_v42 = vpop.f32.mrf.mxu3  ;;  %v9171_v27 = vrot.slane %v8388_v14, 9 }
 0x69d   : > { %v8254_v61 = vadd.f32 %v12927_v20, %v8253_v42  ;;  %v13022_v2 = vrot.slane %v8666_v26, 1 }
 0x6a1   : > { %v8358_v59 = vld [vmem:[#allocation4 + $0x48] sm:$0x3]  ;;  %v8357_v63 = vld [vmem:[#allocation4 + $0x40] sm:$0xff] }
 0x6a2   : > { %v8378_v21 = vmax.f32 %v8370_v28, %v8358_v59  ;;  %v12950_v56 = vmax.f32 %v8369_v45, %v8357_v63 }
 0x6a4   : > { %v8255_v1 = vpop.f32.mrf.mxu3  ;;  %8426 = vst.sshfl [vmem:[#allocation1 + $0x20] sm:$0xff pattern:$0x73625140] %v8378_v21  ;;  %v8391_v35 = vrot.slane %v12950_v56, 4  ;;  %v8390_v8 = vrot.slane %v12950_v56, 2 }
 0x6a5   : > { %v8256_v52 = vadd.f32 %v12927_v20, %v8255_v1  ;;  %8425 = vst.sshfl [vmem:[#allocation1] sm:$0xff pattern:$0x73625140] %v12950_v56  ;;  %v8663_v1 = vrot.slane %v12981_v58, 2 }
 0x6ab   : > { %v12994_v13 = vld [vmem:[#allocation1 + $0x20] ss:$4 sm:$0xff] }
 0x6ac   : > { %v13006_v50 = vld [vmem:[#allocation1 + $0x2] ss:$4 sm:$0xff] }
 0x6ad   : > { %v8282_v40 = vpop.f32.mrf.mxu0 }
 0x6ae   : > { %v8283_v7 = vadd.f32 %v8282_v40, %v8254_v61  ;;  %v8651_v61 = vrot.slane %v12947_v4, 4 }
 0x6b0   : > { %v8312_v41 = vadd.f32 %v8311_v37, %v8283_v7  ;;  %v8670_v7 = vrot.slane %v12976_v46, 1  ;;  %v8655_v44 = vrot.slane %v8651_v61, 2 }
 0x6b2   : > { %8345 = vst.msk [vmem:[#allocation4 + $0x51] sm:$0xff] %vm2309_vm3, %v8312_v41  ;;  %v8389_v41 = vrot.slane %v12943_v25, 6  ;;  %v13031_v4 = vsel %vm8658_vm6, %v8651_v61, %v8655_v44 }
 0x6b3   : > { %v8669_v24 = vrot.slane %v13031_v4, 2 }
 0x6b4   : > { %v9172_v30 = vrot.slane %v8389_v41, 9 }
 0x6b5   : > { %v8284_v48 = vpop.f32.mrf.mxu0  ;;  %v8677_v23 = vrot.slane %v8669_v24, 1 }
 0x6b6   : > { %v8285_v29 = vadd.f32 %v8284_v48, %v8256_v52  ;;  %v8427_v52 = vld [vmem:[#allocation1 + $0x1] ss:$4 sm:$0xff]  ;;  %v13008_v48 = vld [vmem:[#allocation1 + $0x3] ss:$4 sm:$0xff]  ;;  %v8510_v21 = vmax.f32 %v8389_v41, %v9172_v30  ;;  %v9174_v30 = vrot.slane %v8390_v8, 9 }
 0x6b8   : > { %v8314_v33 = vadd.f32 %v8313_v57, %v8285_v29  ;;  %v8392_v57 = vrot.slane %v12950_v56, 6 }
 0x6b9   : > { %v8360_v36 = vld [vmem:[#allocation4 + $0x58] sm:$0x3]  ;;  %v8359_v49 = vld [vmem:[#allocation4 + $0x50] sm:$0xff] }
 0x6ba   : > { %8346 = vst.msk [vmem:[#allocation4 + $0x61] sm:$0xff] %vm2309_vm3, %v8314_v33  ;;  %v8372_v38 = vmax.f32 %v8358_v59, %v8360_v36  ;;  %v8371_v60 = vmax.f32 %v8357_v63, %v8359_v49  ;;  %v9173_v33 = vrot.slane %v12950_v56, 9  ;;  %v8673_v59 = vrot.slane %v8663_v1, 1 }
 0x6bb   : > { %v9176_v45 = vrot.slane %v8392_v57, 9  ;;  %v9175_v36 = vrot.slane %v8391_v35, 9 }
 0x6bc   : > { %v8258_v16 = vpop.f32.mrf.mxu3  ;;  %v8511_v47 = vmax.f32 %v12950_v56, %v9173_v33 }
 0x6bd   : > { %v8259_v6 = vadd.f32 %v12927_v20, %v8258_v16  ;;  %v9170_v16 = vrot.slane %v8387_v39, 9  ;;  %v8514_v56 = vmax.f32 %v8392_v57, %v9176_v45 }
 0x6be   : > { %v8527_v17 = vmax.f32 %v8511_v47, %v8427_v52 }
 0x6bf   : > { %v8530_v57 = vmax.f32 %v8514_v56, %v12994_v13 }
 0x6c1   : > { %v12964_v22 = vld [vmem:[#allocation4 + $0x68] sm:$0x3]  ;;  %v12973_v43 = vld [vmem:[#allocation4 + $0x60] sm:$0xff] }
 0x6c2   : > { %v8380_v53 = vmax.f32 %v8372_v38, %v12964_v22  ;;  %v12989_v40 = vmax.f32 %v8371_v60, %v12973_v43  ;;  %v8698_v38 = vadd.f32 %v13003_v32, %v8527_v17 }
 0x6c4   : > { %v8260_v37 = vpop.f32.mrf.mxu3  ;;  %8432 = vst.sshfl [vmem:[#allocation1 + $0x20] sm:$0xff pattern:$0x73625140] %v8380_v53  ;;  %v9177_v28 = vrot.slane %v12989_v40, 9  ;;  %v8395_v63 = vrot.slane %v12989_v40, 6  ;;  %v8394_v55 = vrot.slane %v12989_v40, 4  ;;  %v8526_v53 = vmax.f32 %v8510_v21, %v12953_v10 }
 0x6c5   : > { %v8261_v0 = vadd.f32 %v12927_v20, %v8260_v37  ;;  %8431 = vst.sshfl [vmem:[#allocation1] sm:$0xff pattern:$0x73625140] %v12989_v40  ;;  %v8672_v20 = vrot.slane %v13003_v32, 1  ;;  %v8393_v49 = vrot.slane %v12989_v40, 2  ;;  %v8508_v37 = vmax.f32 %v8387_v39, %v9170_v16 }
 0x6c6   : > { %v8287_v31 = vpop.f32.mrf.mxu0  ;;  %v9180_v54 = vrot.slane %v8395_v63, 9  ;;  %v8715_v52 = vperm.slane %v8698_v38, 0 }
 0x6c7   : > { %v8288_v51 = vadd.f32 %v8287_v31, %v8259_v6  ;;  %v8515_v31 = vmax.f32 %v12989_v40, %v9177_v28  ;;  %v8697_v28 = vadd.f32 %v12999_v12, %v8526_v53  ;;  %v8701_v12 = vadd.f32 %v8673_v59, %v8530_v57 }
 0x6c8   : > { %v8518_v39 = vmax.f32 %v8395_v63, %v9180_v54  ;;  %v8674_v59 = vrot.slane %v13018_v9, 1 }
 0x6c9   : > { %v8317_v42 = vadd.f32 %v8316_v19, %v8288_v51  ;;  %v13040_v19 = vsel %vm8656_vm0, %v8651_v61, %v8655_v44  ;;  %v9178_v61 = vrot.slane %v8393_v49, 9 }
 0x6cb   : > { %8347 = vst.msk [vmem:[#allocation4 + $0x71] sm:$0xff] %vm2309_vm3, %v8317_v42  ;;  %v8509_v42 = vmax.f32 %v8388_v14, %v9171_v27  ;;  %v8436_v33 = vld [vmem:[#allocation1 + $0x20] ss:$4 sm:$0xff] }
 0x6cc   : > { %v8433_v6 = vld [vmem:[#allocation1 + $0x1] ss:$4 sm:$0xff]  ;;  %v8434_v45 = vld [vmem:[#allocation1 + $0x2] ss:$4 sm:$0xff]  ;;  %v8435_v21 = vld [vmem:[#allocation1 + $0x3] ss:$4 sm:$0xff] }
 0x6cd   : > { %v8531_v41 = vmax.f32 %v8515_v31, %v8433_v6 }
 0x6ce   : > { %v8289_v29 = vpop.f32.mrf.mxu0 }
 0x6cf   : > { %v8290_v34 = vadd.f32 %v8289_v29, %v8261_v0  ;;  %v8714_v0 = vperm.slane %v8694_v62, 0  ;;  %v9179_v29 = vrot.slane %v8394_v55, 9  ;;  %v8512_v62 = vmax.f32 %v8390_v8, %v9174_v30 }
 0x6d1   : > { %v8319_v25 = vadd.f32 %v8318_v15, %v8290_v34  ;;  %v8513_v34 = vmax.f32 %v8391_v35, %v9175_v36  ;;  %v8702_v15 = vadd.f32 %v13018_v9, %v8531_v41  ;;  %v8525_v35 = vmax.f32 %v8509_v42, %v12968_v11 }
 0x6d2   : > { %v8363_v51 = vld [vmem:[#allocation4 + $0x70] sm:$0xff]  ;;  %v8364_v60 = vld [vmem:[#allocation4 + $0x78] sm:$0x3]  ;;  %v8517_v17 = vmax.f32 %v8394_v55, %v9179_v29  ;;  %v8516_v36 = vmax.f32 %v8393_v49, %v9178_v61  ;;  %v8528_v38 = vmax.f32 %v8512_v62, %v13006_v50  ;;  %v8755_v50 = vperm.slane %v8701_v12, 0 }
 0x6d3   : > { %8348 = vst.msk [vmem:[#allocation4 + $0x81] sm:$0xff] %vm2309_vm3, %v8319_v25  ;;  %v8373_v44 = vmax.f32 %v12973_v43, %v8363_v51  ;;  %v8374_v40 = vmax.f32 %v12964_v22, %v8364_v60  ;;  %v8718_v25 = vsel %vm6014_vm13, %v8715_v52, %v8714_v0  ;;  %v8529_v43 = vmax.f32 %v8513_v34, %v13008_v48 }
 0x6d4   : > { %v8716_v16 = vperm.slane %v8702_v15, 0  ;;  %v8534_v22 = vmax.f32 %v8518_v39, %v8436_v33  ;;  %v8696_v11 = vadd.f32 %v8660_v18, %v8525_v35  ;;  %v8524_v48 = vmax.f32 %v8508_v37, %v12966_v5 }
 0x6d5   : > { %v8533_v60 = vmax.f32 %v8517_v17, %v8435_v21  ;;  %v8700_v55 = vadd.f32 %v8663_v1, %v8529_v43  ;;  %v8532_v8 = vmax.f32 %v8516_v36, %v8434_v45  ;;  %v8754_v18 = vperm.slane %v8697_v28, 0 }
 0x6d6   : > { %v8719_v13 = vsel %vm6017_vm14, %v8716_v16, %v8718_v25  ;;  %v8705_v49 = vadd.f32 %v13022_v2, %v8534_v22  ;;  %v8676_v5 = vrot.slane %v13040_v19, 1  ;;  %v8740_v37 = vperm.slane %v8696_v11, 0 }
 0x6d7   : > { %v8695_v58 = vadd.f32 %v8670_v7, %v8524_v48  ;;  %v8699_v1 = vadd.f32 %v8672_v20, %v8528_v38  ;;  %v8704_v56 = vadd.f32 %v8666_v26, %v8533_v60  ;;  %v8741_v41 = vperm.slane %v8700_v55, 0 }
 0x6d8   : > { %v8703_v9 = vadd.f32 %v8674_v59, %v8532_v8  ;;  %v8756_v52 = vperm.slane %v8705_v49, 0  ;;  %v8758_v26 = vsel %vm6014_vm13, %v8755_v50, %v8754_v18 }
 0x6d9   : > { %v8727_v15 = vperm.slane %v8699_v1, 0  ;;  %v8742_v25 = vperm.slane %v8704_v56, 0 }
 0x6da   : > { %v8366_v10 = vld [vmem:[#allocation4 + $0x88] sm:$0x3]  ;;  %v8365_v14 = vld [vmem:[#allocation4 + $0x80] sm:$0xff]  ;;  %v8728_v3 = vperm.slane %v8703_v9, 0  ;;  %v8759_v35 = vsel %vm6017_vm14, %v8756_v52, %v8758_v26 }
 0x6db   : > { %v8381_v47 = vmax.f32 %v8373_v44, %v8365_v14  ;;  %v8382_v27 = vmax.f32 %v8374_v40, %v8366_v10  ;;  %v8726_v10 = vperm.slane %v8695_v58, 0 }
 0x6dd   : > { %v8398_v6 = vrot.slane %v8381_v47, 6  ;;  %8438 = vst.sshfl [vmem:[#allocation1 + $0x20] sm:$0xff pattern:$0x73625140] %v8382_v27  ;;  %v8397_v63 = vrot.slane %v8381_v47, 4  ;;  %v8396_v31 = vrot.slane %v8381_v47, 2  ;;  %v8730_v16 = vsel %vm6014_vm13, %v8727_v15, %v8726_v10 }
 0x6de   : > { %8437 = vst.sshfl [vmem:[#allocation1] sm:$0xff pattern:$0x73625140] %v8381_v47  ;;  %v9181_v42 = vrot.slane %v8381_v47, 9  ;;  %v8731_v4 = vsel %vm6017_vm14, %v8728_v3, %v8730_v16 }
 0x6df   : > { %v9184_v51 = vrot.slane %v8398_v6, 9  ;;  %v9183_v54 = vrot.slane %v8397_v63, 9  ;;  %v9182_v53 = vrot.slane %v8396_v31, 9 }
 0x6e0   : > { %v8519_v30 = vmax.f32 %v8381_v47, %v9181_v42  ;;  %v8744_v47 = vsel %vm6014_vm13, %v8741_v41, %v8740_v37 }
 0x6e1   : > { %v8522_v2 = vmax.f32 %v8398_v6, %v9184_v51  ;;  %v8521_v29 = vmax.f32 %v8397_v63, %v9183_v54  ;;  %v8520_v34 = vmax.f32 %v8396_v31, %v9182_v53  ;;  %v8745_v21 = vsel %vm6017_vm14, %v8742_v25, %v8744_v47 }
 0x6e4   : > { %v8442_v0 = vld [vmem:[#allocation1 + $0x20] ss:$4 sm:$0xff] }
 0x6e5   : > { %v8538_v61 = vmax.f32 %v8522_v2, %v8442_v0  ;;  %v8441_v44 = vld [vmem:[#allocation1 + $0x3] ss:$4 sm:$0xff]  ;;  %v8440_v40 = vld [vmem:[#allocation1 + $0x2] ss:$4 sm:$0xff]  ;;  %v8439_v33 = vld [vmem:[#allocation1 + $0x1] ss:$4 sm:$0xff] }
 0x6e6   : > { %v8537_v46 = vmax.f32 %v8521_v29, %v8441_v44  ;;  %v8536_v7 = vmax.f32 %v8520_v34, %v8440_v40  ;;  %v8535_v32 = vmax.f32 %v8519_v30, %v8439_v33 }
 0x6e7   : > { %v8709_v20 = vadd.f32 %v8677_v23, %v8538_v61 }
 0x6e8   : > { %v8708_v14 = vadd.f32 %v8669_v24, %v8537_v46  ;;  %v8707_v39 = vadd.f32 %v8676_v5, %v8536_v7  ;;  %v8706_v57 = vadd.f32 %v13040_v19, %v8535_v32 }
 0x6e9   : > { %v8757_v28 = vperm.slane %v8709_v20, 0 }
 0x6ea   : > { %v8743_v27 = vperm.slane %v8708_v14, 0  ;;  %v8729_v43 = vperm.slane %v8707_v39, 0  ;;  %v8717_v22 = vperm.slane %v8706_v57, 0 }
 0x6eb   : > { %v8760_v45 = vsel %vm6020_vm15, %v8757_v28, %v8759_v35 }
 0x6ec   : > { %8761 = vrot.lane.b32.xlu1 %v8760_v45, %s9329_s30  ;;  %v8746_v24 = vsel %vm6020_vm15, %v8743_v27, %v8745_v21  ;;  %v8732_v19 = vsel %vm6020_vm15, %v8729_v43, %v8731_v4  ;;  %v8720_v17 = vsel %vm6020_vm15, %v8717_v22, %v8719_v13 }
 0x6ed   : > { %8747 = vrot.lane.b32.xlu0 %v8746_v24, %s9327_s21  ;;  %8733 = vrot.lane.b32.xlu2 %v8732_v19, %s9326_s20 }
 0x747   : > { %v8734_v62 = vpop.permute.xlu2 %8733 }
 0x748   : > { %v8764_v6 = vsel %vm2309_vm3, %v8720_v17, %v8734_v62 }
 0x75e   : > { %v8762_v36 = vpop.permute.xlu1 %8761 }
 0x75f   : > { %v8748_v63 = vpop.permute.xlu0 %8747 }
 0x760   : > { %v8765_v31 = vsel %vm2441_vm9, %v8764_v6, %v8748_v63 }
 0x761   : > { %v8766_v12 = vsel %vm4319_vm12, %v8765_v31, %v8762_v36 }
 0x762   : > { %8767 = vst [vmem:[%s438_s14] sm:$0xf] %v8766_v12 }
 0x763 PF: > { %s23_s25 = sadd.s32 1, %s9317_s25  }
 0x764   : > { %p20_p4 = scmp.ge.s32.totalorder %s23_s25, 4  }
 0x766   :  { %22 = sbr.rel (!%p20_p4) target bundleno = 1 (0x1), region = 119 }

</bundles_post_ra>
